<compile_context>
chip_gen: v7x
topology: tpu7x:2x2x1
jax: 0.10.0
libtpu: 0.0.40
codegen_flags: <defaults>
</compile_context>

<pallas_src>
import functools

import jax
import jax.numpy as jnp
import jax.scipy.linalg
from jax.experimental import pallas as pl
from jax.experimental.pallas import tpu as pltpu  # noqa: F401  (TPU backend)


# ----------------------------- fused Pallas kernel -----------------------------

def _hmipt_fused_kernel(*refs, names, tframes, nhead, head_dim):
    *in_refs, out_ref = refs
    r = dict(zip(names, in_refs))
    f32 = jnp.float32

    def lin(x, wn, bn, relu=False):
        w = r[wn][...]
        if w.dtype == jnp.bfloat16:
            x = x.astype(jnp.bfloat16)
        y = jnp.dot(x, w, preferred_element_type=f32) + r[bn][...]
        return jnp.maximum(y, 0.0) if relu else y

    def layer_norm(x, gn, bn, eps=1e-5):
        m = jnp.mean(x, axis=-1, keepdims=True)
        xc = x - m
        v = jnp.mean(xc * xc, axis=-1, keepdims=True)
        return xc * jax.lax.rsqrt(v + eps) * r[gn][...] + r[bn][...]

    def mha(x_q, x_kv, bias, prefix):
        # torch nn.MultiheadAttention with pre-split per-head weight slabs.
        scale = 1.0 / float(head_dim) ** 0.5
        out = r[prefix + '_bo'][...]                                   # (1, E) broadcasts
        for h in range(nhead):                                         # nhead=2, static unroll
            q = jnp.dot(x_q, r[prefix + '_wq'][h], preferred_element_type=f32) + r[prefix + '_bq'][h]
            k = jnp.dot(x_kv, r[prefix + '_wk'][h], preferred_element_type=f32) + r[prefix + '_bk'][h]
            v = jnp.dot(x_kv, r[prefix + '_wv'][h], preferred_element_type=f32) + r[prefix + '_bv'][h]
            s = jax.lax.dot_general(q * scale, k, (((1,), (1,)), ((), ())),
                                    preferred_element_type=f32) + bias
            s = s - jnp.max(s, axis=-1, keepdims=True)
            p = jnp.exp(s)
            p = p / jnp.sum(p, axis=-1, keepdims=True)
            pv = jnp.dot(p, v, preferred_element_type=f32)
            out = out + jnp.dot(pv, r[prefix + '_wo'][h], preferred_element_type=f32)
        return out

    # ---- image branch: Conv2d(160->64, k3, s2, p1) as one K=1440 matmul on im2col patches ----
    img_feat = lin(r['patches'][...], 'conv_w', 'conv_b')              # (bs*OH*OW, 64) f32

    # ---- landmark / pose branch (per-landmark linears as block-diagonal GEMMs) ----
    lm = lin(r['poses2d'][...], 'lm_bd1_w', 'lm_bd1_b', relu=True)     # (bs*T, 24*64)
    lm = lin(lm, 'lm_bd2_w', 'lm_bd2_b', relu=True)                    # (bs*T, 24*16) == hand_pose
    hp = lin(lm, 'pose1_w', 'pose1_b', relu=True)                      # (bs*T, 512)
    hp = lin(hp, 'pose2_w', 'pose2_b', relu=True)                      # (bs*T, 256)
    hp = lin(hp, 'pose3_w', 'pose3_b', relu=True)                      # (bs*T, 64)

    # ---- head branch ----
    he = lin(r['heads2d'][...], 'head1_w', 'head1_b', relu=True)       # (bs*T, 16)
    he = lin(he, 'head2_w', 'head2_b', relu=True)                      # (bs*T, 32)

    # ---- join (torch.cat folded into a split join_linear_1 weight) ----
    j = (jnp.dot(hp, r['join1_wa'][...], preferred_element_type=f32)
         + jnp.dot(he, r['join1_wb'][...], preferred_element_type=f32)
         + r['join1_b'][...])
    j = jnp.maximum(j, 0.0)                                            # (bs*T, 128)
    j = lin(j, 'join2_w', 'join2_b', relu=True)                        # (bs*T, 64)

    # ---- motion encoder: 1 post-LN transformer layer (batch_first=False semantics via mask) ----
    sa = mha(j, j, r['enc_attn_bias'][...], 'enc')
    x = layer_norm(j + sa, 'enc_ln1_g', 'enc_ln1_b')
    ff = lin(x, 'ff1_w', 'ff1_b', relu=True)                           # (bs*T, 2048)
    ff = lin(ff, 'ff2_w', 'ff2_b')                                     # (bs*T, 64)
    x = layer_norm(x + ff, 'enc_ln2_g', 'enc_ln2_b')                   # motion_feature (bs*T, 64)

    # ---- cross attention against image features (per-batch via mask) + residual LN ----
    ca = mha(x, img_feat, r['cross_attn_bias'][...], 'att')
    dtc = layer_norm(ca + x, 'norm1_g', 'norm1_b')                     # (bs*T, 64)

    # ---- mask detector head: (bs, T*64) flatten realised with per-frame weight blocks ----
    acc = r['mask1_b'][...]                                            # (1, 128) -> broadcasts
    for t in range(tframes):
        z = jnp.dot(r['flat_sel'][t], dtc, preferred_element_type=f32)           # (bs, 64)
        acc = acc + jnp.dot(z, r['mask1_w'][t], preferred_element_type=f32)      # (bs, 128)
    acc = jnp.maximum(acc, 0.0)
    out_ref[...] = (jnp.dot(acc, r['mask2_w'][...], preferred_element_type=f32)
                    + r['mask2_b'][...])                               # (bs, 32)


# ----------------------------- parameters -----------------------------

def init_params(key):
    """Parameters in their native (PyTorch-layout) shapes."""
    def t_linear(k, dout, din, scale=0.05):
        kw, kb = jax.random.split(k)
        return (jax.random.normal(kw, (dout, din), jnp.float32) * scale,
                jax.random.normal(kb, (dout,), jnp.float32) * scale)

    keys = jax.random.split(key, 24)
    p = {}
    p['conv_w'] = jax.random.normal(keys[0], (64, 160, 3, 3), jnp.float32) * 0.05
    p['conv_b'] = jax.random.normal(keys[1], (64,), jnp.float32) * 0.05
    p['lm1_w'], p['lm1_b'] = t_linear(keys[2], 64, 14)
    p['lm2_w'], p['lm2_b'] = t_linear(keys[3], 16, 64)
    p['pose1_w'], p['pose1_b'] = t_linear(keys[4], 512, 24 * 16)
    p['pose2_w'], p['pose2_b'] = t_linear(keys[5], 256, 512)
    p['pose3_w'], p['pose3_b'] = t_linear(keys[6], 64, 256)
    p['head1_w'], p['head1_b'] = t_linear(keys[7], 16, 7)
    p['head2_w'], p['head2_b'] = t_linear(keys[8], 32, 16)
    p['join1_w'], p['join1_b'] = t_linear(keys[9], 128, 64 + 32)
    p['join2_w'], p['join2_b'] = t_linear(keys[10], 64, 128)
    # TransformerEncoderLayer(d_model=64, nhead=2, dim_feedforward=2048)
    p['enc_in_proj_w'] = jax.random.normal(keys[11], (3 * 64, 64), jnp.float32) * 0.05
    p['enc_in_proj_b'] = jax.random.normal(keys[12], (3 * 64,), jnp.float32) * 0.05
    p['enc_out_proj_w'], p['enc_out_proj_b'] = t_linear(keys[13], 64, 64)
    p['enc_ff1_w'], p['enc_ff1_b'] = t_linear(keys[14], 2048, 64)
    p['enc_ff2_w'], p['enc_ff2_b'] = t_linear(keys[15], 64, 2048)
    p['enc_ln1_g'] = jnp.ones((64,), jnp.float32); p['enc_ln1_b'] = jnp.zeros((64,), jnp.float32)
    p['enc_ln2_g'] = jnp.ones((64,), jnp.float32); p['enc_ln2_b'] = jnp.zeros((64,), jnp.float32)
    # attention_1 (cross attention, batch_first=True)
    p['att1_in_proj_w'] = jax.random.normal(keys[16], (3 * 64, 64), jnp.float32) * 0.05
    p['att1_in_proj_b'] = jax.random.normal(keys[17], (3 * 64,), jnp.float32) * 0.05
    p['att1_out_proj_w'], p['att1_out_proj_b'] = t_linear(keys[18], 64, 64)
    p['norm1_g'] = jnp.ones((64,), jnp.float32); p['norm1_b'] = jnp.zeros((64,), jnp.float32)
    p['mask1_w'], p['mask1_b'] = t_linear(keys[19], 128, 5 * 64)
    p['mask2_w'], p['mask2_b'] = t_linear(keys[20], 32, 128)
    # attention_2 / norm_2 are declared in __init__ but never used in forward -> omitted.
    return p


def prepare_params(p, *, tframes=5, nhead=2, use_bf16=True):
    """One-time transform of torch-layout params into kernel-ready, pre-transposed arrays."""
    f32 = jnp.float32
    wdt = jnp.bfloat16 if use_bf16 else f32
    E = 64
    hd = E // nhead
    k = {}

    def wt(w, dt=f32):
        return w.T.astype(dt)

    def bias(b):
        return b.reshape(1, -1).astype(f32)

    # conv: (64, 160, 3, 3) -> im2col weight (160*9, 64), (cin, kh, kw)-major rows.
    k['conv_w'] = p['conv_w'].reshape(p['conv_w'].shape[0], -1).T.astype(wdt)
    k['conv_b'] = bias(p['conv_b'])

    # per-landmark linears folded into block-diagonal GEMMs (24 blocks).
    bd = jax.scipy.linalg.block_diag
    k['lm_bd1_w'] = bd(*([p['lm1_w'].T] * 24)).astype(wdt)            # (24*14, 24*64)
    k['lm_bd1_b'] = jnp.tile(p['lm1_b'], 24).reshape(1, -1).astype(f32)
    k['lm_bd2_w'] = bd(*([p['lm2_w'].T] * 24)).astype(wdt)            # (24*64, 24*16)
    k['lm_bd2_b'] = jnp.tile(p['lm2_b'], 24).reshape(1, -1).astype(f32)

    k['pose1_w'] = wt(p['pose1_w'], wdt); k['pose1_b'] = bias(p['pose1_b'])
    k['pose2_w'] = wt(p['pose2_w'], wdt); k['pose2_b'] = bias(p['pose2_b'])
    k['pose3_w'] = wt(p['pose3_w']);      k['pose3_b'] = bias(p['pose3_b'])
    k['head1_w'] = wt(p['head1_w']);      k['head1_b'] = bias(p['head1_b'])
    k['head2_w'] = wt(p['head2_w']);      k['head2_b'] = bias(p['head2_b'])

    jw = p['join1_w'].T.astype(f32)                                    # (96, 128)
    k['join1_wa'] = jw[:64]                                            # hand part
    k['join1_wb'] = jw[64:]                                            # head part
    k['join1_b'] = bias(p['join1_b'])
    k['join2_w'] = wt(p['join2_w']); k['join2_b'] = bias(p['join2_b'])

    def prep_mha(prefix, in_w, in_b, out_w, out_b):
        wq, wk, wv = in_w[:E].T, in_w[E:2 * E].T, in_w[2 * E:].T
        bq, bk, bv = in_b[:E], in_b[E:2 * E], in_b[2 * E:]
        wo = out_w.T
        k[prefix + '_wq'] = jnp.stack([wq[:, h * hd:(h + 1) * hd] for h in range(nhead)]).astype(f32)
        k[prefix + '_wk'] = jnp.stack([wk[:, h * hd:(h + 1) * hd] for h in range(nhead)]).astype(f32)
        k[prefix + '_wv'] = jnp.stack([wv[:, h * hd:(h + 1) * hd] for h in range(nhead)]).astype(f32)
        k[prefix + '_bq'] = jnp.stack([bq[h * hd:(h + 1) * hd].reshape(1, hd) for h in range(nhead)]).astype(f32)
        k[prefix + '_bk'] = jnp.stack([bk[h * hd:(h + 1) * hd].reshape(1, hd) for h in range(nhead)]).astype(f32)
        k[prefix + '_bv'] = jnp.stack([bv[h * hd:(h + 1) * hd].reshape(1, hd) for h in range(nhead)]).astype(f32)
        k[prefix + '_wo'] = jnp.stack([wo[h * hd:(h + 1) * hd, :] for h in range(nhead)]).astype(f32)
        k[prefix + '_bo'] = out_b.reshape(1, E).astype(f32)

    prep_mha('enc', p['enc_in_proj_w'], p['enc_in_proj_b'], p['enc_out_proj_w'], p['enc_out_proj_b'])
    prep_mha('att', p['att1_in_proj_w'], p['att1_in_proj_b'], p['att1_out_proj_w'], p['att1_out_proj_b'])

    k['enc_ln1_g'] = bias(p['enc_ln1_g']); k['enc_ln1_b'] = bias(p['enc_ln1_b'])
    k['enc_ln2_g'] = bias(p['enc_ln2_g']); k['enc_ln2_b'] = bias(p['enc_ln2_b'])
    k['ff1_w'] = wt(p['enc_ff1_w'], wdt); k['ff1_b'] = bias(p['enc_ff1_b'])
    k['ff2_w'] = wt(p['enc_ff2_w'], wdt); k['ff2_b'] = bias(p['enc_ff2_b'])
    k['norm1_g'] = bias(p['norm1_g']); k['norm1_b'] = bias(p['norm1_b'])

    # mask head: weight split into per-frame (64, 128) blocks matching the (t, c) flatten.
    k['mask1_w'] = p['mask1_w'].T.reshape(tframes, E, -1).astype(f32)  # (T, 64, 128)
    k['mask1_b'] = bias(p['mask1_b'])
    k['mask2_w'] = wt(p['mask2_w']); k['mask2_b'] = bias(p['mask2_b'])
    return k


# ----------------------------- forward pass -----------------------------

def hmipt_forward(imgs, poses, heads, kparams, *, nhead=2):
    bs, T, C, H, W = imgs.shape
    E = 64
    head_dim = E // nhead

    # ---- im2col for Conv2d(T*C -> 64, k=3, s=2, p=1): cheap (<400 KB) XLA-side gather ----
    # TODO(synk): move the stride-2 patch extraction into the kernel with strided VMEM loads.
    x = imgs.reshape(bs, T * C, H, W).astype(jnp.float32)
    xp = jnp.pad(x, ((0, 0), (0, 0), (1, 1), (1, 1)))
    OH = (H + 2 - 3) // 2 + 1
    OW = (W + 2 - 3) // 2 + 1
    cols = [xp[:, :, kh:kh + 2 * OH:2, kw:kw + 2 * OW:2]
            for kh in range(3) for kw in range(3)]                     # each (bs, TC, OH, OW)
    patches = jnp.stack(cols, axis=2)                                  # (bs, TC, 9, OH, OW)
    patches = jnp.transpose(patches, (0, 3, 4, 1, 2)).reshape(bs * OH * OW, T * C * 9)
    patches = patches.astype(kparams['conv_w'].dtype)                  # bf16 halves the DMA

    poses2d = poses.reshape(bs * T, -1).astype(jnp.float32)            # (bs*T, 24*14)
    heads2d = heads.reshape(bs * T, -1).astype(jnp.float32)            # (bs*T, 7)

    M = bs * T
    n_img = OH * OW
    # Additive masks implementing the PyTorch attention batching on flattened rows.
    ft = jnp.arange(M) % T                                             # frame index of each row
    enc_bias = jnp.where(ft[:, None] == ft[None, :], 0.0, -1e30).astype(jnp.float32)
    qb = jnp.arange(M) // T                                            # batch index of query rows
    kb = jnp.arange(bs * n_img) // n_img                               # batch index of key rows
    cross_bias = jnp.where(qb[:, None] == kb[None, :], 0.0, -1e30).astype(jnp.float32)
    # One-hot selectors for the (bs, T*64) detector flatten: sel[t, b, r] = 1 iff r == b*T + t.
    tt = jnp.arange(T)[:, None, None]
    bb = jnp.arange(bs)[None, :, None]
    rr = jnp.arange(M)[None, None, :]
    flat_sel = (rr == bb * T + tt).astype(jnp.float32)                 # (T, bs, bs*T)

    data = {'patches': patches, 'poses2d': poses2d, 'heads2d': heads2d,
            'enc_attn_bias': enc_bias, 'cross_attn_bias': cross_bias, 'flat_sel': flat_sel}
    pnames = tuple(sorted(kparams.keys()))
    names = tuple(data.keys()) + pnames
    arrays = [data[n] for n in data] + [kparams[n] for n in pnames]

    kernel = functools.partial(_hmipt_fused_kernel, names=names, tframes=T,
                               nhead=nhead, head_dim=head_dim)
    # Single fused invocation: everything (weights + activations, ~4-5 MiB) is VMEM-resident.
    out = pl.pallas_call(
        kernel,
        out_shape=jax.ShapeDtypeStruct((bs, 32), jnp.float32),
    )(*arrays)
    return out


# ----------------------------- driver -----------------------------

if __name__ == "__main__":
    key = jax.random.PRNGKey(0)
    k_img, k_pose, k_head, k_param = jax.random.split(key, 4)

    bs, T, C, H, W = 2, 5, 32, 16, 16            # tframes=5, channels=32 (conv in = 5*32)
    imgs = jax.random.normal(k_img, (bs, T, C, H, W), jnp.float32)
    poses = jax.random.normal(k_pose, (bs, T, 24, 14), jnp.float32)    # 24 landmarks x 14
    heads = jax.random.normal(k_head, (bs, T, 7), jnp.float32)

    torch_params = init_params(k_param)
    kparams = prepare_params(torch_params, tframes=T, nhead=2, use_bf16=True)

    fwd = jax.jit(hmipt_forward)
    out = jax.block_until_ready(fwd(imgs, poses, heads, kparams))
    assert out.shape == (bs, 32) and out.dtype == jnp.float32
    assert bool(jnp.all(jnp.isfinite(out)))
    print("KERNEL_OK")
</pallas_src>

<mosaic_0001>
module attributes {stable_mosaic.version = 11 : i64} {
  func.func @_hmipt_fused_kernel(%arg0: memref<128x1440xbf16, #tpu.memory_space<vmem>>, %arg1: memref<10x336xf32, #tpu.memory_space<vmem>>, %arg2: memref<10x7xf32, #tpu.memory_space<vmem>>, %arg3: memref<10x10xf32, #tpu.memory_space<vmem>>, %arg4: memref<10x128xf32, #tpu.memory_space<vmem>>, %arg5: memref<5x2x10xf32, #tpu.memory_space<vmem>>, %arg6: memref<2x1x32xf32, #tpu.memory_space<vmem>>, %arg7: memref<1x64xf32, #tpu.memory_space<vmem>>, %arg8: memref<2x1x32xf32, #tpu.memory_space<vmem>>, %arg9: memref<2x1x32xf32, #tpu.memory_space<vmem>>, %arg10: memref<2x64x32xf32, #tpu.memory_space<vmem>>, %arg11: memref<2x32x64xf32, #tpu.memory_space<vmem>>, %arg12: memref<2x64x32xf32, #tpu.memory_space<vmem>>, %arg13: memref<2x64x32xf32, #tpu.memory_space<vmem>>, %arg14: memref<1x64xf32, #tpu.memory_space<vmem>>, %arg15: memref<1440x64xbf16, #tpu.memory_space<vmem>>, %arg16: memref<2x1x32xf32, #tpu.memory_space<vmem>>, %arg17: memref<1x64xf32, #tpu.memory_space<vmem>>, %arg18: memref<2x1x32xf32, #tpu.memory_space<vmem>>, %arg19: memref<2x1x32xf32, #tpu.memory_space<vmem>>, %arg20: memref<1x64xf32, #tpu.memory_space<vmem>>, %arg21: memref<1x64xf32, #tpu.memory_space<vmem>>, %arg22: memref<1x64xf32, #tpu.memory_space<vmem>>, %arg23: memref<1x64xf32, #tpu.memory_space<vmem>>, %arg24: memref<2x64x32xf32, #tpu.memory_space<vmem>>, %arg25: memref<2x32x64xf32, #tpu.memory_space<vmem>>, %arg26: memref<2x64x32xf32, #tpu.memory_space<vmem>>, %arg27: memref<2x64x32xf32, #tpu.memory_space<vmem>>, %arg28: memref<1x2048xf32, #tpu.memory_space<vmem>>, %arg29: memref<64x2048xbf16, #tpu.memory_space<vmem>>, %arg30: memref<1x64xf32, #tpu.memory_space<vmem>>, %arg31: memref<2048x64xbf16, #tpu.memory_space<vmem>>, %arg32: memref<1x16xf32, #tpu.memory_space<vmem>>, %arg33: memref<7x16xf32, #tpu.memory_space<vmem>>, %arg34: memref<1x32xf32, #tpu.memory_space<vmem>>, %arg35: memref<16x32xf32, #tpu.memory_space<vmem>>, %arg36: memref<1x128xf32, #tpu.memory_space<vmem>>, %arg37: memref<64x128xf32, #tpu.memory_space<vmem>>, %arg38: memref<32x128xf32, #tpu.memory_space<vmem>>, %arg39: memref<1x64xf32, #tpu.memory_space<vmem>>, %arg40: memref<128x64xf32, #tpu.memory_space<vmem>>, %arg41: memref<1x1536xf32, #tpu.memory_space<vmem>>, %arg42: memref<336x1536xbf16, #tpu.memory_space<vmem>>, %arg43: memref<1x384xf32, #tpu.memory_space<vmem>>, %arg44: memref<1536x384xbf16, #tpu.memory_space<vmem>>, %arg45: memref<1x128xf32, #tpu.memory_space<vmem>>, %arg46: memref<5x64x128xf32, #tpu.memory_space<vmem>>, %arg47: memref<1x32xf32, #tpu.memory_space<vmem>>, %arg48: memref<128x32xf32, #tpu.memory_space<vmem>>, %arg49: memref<1x64xf32, #tpu.memory_space<vmem>>, %arg50: memref<1x64xf32, #tpu.memory_space<vmem>>, %arg51: memref<1x512xf32, #tpu.memory_space<vmem>>, %arg52: memref<384x512xbf16, #tpu.memory_space<vmem>>, %arg53: memref<1x256xf32, #tpu.memory_space<vmem>>, %arg54: memref<512x256xbf16, #tpu.memory_space<vmem>>, %arg55: memref<1x64xf32, #tpu.memory_space<vmem>>, %arg56: memref<256x64xf32, #tpu.memory_space<vmem>>, %arg57: memref<2x32xf32, #tpu.memory_space<vmem>>) attributes {dimension_semantics = [], scalar_prefetch = 0 : i64, scratch_operands = 0 : i64, tpu.core_type = #tpu.core_type<tc>} {
    %c0 = arith.constant 0 : index
    %c0_0 = arith.constant 0 : index
    %0 = vector.load %arg0[%c0, %c0_0] : memref<128x1440xbf16, #tpu.memory_space<vmem>>, vector<128x1440xbf16>
    %c0_1 = arith.constant 0 : index
    %c0_2 = arith.constant 0 : index
    %1 = vector.load %arg15[%c0_1, %c0_2] : memref<1440x64xbf16, #tpu.memory_space<vmem>>, vector<1440x64xbf16>
    %cst = arith.constant dense<0.000000e+00> : vector<128x64xf32>
    %2 = tpu.matmul %0, %1, %cst {dimension_numbers = #tpu.dot_dimension_numbers<[1], [0], [0], [1], [0, 0, 1, 1], [], []>} : vector<128x1440xbf16>, vector<1440x64xbf16>, vector<128x64xf32> -> vector<128x64xf32>
    %c0_3 = arith.constant 0 : index
    %c0_4 = arith.constant 0 : index
    %3 = vector.load %arg14[%c0_3, %c0_4] : memref<1x64xf32, #tpu.memory_space<vmem>>, vector<1x64xf32>
    %4 = vector.broadcast %3 : vector<1x64xf32> to vector<128x64xf32>
    %5 = arith.addf %2, %4 : vector<128x64xf32>
    %c0_5 = arith.constant 0 : index
    %c0_6 = arith.constant 0 : index
    %6 = vector.load %arg1[%c0_5, %c0_6] : memref<10x336xf32, #tpu.memory_space<vmem>>, vector<10x336xf32>
    %c0_7 = arith.constant 0 : index
    %c0_8 = arith.constant 0 : index
    %7 = vector.load %arg42[%c0_7, %c0_8] : memref<336x1536xbf16, #tpu.memory_space<vmem>>, vector<336x1536xbf16>
    %8 = arith.truncf %6 : vector<10x336xf32> to vector<10x336xbf16>
    %cst_9 = arith.constant dense<0.000000e+00> : vector<10x1536xf32>
    %9 = tpu.matmul %8, %7, %cst_9 {dimension_numbers = #tpu.dot_dimension_numbers<[1], [0], [0], [1], [0, 0, 1, 1], [], []>} : vector<10x336xbf16>, vector<336x1536xbf16>, vector<10x1536xf32> -> vector<10x1536xf32>
    %c0_10 = arith.constant 0 : index
    %c0_11 = arith.constant 0 : index
    %10 = vector.load %arg41[%c0_10, %c0_11] : memref<1x1536xf32, #tpu.memory_space<vmem>>, vector<1x1536xf32>
    %11 = vector.broadcast %10 : vector<1x1536xf32> to vector<10x1536xf32>
    %12 = arith.addf %9, %11 : vector<10x1536xf32>
    %cst_12 = arith.constant 0.000000e+00 : f32
    %13 = vector.broadcast %cst_12 : f32 to vector<10x1536xf32>
    %14 = arith.maximumf %12, %13 : vector<10x1536xf32>
    %c0_13 = arith.constant 0 : index
    %c0_14 = arith.constant 0 : index
    %15 = vector.load %arg44[%c0_13, %c0_14] : memref<1536x384xbf16, #tpu.memory_space<vmem>>, vector<1536x384xbf16>
    %16 = arith.truncf %14 : vector<10x1536xf32> to vector<10x1536xbf16>
    %cst_15 = arith.constant dense<0.000000e+00> : vector<10x384xf32>
    %17 = tpu.matmul %16, %15, %cst_15 {dimension_numbers = #tpu.dot_dimension_numbers<[1], [0], [0], [1], [0, 0, 1, 1], [], []>} : vector<10x1536xbf16>, vector<1536x384xbf16>, vector<10x384xf32> -> vector<10x384xf32>
    %c0_16 = arith.constant 0 : index
    %c0_17 = arith.constant 0 : index
    %18 = vector.load %arg43[%c0_16, %c0_17] : memref<1x384xf32, #tpu.memory_space<vmem>>, vector<1x384xf32>
    %19 = vector.broadcast %18 : vector<1x384xf32> to vector<10x384xf32>
    %20 = arith.addf %17, %19 : vector<10x384xf32>
    %cst_18 = arith.constant 0.000000e+00 : f32
    %21 = vector.broadcast %cst_18 : f32 to vector<10x384xf32>
    %22 = arith.maximumf %20, %21 : vector<10x384xf32>
    %c0_19 = arith.constant 0 : index
    %c0_20 = arith.constant 0 : index
    %23 = vector.load %arg52[%c0_19, %c0_20] : memref<384x512xbf16, #tpu.memory_space<vmem>>, vector<384x512xbf16>
    %24 = arith.truncf %22 : vector<10x384xf32> to vector<10x384xbf16>
    %cst_21 = arith.constant dense<0.000000e+00> : vector<10x512xf32>
    %25 = tpu.matmul %24, %23, %cst_21 {dimension_numbers = #tpu.dot_dimension_numbers<[1], [0], [0], [1], [0, 0, 1, 1], [], []>} : vector<10x384xbf16>, vector<384x512xbf16>, vector<10x512xf32> -> vector<10x512xf32>
    %c0_22 = arith.constant 0 : index
    %c0_23 = arith.constant 0 : index
    %26 = vector.load %arg51[%c0_22, %c0_23] : memref<1x512xf32, #tpu.memory_space<vmem>>, vector<1x512xf32>
    %27 = vector.broadcast %26 : vector<1x512xf32> to vector<10x512xf32>
    %28 = arith.addf %25, %27 : vector<10x512xf32>
    %cst_24 = arith.constant 0.000000e+00 : f32
    %29 = vector.broadcast %cst_24 : f32 to vector<10x512xf32>
    %30 = arith.maximumf %28, %29 : vector<10x512xf32>
    %c0_25 = arith.constant 0 : index
    %c0_26 = arith.constant 0 : index
    %31 = vector.load %arg54[%c0_25, %c0_26] : memref<512x256xbf16, #tpu.memory_space<vmem>>, vector<512x256xbf16>
    %32 = arith.truncf %30 : vector<10x512xf32> to vector<10x512xbf16>
    %cst_27 = arith.constant dense<0.000000e+00> : vector<10x256xf32>
    %33 = tpu.matmul %32, %31, %cst_27 {dimension_numbers = #tpu.dot_dimension_numbers<[1], [0], [0], [1], [0, 0, 1, 1], [], []>} : vector<10x512xbf16>, vector<512x256xbf16>, vector<10x256xf32> -> vector<10x256xf32>
    %c0_28 = arith.constant 0 : index
    %c0_29 = arith.constant 0 : index
    %34 = vector.load %arg53[%c0_28, %c0_29] : memref<1x256xf32, #tpu.memory_space<vmem>>, vector<1x256xf32>
    %35 = vector.broadcast %34 : vector<1x256xf32> to vector<10x256xf32>
    %36 = arith.addf %33, %35 : vector<10x256xf32>
    %cst_30 = arith.constant 0.000000e+00 : f32
    %37 = vector.broadcast %cst_30 : f32 to vector<10x256xf32>
    %38 = arith.maximumf %36, %37 : vector<10x256xf32>
    %c0_31 = arith.constant 0 : index
    %c0_32 = arith.constant 0 : index
    %39 = vector.load %arg56[%c0_31, %c0_32] : memref<256x64xf32, #tpu.memory_space<vmem>>, vector<256x64xf32>
    %cst_33 = arith.constant dense<0.000000e+00> : vector<10x64xf32>
    %40 = tpu.matmul %38, %39, %cst_33 {dimension_numbers = #tpu.dot_dimension_numbers<[1], [0], [0], [1], [0, 0, 1, 1], [], []>} : vector<10x256xf32>, vector<256x64xf32>, vector<10x64xf32> -> vector<10x64xf32>
    %c0_34 = arith.constant 0 : index
    %c0_35 = arith.constant 0 : index
    %41 = vector.load %arg55[%c0_34, %c0_35] : memref<1x64xf32, #tpu.memory_space<vmem>>, vector<1x64xf32>
    %42 = vector.broadcast %41 : vector<1x64xf32> to vector<10x64xf32>
    %43 = arith.addf %40, %42 : vector<10x64xf32>
    %cst_36 = arith.constant 0.000000e+00 : f32
    %44 = vector.broadcast %cst_36 : f32 to vector<10x64xf32>
    %45 = arith.maximumf %43, %44 : vector<10x64xf32>
    %c0_37 = arith.constant 0 : index
    %c0_38 = arith.constant 0 : index
    %46 = vector.load %arg2[%c0_37, %c0_38] : memref<10x7xf32, #tpu.memory_space<vmem>>, vector<10x7xf32>
    %c0_39 = arith.constant 0 : index
    %c0_40 = arith.constant 0 : index
    %47 = vector.load %arg33[%c0_39, %c0_40] : memref<7x16xf32, #tpu.memory_space<vmem>>, vector<7x16xf32>
    %cst_41 = arith.constant dense<0.000000e+00> : vector<10x16xf32>
    %48 = tpu.matmul %46, %47, %cst_41 {dimension_numbers = #tpu.dot_dimension_numbers<[1], [0], [0], [1], [0, 0, 1, 1], [], []>} : vector<10x7xf32>, vector<7x16xf32>, vector<10x16xf32> -> vector<10x16xf32>
    %c0_42 = arith.constant 0 : index
    %c0_43 = arith.constant 0 : index
    %49 = vector.load %arg32[%c0_42, %c0_43] : memref<1x16xf32, #tpu.memory_space<vmem>>, vector<1x16xf32>
    %50 = vector.broadcast %49 : vector<1x16xf32> to vector<10x16xf32>
    %51 = arith.addf %48, %50 : vector<10x16xf32>
    %cst_44 = arith.constant 0.000000e+00 : f32
    %52 = vector.broadcast %cst_44 : f32 to vector<10x16xf32>
    %53 = arith.maximumf %51, %52 : vector<10x16xf32>
    %c0_45 = arith.constant 0 : index
    %c0_46 = arith.constant 0 : index
    %54 = vector.load %arg35[%c0_45, %c0_46] : memref<16x32xf32, #tpu.memory_space<vmem>>, vector<16x32xf32>
    %cst_47 = arith.constant dense<0.000000e+00> : vector<10x32xf32>
    %55 = tpu.matmul %53, %54, %cst_47 {dimension_numbers = #tpu.dot_dimension_numbers<[1], [0], [0], [1], [0, 0, 1, 1], [], []>} : vector<10x16xf32>, vector<16x32xf32>, vector<10x32xf32> -> vector<10x32xf32>
    %c0_48 = arith.constant 0 : index
    %c0_49 = arith.constant 0 : index
    %56 = vector.load %arg34[%c0_48, %c0_49] : memref<1x32xf32, #tpu.memory_space<vmem>>, vector<1x32xf32>
    %57 = vector.broadcast %56 : vector<1x32xf32> to vector<10x32xf32>
    %58 = arith.addf %55, %57 : vector<10x32xf32>
    %cst_50 = arith.constant 0.000000e+00 : f32
    %59 = vector.broadcast %cst_50 : f32 to vector<10x32xf32>
    %60 = arith.maximumf %58, %59 : vector<10x32xf32>
    %c0_51 = arith.constant 0 : index
    %c0_52 = arith.constant 0 : index
    %61 = vector.load %arg37[%c0_51, %c0_52] : memref<64x128xf32, #tpu.memory_space<vmem>>, vector<64x128xf32>
    %cst_53 = arith.constant dense<0.000000e+00> : vector<10x128xf32>
    %62 = tpu.matmul %45, %61, %cst_53 {dimension_numbers = #tpu.dot_dimension_numbers<[1], [0], [0], [1], [0, 0, 1, 1], [], []>} : vector<10x64xf32>, vector<64x128xf32>, vector<10x128xf32> -> vector<10x128xf32>
    %c0_54 = arith.constant 0 : index
    %c0_55 = arith.constant 0 : index
    %63 = vector.load %arg38[%c0_54, %c0_55] : memref<32x128xf32, #tpu.memory_space<vmem>>, vector<32x128xf32>
    %cst_56 = arith.constant dense<0.000000e+00> : vector<10x128xf32>
    %64 = tpu.matmul %60, %63, %cst_56 {dimension_numbers = #tpu.dot_dimension_numbers<[1], [0], [0], [1], [0, 0, 1, 1], [], []>} : vector<10x32xf32>, vector<32x128xf32>, vector<10x128xf32> -> vector<10x128xf32>
    %65 = arith.addf %62, %64 : vector<10x128xf32>
    %c0_57 = arith.constant 0 : index
    %c0_58 = arith.constant 0 : index
    %66 = vector.load %arg36[%c0_57, %c0_58] : memref<1x128xf32, #tpu.memory_space<vmem>>, vector<1x128xf32>
    %67 = vector.broadcast %66 : vector<1x128xf32> to vector<10x128xf32>
    %68 = arith.addf %65, %67 : vector<10x128xf32>
    %cst_59 = arith.constant 0.000000e+00 : f32
    %69 = vector.broadcast %cst_59 : f32 to vector<10x128xf32>
    %70 = arith.maximumf %68, %69 : vector<10x128xf32>
    %c0_60 = arith.constant 0 : index
    %c0_61 = arith.constant 0 : index
    %71 = vector.load %arg40[%c0_60, %c0_61] : memref<128x64xf32, #tpu.memory_space<vmem>>, vector<128x64xf32>
    %cst_62 = arith.constant dense<0.000000e+00> : vector<10x64xf32>
    %72 = tpu.matmul %70, %71, %cst_62 {dimension_numbers = #tpu.dot_dimension_numbers<[1], [0], [0], [1], [0, 0, 1, 1], [], []>} : vector<10x128xf32>, vector<128x64xf32>, vector<10x64xf32> -> vector<10x64xf32>
    %c0_63 = arith.constant 0 : index
    %c0_64 = arith.constant 0 : index
    %73 = vector.load %arg39[%c0_63, %c0_64] : memref<1x64xf32, #tpu.memory_space<vmem>>, vector<1x64xf32>
    %74 = vector.broadcast %73 : vector<1x64xf32> to vector<10x64xf32>
    %75 = arith.addf %72, %74 : vector<10x64xf32>
    %cst_65 = arith.constant 0.000000e+00 : f32
    %76 = vector.broadcast %cst_65 : f32 to vector<10x64xf32>
    %77 = arith.maximumf %75, %76 : vector<10x64xf32>
    %c0_66 = arith.constant 0 : index
    %c0_67 = arith.constant 0 : index
    %78 = vector.load %arg3[%c0_66, %c0_67] : memref<10x10xf32, #tpu.memory_space<vmem>>, vector<10x10xf32>
    %c0_68 = arith.constant 0 : index
    %c0_69 = arith.constant 0 : index
    %79 = vector.load %arg17[%c0_68, %c0_69] : memref<1x64xf32, #tpu.memory_space<vmem>>, vector<1x64xf32>
    %c0_70 = arith.constant 0 : index
    %c0_71 = arith.constant 0 : index
    %c0_72 = arith.constant 0 : index
    %80 = vector.load %arg26[%c0_70, %c0_71, %c0_72] : memref<2x64x32xf32, #tpu.memory_space<vmem>>, vector<1x64x32xf32>
    %81 = vector.shape_cast %80 : vector<1x64x32xf32> to vector<64x32xf32>
    %cst_73 = arith.constant dense<0.000000e+00> : vector<10x32xf32>
    %82 = tpu.matmul %77, %81, %cst_73 {dimension_numbers = #tpu.dot_dimension_numbers<[1], [0], [0], [1], [0, 0, 1, 1], [], []>} : vector<10x64xf32>, vector<64x32xf32>, vector<10x32xf32> -> vector<10x32xf32>
    %c0_74 = arith.constant 0 : index
    %c0_75 = arith.constant 0 : index
    %c0_76 = arith.constant 0 : index
    %83 = vector.load %arg18[%c0_74, %c0_75, %c0_76] : memref<2x1x32xf32, #tpu.memory_space<vmem>>, vector<1x1x32xf32>
    %84 = vector.shape_cast %83 : vector<1x1x32xf32> to vector<1x32xf32>
    %85 = vector.broadcast %84 : vector<1x32xf32> to vector<10x32xf32>
    %86 = arith.addf %82, %85 : vector<10x32xf32>
    %c0_77 = arith.constant 0 : index
    %c0_78 = arith.constant 0 : index
    %c0_79 = arith.constant 0 : index
    %87 = vector.load %arg24[%c0_77, %c0_78, %c0_79] : memref<2x64x32xf32, #tpu.memory_space<vmem>>, vector<1x64x32xf32>
    %88 = vector.shape_cast %87 : vector<1x64x32xf32> to vector<64x32xf32>
    %cst_80 = arith.constant dense<0.000000e+00> : vector<10x32xf32>
    %89 = tpu.matmul %77, %88, %cst_80 {dimension_numbers = #tpu.dot_dimension_numbers<[1], [0], [0], [1], [0, 0, 1, 1], [], []>} : vector<10x64xf32>, vector<64x32xf32>, vector<10x32xf32> -> vector<10x32xf32>
    %c0_81 = arith.constant 0 : index
    %c0_82 = arith.constant 0 : index
    %c0_83 = arith.constant 0 : index
    %90 = vector.load %arg16[%c0_81, %c0_82, %c0_83] : memref<2x1x32xf32, #tpu.memory_space<vmem>>, vector<1x1x32xf32>
    %91 = vector.shape_cast %90 : vector<1x1x32xf32> to vector<1x32xf32>
    %92 = vector.broadcast %91 : vector<1x32xf32> to vector<10x32xf32>
    %93 = arith.addf %89, %92 : vector<10x32xf32>
    %c0_84 = arith.constant 0 : index
    %c0_85 = arith.constant 0 : index
    %c0_86 = arith.constant 0 : index
    %94 = vector.load %arg27[%c0_84, %c0_85, %c0_86] : memref<2x64x32xf32, #tpu.memory_space<vmem>>, vector<1x64x32xf32>
    %95 = vector.shape_cast %94 : vector<1x64x32xf32> to vector<64x32xf32>
    %cst_87 = arith.constant dense<0.000000e+00> : vector<10x32xf32>
    %96 = tpu.matmul %77, %95, %cst_87 {dimension_numbers = #tpu.dot_dimension_numbers<[1], [0], [0], [1], [0, 0, 1, 1], [], []>} : vector<10x64xf32>, vector<64x32xf32>, vector<10x32xf32> -> vector<10x32xf32>
    %c0_88 = arith.constant 0 : index
    %c0_89 = arith.constant 0 : index
    %c0_90 = arith.constant 0 : index
    %97 = vector.load %arg19[%c0_88, %c0_89, %c0_90] : memref<2x1x32xf32, #tpu.memory_space<vmem>>, vector<1x1x32xf32>
    %98 = vector.shape_cast %97 : vector<1x1x32xf32> to vector<1x32xf32>
    %99 = vector.broadcast %98 : vector<1x32xf32> to vector<10x32xf32>
    %100 = arith.addf %96, %99 : vector<10x32xf32>
    %cst_91 = arith.constant 0.176776692 : f32
    %101 = vector.broadcast %cst_91 : f32 to vector<10x32xf32>
    %102 = arith.mulf %86, %101 : vector<10x32xf32>
    %cst_92 = arith.constant dense<0.000000e+00> : vector<10x10xf32>
    %103 = tpu.matmul %102, %93, %cst_92 {dimension_numbers = #tpu.dot_dimension_numbers<[1], [1], [0], [0], [0, 0, 1, 0], [], []>} : vector<10x32xf32>, vector<10x32xf32>, vector<10x10xf32> -> vector<10x10xf32>
    %104 = arith.addf %103, %78 : vector<10x10xf32>
    %cst_93 = arith.constant dense<0xFF800000> : vector<10xf32>
    %105 = vector.multi_reduction <maximumf>, %104, %cst_93 [1] : vector<10x10xf32> to vector<10xf32>
    %106 = vector.shape_cast %105 : vector<10xf32> to vector<10x1xf32>
    %107 = vector.broadcast %106 : vector<10x1xf32> to vector<10x10xf32>
    %108 = arith.subf %104, %107 : vector<10x10xf32>
    %109 = math.exp %108 : vector<10x10xf32>
    %cst_94 = arith.constant dense<0.000000e+00> : vector<10xf32>
    %110 = vector.multi_reduction <add>, %109, %cst_94 [1] : vector<10x10xf32> to vector<10xf32>
    %111 = vector.shape_cast %110 : vector<10xf32> to vector<10x1xf32>
    %112 = vector.broadcast %111 : vector<10x1xf32> to vector<10x10xf32>
    %113 = arith.divf %109, %112 : vector<10x10xf32>
    %cst_95 = arith.constant dense<0.000000e+00> : vector<10x32xf32>
    %114 = tpu.matmul %113, %100, %cst_95 {dimension_numbers = #tpu.dot_dimension_numbers<[1], [0], [0], [1], [0, 0, 1, 1], [], []>} : vector<10x10xf32>, vector<10x32xf32>, vector<10x32xf32> -> vector<10x32xf32>
    %c0_96 = arith.constant 0 : index
    %c0_97 = arith.constant 0 : index
    %c0_98 = arith.constant 0 : index
    %115 = vector.load %arg25[%c0_96, %c0_97, %c0_98] : memref<2x32x64xf32, #tpu.memory_space<vmem>>, vector<1x32x64xf32>
    %116 = vector.shape_cast %115 : vector<1x32x64xf32> to vector<32x64xf32>
    %cst_99 = arith.constant dense<0.000000e+00> : vector<10x64xf32>
    %117 = tpu.matmul %114, %116, %cst_99 {dimension_numbers = #tpu.dot_dimension_numbers<[1], [0], [0], [1], [0, 0, 1, 1], [], []>} : vector<10x32xf32>, vector<32x64xf32>, vector<10x64xf32> -> vector<10x64xf32>
    %118 = vector.broadcast %79 : vector<1x64xf32> to vector<10x64xf32>
    %119 = arith.addf %118, %117 : vector<10x64xf32>
    %c1 = arith.constant 1 : index
    %c0_100 = arith.constant 0 : index
    %c0_101 = arith.constant 0 : index
    %120 = vector.load %arg26[%c1, %c0_100, %c0_101] : memref<2x64x32xf32, #tpu.memory_space<vmem>>, vector<1x64x32xf32>
    %121 = vector.shape_cast %120 : vector<1x64x32xf32> to vector<64x32xf32>
    %cst_102 = arith.constant dense<0.000000e+00> : vector<10x32xf32>
    %122 = tpu.matmul %77, %121, %cst_102 {dimension_numbers = #tpu.dot_dimension_numbers<[1], [0], [0], [1], [0, 0, 1, 1], [], []>} : vector<10x64xf32>, vector<64x32xf32>, vector<10x32xf32> -> vector<10x32xf32>
    %c1_103 = arith.constant 1 : index
    %c0_104 = arith.constant 0 : index
    %c0_105 = arith.constant 0 : index
    %123 = vector.load %arg18[%c1_103, %c0_104, %c0_105] : memref<2x1x32xf32, #tpu.memory_space<vmem>>, vector<1x1x32xf32>
    %124 = vector.shape_cast %123 : vector<1x1x32xf32> to vector<1x32xf32>
    %125 = vector.broadcast %124 : vector<1x32xf32> to vector<10x32xf32>
    %126 = arith.addf %122, %125 : vector<10x32xf32>
    %c1_106 = arith.constant 1 : index
    %c0_107 = arith.constant 0 : index
    %c0_108 = arith.constant 0 : index
    %127 = vector.load %arg24[%c1_106, %c0_107, %c0_108] : memref<2x64x32xf32, #tpu.memory_space<vmem>>, vector<1x64x32xf32>
    %128 = vector.shape_cast %127 : vector<1x64x32xf32> to vector<64x32xf32>
    %cst_109 = arith.constant dense<0.000000e+00> : vector<10x32xf32>
    %129 = tpu.matmul %77, %128, %cst_109 {dimension_numbers = #tpu.dot_dimension_numbers<[1], [0], [0], [1], [0, 0, 1, 1], [], []>} : vector<10x64xf32>, vector<64x32xf32>, vector<10x32xf32> -> vector<10x32xf32>
    %c1_110 = arith.constant 1 : index
    %c0_111 = arith.constant 0 : index
    %c0_112 = arith.constant 0 : index
    %130 = vector.load %arg16[%c1_110, %c0_111, %c0_112] : memref<2x1x32xf32, #tpu.memory_space<vmem>>, vector<1x1x32xf32>
    %131 = vector.shape_cast %130 : vector<1x1x32xf32> to vector<1x32xf32>
    %132 = vector.broadcast %131 : vector<1x32xf32> to vector<10x32xf32>
    %133 = arith.addf %129, %132 : vector<10x32xf32>
    %c1_113 = arith.constant 1 : index
    %c0_114 = arith.constant 0 : index
    %c0_115 = arith.constant 0 : index
    %134 = vector.load %arg27[%c1_113, %c0_114, %c0_115] : memref<2x64x32xf32, #tpu.memory_space<vmem>>, vector<1x64x32xf32>
    %135 = vector.shape_cast %134 : vector<1x64x32xf32> to vector<64x32xf32>
    %cst_116 = arith.constant dense<0.000000e+00> : vector<10x32xf32>
    %136 = tpu.matmul %77, %135, %cst_116 {dimension_numbers = #tpu.dot_dimension_numbers<[1], [0], [0], [1], [0, 0, 1, 1], [], []>} : vector<10x64xf32>, vector<64x32xf32>, vector<10x32xf32> -> vector<10x32xf32>
    %c1_117 = arith.constant 1 : index
    %c0_118 = arith.constant 0 : index
    %c0_119 = arith.constant 0 : index
    %137 = vector.load %arg19[%c1_117, %c0_118, %c0_119] : memref<2x1x32xf32, #tpu.memory_space<vmem>>, vector<1x1x32xf32>
    %138 = vector.shape_cast %137 : vector<1x1x32xf32> to vector<1x32xf32>
    %139 = vector.broadcast %138 : vector<1x32xf32> to vector<10x32xf32>
    %140 = arith.addf %136, %139 : vector<10x32xf32>
    %cst_120 = arith.constant 0.176776692 : f32
    %141 = vector.broadcast %cst_120 : f32 to vector<10x32xf32>
    %142 = arith.mulf %126, %141 : vector<10x32xf32>
    %cst_121 = arith.constant dense<0.000000e+00> : vector<10x10xf32>
    %143 = tpu.matmul %142, %133, %cst_121 {dimension_numbers = #tpu.dot_dimension_numbers<[1], [1], [0], [0], [0, 0, 1, 0], [], []>} : vector<10x32xf32>, vector<10x32xf32>, vector<10x10xf32> -> vector<10x10xf32>
    %144 = arith.addf %143, %78 : vector<10x10xf32>
    %cst_122 = arith.constant dense<0xFF800000> : vector<10xf32>
    %145 = vector.multi_reduction <maximumf>, %144, %cst_122 [1] : vector<10x10xf32> to vector<10xf32>
    %146 = vector.shape_cast %145 : vector<10xf32> to vector<10x1xf32>
    %147 = vector.broadcast %146 : vector<10x1xf32> to vector<10x10xf32>
    %148 = arith.subf %144, %147 : vector<10x10xf32>
    %149 = math.exp %148 : vector<10x10xf32>
    %cst_123 = arith.constant dense<0.000000e+00> : vector<10xf32>
    %150 = vector.multi_reduction <add>, %149, %cst_123 [1] : vector<10x10xf32> to vector<10xf32>
    %151 = vector.shape_cast %150 : vector<10xf32> to vector<10x1xf32>
    %152 = vector.broadcast %151 : vector<10x1xf32> to vector<10x10xf32>
    %153 = arith.divf %149, %152 : vector<10x10xf32>
    %cst_124 = arith.constant dense<0.000000e+00> : vector<10x32xf32>
    %154 = tpu.matmul %153, %140, %cst_124 {dimension_numbers = #tpu.dot_dimension_numbers<[1], [0], [0], [1], [0, 0, 1, 1], [], []>} : vector<10x10xf32>, vector<10x32xf32>, vector<10x32xf32> -> vector<10x32xf32>
    %c1_125 = arith.constant 1 : index
    %c0_126 = arith.constant 0 : index
    %c0_127 = arith.constant 0 : index
    %155 = vector.load %arg25[%c1_125, %c0_126, %c0_127] : memref<2x32x64xf32, #tpu.memory_space<vmem>>, vector<1x32x64xf32>
    %156 = vector.shape_cast %155 : vector<1x32x64xf32> to vector<32x64xf32>
    %cst_128 = arith.constant dense<0.000000e+00> : vector<10x64xf32>
    %157 = tpu.matmul %154, %156, %cst_128 {dimension_numbers = #tpu.dot_dimension_numbers<[1], [0], [0], [1], [0, 0, 1, 1], [], []>} : vector<10x32xf32>, vector<32x64xf32>, vector<10x64xf32> -> vector<10x64xf32>
    %158 = arith.addf %119, %157 : vector<10x64xf32>
    %159 = arith.addf %77, %158 : vector<10x64xf32>
    %cst_129 = arith.constant dense<0.000000e+00> : vector<10xf32>
    %160 = vector.multi_reduction <add>, %159, %cst_129 [1] : vector<10x64xf32> to vector<10xf32>
    %161 = vector.shape_cast %160 : vector<10xf32> to vector<10x1xf32>
    %cst_130 = arith.constant 6.400000e+01 : f32
    %162 = vector.broadcast %cst_130 : f32 to vector<10x1xf32>
    %163 = arith.divf %161, %162 : vector<10x1xf32>
    %164 = vector.broadcast %163 : vector<10x1xf32> to vector<10x64xf32>
    %165 = arith.subf %159, %164 : vector<10x64xf32>
    %166 = arith.mulf %165, %165 : vector<10x64xf32>
    %cst_131 = arith.constant dense<0.000000e+00> : vector<10xf32>
    %167 = vector.multi_reduction <add>, %166, %cst_131 [1] : vector<10x64xf32> to vector<10xf32>
    %168 = vector.shape_cast %167 : vector<10xf32> to vector<10x1xf32>
    %cst_132 = arith.constant 6.400000e+01 : f32
    %169 = vector.broadcast %cst_132 : f32 to vector<10x1xf32>
    %170 = arith.divf %168, %169 : vector<10x1xf32>
    %cst_133 = arith.constant 9.99999974E-6 : f32
    %171 = vector.broadcast %cst_133 : f32 to vector<10x1xf32>
    %172 = arith.addf %170, %171 : vector<10x1xf32>
    %173 = math.rsqrt %172 : vector<10x1xf32>
    %174 = vector.broadcast %173 : vector<10x1xf32> to vector<10x64xf32>
    %175 = arith.mulf %165, %174 : vector<10x64xf32>
    %c0_134 = arith.constant 0 : index
    %c0_135 = arith.constant 0 : index
    %176 = vector.load %arg21[%c0_134, %c0_135] : memref<1x64xf32, #tpu.memory_space<vmem>>, vector<1x64xf32>
    %177 = vector.broadcast %176 : vector<1x64xf32> to vector<10x64xf32>
    %178 = arith.mulf %175, %177 : vector<10x64xf32>
    %c0_136 = arith.constant 0 : index
    %c0_137 = arith.constant 0 : index
    %179 = vector.load %arg20[%c0_136, %c0_137] : memref<1x64xf32, #tpu.memory_space<vmem>>, vector<1x64xf32>
    %180 = vector.broadcast %179 : vector<1x64xf32> to vector<10x64xf32>
    %181 = arith.addf %178, %180 : vector<10x64xf32>
    %c0_138 = arith.constant 0 : index
    %c0_139 = arith.constant 0 : index
    %182 = vector.load %arg29[%c0_138, %c0_139] : memref<64x2048xbf16, #tpu.memory_space<vmem>>, vector<64x2048xbf16>
    %183 = arith.truncf %181 : vector<10x64xf32> to vector<10x64xbf16>
    %cst_140 = arith.constant dense<0.000000e+00> : vector<10x2048xf32>
    %184 = tpu.matmul %183, %182, %cst_140 {dimension_numbers = #tpu.dot_dimension_numbers<[1], [0], [0], [1], [0, 0, 1, 1], [], []>} : vector<10x64xbf16>, vector<64x2048xbf16>, vector<10x2048xf32> -> vector<10x2048xf32>
    %c0_141 = arith.constant 0 : index
    %c0_142 = arith.constant 0 : index
    %185 = vector.load %arg28[%c0_141, %c0_142] : memref<1x2048xf32, #tpu.memory_space<vmem>>, vector<1x2048xf32>
    %186 = vector.broadcast %185 : vector<1x2048xf32> to vector<10x2048xf32>
    %187 = arith.addf %184, %186 : vector<10x2048xf32>
    %cst_143 = arith.constant 0.000000e+00 : f32
    %188 = vector.broadcast %cst_143 : f32 to vector<10x2048xf32>
    %189 = arith.maximumf %187, %188 : vector<10x2048xf32>
    %c0_144 = arith.constant 0 : index
    %c0_145 = arith.constant 0 : index
    %190 = vector.load %arg31[%c0_144, %c0_145] : memref<2048x64xbf16, #tpu.memory_space<vmem>>, vector<2048x64xbf16>
    %191 = arith.truncf %189 : vector<10x2048xf32> to vector<10x2048xbf16>
    %cst_146 = arith.constant dense<0.000000e+00> : vector<10x64xf32>
    %192 = tpu.matmul %191, %190, %cst_146 {dimension_numbers = #tpu.dot_dimension_numbers<[1], [0], [0], [1], [0, 0, 1, 1], [], []>} : vector<10x2048xbf16>, vector<2048x64xbf16>, vector<10x64xf32> -> vector<10x64xf32>
    %c0_147 = arith.constant 0 : index
    %c0_148 = arith.constant 0 : index
    %193 = vector.load %arg30[%c0_147, %c0_148] : memref<1x64xf32, #tpu.memory_space<vmem>>, vector<1x64xf32>
    %194 = vector.broadcast %193 : vector<1x64xf32> to vector<10x64xf32>
    %195 = arith.addf %192, %194 : vector<10x64xf32>
    %196 = arith.addf %181, %195 : vector<10x64xf32>
    %cst_149 = arith.constant dense<0.000000e+00> : vector<10xf32>
    %197 = vector.multi_reduction <add>, %196, %cst_149 [1] : vector<10x64xf32> to vector<10xf32>
    %198 = vector.shape_cast %197 : vector<10xf32> to vector<10x1xf32>
    %cst_150 = arith.constant 6.400000e+01 : f32
    %199 = vector.broadcast %cst_150 : f32 to vector<10x1xf32>
    %200 = arith.divf %198, %199 : vector<10x1xf32>
    %201 = vector.broadcast %200 : vector<10x1xf32> to vector<10x64xf32>
    %202 = arith.subf %196, %201 : vector<10x64xf32>
    %203 = arith.mulf %202, %202 : vector<10x64xf32>
    %cst_151 = arith.constant dense<0.000000e+00> : vector<10xf32>
    %204 = vector.multi_reduction <add>, %203, %cst_151 [1] : vector<10x64xf32> to vector<10xf32>
    %205 = vector.shape_cast %204 : vector<10xf32> to vector<10x1xf32>
    %cst_152 = arith.constant 6.400000e+01 : f32
    %206 = vector.broadcast %cst_152 : f32 to vector<10x1xf32>
    %207 = arith.divf %205, %206 : vector<10x1xf32>
    %cst_153 = arith.constant 9.99999974E-6 : f32
    %208 = vector.broadcast %cst_153 : f32 to vector<10x1xf32>
    %209 = arith.addf %207, %208 : vector<10x1xf32>
    %210 = math.rsqrt %209 : vector<10x1xf32>
    %211 = vector.broadcast %210 : vector<10x1xf32> to vector<10x64xf32>
    %212 = arith.mulf %202, %211 : vector<10x64xf32>
    %c0_154 = arith.constant 0 : index
    %c0_155 = arith.constant 0 : index
    %213 = vector.load %arg23[%c0_154, %c0_155] : memref<1x64xf32, #tpu.memory_space<vmem>>, vector<1x64xf32>
    %214 = vector.broadcast %213 : vector<1x64xf32> to vector<10x64xf32>
    %215 = arith.mulf %212, %214 : vector<10x64xf32>
    %c0_156 = arith.constant 0 : index
    %c0_157 = arith.constant 0 : index
    %216 = vector.load %arg22[%c0_156, %c0_157] : memref<1x64xf32, #tpu.memory_space<vmem>>, vector<1x64xf32>
    %217 = vector.broadcast %216 : vector<1x64xf32> to vector<10x64xf32>
    %218 = arith.addf %215, %217 : vector<10x64xf32>
    %c0_158 = arith.constant 0 : index
    %c0_159 = arith.constant 0 : index
    %219 = vector.load %arg4[%c0_158, %c0_159] : memref<10x128xf32, #tpu.memory_space<vmem>>, vector<10x128xf32>
    %c0_160 = arith.constant 0 : index
    %c0_161 = arith.constant 0 : index
    %220 = vector.load %arg7[%c0_160, %c0_161] : memref<1x64xf32, #tpu.memory_space<vmem>>, vector<1x64xf32>
    %c0_162 = arith.constant 0 : index
    %c0_163 = arith.constant 0 : index
    %c0_164 = arith.constant 0 : index
    %221 = vector.load %arg12[%c0_162, %c0_163, %c0_164] : memref<2x64x32xf32, #tpu.memory_space<vmem>>, vector<1x64x32xf32>
    %222 = vector.shape_cast %221 : vector<1x64x32xf32> to vector<64x32xf32>
    %cst_165 = arith.constant dense<0.000000e+00> : vector<10x32xf32>
    %223 = tpu.matmul %218, %222, %cst_165 {dimension_numbers = #tpu.dot_dimension_numbers<[1], [0], [0], [1], [0, 0, 1, 1], [], []>} : vector<10x64xf32>, vector<64x32xf32>, vector<10x32xf32> -> vector<10x32xf32>
    %c0_166 = arith.constant 0 : index
    %c0_167 = arith.constant 0 : index
    %c0_168 = arith.constant 0 : index
    %224 = vector.load %arg8[%c0_166, %c0_167, %c0_168] : memref<2x1x32xf32, #tpu.memory_space<vmem>>, vector<1x1x32xf32>
    %225 = vector.shape_cast %224 : vector<1x1x32xf32> to vector<1x32xf32>
    %226 = vector.broadcast %225 : vector<1x32xf32> to vector<10x32xf32>
    %227 = arith.addf %223, %226 : vector<10x32xf32>
    %c0_169 = arith.constant 0 : index
    %c0_170 = arith.constant 0 : index
    %c0_171 = arith.constant 0 : index
    %228 = vector.load %arg10[%c0_169, %c0_170, %c0_171] : memref<2x64x32xf32, #tpu.memory_space<vmem>>, vector<1x64x32xf32>
    %229 = vector.shape_cast %228 : vector<1x64x32xf32> to vector<64x32xf32>
    %cst_172 = arith.constant dense<0.000000e+00> : vector<128x32xf32>
    %230 = tpu.matmul %5, %229, %cst_172 {dimension_numbers = #tpu.dot_dimension_numbers<[1], [0], [0], [1], [0, 0, 1, 1], [], []>} : vector<128x64xf32>, vector<64x32xf32>, vector<128x32xf32> -> vector<128x32xf32>
    %c0_173 = arith.constant 0 : index
    %c0_174 = arith.constant 0 : index
    %c0_175 = arith.constant 0 : index
    %231 = vector.load %arg6[%c0_173, %c0_174, %c0_175] : memref<2x1x32xf32, #tpu.memory_space<vmem>>, vector<1x1x32xf32>
    %232 = vector.shape_cast %231 : vector<1x1x32xf32> to vector<1x32xf32>
    %233 = vector.broadcast %232 : vector<1x32xf32> to vector<128x32xf32>
    %234 = arith.addf %230, %233 : vector<128x32xf32>
    %c0_176 = arith.constant 0 : index
    %c0_177 = arith.constant 0 : index
    %c0_178 = arith.constant 0 : index
    %235 = vector.load %arg13[%c0_176, %c0_177, %c0_178] : memref<2x64x32xf32, #tpu.memory_space<vmem>>, vector<1x64x32xf32>
    %236 = vector.shape_cast %235 : vector<1x64x32xf32> to vector<64x32xf32>
    %cst_179 = arith.constant dense<0.000000e+00> : vector<128x32xf32>
    %237 = tpu.matmul %5, %236, %cst_179 {dimension_numbers = #tpu.dot_dimension_numbers<[1], [0], [0], [1], [0, 0, 1, 1], [], []>} : vector<128x64xf32>, vector<64x32xf32>, vector<128x32xf32> -> vector<128x32xf32>
    %c0_180 = arith.constant 0 : index
    %c0_181 = arith.constant 0 : index
    %c0_182 = arith.constant 0 : index
    %238 = vector.load %arg9[%c0_180, %c0_181, %c0_182] : memref<2x1x32xf32, #tpu.memory_space<vmem>>, vector<1x1x32xf32>
    %239 = vector.shape_cast %238 : vector<1x1x32xf32> to vector<1x32xf32>
    %240 = vector.broadcast %239 : vector<1x32xf32> to vector<128x32xf32>
    %241 = arith.addf %237, %240 : vector<128x32xf32>
    %cst_183 = arith.constant 0.176776692 : f32
    %242 = vector.broadcast %cst_183 : f32 to vector<10x32xf32>
    %243 = arith.mulf %227, %242 : vector<10x32xf32>
    %cst_184 = arith.constant dense<0.000000e+00> : vector<10x128xf32>
    %244 = tpu.matmul %243, %234, %cst_184 {dimension_numbers = #tpu.dot_dimension_numbers<[1], [1], [0], [0], [0, 0, 1, 0], [], []>} : vector<10x32xf32>, vector<128x32xf32>, vector<10x128xf32> -> vector<10x128xf32>
    %245 = arith.addf %244, %219 : vector<10x128xf32>
    %cst_185 = arith.constant dense<0xFF800000> : vector<10xf32>
    %246 = vector.multi_reduction <maximumf>, %245, %cst_185 [1] : vector<10x128xf32> to vector<10xf32>
    %247 = vector.shape_cast %246 : vector<10xf32> to vector<10x1xf32>
    %248 = vector.broadcast %247 : vector<10x1xf32> to vector<10x128xf32>
    %249 = arith.subf %245, %248 : vector<10x128xf32>
    %250 = math.exp %249 : vector<10x128xf32>
    %cst_186 = arith.constant dense<0.000000e+00> : vector<10xf32>
    %251 = vector.multi_reduction <add>, %250, %cst_186 [1] : vector<10x128xf32> to vector<10xf32>
    %252 = vector.shape_cast %251 : vector<10xf32> to vector<10x1xf32>
    %253 = vector.broadcast %252 : vector<10x1xf32> to vector<10x128xf32>
    %254 = arith.divf %250, %253 : vector<10x128xf32>
    %cst_187 = arith.constant dense<0.000000e+00> : vector<10x32xf32>
    %255 = tpu.matmul %254, %241, %cst_187 {dimension_numbers = #tpu.dot_dimension_numbers<[1], [0], [0], [1], [0, 0, 1, 1], [], []>} : vector<10x128xf32>, vector<128x32xf32>, vector<10x32xf32> -> vector<10x32xf32>
    %c0_188 = arith.constant 0 : index
    %c0_189 = arith.constant 0 : index
    %c0_190 = arith.constant 0 : index
    %256 = vector.load %arg11[%c0_188, %c0_189, %c0_190] : memref<2x32x64xf32, #tpu.memory_space<vmem>>, vector<1x32x64xf32>
    %257 = vector.shape_cast %256 : vector<1x32x64xf32> to vector<32x64xf32>
    %cst_191 = arith.constant dense<0.000000e+00> : vector<10x64xf32>
    %258 = tpu.matmul %255, %257, %cst_191 {dimension_numbers = #tpu.dot_dimension_numbers<[1], [0], [0], [1], [0, 0, 1, 1], [], []>} : vector<10x32xf32>, vector<32x64xf32>, vector<10x64xf32> -> vector<10x64xf32>
    %259 = vector.broadcast %220 : vector<1x64xf32> to vector<10x64xf32>
    %260 = arith.addf %259, %258 : vector<10x64xf32>
    %c1_192 = arith.constant 1 : index
    %c0_193 = arith.constant 0 : index
    %c0_194 = arith.constant 0 : index
    %261 = vector.load %arg12[%c1_192, %c0_193, %c0_194] : memref<2x64x32xf32, #tpu.memory_space<vmem>>, vector<1x64x32xf32>
    %262 = vector.shape_cast %261 : vector<1x64x32xf32> to vector<64x32xf32>
    %cst_195 = arith.constant dense<0.000000e+00> : vector<10x32xf32>
    %263 = tpu.matmul %218, %262, %cst_195 {dimension_numbers = #tpu.dot_dimension_numbers<[1], [0], [0], [1], [0, 0, 1, 1], [], []>} : vector<10x64xf32>, vector<64x32xf32>, vector<10x32xf32> -> vector<10x32xf32>
    %c1_196 = arith.constant 1 : index
    %c0_197 = arith.constant 0 : index
    %c0_198 = arith.constant 0 : index
    %264 = vector.load %arg8[%c1_196, %c0_197, %c0_198] : memref<2x1x32xf32, #tpu.memory_space<vmem>>, vector<1x1x32xf32>
    %265 = vector.shape_cast %264 : vector<1x1x32xf32> to vector<1x32xf32>
    %266 = vector.broadcast %265 : vector<1x32xf32> to vector<10x32xf32>
    %267 = arith.addf %263, %266 : vector<10x32xf32>
    %c1_199 = arith.constant 1 : index
    %c0_200 = arith.constant 0 : index
    %c0_201 = arith.constant 0 : index
    %268 = vector.load %arg10[%c1_199, %c0_200, %c0_201] : memref<2x64x32xf32, #tpu.memory_space<vmem>>, vector<1x64x32xf32>
    %269 = vector.shape_cast %268 : vector<1x64x32xf32> to vector<64x32xf32>
    %cst_202 = arith.constant dense<0.000000e+00> : vector<128x32xf32>
    %270 = tpu.matmul %5, %269, %cst_202 {dimension_numbers = #tpu.dot_dimension_numbers<[1], [0], [0], [1], [0, 0, 1, 1], [], []>} : vector<128x64xf32>, vector<64x32xf32>, vector<128x32xf32> -> vector<128x32xf32>
    %c1_203 = arith.constant 1 : index
    %c0_204 = arith.constant 0 : index
    %c0_205 = arith.constant 0 : index
    %271 = vector.load %arg6[%c1_203, %c0_204, %c0_205] : memref<2x1x32xf32, #tpu.memory_space<vmem>>, vector<1x1x32xf32>
    %272 = vector.shape_cast %271 : vector<1x1x32xf32> to vector<1x32xf32>
    %273 = vector.broadcast %272 : vector<1x32xf32> to vector<128x32xf32>
    %274 = arith.addf %270, %273 : vector<128x32xf32>
    %c1_206 = arith.constant 1 : index
    %c0_207 = arith.constant 0 : index
    %c0_208 = arith.constant 0 : index
    %275 = vector.load %arg13[%c1_206, %c0_207, %c0_208] : memref<2x64x32xf32, #tpu.memory_space<vmem>>, vector<1x64x32xf32>
    %276 = vector.shape_cast %275 : vector<1x64x32xf32> to vector<64x32xf32>
    %cst_209 = arith.constant dense<0.000000e+00> : vector<128x32xf32>
    %277 = tpu.matmul %5, %276, %cst_209 {dimension_numbers = #tpu.dot_dimension_numbers<[1], [0], [0], [1], [0, 0, 1, 1], [], []>} : vector<128x64xf32>, vector<64x32xf32>, vector<128x32xf32> -> vector<128x32xf32>
    %c1_210 = arith.constant 1 : index
    %c0_211 = arith.constant 0 : index
    %c0_212 = arith.constant 0 : index
    %278 = vector.load %arg9[%c1_210, %c0_211, %c0_212] : memref<2x1x32xf32, #tpu.memory_space<vmem>>, vector<1x1x32xf32>
    %279 = vector.shape_cast %278 : vector<1x1x32xf32> to vector<1x32xf32>
    %280 = vector.broadcast %279 : vector<1x32xf32> to vector<128x32xf32>
    %281 = arith.addf %277, %280 : vector<128x32xf32>
    %cst_213 = arith.constant 0.176776692 : f32
    %282 = vector.broadcast %cst_213 : f32 to vector<10x32xf32>
    %283 = arith.mulf %267, %282 : vector<10x32xf32>
    %cst_214 = arith.constant dense<0.000000e+00> : vector<10x128xf32>
    %284 = tpu.matmul %283, %274, %cst_214 {dimension_numbers = #tpu.dot_dimension_numbers<[1], [1], [0], [0], [0, 0, 1, 0], [], []>} : vector<10x32xf32>, vector<128x32xf32>, vector<10x128xf32> -> vector<10x128xf32>
    %285 = arith.addf %284, %219 : vector<10x128xf32>
    %cst_215 = arith.constant dense<0xFF800000> : vector<10xf32>
    %286 = vector.multi_reduction <maximumf>, %285, %cst_215 [1] : vector<10x128xf32> to vector<10xf32>
    %287 = vector.shape_cast %286 : vector<10xf32> to vector<10x1xf32>
    %288 = vector.broadcast %287 : vector<10x1xf32> to vector<10x128xf32>
    %289 = arith.subf %285, %288 : vector<10x128xf32>
    %290 = math.exp %289 : vector<10x128xf32>
    %cst_216 = arith.constant dense<0.000000e+00> : vector<10xf32>
    %291 = vector.multi_reduction <add>, %290, %cst_216 [1] : vector<10x128xf32> to vector<10xf32>
    %292 = vector.shape_cast %291 : vector<10xf32> to vector<10x1xf32>
    %293 = vector.broadcast %292 : vector<10x1xf32> to vector<10x128xf32>
    %294 = arith.divf %290, %293 : vector<10x128xf32>
    %cst_217 = arith.constant dense<0.000000e+00> : vector<10x32xf32>
    %295 = tpu.matmul %294, %281, %cst_217 {dimension_numbers = #tpu.dot_dimension_numbers<[1], [0], [0], [1], [0, 0, 1, 1], [], []>} : vector<10x128xf32>, vector<128x32xf32>, vector<10x32xf32> -> vector<10x32xf32>
    %c1_218 = arith.constant 1 : index
    %c0_219 = arith.constant 0 : index
    %c0_220 = arith.constant 0 : index
    %296 = vector.load %arg11[%c1_218, %c0_219, %c0_220] : memref<2x32x64xf32, #tpu.memory_space<vmem>>, vector<1x32x64xf32>
    %297 = vector.shape_cast %296 : vector<1x32x64xf32> to vector<32x64xf32>
    %cst_221 = arith.constant dense<0.000000e+00> : vector<10x64xf32>
    %298 = tpu.matmul %295, %297, %cst_221 {dimension_numbers = #tpu.dot_dimension_numbers<[1], [0], [0], [1], [0, 0, 1, 1], [], []>} : vector<10x32xf32>, vector<32x64xf32>, vector<10x64xf32> -> vector<10x64xf32>
    %299 = arith.addf %260, %298 : vector<10x64xf32>
    %300 = arith.addf %299, %218 : vector<10x64xf32>
    %cst_222 = arith.constant dense<0.000000e+00> : vector<10xf32>
    %301 = vector.multi_reduction <add>, %300, %cst_222 [1] : vector<10x64xf32> to vector<10xf32>
    %302 = vector.shape_cast %301 : vector<10xf32> to vector<10x1xf32>
    %cst_223 = arith.constant 6.400000e+01 : f32
    %303 = vector.broadcast %cst_223 : f32 to vector<10x1xf32>
    %304 = arith.divf %302, %303 : vector<10x1xf32>
    %305 = vector.broadcast %304 : vector<10x1xf32> to vector<10x64xf32>
    %306 = arith.subf %300, %305 : vector<10x64xf32>
    %307 = arith.mulf %306, %306 : vector<10x64xf32>
    %cst_224 = arith.constant dense<0.000000e+00> : vector<10xf32>
    %308 = vector.multi_reduction <add>, %307, %cst_224 [1] : vector<10x64xf32> to vector<10xf32>
    %309 = vector.shape_cast %308 : vector<10xf32> to vector<10x1xf32>
    %cst_225 = arith.constant 6.400000e+01 : f32
    %310 = vector.broadcast %cst_225 : f32 to vector<10x1xf32>
    %311 = arith.divf %309, %310 : vector<10x1xf32>
    %cst_226 = arith.constant 9.99999974E-6 : f32
    %312 = vector.broadcast %cst_226 : f32 to vector<10x1xf32>
    %313 = arith.addf %311, %312 : vector<10x1xf32>
    %314 = math.rsqrt %313 : vector<10x1xf32>
    %315 = vector.broadcast %314 : vector<10x1xf32> to vector<10x64xf32>
    %316 = arith.mulf %306, %315 : vector<10x64xf32>
    %c0_227 = arith.constant 0 : index
    %c0_228 = arith.constant 0 : index
    %317 = vector.load %arg50[%c0_227, %c0_228] : memref<1x64xf32, #tpu.memory_space<vmem>>, vector<1x64xf32>
    %318 = vector.broadcast %317 : vector<1x64xf32> to vector<10x64xf32>
    %319 = arith.mulf %316, %318 : vector<10x64xf32>
    %c0_229 = arith.constant 0 : index
    %c0_230 = arith.constant 0 : index
    %320 = vector.load %arg49[%c0_229, %c0_230] : memref<1x64xf32, #tpu.memory_space<vmem>>, vector<1x64xf32>
    %321 = vector.broadcast %320 : vector<1x64xf32> to vector<10x64xf32>
    %322 = arith.addf %319, %321 : vector<10x64xf32>
    %c0_231 = arith.constant 0 : index
    %c0_232 = arith.constant 0 : index
    %323 = vector.load %arg45[%c0_231, %c0_232] : memref<1x128xf32, #tpu.memory_space<vmem>>, vector<1x128xf32>
    %c0_233 = arith.constant 0 : index
    %c0_234 = arith.constant 0 : index
    %c0_235 = arith.constant 0 : index
    %324 = vector.load %arg5[%c0_233, %c0_234, %c0_235] : memref<5x2x10xf32, #tpu.memory_space<vmem>>, vector<1x2x10xf32>
    %325 = vector.shape_cast %324 : vector<1x2x10xf32> to vector<2x10xf32>
    %cst_236 = arith.constant dense<0.000000e+00> : vector<2x64xf32>
    %326 = tpu.matmul %325, %322, %cst_236 {dimension_numbers = #tpu.dot_dimension_numbers<[1], [0], [0], [1], [0, 0, 1, 1], [], []>} : vector<2x10xf32>, vector<10x64xf32>, vector<2x64xf32> -> vector<2x64xf32>
    %c0_237 = arith.constant 0 : index
    %c0_238 = arith.constant 0 : index
    %c0_239 = arith.constant 0 : index
    %327 = vector.load %arg46[%c0_237, %c0_238, %c0_239] : memref<5x64x128xf32, #tpu.memory_space<vmem>>, vector<1x64x128xf32>
    %328 = vector.shape_cast %327 : vector<1x64x128xf32> to vector<64x128xf32>
    %cst_240 = arith.constant dense<0.000000e+00> : vector<2x128xf32>
    %329 = tpu.matmul %326, %328, %cst_240 {dimension_numbers = #tpu.dot_dimension_numbers<[1], [0], [0], [1], [0, 0, 1, 1], [], []>} : vector<2x64xf32>, vector<64x128xf32>, vector<2x128xf32> -> vector<2x128xf32>
    %330 = vector.broadcast %323 : vector<1x128xf32> to vector<2x128xf32>
    %331 = arith.addf %330, %329 : vector<2x128xf32>
    %c1_241 = arith.constant 1 : index
    %c0_242 = arith.constant 0 : index
    %c0_243 = arith.constant 0 : index
    %332 = vector.load %arg5[%c1_241, %c0_242, %c0_243] : memref<5x2x10xf32, #tpu.memory_space<vmem>>, vector<1x2x10xf32>
    %333 = vector.shape_cast %332 : vector<1x2x10xf32> to vector<2x10xf32>
    %cst_244 = arith.constant dense<0.000000e+00> : vector<2x64xf32>
    %334 = tpu.matmul %333, %322, %cst_244 {dimension_numbers = #tpu.dot_dimension_numbers<[1], [0], [0], [1], [0, 0, 1, 1], [], []>} : vector<2x10xf32>, vector<10x64xf32>, vector<2x64xf32> -> vector<2x64xf32>
    %c1_245 = arith.constant 1 : index
    %c0_246 = arith.constant 0 : index
    %c0_247 = arith.constant 0 : index
    %335 = vector.load %arg46[%c1_245, %c0_246, %c0_247] : memref<5x64x128xf32, #tpu.memory_space<vmem>>, vector<1x64x128xf32>
    %336 = vector.shape_cast %335 : vector<1x64x128xf32> to vector<64x128xf32>
    %cst_248 = arith.constant dense<0.000000e+00> : vector<2x128xf32>
    %337 = tpu.matmul %334, %336, %cst_248 {dimension_numbers = #tpu.dot_dimension_numbers<[1], [0], [0], [1], [0, 0, 1, 1], [], []>} : vector<2x64xf32>, vector<64x128xf32>, vector<2x128xf32> -> vector<2x128xf32>
    %338 = arith.addf %331, %337 : vector<2x128xf32>
    %c2 = arith.constant 2 : index
    %c0_249 = arith.constant 0 : index
    %c0_250 = arith.constant 0 : index
    %339 = vector.load %arg5[%c2, %c0_249, %c0_250] : memref<5x2x10xf32, #tpu.memory_space<vmem>>, vector<1x2x10xf32>
    %340 = vector.shape_cast %339 : vector<1x2x10xf32> to vector<2x10xf32>
    %cst_251 = arith.constant dense<0.000000e+00> : vector<2x64xf32>
    %341 = tpu.matmul %340, %322, %cst_251 {dimension_numbers = #tpu.dot_dimension_numbers<[1], [0], [0], [1], [0, 0, 1, 1], [], []>} : vector<2x10xf32>, vector<10x64xf32>, vector<2x64xf32> -> vector<2x64xf32>
    %c2_252 = arith.constant 2 : index
    %c0_253 = arith.constant 0 : index
    %c0_254 = arith.constant 0 : index
    %342 = vector.load %arg46[%c2_252, %c0_253, %c0_254] : memref<5x64x128xf32, #tpu.memory_space<vmem>>, vector<1x64x128xf32>
    %343 = vector.shape_cast %342 : vector<1x64x128xf32> to vector<64x128xf32>
    %cst_255 = arith.constant dense<0.000000e+00> : vector<2x128xf32>
    %344 = tpu.matmul %341, %343, %cst_255 {dimension_numbers = #tpu.dot_dimension_numbers<[1], [0], [0], [1], [0, 0, 1, 1], [], []>} : vector<2x64xf32>, vector<64x128xf32>, vector<2x128xf32> -> vector<2x128xf32>
    %345 = arith.addf %338, %344 : vector<2x128xf32>
    %c3 = arith.constant 3 : index
    %c0_256 = arith.constant 0 : index
    %c0_257 = arith.constant 0 : index
    %346 = vector.load %arg5[%c3, %c0_256, %c0_257] : memref<5x2x10xf32, #tpu.memory_space<vmem>>, vector<1x2x10xf32>
    %347 = vector.shape_cast %346 : vector<1x2x10xf32> to vector<2x10xf32>
    %cst_258 = arith.constant dense<0.000000e+00> : vector<2x64xf32>
    %348 = tpu.matmul %347, %322, %cst_258 {dimension_numbers = #tpu.dot_dimension_numbers<[1], [0], [0], [1], [0, 0, 1, 1], [], []>} : vector<2x10xf32>, vector<10x64xf32>, vector<2x64xf32> -> vector<2x64xf32>
    %c3_259 = arith.constant 3 : index
    %c0_260 = arith.constant 0 : index
    %c0_261 = arith.constant 0 : index
    %349 = vector.load %arg46[%c3_259, %c0_260, %c0_261] : memref<5x64x128xf32, #tpu.memory_space<vmem>>, vector<1x64x128xf32>
    %350 = vector.shape_cast %349 : vector<1x64x128xf32> to vector<64x128xf32>
    %cst_262 = arith.constant dense<0.000000e+00> : vector<2x128xf32>
    %351 = tpu.matmul %348, %350, %cst_262 {dimension_numbers = #tpu.dot_dimension_numbers<[1], [0], [0], [1], [0, 0, 1, 1], [], []>} : vector<2x64xf32>, vector<64x128xf32>, vector<2x128xf32> -> vector<2x128xf32>
    %352 = arith.addf %345, %351 : vector<2x128xf32>
    %c4 = arith.constant 4 : index
    %c0_263 = arith.constant 0 : index
    %c0_264 = arith.constant 0 : index
    %353 = vector.load %arg5[%c4, %c0_263, %c0_264] : memref<5x2x10xf32, #tpu.memory_space<vmem>>, vector<1x2x10xf32>
    %354 = vector.shape_cast %353 : vector<1x2x10xf32> to vector<2x10xf32>
    %cst_265 = arith.constant dense<0.000000e+00> : vector<2x64xf32>
    %355 = tpu.matmul %354, %322, %cst_265 {dimension_numbers = #tpu.dot_dimension_numbers<[1], [0], [0], [1], [0, 0, 1, 1], [], []>} : vector<2x10xf32>, vector<10x64xf32>, vector<2x64xf32> -> vector<2x64xf32>
    %c4_266 = arith.constant 4 : index
    %c0_267 = arith.constant 0 : index
    %c0_268 = arith.constant 0 : index
    %356 = vector.load %arg46[%c4_266, %c0_267, %c0_268] : memref<5x64x128xf32, #tpu.memory_space<vmem>>, vector<1x64x128xf32>
    %357 = vector.shape_cast %356 : vector<1x64x128xf32> to vector<64x128xf32>
    %cst_269 = arith.constant dense<0.000000e+00> : vector<2x128xf32>
    %358 = tpu.matmul %355, %357, %cst_269 {dimension_numbers = #tpu.dot_dimension_numbers<[1], [0], [0], [1], [0, 0, 1, 1], [], []>} : vector<2x64xf32>, vector<64x128xf32>, vector<2x128xf32> -> vector<2x128xf32>
    %359 = arith.addf %352, %358 : vector<2x128xf32>
    %cst_270 = arith.constant 0.000000e+00 : f32
    %360 = vector.broadcast %cst_270 : f32 to vector<2x128xf32>
    %361 = arith.maximumf %359, %360 : vector<2x128xf32>
    %c0_271 = arith.constant 0 : index
    %c0_272 = arith.constant 0 : index
    %362 = vector.load %arg48[%c0_271, %c0_272] : memref<128x32xf32, #tpu.memory_space<vmem>>, vector<128x32xf32>
    %cst_273 = arith.constant dense<0.000000e+00> : vector<2x32xf32>
    %363 = tpu.matmul %361, %362, %cst_273 {dimension_numbers = #tpu.dot_dimension_numbers<[1], [0], [0], [1], [0, 0, 1, 1], [], []>} : vector<2x128xf32>, vector<128x32xf32>, vector<2x32xf32> -> vector<2x32xf32>
    %c0_274 = arith.constant 0 : index
    %c0_275 = arith.constant 0 : index
    %364 = vector.load %arg47[%c0_274, %c0_275] : memref<1x32xf32, #tpu.memory_space<vmem>>, vector<1x32xf32>
    %365 = vector.broadcast %364 : vector<1x32xf32> to vector<2x32xf32>
    %366 = arith.addf %363, %365 : vector<2x32xf32>
    %c0_276 = arith.constant 0 : index
    %c0_277 = arith.constant 0 : index
    %367 = vector.load %arg57[%c0_276, %c0_277] : memref<2x32xf32, #tpu.memory_space<vmem>>, vector<2x32xf32>
    tpu.vector_store %arg57[%c0_276, %c0_277], %366 {strides = array<i32>} : memref<2x32xf32, #tpu.memory_space<vmem>>, vector<2x32xf32>,
    return
  }
}

</mosaic_0001>

<bundles_post_ra>
// kernel: hmipt_forward.1
= control target key start
LH: loop header
LB: loop body
LE: loop exit
PB: predicated region body
PF: predicated region fallthrough
CT: control target
= control target key end

     0   :  { %s20474_s6 = smov 1   ;;  %s20475_s10 = smov 2   ;;  %s23111_s0 = inlined_call_operand.smem [shape: u32[58], index: -1, kind: input, shape index: {}] }
   0x1   :  { %s20558_s5 = sld [smem:[%s23111_s0]]   ;;  %s20476_s14 = smov 3  }
   0x2   :  { %s20563_s9 = sld [smem:[%s23111_s0 + %s20474_s6]]   ;;  %s20477_s18 = smov 4  }
   0x3   :  { %s20568_s13 = sld [smem:[%s23111_s0 + %s20475_s10]]   ;;  %s20478_s22 = smov 5  }
   0x4   :  { %s20573_s17 = sld [smem:[%s23111_s0 + %s20476_s14]]   ;;  %s20479_s26 = smov 6  }
   0x5   :  { %s20578_s21 = sld [smem:[%s23111_s0 + %s20477_s18]]   ;;  %s20480_s30 = smov 7  }
   0x6   :  { %s20583_s25 = sld [smem:[%s23111_s0 + %s20478_s22]]   ;;  %s20481_s4 = smov 8  }
   0x7   :  { %s20588_s29 = sld [smem:[%s23111_s0 + %s20479_s26]]   ;;  %s20482_s10 = smov 9  }
   0x8   :  { %23144 = sst [smem:[#allocation32_spill]] %s20563_s9  ;;  %s20483_s15 = smov 10  }
   0x9   :  { %23145 = sst [smem:[#allocation33_spill]] %s20568_s13  ;;  %s20484_s20 = smov 11  }
   0xa   :  { %23146 = sst [smem:[#allocation34_spill]] %s20573_s17  ;;  %s20485_s26 = smov 12  }
   0xb   :  { %23147 = sst [smem:[#allocation35_spill]] %s20578_s21  ;;  %s20486_s1 = smov 13  }
   0xc   :  { %23148 = sst [smem:[#allocation36_spill]] %s20583_s25  ;;  %s20487_s7 = smov 14  }
   0xd   :  { %23149 = sst [smem:[#allocation37_spill]] %s20588_s29  ;;  %s20489_s22 = smov 16  }
   0xe   :  { %s20593_s3 = sld [smem:[%s23111_s0 + %s20480_s30]]   ;;  %s20490_s28 = smov 17  }
   0xf   :  { %s20598_s8 = sld [smem:[%s23111_s0 + %s20481_s4]]  }
  0x10   :  { %s20603_s14 = sld [smem:[%s23111_s0 + %s20482_s10]]  }
  0x11   :  { %s20608_s19 = sld [smem:[%s23111_s0 + %s20483_s15]]   ;;  %s20488_s15 = smov 15  }
  0x12   :  { %s20613_s24 = sld [smem:[%s23111_s0 + %s20484_s20]]  }
  0x13   :  { %s20618_s30 = sld [smem:[%s23111_s0 + %s20485_s26]]  }
  0x14   :  { %23150 = sst [smem:[#allocation38_spill]] %s20593_s3 }
  0x15   :  { %23151 = sst [smem:[#allocation39_spill]] %s20598_s8 }
  0x16   :  { %23152 = sst [smem:[#allocation40_spill]] %s20603_s14 }
  0x17   :  { %23153 = sst [smem:[#allocation41_spill]] %s20608_s19 }
  0x18   :  { %23154 = sst [smem:[#allocation42_spill]] %s20613_s24 }
  0x19   :  { %23155 = sst [smem:[#allocation43_spill]] %s20618_s30 }
  0x1a   :  { %s20623_s6 = sld [smem:[%s23111_s0 + %s20486_s1]]  }
  0x1b   :  { %s20628_s12 = sld [smem:[%s23111_s0 + %s20487_s7]]   ;;  %s20491_s7 = smov 18  }
  0x1c   :  { %s20633_s20 = sld [smem:[%s23111_s0 + %s20488_s15]]   ;;  %s20492_s15 = smov 19  }
  0x1d   :  { %s20638_s27 = sld [smem:[%s23111_s0 + %s20489_s22]]   ;;  %s20493_s22 = smov 20  }
  0x1e   :  { %s20643_s4 = sld [smem:[%s23111_s0 + %s20490_s28]]   ;;  %s20494_s28 = smov 21  }
  0x1f   :  { %s20648_s25 = sld [smem:[%s23111_s0 + %s20491_s7]]   ;;  %s20495_s7 = smov 22  }
  0x20   :  { %23156 = sst [smem:[#allocation44_spill]] %s20623_s6 }
  0x21   :  { %23157 = sst [smem:[#allocation45_spill]] %s20628_s12 }
  0x22   :  { %s20653_s3 = sld [smem:[%s23111_s0 + %s20492_s15]]   ;;  %s20496_s15 = smov 23  }
  0x23   :  { %23158 = sst [smem:[#allocation46_spill]] %s20638_s27 }
  0x24   :  { %23159 = sst [smem:[#allocation47_spill]] %s20643_s4 }
  0x25   :  { %23160 = sst [smem:[#allocation48_spill]] %s20648_s25 }
  0x26   :  { %s20658_s24 = sld [smem:[%s23111_s0 + %s20493_s22]]   ;;  %s20497_s22 = smov 24  }
  0x27   :  { %s20663_s21 = sld [smem:[%s23111_s0 + %s20494_s28]]   ;;  %s20498_s28 = smov 25  }
  0x28   :  { %23161 = sst [smem:[#allocation49_spill]] %s20653_s3 }
  0x29   :  { %s20668_s14 = sld [smem:[%s23111_s0 + %s20495_s7]]   ;;  %s20499_s7 = smov 26  }
  0x2a   :  { %s20673_s8 = sld [smem:[%s23111_s0 + %s20496_s15]]   ;;  %s20500_s15 = smov 27  }
  0x2b   :  { %s20678_s6 = sld [smem:[%s23111_s0 + %s20497_s22]]   ;;  %s20501_s22 = smov 28  }
  0x2c   :  { %23162 = sst [smem:[#allocation50_spill]] %s20658_s24 }
  0x2d   :  { %s20683_s30 = sld [smem:[%s23111_s0 + %s20498_s28]]   ;;  %s20502_s28 = smov 29  }
  0x2e   :  { %s20688_s29 = sld [smem:[%s23111_s0 + %s20499_s7]]   ;;  %s20503_s7 = smov 30  }
  0x2f   :  { %s20693_s19 = sld [smem:[%s23111_s0 + %s20500_s15]]   ;;  %s20504_s15 = smov 31  }
  0x30   :  { %s20698_s24 = sld [smem:[%s23111_s0 + %s20501_s22]]   ;;  %s20505_s22 = smov 32  }
  0x31   :  { %23163 = sst [smem:[#allocation51_spill]] %s20678_s6 }
  0x32   :  { %s20703_s4 = sld [smem:[%s23111_s0 + %s20502_s28]]   ;;  %s20506_s28 = smov 33  }
  0x33   :  { %23164 = sst [smem:[#allocation52_spill]] %s20683_s30 }
  0x34   :  { %23165 = sst [smem:[#allocation53_spill]] %s20688_s29 }
  0x35   :  { %23166 = sst [smem:[#allocation54_spill]] %s20693_s19 }
  0x36   :  { %23167 = sst [smem:[#allocation55_spill]] %s20698_s24 }
  0x37   :  { %s20708_s30 = sld [smem:[%s23111_s0 + %s20503_s7]]   ;;  %s20507_s7 = smov 34  }
  0x38   :  { %23168 = sst [smem:[#allocation56_spill]] %s20703_s4 }
  0x39   :  { %s20713_s17 = sld [smem:[%s23111_s0 + %s20504_s15]]   ;;  %s20508_s15 = smov 35  }
  0x3a   :  { %s20718_s24 = sld [smem:[%s23111_s0 + %s20505_s22]]   ;;  %s20509_s22 = smov 36  }
  0x3b   :  { %s20723_s4 = sld [smem:[%s23111_s0 + %s20506_s28]]   ;;  %s20510_s28 = smov 37  }
  0x3c   :  { %s20728_s27 = sld [smem:[%s23111_s0 + %s20507_s7]]   ;;  %s20511_s7 = smov 38  }
  0x3d   :  { %s20738_s25 = sld [smem:[%s23111_s0 + %s20509_s22]]   ;;  %s20513_s22 = smov 40  }
  0x3e   :  { %s20743_s3 = sld [smem:[%s23111_s0 + %s20510_s28]]   ;;  %s20514_s28 = smov 41  }
  0x3f   :  { %23169 = sst [smem:[#allocation57_spill]] %s20713_s17 }
  0x40   :  { %s20733_s17 = sld [smem:[%s23111_s0 + %s20508_s15]]   ;;  %s20512_s15 = smov 39  }
  0x41   :  { %23170 = sst [smem:[#allocation58_spill]] %s20723_s4 }
  0x42   :  { %s20748_s6 = sld [smem:[%s23111_s0 + %s20511_s7]]   ;;  %s20515_s7 = smov 42  }
  0x43   :  { %s20753_s19 = sld [smem:[%s23111_s0 + %s20512_s15]]   ;;  %s20516_s15 = smov 43  }
  0x44   :  { %23172 = sst [smem:[#allocation60_spill]] %s20743_s3 }
  0x45   :  { %s20758_s29 = sld [smem:[%s23111_s0 + %s20513_s22]]   ;;  %s20517_s22 = smov 44  }
  0x46   :  { %23171 = sst [smem:[#allocation59_spill]] %s20733_s17 }
  0x47   :  { %s20763_s3 = sld [smem:[%s23111_s0 + %s20514_s28]]   ;;  %s20518_s28 = smov 45  }
  0x48   :  { %23173 = sst [smem:[#allocation61_spill]] %s20748_s6 }
  0x49   :  { %s20768_s6 = sld [smem:[%s23111_s0 + %s20515_s7]]   ;;  %s20519_s7 = smov 46  }
  0x4a   :  { %s20773_s17 = sld [smem:[%s23111_s0 + %s20516_s15]]   ;;  %s20520_s15 = smov 47  }
  0x4b   :  { %23174 = sst [smem:[#allocation62_spill]] %s20758_s29 }
  0x4c   :  { %s20778_s29 = sld [smem:[%s23111_s0 + %s20517_s22]]   ;;  %s20521_s22 = smov 48  }
  0x4d   :  { %23175 = sst [smem:[#allocation63_spill]] %s20763_s3 }
  0x4e   :  { %s20783_s13 = sld [smem:[%s23111_s0 + %s20518_s28]]   ;;  %s20522_s28 = smov 49  }
  0x4f   :  { %23176 = sst [smem:[#allocation64_spill]] %s20768_s6 }
  0x50   :  { %23177 = sst [smem:[#allocation65_spill]] %s20773_s17 }
  0x51   :  { %s20788_s4 = sld [smem:[%s23111_s0 + %s20519_s7]]   ;;  %s20523_s7 = smov 50  }
  0x52   :  { %23178 = sst [smem:[#allocation66_spill]] %s20778_s29 }
  0x53   :  { %s20793_s17 = sld [smem:[%s23111_s0 + %s20520_s15]]   ;;  %s20524_s15 = smov 51  }
  0x54   :  { %s20798_s3 = sld [smem:[%s23111_s0 + %s20521_s22]]   ;;  %s20525_s22 = smov 52  }
  0x55   :  { %s20803_s29 = sld [smem:[%s23111_s0 + %s20522_s28]]   ;;  %s20526_s28 = smov 53  }
  0x56   :  { %s20813_s12 = sld [smem:[%s23111_s0 + %s20524_s15]]   ;;  %s20528_s15 = smov 55  }
  0x57   :  { %23179 = sst [smem:[#allocation67_spill]] %s20788_s4 }
  0x58   :  { %s20808_s4 = sld [smem:[%s23111_s0 + %s20523_s7]]   ;;  %s20527_s7 = smov 54  }
  0x59   :  { %s20823_s9 = sld [smem:[%s23111_s0 + %s20526_s28]]   ;;  %s20530_s28 = smov 57  }
  0x5a   :  { %23180 = sst [smem:[#allocation68_spill]] %s20798_s3 }
  0x5b   :  { %s20818_s3 = sld [smem:[%s23111_s0 + %s20525_s22]]   ;;  %s20529_s22 = smov 56  }
  0x5c   :  { %23181 = sst [smem:[#allocation69_spill]] %s20813_s12 }
  0x5d   :  { %s20828_s6 = sld [smem:[%s23111_s0 + %s20527_s7]]  }
  0x5e   :  { %s20833_s12 = sld [smem:[%s23111_s0 + %s20528_s15]]  }
  0x5f   :  { %23183 = sst [smem:[#allocation71_spill]] %s20823_s9 }
  0x60   :  { %s20843_s9 = sld [smem:[%s23111_s0 + %s20530_s28]]  }
  0x61   :  { %23182 = sst [smem:[#allocation70_spill]] %s20818_s3 }
  0x62   :  { %s20838_s3 = sld [smem:[%s23111_s0 + %s20529_s22]]  }
  0x63   :  { %120 = vsyncpa [#allocation3], 0 }
  0x64   :  { %121 = vsyncpa [#allocation6], 0 }
  0x65   :  { %122 = vsyncpa [#allocation9], 0 }
  0x66   :  { %123 = vsyncpa [#allocation12], 0 }
  0x67   :  { %124 = vsyncpa [#allocation15], 0 }
  0x68   :  { %125 = vsyncpa [#allocation18], 0 }
  0x69   :  { %126 = vsyncpa [#allocation21], 0 }
  0x6a   :  { %127 = vsyncpa [#allocation4], 0  ;;  %s20531_s7 = smov [#allocation5]   ;;  %s20532_s11 = smov [#allocation8]  }
  0x6b   :  { %s186_s10 = sshll.u32 %s20531_s7, 4  ;;  %s218_s15 = sshll.u32 %s20532_s11, 4  ;;  %s187_s10 = int_to_ptr.vmem [resolvable:$true] %s186_s10  ;;  %s219_s15 = int_to_ptr.vmem [resolvable:$true] %s218_s15 }
  0x6c   :  { %s20150_s16 = scalar_lea.hbm %s20668_s14, 16 }
  0x6d   :  { %p20151_p0 = scmp.ne.s32.totalorder %s20668_s14, %s20150_s16  ;;  %p20154_p1 = scmp.lt.u32.totalorder %s20150_s16, %s20668_s14 }
  0x6f   :  { %p20156_p2 = pnand %p20154_p1, %p20151_p0 }
  0x71   :  { %20159 = shalt.err (!%p20156_p2)
}
  0x72   :  { %s20160_s0 = scalar_lea.vmem %s187_s10, 16  ;;  %s20164_s18 = scalar_lea.vmem %s187_s10, 32 }
  0x73   :  { %p20161_p3 = scmp.ne.s32.totalorder %s187_s10, %s20160_s0  ;;  %p20165_p4 = scmp.lt.s32.totalorder %s187_s10, %s187_s10 }
  0x74   :  { %p20166_p5 = scmp.lt.s32.totalorder %s20164_s18, %s20160_s0 }
  0x76   :  { %p20167_p6 = por %p20166_p5, %p20165_p4 }
  0x78   :  { %p20168_p7 = pnand %p20167_p6, %p20161_p3 }
  0x7a   :  { %20171 = shalt.err (!%p20168_p7)
}
  0x7b   :  { %189 = dma.hbm_to_vmem [thread:$0]  %s20668_s14, 16, %s187_s10, [#allocation6]  }
  0x7c   :  { %s20172_s22 = scalar_lea.hbm %s20708_s30, 16 }
  0x7d   :  { %p20173_p8 = scmp.ne.s32.totalorder %s20708_s30, %s20172_s22  ;;  %p20176_p9 = scmp.lt.u32.totalorder %s20172_s22, %s20708_s30 }
  0x7f   :  { %p20178_p10 = pnand %p20176_p9, %p20173_p8 }
  0x81   :  { %20181 = shalt.err (!%p20178_p10)
}
  0x82   :  { %s20182_s23 = scalar_lea.vmem %s219_s15, 16  ;;  %s20186_s26 = scalar_lea.vmem %s219_s15, 32 }
  0x83   :  { %p20183_p11 = scmp.ne.s32.totalorder %s219_s15, %s20182_s23  ;;  %p20187_p12 = scmp.lt.s32.totalorder %s219_s15, %s219_s15 }
  0x84   :  { %p20188_p13 = scmp.lt.s32.totalorder %s20186_s26, %s20182_s23 }
  0x86   :  { %p20189_p0 = por %p20188_p13, %p20187_p12 }
  0x88   :  { %p20190_p1 = pnand %p20189_p0, %p20183_p11 }
  0x8a   :  { %20193 = shalt.err (!%p20190_p1)
}
  0x8b   :  { %221 = dma.hbm_to_vmem [thread:$0]  %s20708_s30, 16, %s219_s15, [#allocation9]  }
  0x8c   :  { %s20533_s28 = smov [#allocation11]   ;;  %s20534_s1 = smov [#allocation14]  }
  0x8d   :  { %s242_s14 = sshll.u32 %s20533_s28, 4  ;;  %s268_s2 = sshll.u32 %s20534_s1, 4  ;;  %s243_s14 = int_to_ptr.vmem [resolvable:$true] %s242_s14  ;;  %s269_s2 = int_to_ptr.vmem [resolvable:$true] %s268_s2 }
  0x8e   :  { %s20194_s7 = scalar_lea.hbm %s20728_s27, 16 }
  0x8f   :  { %p20195_p2 = scmp.ne.s32.totalorder %s20728_s27, %s20194_s7  ;;  %p20198_p3 = scmp.lt.u32.totalorder %s20194_s7, %s20728_s27 }
  0x91   :  { %p20200_p4 = pnand %p20198_p3, %p20195_p2 }
  0x93   :  { %20203 = shalt.err (!%p20200_p4)
}
  0x94   :  { %s20204_s10 = scalar_lea.vmem %s243_s14, 16  ;;  %s20208_s11 = scalar_lea.vmem %s243_s14, 32 }
  0x95   :  { %p20205_p5 = scmp.ne.s32.totalorder %s243_s14, %s20204_s10  ;;  %p20209_p6 = scmp.lt.s32.totalorder %s243_s14, %s243_s14 }
  0x96   :  { %p20210_p7 = scmp.lt.s32.totalorder %s20208_s11, %s20204_s10 }
  0x98   :  { %p20211_p8 = por %p20210_p7, %p20209_p6 }
  0x9a   :  { %p20212_p9 = pnand %p20211_p8, %p20205_p5 }
  0x9c   :  { %20215 = shalt.err (!%p20212_p9)
}
  0x9d   :  { %245 = dma.hbm_to_vmem [thread:$0]  %s20728_s27, 16, %s243_s14, [#allocation12]  }
  0x9e   :  { %s20216_s30 = scalar_lea.hbm %s20753_s19, 16 }
  0x9f   :  { %p20217_p10 = scmp.ne.s32.totalorder %s20753_s19, %s20216_s30  ;;  %p20220_p11 = scmp.lt.u32.totalorder %s20216_s30, %s20753_s19 }
  0xa1   :  { %p20222_p12 = pnand %p20220_p11, %p20217_p10 }
  0xa3   :  { %20225 = shalt.err (!%p20222_p12)
}
  0xa4   :  { %s20226_s15 = scalar_lea.vmem %s269_s2, 16  ;;  %s20230_s16 = scalar_lea.vmem %s269_s2, 32 }
  0xa5   :  { %p20227_p13 = scmp.ne.s32.totalorder %s269_s2, %s20226_s15  ;;  %p20231_p0 = scmp.lt.s32.totalorder %s269_s2, %s269_s2 }
  0xa6   :  { %p20232_p1 = scmp.lt.s32.totalorder %s20230_s16, %s20226_s15 }
  0xa8   :  { %p20233_p2 = por %p20232_p1, %p20231_p0 }
  0xaa   :  { %p20234_p3 = pnand %p20233_p2, %p20227_p13 }
  0xac   :  { %20237 = shalt.err (!%p20234_p3)
}
  0xad   :  { %271 = dma.hbm_to_vmem [thread:$0]  %s20753_s19, 16, %s269_s2, [#allocation15]  }
  0xae   :  { %s20535_s0 = smov [#allocation17]   ;;  %s20536_s18 = smov [#allocation20]  }
  0xaf   :  { %s300_s27 = sshll.u32 %s20535_s0, 4  ;;  %s322_s22 = sshll.u32 %s20536_s18, 4  ;;  %s301_s27 = int_to_ptr.vmem [resolvable:$true] %s300_s27  ;;  %s323_s22 = int_to_ptr.vmem [resolvable:$true] %s322_s22 }
  0xb0   :  { %s20238_s23 = scalar_lea.hbm %s20793_s17, 16 }
  0xb1   :  { %p20239_p4 = scmp.ne.s32.totalorder %s20793_s17, %s20238_s23  ;;  %p20242_p5 = scmp.lt.u32.totalorder %s20238_s23, %s20793_s17 }
  0xb3   :  { %p20244_p6 = pnand %p20242_p5, %p20239_p4 }
  0xb5   :  { %20247 = shalt.err (!%p20244_p6)
}
  0xb6   :  { %s20248_s26 = scalar_lea.vmem %s301_s27, 16  ;;  %s20252_s28 = scalar_lea.vmem %s301_s27, 32 }
  0xb7   :  { %p20249_p7 = scmp.ne.s32.totalorder %s301_s27, %s20248_s26  ;;  %p20253_p8 = scmp.lt.s32.totalorder %s301_s27, %s301_s27 }
  0xb8   :  { %p20254_p9 = scmp.lt.s32.totalorder %s20252_s28, %s20248_s26 }
  0xba   :  { %p20255_p10 = por %p20254_p9, %p20253_p8 }
  0xbc   :  { %p20256_p11 = pnand %p20255_p10, %p20249_p7 }
  0xbe   :  { %20259 = shalt.err (!%p20256_p11)
}
  0xbf   :  { %303 = dma.hbm_to_vmem [thread:$0]  %s20793_s17, 16, %s301_s27, [#allocation18]  }
  0xc0   :  { %s20260_s19 = scalar_lea.hbm %s20808_s4, 16 }
  0xc1   :  { %p20261_p12 = scmp.ne.s32.totalorder %s20808_s4, %s20260_s19  ;;  %p20264_p13 = scmp.lt.u32.totalorder %s20260_s19, %s20808_s4 }
  0xc3   :  { %p20266_p0 = pnand %p20264_p13, %p20261_p12 }
  0xc5   :  { %20269 = shalt.err (!%p20266_p0)
}
  0xc6   :  { %s20270_s14 = scalar_lea.vmem %s323_s22, 16  ;;  %s20274_s1 = scalar_lea.vmem %s323_s22, 32 }
  0xc7   :  { %p20271_p1 = scmp.ne.s32.totalorder %s323_s22, %s20270_s14  ;;  %p20275_p2 = scmp.lt.s32.totalorder %s323_s22, %s323_s22 }
  0xc8   :  { %p20276_p3 = scmp.lt.s32.totalorder %s20274_s1, %s20270_s14 }
  0xca   :  { %p20277_p4 = por %p20276_p3, %p20275_p2 }
  0xcc   :  { %p20278_p5 = pnand %p20277_p4, %p20271_p1 }
  0xce   :  { %20281 = shalt.err (!%p20278_p5)
}
  0xcf   :  { %325 = dma.hbm_to_vmem [thread:$0]  %s20808_s4, 16, %s323_s22, [#allocation21]  }
  0xd0   :  { %s20537_s2 = smov [#allocation2]   ;;  %s20538_s7 = smov [#allocation7]  }
  0xd1   :  { %s176_s17 = sshll.u32 %s20537_s2, 4  ;;  %s196_s10 = sshll.u32 %s20538_s7, 4  ;;  %s177_s17 = int_to_ptr.vmem [resolvable:$true] %s176_s17  ;;  %s197_s10 = int_to_ptr.vmem [resolvable:$true] %s196_s10 }
  0xd2   :  { %s20282_s11 = scalar_lea.hbm %s20663_s21, 16 }
  0xd3   :  { %p20283_p6 = scmp.ne.s32.totalorder %s20663_s21, %s20282_s11  ;;  %p20286_p7 = scmp.lt.u32.totalorder %s20282_s11, %s20663_s21 }
  0xd5   :  { %p20288_p8 = pnand %p20286_p7, %p20283_p6 }
  0xd7   :  { %20291 = shalt.err (!%p20288_p8)
}
  0xd8   :  { %s20292_s30 = scalar_lea.vmem %s177_s17, 16  ;;  %s20296_s15 = scalar_lea.vmem %s177_s17, 32 }
  0xd9   :  { %p20293_p9 = scmp.ne.s32.totalorder %s177_s17, %s20292_s30  ;;  %p20297_p10 = scmp.lt.s32.totalorder %s177_s17, %s177_s17 }
  0xda   :  { %p20298_p11 = scmp.lt.s32.totalorder %s20296_s15, %s20292_s30 }
  0xdc   :  { %p20299_p12 = por %p20298_p11, %p20297_p10 }
  0xde   :  { %p20300_p13 = pnand %p20299_p12, %p20293_p9 }
  0xe0   :  { %20303 = shalt.err (!%p20300_p13)
}
  0xe1   :  { %179 = dma.hbm_to_vmem [thread:$0]  %s20663_s21, 16, %s177_s17, [#allocation3]  }
  0xe2   :  { %s20304_s4 = scalar_lea.hbm %s20673_s8, 16 }
  0xe3   :  { %p20305_p0 = scmp.ne.s32.totalorder %s20673_s8, %s20304_s4  ;;  %p20308_p1 = scmp.lt.u32.totalorder %s20304_s4, %s20673_s8 }
  0xe5   :  { %p20310_p2 = pnand %p20308_p1, %p20305_p0 }
  0xe7   :  { %20313 = shalt.err (!%p20310_p2)
}
  0xe8   :  { %s20314_s16 = scalar_lea.vmem %s197_s10, 16  ;;  %s20318_s0 = scalar_lea.vmem %s197_s10, 32 }
  0xe9   :  { %p20315_p3 = scmp.ne.s32.totalorder %s197_s10, %s20314_s16  ;;  %p20319_p4 = scmp.lt.s32.totalorder %s197_s10, %s197_s10 }
  0xea   :  { %p20320_p5 = scmp.lt.s32.totalorder %s20318_s0, %s20314_s16 }
  0xec   :  { %p20321_p6 = por %p20320_p5, %p20319_p4 }
  0xee   :  { %p20322_p7 = pnand %p20321_p6, %p20315_p3 }
  0xf0   :  { %20325 = shalt.err (!%p20322_p7)
}
  0xf1   :  { %199 = dma.hbm_to_vmem [thread:$0]  %s20673_s8, 16, %s197_s10, [#allocation6]  }
  0xf2   :  { %s20539_s27 = smov [#allocation10]   ;;  %s20540_s18 = smov [#allocation13]  }
  0xf3   :  { %s230_s21 = sshll.u32 %s20539_s27, 4  ;;  %s254_s22 = sshll.u32 %s20540_s18, 4  ;;  %s231_s21 = int_to_ptr.vmem [resolvable:$true] %s230_s21  ;;  %s255_s22 = int_to_ptr.vmem [resolvable:$true] %s254_s22 }
  0xf4   :  { %s20326_s23 = scalar_lea.hbm %s20718_s24, 16 }
  0xf5   :  { %p20327_p8 = scmp.ne.s32.totalorder %s20718_s24, %s20326_s23  ;;  %p20330_p9 = scmp.lt.u32.totalorder %s20326_s23, %s20718_s24 }
  0xf7   :  { %p20332_p10 = pnand %p20330_p9, %p20327_p8 }
  0xf9   :  { %20335 = shalt.err (!%p20332_p10)
}
  0xfa   :  { %s20336_s26 = scalar_lea.vmem %s231_s21, 16  ;;  %s20340_s28 = scalar_lea.vmem %s231_s21, 32 }
  0xfb   :  { %p20337_p11 = scmp.ne.s32.totalorder %s231_s21, %s20336_s26  ;;  %p20341_p12 = scmp.lt.s32.totalorder %s231_s21, %s231_s21 }
  0xfc   :  { %p20342_p13 = scmp.lt.s32.totalorder %s20340_s28, %s20336_s26 }
  0xfe   :  { %p20343_p0 = por %p20342_p13, %p20341_p12 }
 0x100   :  { %p20344_p1 = pnand %p20343_p0, %p20337_p11 }
 0x102   :  { %20347 = shalt.err (!%p20344_p1)
}
 0x103   :  { %233 = dma.hbm_to_vmem [thread:$0]  %s20718_s24, 16, %s231_s21, [#allocation9]  }
 0x104   :  { %s20348_s8 = scalar_lea.hbm %s20738_s25, 16 }
 0x105   :  { %p20349_p2 = scmp.ne.s32.totalorder %s20738_s25, %s20348_s8  ;;  %p20352_p3 = scmp.lt.u32.totalorder %s20348_s8, %s20738_s25 }
 0x107   :  { %p20354_p4 = pnand %p20352_p3, %p20349_p2 }
 0x109   :  { %20357 = shalt.err (!%p20354_p4)
}
 0x10a   :  { %s20358_s19 = scalar_lea.vmem %s255_s22, 16  ;;  %s20362_s14 = scalar_lea.vmem %s255_s22, 32 }
 0x10b   :  { %p20359_p5 = scmp.ne.s32.totalorder %s255_s22, %s20358_s19  ;;  %p20363_p6 = scmp.lt.s32.totalorder %s255_s22, %s255_s22 }
 0x10c   :  { %p20364_p7 = scmp.lt.s32.totalorder %s20362_s14, %s20358_s19 }
 0x10e   :  { %p20365_p8 = por %p20364_p7, %p20363_p6 }
 0x110   :  { %p20366_p9 = pnand %p20365_p8, %p20359_p5 }
 0x112   :  { %20369 = shalt.err (!%p20366_p9)
}
 0x113   :  { %257 = dma.hbm_to_vmem [thread:$0]  %s20738_s25, 16, %s255_s22, [#allocation12]  }
 0x114   :  { %s20541_s1 = smov [#allocation16]   ;;  %s20542_s2 = smov [#allocation19]  }
 0x115   :  { %s288_s24 = sshll.u32 %s20541_s1, 4  ;;  %s312_s17 = sshll.u32 %s20542_s2, 4  ;;  %s289_s24 = int_to_ptr.vmem [resolvable:$true] %s288_s24  ;;  %s313_s17 = int_to_ptr.vmem [resolvable:$true] %s312_s17 }
 0x116   :  { %s20370_s7 = scalar_lea.hbm %s20783_s13, 16 }
 0x117   :  { %p20371_p10 = scmp.ne.s32.totalorder %s20783_s13, %s20370_s7  ;;  %p20374_p11 = scmp.lt.u32.totalorder %s20370_s7, %s20783_s13 }
 0x119   :  { %p20376_p12 = pnand %p20374_p11, %p20371_p10 }
 0x11b   :  { %20379 = shalt.err (!%p20376_p12)
}
 0x11c   :  { %s20380_s10 = scalar_lea.vmem %s289_s24, 16  ;;  %s20384_s11 = scalar_lea.vmem %s289_s24, 32 }
 0x11d   :  { %p20381_p13 = scmp.ne.s32.totalorder %s289_s24, %s20380_s10  ;;  %p20385_p0 = scmp.lt.s32.totalorder %s289_s24, %s289_s24 }
 0x11e   :  { %p20386_p1 = scmp.lt.s32.totalorder %s20384_s11, %s20380_s10 }
 0x120   :  { %p20387_p2 = por %p20386_p1, %p20385_p0 }
 0x122   :  { %p20388_p3 = pnand %p20387_p2, %p20381_p13 }
 0x124   :  { %20391 = shalt.err (!%p20388_p3)
}
 0x125   :  { %291 = dma.hbm_to_vmem [thread:$0]  %s20783_s13, 16, %s289_s24, [#allocation15]  }
 0x126   :  { %s20392_s25 = scalar_lea.hbm %s20803_s29, 16 }
 0x127   :  { %p20393_p4 = scmp.ne.s32.totalorder %s20803_s29, %s20392_s25  ;;  %p20396_p5 = scmp.lt.u32.totalorder %s20392_s25, %s20803_s29 }
 0x129   :  { %p20398_p6 = pnand %p20396_p5, %p20393_p4 }
 0x12b   :  { %20401 = shalt.err (!%p20398_p6)
}
 0x12c   :  { %s20402_s30 = scalar_lea.vmem %s313_s17, 16  ;;  %s20406_s15 = scalar_lea.vmem %s313_s17, 32 }
 0x12d   :  { %p20403_p7 = scmp.ne.s32.totalorder %s313_s17, %s20402_s30  ;;  %p20407_p8 = scmp.lt.s32.totalorder %s313_s17, %s313_s17 }
 0x12e   :  { %p20408_p9 = scmp.lt.s32.totalorder %s20406_s15, %s20402_s30 }
 0x130   :  { %p20409_p10 = por %p20408_p9, %p20407_p8 }
 0x132   :  { %p20410_p11 = pnand %p20409_p10, %p20403_p7 }
 0x134   :  { %20413 = shalt.err (!%p20410_p11)
}
 0x135   :  { %315 = dma.hbm_to_vmem [thread:$0]  %s20803_s29, 16, %s313_s17, [#allocation18]  }
 0x136   :  { %s20543_s4 = smov [#allocation22]   ;;  %s20414_s16 = scalar_lea.hbm %s20833_s12, 16 }
 0x137   :  { %s340_s13 = sshll.u32 %s20543_s4, 4  ;;  %p20415_p12 = scmp.ne.s32.totalorder %s20833_s12, %s20414_s16  ;;  %s341_s13 = int_to_ptr.vmem [resolvable:$true] %s340_s13 }
 0x138   :  { %p20418_p13 = scmp.lt.u32.totalorder %s20414_s16, %s20833_s12 }
 0x13a   :  { %p20420_p0 = pnand %p20418_p13, %p20415_p12 }
 0x13c   :  { %20423 = shalt.err (!%p20420_p0)
}
 0x13d   :  { %s20424_s0 = scalar_lea.vmem %s341_s13, 16  ;;  %s20428_s27 = scalar_lea.vmem %s341_s13, 32 }
 0x13e   :  { %p20425_p1 = scmp.ne.s32.totalorder %s341_s13, %s20424_s0  ;;  %p20429_p2 = scmp.lt.s32.totalorder %s341_s13, %s341_s13 }
 0x13f   :  { %p20430_p3 = scmp.lt.s32.totalorder %s20428_s27, %s20424_s0 }
 0x141   :  { %p20431_p4 = por %p20430_p3, %p20429_p2 }
 0x143   :  { %p20432_p5 = pnand %p20431_p4, %p20425_p1 }
 0x145   :  { %20435 = shalt.err (!%p20432_p5)
}
 0x146   :  { %343 = dma.hbm_to_vmem [thread:$0]  %s20833_s12, 16, %s341_s13, [#allocation21]  }
 0x147   :  { %20458 = dma.done.wait [#allocation3], 16  }
 0x148   :  { %20459 = vsyncadd [#allocation3], 4294967280 }
 0x149   :  { %20460 = dma.done.wait [#allocation6], 32  }
 0x14a   :  { %20461 = vsyncadd [#allocation6], 4294967264 }
 0x14b   :  { %20462 = dma.done.wait [#allocation9], 32  }
 0x14c   :  { %20463 = vsyncadd [#allocation9], 4294967264 }
 0x14d   :  { %20464 = dma.done.wait [#allocation12], 32  }
 0x14e   :  { %20465 = vsyncadd [#allocation12], 4294967264 }
 0x14f   :  { %20466 = dma.done.wait [#allocation15], 32  }
 0x150   :  { %20467 = vsyncadd [#allocation15], 4294967264 }
 0x151   :  { %20468 = dma.done.wait [#allocation18], 32  }
 0x152   :  { %20469 = vsyncadd [#allocation18], 4294967264 }
 0x153   :  { %20470 = dma.done.wait [#allocation21], 32  }
 0x154   :  { %20471 = vsyncadd [#allocation21], 4294967264  ;;  %v18742_v0 = vld [vmem:[%s20633_s20 + $0x40] sm:$0xff]   ;;  %v18746_v4 = vld [vmem:[%s20633_s20 + $0x48] sm:$0xff]   ;;  %s23184_s29 = sld [smem:[#allocation64_spill]]  ;;  %vm1681_vm0 = vcmask 261120  }
 0x155   :  { %v18743_v1 = vld [vmem:[%s20633_s20] sm:$0xff]   ;;  %16109 = vmatprep.subr.bf16.mxu0 %v18742_v0  ;;  %v18747_v5 = vld [vmem:[%s20633_s20 + $0x8] sm:$0xff]   ;;  %v18750_v8 = vld [vmem:[%s20633_s20 + $0x50] sm:$0xff]   ;;  %s23185_s12 = sld [smem:[#allocation32_spill]]  ;;  %vm3873_vm1 = vcmask 654336   ;;  %s23188_s21 = sld [smem:[#allocation63_spill]] }
 0x156   :  { %v18744_v2 = vld [vmem:[%s20633_s20 + $0xc0] sm:$0xff]   ;;  %16110 = vmatpush3.bf16.msra.mxu0 %v18743_v1  ;;  %v18748_v6 = vld [vmem:[%s20633_s20 + $0xc8] sm:$0xff]   ;;  %v18751_v9 = vld [vmem:[%s20633_s20 + $0x10] sm:$0xff]   ;;  %s23189_s18 = sld [smem:[#allocation65_spill]]  ;;  %s23190_s22 = sld [smem:[#allocation70_spill]]  ;;  %vm8280_vm2 = vcmask 1046528  }
 0x157   :  { %v18745_v3 = vld [vmem:[%s20633_s20 + $0x80] sm:$0xff]   ;;  %16173 = vmatprep.subr.bf16.mxu1 %v18744_v2  ;;  %16111 = vmatprep.subr.bf16.mxu0 %v18746_v4  ;;  %v18749_v7 = vld [vmem:[%s20633_s20 + $0x88] sm:$0xff]   ;;  %v18752_v10 = vld [vmem:[%s20633_s20 + $0xd0] sm:$0xff]   ;;  %s23191_s23 = sld [smem:[#allocation69_spill]]  ;;  %s23193_s26 = sld [smem:[#allocation71_spill]]  ;;  %vm8273_vm3 = vcmask 56320  }
 0x158   :  { %16174 = vmatpush3.bf16.msra.mxu1 %v18745_v3  ;;  %v18753_v11 = vld [vmem:[%s20633_s20 + $0x90] sm:$0xff]   ;;  %v18754_v12 = vld [vmem:[%s20633_s20 + $0x58] sm:$0xff]   ;;  %v18758_v16 = vld [vmem:[%s20633_s20 + $0x60] sm:$0xff]   ;;  %s23194_s28 = sld [smem:[#allocation33_spill]]  ;;  %s23196_s8 = sld [smem:[#allocation61_spill]]  ;;  %vm8370_vm4 = vcmask 130048  }
 0x159   :  { %16175 = vmatprep.subr.bf16.mxu1 %v18748_v6  ;;  %v18755_v13 = vld [vmem:[%s20633_s20 + $0x18] sm:$0xff]   ;;  %v18759_v17 = vld [vmem:[%s20633_s20 + $0x20] sm:$0xff]   ;;  %v18762_v20 = vld [vmem:[%s20633_s20 + $0x68] sm:$0xff]   ;;  %s23197_s19 = sld [smem:[#allocation60_spill]]  ;;  %vm8547_vm5 = vcmask 523264   ;;  %s23198_s14 = sld [smem:[#allocation62_spill]] }
 0x15a   :  { %16112 = vmatpush3.bf16.msra.mxu0 %v18747_v5  ;;  %v18756_v14 = vld [vmem:[%s20633_s20 + $0xd8] sm:$0xff]   ;;  %v18760_v18 = vld [vmem:[%s20633_s20 + $0xe0] sm:$0xff]   ;;  %v18763_v21 = vld [vmem:[%s20633_s20 + $0x28] sm:$0xff]   ;;  %s23199_s1 = sld [smem:[#allocation53_spill]]  ;;  %s23200_s24 = sld [smem:[#allocation54_spill]]  ;;  %vm9138_vm6 = vcmask 1041408  }
 0x15b   :  { %16113 = vmatprep.subr.bf16.mxu0 %v18750_v8  ;;  %v18757_v15 = vld [vmem:[%s20633_s20 + $0x98] sm:$0xff]   ;;  %v18761_v19 = vld [vmem:[%s20633_s20 + $0xa0] sm:$0xff]   ;;  %v18764_v22 = vld [vmem:[%s20633_s20 + $0xe8] sm:$0xff]   ;;  %s23201_s2 = sld [smem:[#allocation51_spill]]  ;;  %s23202_s17 = sld [smem:[#allocation49_spill]]  ;;  %vm20545_vm8 = vmmov 1  }
 0x15c   :  { %16176 = vmatpush3.bf16.msra.mxu1 %v18749_v7  ;;  %v18765_v23 = vld [vmem:[%s20633_s20 + $0xa8] sm:$0xff]   ;;  %v18766_v24 = vld [vmem:[%s20633_s20 + $0x70] sm:$0xff]   ;;  %v18770_v28 = vld [vmem:[%s20633_s20 + $0x78] sm:$0xff]   ;;  %s23203_s7 = sld [smem:[#allocation48_spill]]  ;;  %s23204_s10 = sld [smem:[#allocation46_spill]]  ;;  %vm9108_vm10 = vcmask 80896  }
 0x15d   :  { %16177 = vmatprep.subr.bf16.mxu1 %v18752_v10  ;;  %v18767_v25 = vld [vmem:[%s20633_s20 + $0x30] sm:$0xff]   ;;  %v18771_v29 = vld [vmem:[%s20633_s20 + $0x38] sm:$0xff]   ;;  %v18777_v34 = vld [vmem:[%s20633_s20 + $0x140] sm:$0xff]   ;;  %s23205_s11 = sld [smem:[#allocation34_spill]]  ;;  %vm9112_vm11 = vcmask 74752   ;;  %s23210_s25 = sld [smem:[#allocation52_spill]] }
 0x15e   :  { %16114 = vmatpush3.bf16.msra.mxu0 %v18751_v9  ;;  %v18768_v26 = vld [vmem:[%s20633_s20 + $0xf0] sm:$0xff]   ;;  %v18772_v30 = vld [vmem:[%s20633_s20 + $0xf8] sm:$0xff]   ;;  %v18781_v37 = vld [vmem:[%s20633_s20 + $0x100] sm:$0xff]   ;;  %s23211_s30 = sld [smem:[#allocation47_spill]]  ;;  %vm9874_vm12 = vcmask 517120   ;;  %s23212_s15 = sld [smem:[#allocation56_spill]] }
 0x15f   :  { %16115 = vmatprep.subr.bf16.mxu0 %v18754_v12  ;;  %v18769_v27 = vld [vmem:[%s20633_s20 + $0xb0] sm:$0xff]   ;;  %v18776_v33 = vld [vmem:[%s20633_s20 + $0xb8] sm:$0xff]   ;;  %v18785_v40 = vld [vmem:[%s20633_s20 + $0x148] sm:$0xff]   ;;  %s23213_s4 = sld [smem:[#allocation50_spill]]  ;;  %s23214_s13 = sld [smem:[#allocation57_spill]]  ;;  %vm20547_vm13 = vmmov 0  }
 0x160   :  { %16178 = vmatpush3.bf16.msra.mxu1 %v18753_v11  ;;  %v18773_v31 = vld [vmem:[%s20558_s5] ss:$48 sps:$4 sm:$0xff]   ;;  %v18775_v32 = vld [vmem:[%s20558_s5 + $0x4] ss:$48 sps:$4 sm:$0xff]   ;;  %v18778_v35 = vld [vmem:[%s20558_s5 + $0x8] ss:$48 sps:$4 sm:$0xff]  }
 0x161   :  { %16179 = vmatprep.subr.bf16.mxu1 %v18756_v14  ;;  %1738 = vmatprep.mubr.bf16.mxu0 %v18775_v32  ;;  %v18780_v36 = vld [vmem:[%s20558_s5 + $0xc] ss:$48 sps:$4 sm:$0xff]   ;;  %v18782_v38 = vld [vmem:[%s20558_s5 + $0x64] ss:$48 sps:$4 sm:$0xff]   ;;  %v18784_v39 = vld [vmem:[%s20558_s5 + $0x60] ss:$48 sps:$4 sm:$0xff]  }
 0x162   :  { %16116 = vmatpush3.bf16.msra.mxu0 %v18755_v13  ;;  %1835 = vmatprep.mubr.bf16.mxu1 %v18780_v36  ;;  %v18786_v41 = vld [vmem:[%s20558_s5 + $0x6c] ss:$48 sps:$4 sm:$0xff]   ;;  %v18789_v43 = vld [vmem:[%s20558_s5 + $0x68] ss:$48 sps:$4 sm:$0xff]   ;;  %v18790_v44 = vld [vmem:[%s20558_s5 + $0xc4] ss:$48 sps:$4 sm:$0xff]  }
 0x163   :  { %16117 = vmatprep.subr.bf16.mxu0 %v18758_v16  ;;  %v18788_v42 = vld [vmem:[%s20633_s20 + $0x108] sm:$0xff]   ;;  %v18793_v45 = vld [vmem:[%s20633_s20 + $0x150] sm:$0xff]   ;;  %v18801_v50 = vld [vmem:[%s20633_s20 + $0x158] sm:$0xff]   ;;  %s23215_s16 = sld [smem:[#allocation55_spill]]  ;;  %s23216_s0 = sld [smem:[#allocation41_spill]]  ;;  %vm14640_vm14 = vcmask 254976  }
 0x164   :  { %16180 = vmatpush3.bf16.msra.mxu1 %v18757_v15  ;;  %v18794_v46 = vld [vmem:[%s20558_s5 + $0xcc] ss:$48 sps:$4 sm:$0xff]   ;;  %v18796_v47 = vld [vmem:[%s20633_s20 + $0x110] sm:$0xff]   ;;  %v18797_v51 = vld [vmem:[%s20558_s5 + $0xc8] ss:$48 sps:$4 sm:$0xff]   ;;  %s23217_s27 = sld [smem:[#allocation37_spill]] }
 0x165   :  { %16181 = vmatprep.subr.bf16.mxu1 %v18760_v18  ;;  %v18792_v48 = vld [vmem:[%s20558_s5 + $0xc0] ss:$48 sps:$4 sm:$0xff]   ;;  %v18798_v49 = vld [vmem:[%s20558_s5 + $0x124] ss:$48 sps:$4 sm:$0xff]   ;;  %v18804_v52 = vld [vmem:[%s20633_s20 + $0x118] sm:$0xff]  }
 0x166   :  { %16118 = vmatpush3.bf16.msra.mxu0 %v18759_v17  ;;  %v18802_v53 = vld [vmem:[%s20558_s5 + $0x12c] ss:$48 sps:$4 sm:$0xff]   ;;  %v18809_v54 = vld [vmem:[%s20633_s20 + $0x160] sm:$0xff]   ;;  %v18805_v58 = vld [vmem:[%s20558_s5 + $0x128] ss:$48 sps:$4 sm:$0xff]  }
 0x167   :  { %16119 = vmatprep.subr.bf16.mxu0 %v18762_v20  ;;  %v18800_v55 = vld [vmem:[%s20558_s5 + $0x120] ss:$48 sps:$4 sm:$0xff]   ;;  %v18806_v57 = vld [vmem:[%s20558_s5 + $0x184] ss:$48 sps:$4 sm:$0xff]   ;;  %v18816_v61 = vld [vmem:[%s20633_s20 + $0x1c8] sm:$0xff]  }
 0x168   :  { %16182 = vmatpush3.bf16.msra.mxu1 %v18761_v19  ;;  %v18812_v56 = vld [vmem:[%s20633_s20 + $0x120] sm:$0xff]   ;;  %v18810_v62 = vld [vmem:[%s20558_s5 + $0x18c] ss:$48 sps:$4 sm:$0xff]   ;;  %v18813_v4 = vld [vmem:[%s20558_s5 + $0x188] ss:$48 sps:$4 sm:$0xff]  }
 0x169   :  { %16183 = vmatprep.subr.bf16.mxu1 %v18764_v22  ;;  %v18814_v59 = vld [vmem:[%s20633_s20 + $0x1c0] sm:$0xff]   ;;  %v18819_v63 = vld [vmem:[%s20633_s20 + $0x188] sm:$0xff]   ;;  %v18826_v5 = vld [vmem:[%s20633_s20 + $0x1d0] sm:$0xff]  }
 0x16a   :  { %16120 = vmatpush3.bf16.msra.mxu0 %v18763_v21  ;;  %v18815_v60 = vld [vmem:[%s20633_s20 + $0x180] sm:$0xff]   ;;  %v18821_v0 = vld [vmem:[%s20633_s20 + $0x168] sm:$0xff]   ;;  %v18827_v6 = vld [vmem:[%s20633_s20 + $0x190] sm:$0xff]  }
 0x16b   :  { %16121 = vmatprep.subr.bf16.mxu0 %v18766_v24  ;;  %v18808_v1 = vld [vmem:[%s20558_s5 + $0x180] ss:$48 sps:$4 sm:$0xff]   ;;  %v18817_v2 = vld [vmem:[%s20558_s5 + $0x1e4] ss:$48 sps:$4 sm:$0xff]   ;;  %v18824_v3 = vld [vmem:[%s20633_s20 + $0x128] sm:$0xff]  }
 0x16c   :  { %16184 = vmatpush3.bf16.msra.mxu1 %v18765_v23  ;;  %v18828_v7 = vld [vmem:[%s20633_s20 + $0x1d8] sm:$0xff]   ;;  %v18833_v10 = vld [vmem:[%s20633_s20 + $0x170] sm:$0xff]   ;;  %v18838_v16 = vld [vmem:[%s20633_s20 + $0x1e0] sm:$0xff]  }
 0x16d   :  { %16185 = vmatprep.subr.bf16.mxu1 %v18768_v26  ;;  %v18822_v8 = vld [vmem:[%s20558_s5 + $0x1ec] ss:$48 sps:$4 sm:$0xff]   ;;  %v18820_v11 = vld [vmem:[%s20558_s5 + $0x1e0] ss:$48 sps:$4 sm:$0xff]   ;;  %v18825_v12 = vld [vmem:[%s20558_s5 + $0x1e8] ss:$48 sps:$4 sm:$0xff]  }
 0x16e   :  { %16122 = vmatpush3.bf16.msra.mxu0 %v18767_v25  ;;  %v18831_v9 = vld [vmem:[%s20633_s20 + $0x198] sm:$0xff]   ;;  %v18829_v13 = vld [vmem:[%s20558_s5 + $0x244] ss:$48 sps:$4 sm:$0xff]   ;;  %v18840_v18 = vld [vmem:[%s20633_s20 + $0x1e8] sm:$0xff]  }
 0x16f   :  { %16123 = vmatprep.subr.bf16.mxu0 %v18770_v28  ;;  %v18836_v14 = vld [vmem:[%s20633_s20 + $0x130] sm:$0xff]   ;;  %v18834_v15 = vld [vmem:[%s20558_s5 + $0x24c] ss:$48 sps:$4 sm:$0xff]   ;;  %v18839_v17 = vld [vmem:[%s20633_s20 + $0x1a0] sm:$0xff]  }
 0x170   :  { %16186 = vmatpush3.bf16.msra.mxu1 %v18769_v27  ;;  %v18832_v19 = vld [vmem:[%s20558_s5 + $0x240] ss:$48 sps:$4 sm:$0xff]   ;;  %v18843_v20 = vld [vmem:[%s20633_s20 + $0x1a8] sm:$0xff]   ;;  %v18845_v21 = vld [vmem:[%s20633_s20 + $0x178] sm:$0xff]  }
 0x171   :  { %16187 = vmatprep.subr.bf16.mxu1 %v18772_v30  ;;  %v18841_v22 = vld [vmem:[%s20558_s5 + $0x2a4] ss:$48 sps:$4 sm:$0xff]   ;;  %v18837_v23 = vld [vmem:[%s20558_s5 + $0x248] ss:$48 sps:$4 sm:$0xff]   ;;  %v18846_v25 = vld [vmem:[%s20558_s5 + $0x2ac] ss:$48 sps:$4 sm:$0xff]  }
 0x172   :  { %16124 = vmatpush3.bf16.msra.mxu0 %v18771_v29  ;;  %v18848_v24 = vld [vmem:[%s20633_s20 + $0x138] sm:$0xff]   ;;  %v18850_v26 = vld [vmem:[%s20633_s20 + $0x1f0] sm:$0xff]   ;;  %vm22238_vm7 = vmpackc.low %vm1681_vm0, %vm1681_vm0 }
 0x173   :  { %16237 = vmatprep.subr.bf16.mxu0 %v18777_v34  ;;  %v18851_v27 = vld [vmem:[%s20633_s20 + $0x1b0] sm:$0xff]   ;;  %v18852_v28 = vld [vmem:[%s20633_s20 + $0x1f8] sm:$0xff]   ;;  %v20544_v34 = vmov 0   ;;  %vm22243_vm9 = vmpackc.low %vm9138_vm6, %vm20545_vm8 }
 0x174   :  { %16188 = vmatpush3.bf16.msra.mxu1 %v18776_v33  ;;  %v18844_v29 = vld [vmem:[%s20558_s5 + $0x2a0] ss:$48 sps:$4 sm:$0xff]   ;;  %v18856_v30 = vld [vmem:[%s20633_s20 + $0x1b8] sm:$0xff]   ;;  %v18855_v32 = vld [vmem:[%s20558_s5 + $0x14] ss:$48 sps:$4 sm:$0xff]  }
 0x175   :  { %1739 = vmatmul.mubr.bf16.vlgmr.msra.gmra.mrb[0].mxu0 %v18773_v31  ;;  %16301 = vmatprep.subr.bf16.mxu1 %v18814_v59  ;;  %v18857_v31 = vld [vmem:[%s20633_s20 + $0x240] sm:$0xff]   ;;  %v18849_v33 = vld [vmem:[%s20558_s5 + $0x2a8] ss:$48 sps:$4 sm:$0xff]  }
 0x176   :  { %16238 = vmatpush3.bf16.msra.mxu0 %v18781_v37  ;;  %1746 = vmatprep.mubr.bf16.mxu0 %v18782_v38  ;;  %v18853_v36 = vld [vmem:[%s20558_s5 + $0x10] ss:$48 sps:$4 sm:$0xff]   ;;  %v18862_v38 = vld [vmem:[%s20558_s5 + $0x74] ss:$48 sps:$4 sm:$0xff]   ;;  %v18877_v59 = vld [vmem:[%s20558_s5 + $0xd8] ss:$48 sps:$4 sm:$0xff]  }
 0x177   :  { %1836 = vmatmul.mubr.bf16.vlgmr.msra.gmra.mrb[0].mxu1 %v18778_v35  ;;  %16239 = vmatprep.subr.bf16.mxu0 %v18785_v40  ;;  %v18860_v35 = vld [vmem:[%s20558_s5 + $0x1c] ss:$48 sps:$4 sm:$0xff]   ;;  %v18861_v37 = vld [vmem:[%s20633_s20 + $0x200] sm:$0xff]   ;;  %v18858_v40 = vld [vmem:[%s20558_s5 + $0x18] ss:$48 sps:$4 sm:$0xff]  }
 0x178   :  { %1843 = vmatprep.mubr.bf16.mxu1 %v18786_v41  ;;  %16302 = vmatpush3.bf16.msra.mxu1 %v18815_v60  ;;  %v18866_v41 = vld [vmem:[%s20558_s5 + $0x7c] ss:$48 sps:$4 sm:$0xff]  }
 0x179   :  { %16303 = vmatprep.subr.bf16.mxu1 %v18816_v61  ;;  %v18882_v60 = vld [vmem:[%s20558_s5 + $0x13c] ss:$48 sps:$4 sm:$0xff]  }
 0x17a   :  { %16240 = vmatpush3.bf16.msra.mxu0 %v18788_v42  ;;  %v18868_v42 = vld [vmem:[%s20633_s20 + $0x208] sm:$0xff]  }
 0x17b   :  { %16241 = vmatprep.subr.bf16.mxu0 %v18793_v45  ;;  %v18870_v45 = vld [vmem:[%s20558_s5 + $0xd4] ss:$48 sps:$4 sm:$0xff]   ;;  %v18903_v61 = vld [vmem:[%s20633_s20 + $0x228] sm:$0xff]  }
 0x17c   :  { %16304 = vmatpush3.bf16.msra.mxu1 %v18819_v63  ;;  %v18880_v63 = vld [vmem:[%s20558_s5 + $0x130] ss:$48 sps:$4 sm:$0xff]  }
 0x17d   :  { %1747 = vmatmul.mubr.bf16.gmra.mrb[4].mxu0 %v18784_v39  ;;  %16305 = vmatprep.subr.bf16.mxu1 %v18826_v5  ;;  %v18865_v39 = vld [vmem:[%s20633_s20 + $0x248] sm:$0xff]  }
 0x17e   :  { %1754 = vmatprep.mubr.bf16.mxu0 %v18790_v44  ;;  %16242 = vmatpush3.bf16.msra.mxu0 %v18796_v47  ;;  %v18864_v44 = vld [vmem:[%s20558_s5 + $0x70] ss:$48 sps:$4 sm:$0xff]   ;;  %v18891_v5 = vld [vmem:[%s20558_s5 + $0x19c] ss:$48 sps:$4 sm:$0xff]  }
 0x17f   :  { %1844 = vmatmul.mubr.bf16.gmra.mrb[4].mxu1 %v18789_v43  ;;  %16243 = vmatprep.subr.bf16.mxu0 %v18801_v50  ;;  %v18873_v43 = vld [vmem:[%s20633_s20 + $0x250] sm:$0xff]   ;;  %v18886_v47 = vld [vmem:[%s20633_s20 + $0x280] sm:$0xff]   ;;  %v18874_v50 = vld [vmem:[%s20558_s5 + $0xdc] ss:$48 sps:$4 sm:$0xff]  }
 0x180   :  { %1851 = vmatprep.mubr.bf16.mxu1 %v18794_v46  ;;  %16306 = vmatpush3.bf16.msra.mxu1 %v18827_v6  ;;  %v18876_v46 = vld [vmem:[%s20633_s20 + $0x210] sm:$0xff]   ;;  %v18915_v6 = vld [vmem:[%s20633_s20 + $0x2a8] sm:$0xff]  }
 0x181   :  { %16307 = vmatprep.subr.bf16.mxu1 %v18828_v7  ;;  %v18889_v7 = vld [vmem:[%s20558_s5 + $0x190] ss:$48 sps:$4 sm:$0xff]  }
 0x182   :  { %16244 = vmatpush3.bf16.msra.mxu0 %v18804_v52  ;;  %v18872_v52 = vld [vmem:[%s20558_s5 + $0xd0] ss:$48 sps:$4 sm:$0xff]  }
 0x183   :  { %16245 = vmatprep.subr.bf16.mxu0 %v18809_v54  ;;  %v18895_v54 = vld [vmem:[%s20633_s20 + $0x288] sm:$0xff]  }
 0x184   :  { %16308 = vmatpush3.bf16.msra.mxu1 %v18831_v9  ;;  %v18897_v9 = vld [vmem:[%s20558_s5 + $0x1f4] ss:$48 sps:$4 sm:$0xff]  }
 0x185   :  { %1755 = vmatmul.mubr.bf16.gmra.mrb[8].mxu0 %v18792_v48  ;;  %16309 = vmatprep.subr.bf16.mxu1 %v18838_v16  ;;  %v18881_v48 = vld [vmem:[%s20633_s20 + $0x258] sm:$0xff]   ;;  %v18899_v16 = vld [vmem:[%s20558_s5 + $0x1f0] ss:$48 sps:$4 sm:$0xff]  }
 0x186   :  { %1762 = vmatprep.mubr.bf16.mxu0 %v18798_v49  ;;  %16246 = vmatpush3.bf16.msra.mxu0 %v18812_v56  ;;  %v18869_v49 = vld [vmem:[%s20558_s5 + $0x78] ss:$48 sps:$4 sm:$0xff]   ;;  %v18893_v56 = vld [vmem:[%s20633_s20 + $0x220] sm:$0xff]  }
 0x187   :  { %1852 = vmatmul.mubr.bf16.gmra.mrb[8].mxu1 %v18797_v51  ;;  %16247 = vmatprep.subr.bf16.mxu0 %v18821_v0  ;;  %v18884_v51 = vld [vmem:[%s20633_s20 + $0x218] sm:$0xff]   ;;  %v18887_v0 = vld [vmem:[%s20558_s5 + $0x194] ss:$48 sps:$4 sm:$0xff]  }
 0x188   :  { %1859 = vmatprep.mubr.bf16.mxu1 %v18802_v53  ;;  %16310 = vmatpush3.bf16.msra.mxu1 %v18839_v17  ;;  %v18890_v53 = vld [vmem:[%s20633_s20 + $0x260] sm:$0xff]  }
 0x189   :  { %16311 = vmatprep.subr.bf16.mxu1 %v18840_v18  ;;  %v18907_v17 = vld [vmem:[%s20558_s5 + $0x254] ss:$48 sps:$4 sm:$0xff]  }
 0x18a   :  { %16248 = vmatpush3.bf16.msra.mxu0 %v18824_v3  ;;  %v18885_v3 = vld [vmem:[%s20558_s5 + $0x138] ss:$48 sps:$4 sm:$0xff]   ;;  %v18926_v18 = vld [vmem:[%s20633_s20 + $0x2c0] sm:$0xff]  }
 0x18b   :  { %16249 = vmatprep.subr.bf16.mxu0 %v18833_v10  ;;  %v18916_v10 = vld [vmem:[%s20633_s20 + $0x2b0] sm:$0xff]  }
 0x18c   :  { %16312 = vmatpush3.bf16.msra.mxu1 %v18843_v20  ;;  %v18911_v20 = vld [vmem:[%s20558_s5 + $0x25c] ss:$48 sps:$4 sm:$0xff]  }
 0x18d   :  { %1763 = vmatmul.mubr.bf16.gmra.mrb[12].mxu0 %v18800_v55  ;;  %16313 = vmatprep.subr.bf16.mxu1 %v18850_v26  ;;  %v18878_v55 = vld [vmem:[%s20558_s5 + $0x134] ss:$48 sps:$4 sm:$0xff]   ;;  %v18965_v26 = vld [vmem:[%s23184_s29 + $0xc] ss:$48 sps:$4 sm:$0xff]  }
 0x18e   :  { %1770 = vmatprep.mubr.bf16.mxu0 %v18806_v57  ;;  %16250 = vmatpush3.bf16.msra.mxu0 %v18836_v14  ;;  %v18896_v57 = vld [vmem:[%s20633_s20 + $0x290] sm:$0xff]   ;;  %v18925_v14 = vld [vmem:[%s20633_s20 + $0x2b8] sm:$0xff]  }
 0x18f   :  { %1860 = vmatmul.mubr.bf16.gmra.mrb[12].mxu1 %v18805_v58  ;;  %16251 = vmatprep.subr.bf16.mxu0 %v18845_v21  ;;  %v18900_v58 = vld [vmem:[%s20633_s20 + $0x268] sm:$0xff]  }
 0x190   :  { %1867 = vmatprep.mubr.bf16.mxu1 %v18810_v62  ;;  %16314 = vmatpush3.bf16.msra.mxu1 %v18851_v27  ;;  %v18905_v62 = vld [vmem:[%s20633_s20 + $0x298] sm:$0xff]   ;;  %v18933_v21 = vld [vmem:[%s20633_s20 + $0x2c8] sm:$0xff]   ;;  %v18919_v27 = vld [vmem:[%s20558_s5 + $0x2b0] ss:$48 sps:$4 sm:$0xff]  }
 0x191   :  { %16315 = vmatprep.subr.bf16.mxu1 %v18852_v28  ;;  %v18929_v28 = vld [vmem:[%s20558_s5 + $0x24] ss:$48 sps:$4 sm:$0xff]  }
 0x192   :  { %16252 = vmatpush3.bf16.msra.mxu0 %v18848_v24  ;;  %v18914_v24 = vld [vmem:[%s20558_s5 + $0x258] ss:$48 sps:$4 sm:$0xff]  }
 0x193   :  { %16365 = vmatprep.subr.bf16.mxu0 %v18857_v31  ;;  %v18927_v31 = vld [vmem:[%s20558_s5 + $0x20] ss:$48 sps:$4 sm:$0xff]  }
 0x194   :  { %16316 = vmatpush3.bf16.msra.mxu1 %v18856_v30  ;;  %v18939_v30 = vld [vmem:[%s20558_s5 + $0x2c] ss:$48 sps:$4 sm:$0xff]  }
 0x195   :  { %1771 = vmatmul.mubr.bf16.gmra.mrb[16].mxu0 %v18808_v1  ;;  %2191 = vmatprep.subr.bf16.mxu1 %v20544_v34  ;;  %v18910_v1 = vld [vmem:[%s20633_s20 + $0x270] sm:$0xff]  }
 0x196   :  { %1778 = vmatprep.mubr.bf16.mxu0 %v18817_v2  ;;  %v18906_v2 = vld [vmem:[%s20633_s20 + $0x2a0] sm:$0xff]  }
 0x197   :  { %1868 = vmatmul.mubr.bf16.gmra.mrb[16].mxu1 %v18813_v4  ;;  %v18913_v4 = vld [vmem:[%s20633_s20 + $0x230] sm:$0xff]  }
 0x198   :  { %1875 = vmatprep.mubr.bf16.mxu1 %v18822_v8  ;;  %v18920_v8 = vld [vmem:[%s20633_s20 + $0x278] sm:$0xff]  }
 0x19d   :  { %1779 = vmatmul.mubr.bf16.gmra.mrb[20].mxu0 %v18820_v11  ;;  %v18923_v11 = vld [vmem:[%s20633_s20 + $0x238] sm:$0xff]   ;;  %s23187_s20 = sld [smem:[#allocation66_spill]] }
 0x19e   :  { %1786 = vmatprep.mubr.bf16.mxu0 %v18829_v13  ;;  %v18901_v13 = vld [vmem:[%s20558_s5 + $0x1fc] ss:$48 sps:$4 sm:$0xff]  }
 0x19f   :  { %1876 = vmatmul.mubr.bf16.gmra.mrb[20].mxu1 %v18825_v12  ;;  %v18894_v12 = vld [vmem:[%s20558_s5 + $0x198] ss:$48 sps:$4 sm:$0xff]  }
 0x1a0   :  { %1883 = vmatprep.mubr.bf16.mxu1 %v18834_v15  ;;  %v18932_v15 = vld [vmem:[%s23184_s29 + $0x4] ss:$48 sps:$4 sm:$0xff]  }
 0x1a5   :  { %1787 = vmatmul.mubr.bf16.gmra.mrb[24].mxu0 %v18832_v19  ;;  %v18904_v19 = vld [vmem:[%s20558_s5 + $0x1f8] ss:$48 sps:$4 sm:$0xff]  }
 0x1a6   :  { %1794 = vmatprep.mubr.bf16.mxu0 %v18841_v22  ;;  %v18909_v22 = vld [vmem:[%s20558_s5 + $0x250] ss:$48 sps:$4 sm:$0xff]  }
 0x1a7   :  { %1884 = vmatmul.mubr.bf16.gmra.mrb[24].mxu1 %v18837_v23  ;;  %v18917_v23 = vld [vmem:[%s20558_s5 + $0x2b4] ss:$48 sps:$4 sm:$0xff]  }
 0x1a8   :  { %1891 = vmatprep.mubr.bf16.mxu1 %v18846_v25  ;;  %v18921_v25 = vld [vmem:[%s20558_s5 + $0x2bc] ss:$48 sps:$4 sm:$0xff]  }
 0x1ad   :  { %1795 = vmatmul.mubr.bf16.gmra.mrb[28].mxu0 %v18844_v29  ;;  %v18924_v29 = vld [vmem:[%s20558_s5 + $0x2b8] ss:$48 sps:$4 sm:$0xff]  }
 0x1ae   :  { %1932 = vmatprep.mubr.bf16.mxu0 %v18855_v32  ;;  %v18930_v32 = vld [vmem:[%s23184_s29] ss:$48 sps:$4 sm:$0xff]  }
 0x1af   :  { %1892 = vmatmul.mubr.bf16.gmra.mrb[28].mxu1 %v18849_v33  ;;  %v18940_v33 = vld [vmem:[%s20558_s5 + $0x84] ss:$48 sps:$4 sm:$0xff]  }
 0x1b0   :  { %2029 = vmatprep.mubr.bf16.mxu1 %v18860_v35  ;;  %v18936_v35 = vld [vmem:[%s23184_s29 + $0x64] ss:$48 sps:$4 sm:$0xff]  }
 0x1b5   :  { %1933 = vmatmul.mubr.bf16.vlgmr.msra.gmra.mrb[32].mxu0 %v18853_v36  ;;  %v18937_v36 = vld [vmem:[%s20558_s5 + $0x28] ss:$48 sps:$4 sm:$0xff]  }
 0x1b6   :  { %16366 = vmatpush3.bf16.msra.mxu0 %v18861_v37  ;;  %1940 = vmatprep.mubr.bf16.mxu0 %v18862_v38  ;;  %v18934_v37 = vld [vmem:[%s23184_s29 + $0x60] ss:$48 sps:$4 sm:$0xff]   ;;  %v18949_v38 = vld [vmem:[%s20558_s5 + $0x8c] ss:$48 sps:$4 sm:$0xff]  }
 0x1b7   :  { %16367 = vmatprep.subr.bf16.mxu0 %v18865_v39  ;;  %2030 = vmatmul.mubr.bf16.vlgmr.msra.gmra.mrb[32].mxu1 %v18858_v40  ;;  %v18963_v39 = vld [vmem:[%s23184_s29 + $0x8] ss:$48 sps:$4 sm:$0xff]   ;;  %v18975_v40 = vld [vmem:[%s23184_s29 + $0x6c] ss:$48 sps:$4 sm:$0xff]  }
 0x1b8   :  { %2037 = vmatprep.mubr.bf16.mxu1 %v18866_v41  ;;  %2192 = vmatpush1.bf16.msra.mxu1 %v18886_v47  ;;  %v18944_v41 = vld [vmem:[%s23184_s29 + $0xc4] ss:$48 sps:$4 sm:$0xff]   ;;  %v18951_v47 = vld [vmem:[%s20558_s5 + $0x88] ss:$48 sps:$4 sm:$0xff]  }
 0x1b9   :  { %2193 = vmatprep.subr.bf16.mxu1 %v20544_v34 }
 0x1ba   :  { %16368 = vmatpush3.bf16.msra.mxu0 %v18868_v42  ;;  %v18942_v42 = vld [vmem:[%s23184_s29 + $0xc0] ss:$48 sps:$4 sm:$0xff]  }
 0x1bb   :  { %16369 = vmatprep.subr.bf16.mxu0 %v18873_v43  ;;  %v18945_v43 = vld [vmem:[%s20558_s5 + $0x80] ss:$48 sps:$4 sm:$0xff]  }
 0x1bc   :  { %2194 = vmatpush1.bf16.msra.mxu1 %v18895_v54  ;;  %v18954_v54 = vld [vmem:[%s23184_s29 + $0x180] ss:$48 sps:$4 sm:$0xff]  }
 0x1bd   :  { %1941 = vmatmul.mubr.bf16.gmra.mrb[36].mxu0 %v18864_v44  ;;  %2195 = vmatprep.subr.bf16.mxu1 %v20544_v34  ;;  %v18973_v44 = vld [vmem:[%s23184_s29 + $0x68] ss:$48 sps:$4 sm:$0xff]  }
 0x1be   :  { %1948 = vmatprep.mubr.bf16.mxu0 %v18870_v45  ;;  %16370 = vmatpush3.bf16.msra.mxu0 %v18876_v46  ;;  %v18948_v45 = vld [vmem:[%s23184_s29 + $0x124] ss:$48 sps:$4 sm:$0xff]  }
 0x1bf   :  { %16371 = vmatprep.subr.bf16.mxu0 %v18881_v48  ;;  %2038 = vmatmul.mubr.bf16.gmra.mrb[36].mxu1 %v18869_v49  ;;  %v18952_v46 = vld [vmem:[%s20558_s5 + $0xe4] ss:$48 sps:$4 sm:$0xff]   ;;  %v18983_v48 = vld [vmem:[%s23184_s29 + $0xcc] ss:$48 sps:$4 sm:$0xff]   ;;  %v18946_v49 = vld [vmem:[%s23184_s29 + $0x120] ss:$48 sps:$4 sm:$0xff]  }
 0x1c0   :  { %2045 = vmatprep.mubr.bf16.mxu1 %v18874_v50  ;;  %2196 = vmatpush1.bf16.msra.mxu1 %v18896_v57  ;;  %v18961_v50 = vld [vmem:[%s20558_s5 + $0xec] ss:$48 sps:$4 sm:$0xff]   ;;  %v18960_v57 = vld [vmem:[%s23184_s29 + $0x1e4] ss:$48 sps:$4 sm:$0xff]  }
 0x1c1   :  { %2197 = vmatprep.subr.bf16.mxu1 %v20544_v34 }
 0x1c2   :  { %16372 = vmatpush3.bf16.msra.mxu0 %v18884_v51  ;;  %v18981_v51 = vld [vmem:[%s23184_s29 + $0xc8] ss:$48 sps:$4 sm:$0xff]  }
 0x1c3   :  { %16373 = vmatprep.subr.bf16.mxu0 %v18890_v53  ;;  %v18956_v53 = vld [vmem:[%s23184_s29 + $0x184] ss:$48 sps:$4 sm:$0xff]  }
 0x1c4   :  { %2198 = vmatpush1.bf16.msra.mxu1 %v18905_v62  ;;  %v18979_v62 = vld [vmem:[%s20558_s5 + $0x14c] ss:$48 sps:$4 sm:$0xff]  }
 0x1c5   :  { %1949 = vmatmul.mubr.bf16.gmra.mrb[40].mxu0 %v18872_v52  ;;  %2199 = vmatprep.subr.bf16.mxu1 %v20544_v34  ;;  %v18993_v52 = vld [vmem:[%s23184_s29 + $0x12c] ss:$48 sps:$4 sm:$0xff]  }
 0x1c6   :  { %1956 = vmatprep.mubr.bf16.mxu0 %v18878_v55  ;;  %16374 = vmatpush3.bf16.msra.mxu0 %v18893_v56  ;;  %v18957_v55 = vld [vmem:[%s20558_s5 + $0xe0] ss:$48 sps:$4 sm:$0xff]   ;;  %v18991_v56 = vld [vmem:[%s23184_s29 + $0x128] ss:$48 sps:$4 sm:$0xff]  }
 0x1c7   :  { %16375 = vmatprep.subr.bf16.mxu0 %v18900_v58  ;;  %2046 = vmatmul.mubr.bf16.gmra.mrb[40].mxu1 %v18877_v59  ;;  %v18967_v58 = vld [vmem:[%s20558_s5 + $0x144] ss:$48 sps:$4 sm:$0xff]   ;;  %v18966_v59 = vld [vmem:[%s20558_s5 + $0xe8] ss:$48 sps:$4 sm:$0xff]  }
 0x1c8   :  { %2053 = vmatprep.mubr.bf16.mxu1 %v18882_v60  ;;  %2200 = vmatpush1.bf16.msra.mxu1 %v18906_v2  ;;  %v19001_v60 = vld [vmem:[%s23184_s29 + $0x18c] ss:$48 sps:$4 sm:$0xff]   ;;  %v18969_v2 = vld [vmem:[%s23184_s29 + $0x240] ss:$48 sps:$4 sm:$0xff]  }
 0x1c9   :  { %2201 = vmatprep.subr.bf16.mxu1 %v20544_v34 }
 0x1ca   :  { %16376 = vmatpush3.bf16.msra.mxu0 %v18903_v61  ;;  %v18958_v61 = vld [vmem:[%s23184_s29 + $0x1e0] ss:$48 sps:$4 sm:$0xff]  }
 0x1cb   :  { %16377 = vmatprep.subr.bf16.mxu0 %v18910_v1  ;;  %v18971_v1 = vld [vmem:[%s23184_s29 + $0x244] ss:$48 sps:$4 sm:$0xff]  }
 0x1cc   :  { %2202 = vmatpush1.bf16.msra.mxu1 %v18915_v6  ;;  %v18985_v6 = vld [vmem:[%s20558_s5 + $0x1a4] ss:$48 sps:$4 sm:$0xff]  }
 0x1cd   :  { %1957 = vmatmul.mubr.bf16.gmra.mrb[44].mxu0 %v18880_v63  ;;  %2203 = vmatprep.subr.bf16.mxu1 %v20544_v34  ;;  %v18999_v63 = vld [vmem:[%s23184_s29 + $0x188] ss:$48 sps:$4 sm:$0xff]  }
 0x1ce   :  { %1964 = vmatprep.mubr.bf16.mxu0 %v18887_v0  ;;  %16378 = vmatpush3.bf16.msra.mxu0 %v18913_v4  ;;  %v19011_v0 = vld [vmem:[%s23184_s29 + $0x1ec] ss:$48 sps:$4 sm:$0xff]   ;;  %v19009_v4 = vld [vmem:[%s23184_s29 + $0x1e8] ss:$48 sps:$4 sm:$0xff]  }
 0x1cf   :  { %2054 = vmatmul.mubr.bf16.gmra.mrb[44].mxu1 %v18885_v3  ;;  %16379 = vmatprep.subr.bf16.mxu0 %v18920_v8  ;;  %v18972_v3 = vld [vmem:[%s20558_s5 + $0x140] ss:$48 sps:$4 sm:$0xff]   ;;  %v19019_v8 = vld [vmem:[%s23184_s29 + $0x24c] ss:$48 sps:$4 sm:$0xff]  }
 0x1d0   :  { %2061 = vmatprep.mubr.bf16.mxu1 %v18891_v5  ;;  %2204 = vmatpush1.bf16.msra.mxu1 %v18916_v10  ;;  %v18978_v5 = vld [vmem:[%s23184_s29 + $0x2a4] ss:$48 sps:$4 sm:$0xff]   ;;  %v18997_v10 = vld [vmem:[%s20558_s5 + $0x1ac] ss:$48 sps:$4 sm:$0xff]  }
 0x1d1   :  { %2205 = vmatprep.subr.bf16.mxu1 %v20544_v34 }
 0x1d2   :  { %16380 = vmatpush3.bf16.msra.mxu0 %v18923_v11  ;;  %v19017_v11 = vld [vmem:[%s23184_s29 + $0x248] ss:$48 sps:$4 sm:$0xff]  }
 0x1d3   :  { %3877 = vmatprep.subr.bf16.mxu0 %v18932_v15  ;;  %v18990_v15 = vld [vmem:[%s20558_s5 + $0x1a0] ss:$48 sps:$4 sm:$0xff]  }
 0x1d4   :  { %2206 = vmatpush1.bf16.msra.mxu1 %v18925_v14  ;;  %v18987_v14 = vld [vmem:[%s23184_s29 + $0x300] ss:$48 sps:$4 sm:$0xff]  }
 0x1d5   :  { %1965 = vmatmul.mubr.bf16.gmra.mrb[48].mxu0 %v18889_v7  ;;  %2207 = vmatprep.subr.bf16.mxu1 %v20544_v34  ;;  %v18984_v7 = vld [vmem:[%s20558_s5 + $0x148] ss:$48 sps:$4 sm:$0xff]  }
 0x1d6   :  { %1972 = vmatprep.mubr.bf16.mxu0 %v18897_v9  ;;  %v18976_v9 = vld [vmem:[%s23184_s29 + $0x2a0] ss:$48 sps:$4 sm:$0xff]  }
 0x1d7   :  { %2062 = vmatmul.mubr.bf16.gmra.mrb[48].mxu1 %v18894_v12  ;;  %v19029_v12 = vld [vmem:[%s23184_s29 + $0x2ac] ss:$48 sps:$4 sm:$0xff]  }
 0x1d8   :  { %2069 = vmatprep.mubr.bf16.mxu1 %v18901_v13  ;;  %2208 = vmatpush1.bf16.msra.mxu1 %v18926_v18  ;;  %v18989_v13 = vld [vmem:[%s23184_s29 + $0x304] ss:$48 sps:$4 sm:$0xff]  }
 0x1d9   :  { %2209 = vmatprep.subr.bf16.mxu1 %v20544_v34  ;;  %v19003_v18 = vld [vmem:[%s20558_s5 + $0x204] ss:$48 sps:$4 sm:$0xff]  }
 0x1dc   :  { %2210 = vmatpush1.bf16.msra.mxu1 %v18933_v21  ;;  %v19015_v21 = vld [vmem:[%s20558_s5 + $0x20c] ss:$48 sps:$4 sm:$0xff]  }
 0x1dd   :  { %1973 = vmatmul.mubr.bf16.gmra.mrb[52].mxu0 %v18899_v16  ;;  %3963 = vmatprep.subr.bf16.mxu1 %v18965_v26  ;;  %v19027_v16 = vld [vmem:[%s23184_s29 + $0x2a8] ss:$48 sps:$4 sm:$0xff]   ;;  %v19005_v26 = vld [vmem:[%s23184_s29 + $0x3c0] ss:$48 sps:$4 sm:$0xff]  }
 0x1de   :  { %1980 = vmatprep.mubr.bf16.mxu0 %v18907_v17  ;;  %v18996_v17 = vld [vmem:[%s23184_s29 + $0x364] ss:$48 sps:$4 sm:$0xff]  }
 0x1df   :  { %2070 = vmatmul.mubr.bf16.gmra.mrb[52].mxu1 %v18904_v19  ;;  %v19002_v19 = vld [vmem:[%s20558_s5 + $0x1a8] ss:$48 sps:$4 sm:$0xff]  }
 0x1e0   :  { %2077 = vmatprep.mubr.bf16.mxu1 %v18911_v20  ;;  %v19037_v20 = vld [vmem:[%s23184_s29 + $0x30c] ss:$48 sps:$4 sm:$0xff]  }
 0x1e5   :  { %1981 = vmatmul.mubr.bf16.gmra.mrb[56].mxu0 %v18909_v22  ;;  %v19035_v22 = vld [vmem:[%s23184_s29 + $0x308] ss:$48 sps:$4 sm:$0xff]  }
 0x1e6   :  { %1988 = vmatprep.mubr.bf16.mxu0 %v18917_v23  ;;  %v18994_v23 = vld [vmem:[%s23184_s29 + $0x360] ss:$48 sps:$4 sm:$0xff]  }
 0x1e7   :  { %2078 = vmatmul.mubr.bf16.gmra.mrb[56].mxu1 %v18914_v24  ;;  %v19047_v24 = vld [vmem:[%s23184_s29 + $0x36c] ss:$48 sps:$4 sm:$0xff]  }
 0x1e8   :  { %2085 = vmatprep.mubr.bf16.mxu1 %v18921_v25  ;;  %v19007_v25 = vld [vmem:[%s23184_s29 + $0x3c4] ss:$48 sps:$4 sm:$0xff]  }
 0x1ed   :  { %1989 = vmatmul.mubr.bf16.gmra.mrb[60].mxu0 %v18919_v27  ;;  %v19008_v27 = vld [vmem:[%s20558_s5 + $0x200] ss:$48 sps:$4 sm:$0xff]  }
 0x1ee   :  { %2126 = vmatprep.mubr.bf16.mxu0 %v18929_v28  ;;  %v19045_v28 = vld [vmem:[%s23184_s29 + $0x368] ss:$48 sps:$4 sm:$0xff]  }
 0x1ef   :  { %2086 = vmatmul.mubr.bf16.gmra.mrb[60].mxu1 %v18924_v29  ;;  %v19014_v29 = vld [vmem:[%s23184_s29 + $0x424] ss:$48 sps:$4 sm:$0xff]  }
 0x1f0   :  { %14907 = vmatprep.mubr.msk.bf16.mxu1 %vm1681_vm0, %v18939_v30  ;;  %v19021_v30 = vld [vmem:[%s20558_s5 + $0x264] ss:$48 sps:$4 sm:$0xff]  }
 0x1f5   :  { %2127 = vmatmul.mubr.bf16.vlgmr.msra.gmra.mrb[64].mxu0 %v18927_v31  ;;  %v19020_v31 = vld [vmem:[%s20558_s5 + $0x208] ss:$48 sps:$4 sm:$0xff]  }
 0x1f6   :  { %3878 = vmatpush1.bf16.msra.mxu0 %v18930_v32  ;;  %2134 = vmatprep.mubr.bf16.mxu0 %v18940_v33  ;;  %v19055_v32 = vld [vmem:[%s23184_s29 + $0x3cc] ss:$48 sps:$4 sm:$0xff]  }
 0x1f7   :  { %3879 = vmatprep.subr.bf16.mxu0 %v18936_v35  ;;  %2224 = vmatmul.mubr.bf16.vlgmr.msra.gmra.mrb[64].mxu1 %v18937_v36  ;;  %v19033_v33 = vld [vmem:[%s20558_s5 + $0x26c] ss:$48 sps:$4 sm:$0xff]   ;;  %v19053_v35 = vld [vmem:[%s23184_s29 + $0x3c8] ss:$48 sps:$4 sm:$0xff]   ;;  %v19012_v36 = vld [vmem:[%s23184_s29 + $0x420] ss:$48 sps:$4 sm:$0xff]  }
 0x1f8   :  { %14908 = vmatprep.mubr.msk.bf16.mxu1 %vm1681_vm0, %v18949_v38  ;;  %3964 = vmatpush1.bf16.msra.mxu1 %v18963_v39  ;;  %v19025_v38 = vld [vmem:[%s23184_s29 + $0x484] ss:$48 sps:$4 sm:$0xff]   ;;  %v19023_v39 = vld [vmem:[%s23184_s29 + $0x480] ss:$48 sps:$4 sm:$0xff]  }
 0x1f9   :  { %3965 = vmatprep.subr.bf16.mxu1 %v18975_v40  ;;  %v19026_v40 = vld [vmem:[%s20558_s5 + $0x260] ss:$48 sps:$4 sm:$0xff]  }
 0x1fa   :  { %3880 = vmatpush1.bf16.msra.mxu0 %v18934_v37  ;;  %v19062_v37 = vld [vmem:[%s23184_s29 + $0x42c] ss:$48 sps:$4 sm:$0xff]  }
 0x1fb   :  { %3881 = vmatprep.subr.bf16.mxu0 %v18944_v41  ;;  %v19060_v41 = vld [vmem:[%s23184_s29 + $0x428] ss:$48 sps:$4 sm:$0xff]  }
 0x1fc   :  { %3966 = vmatpush1.bf16.msra.mxu1 %v18973_v44  ;;  %v19068_v44 = vld [vmem:[%s23184_s29 + $0x48c] ss:$48 sps:$4 sm:$0xff]  }
 0x1fd   :  { %2135 = vmatmul.mubr.bf16.gmra.mrb[68].mxu0 %v18945_v43  ;;  %3967 = vmatprep.subr.bf16.mxu1 %v18983_v48  ;;  %v19032_v43 = vld [vmem:[%s23184_s29 + $0x4e4] ss:$48 sps:$4 sm:$0xff]  }
 0x1fe   :  { %3882 = vmatpush1.bf16.msra.mxu0 %v18942_v42  ;;  %2142 = vmatprep.mubr.bf16.mxu0 %v18952_v46  ;;  %v19039_v42 = vld [vmem:[%s20558_s5 + $0x2c4] ss:$48 sps:$4 sm:$0xff]   ;;  %v19038_v46 = vld [vmem:[%s20558_s5 + $0x268] ss:$48 sps:$4 sm:$0xff]  }
 0x1ff   :  { %3883 = vmatprep.subr.bf16.mxu0 %v18948_v45  ;;  %2232 = vmatmul.mubr.bf16.gmra.mrb[68].mxu1 %v18951_v47  ;;  %v19030_v45 = vld [vmem:[%s23184_s29 + $0x4e0] ss:$48 sps:$4 sm:$0xff]   ;;  %v19051_v47 = vld [vmem:[%s20558_s5 + $0x2cc] ss:$48 sps:$4 sm:$0xff]   ;;  %v19043_v48 = vld [vmem:[%s23184_s29 + $0x544] ss:$48 sps:$4 sm:$0xff]  }
 0x200   :  { %14909 = vmatprep.mubr.msk.bf16.mxu1 %vm1681_vm0, %v18961_v50  ;;  %3968 = vmatpush1.bf16.msra.mxu1 %v18981_v51  ;;  %v19074_v50 = vld [vmem:[%s23184_s29 + $0x4ec] ss:$48 sps:$4 sm:$0xff]  }
 0x201   :  { %3969 = vmatprep.subr.bf16.mxu1 %v18993_v52  ;;  %v2289_v51 = vld [vmem:[%s23185_s12 + $0x8] sm:$0xff]  ;;  %v2292_v52 = vld [vmem:[%s23185_s12 + $0x20] sm:$0x3] }
 0x202   :  { %3884 = vmatpush1.bf16.msra.mxu0 %v18946_v49  ;;  %v19066_v49 = vld [vmem:[%s23184_s29 + $0x488] ss:$48 sps:$4 sm:$0xff]  }
 0x203   :  { %3885 = vmatprep.subr.bf16.mxu0 %v18956_v53  ;;  %v19041_v53 = vld [vmem:[%s23184_s29 + $0x540] ss:$48 sps:$4 sm:$0xff]  }
 0x204   :  { %3970 = vmatpush1.bf16.msra.mxu1 %v18991_v56  ;;  %v19050_v56 = vld [vmem:[%s23184_s29 + $0x5a4] ss:$48 sps:$4 sm:$0xff]  }
 0x205   :  { %2143 = vmatmul.mubr.bf16.gmra.mrb[72].mxu0 %v18957_v55  ;;  %3971 = vmatprep.subr.bf16.mxu1 %v19001_v60  ;;  %v19072_v55 = vld [vmem:[%s23184_s29 + $0x4e8] ss:$48 sps:$4 sm:$0xff]   ;;  %v19048_v60 = vld [vmem:[%s23184_s29 + $0x5a0] ss:$48 sps:$4 sm:$0xff]  }
 0x206   :  { %3886 = vmatpush1.bf16.msra.mxu0 %v18954_v54  ;;  %2150 = vmatprep.mubr.bf16.mxu0 %v18967_v58  ;;  %v19044_v54 = vld [vmem:[%s20558_s5 + $0x2c0] ss:$48 sps:$4 sm:$0xff]   ;;  %v19056_v58 = vld [vmem:[%s20558_s5 + $0x2c8] ss:$48 sps:$4 sm:$0xff]   ;;  %s23186_s5 = sld [smem:[#allocation45_spill]] }
 0x207   :  { %3887 = vmatprep.subr.bf16.mxu0 %v18960_v57  ;;  %2240 = vmatmul.mubr.bf16.gmra.mrb[72].mxu1 %v18966_v59  ;;  %v21161_v57 = vpack.c.bf16 %v2292_v52, %v2289_v51  ;;  %v19080_v59 = vld [vmem:[%s23184_s29 + $0x54c] ss:$48 sps:$4 sm:$0xff]  }
 0x208   :  { %14910 = vmatprep.mubr.msk.bf16.mxu1 %vm1681_vm0, %v18979_v62  ;;  %3972 = vmatpush1.bf16.msra.mxu1 %v18999_v63  ;;  %v2291_v62 = vld [vmem:[%s23185_s12 + $0x18] sm:$0x3]  ;;  %v19134_v51 = vld [vmem:[%s23184_s29 + $0xdc] ss:$48 sps:$4 sm:$0xff]  }
 0x209   :  { %3973 = vmatprep.subr.bf16.mxu1 %v19011_v0  ;;  %v19078_v63 = vld [vmem:[%s23184_s29 + $0x548] ss:$48 sps:$4 sm:$0xff]   ;;  %v19086_v0 = vld [vmem:[%s23184_s29 + $0x5ac] ss:$48 sps:$4 sm:$0xff]  }
 0x20a   :  { %3888 = vmatpush1.bf16.msra.mxu0 %v18958_v61  ;;  %v2288_v61 = vld [vmem:[%s23185_s12] sm:$0xff] }
 0x20b   :  { %3889 = vmatprep.subr.bf16.mxu0 %v18971_v1  ;;  %v19059_v1 = vld [vmem:[%s23184_s29 + $0x604] ss:$48 sps:$4 sm:$0xff]  }
 0x20c   :  { %3974 = vmatpush1.bf16.msra.mxu1 %v19009_v4  ;;  %v19057_v4 = vld [vmem:[%s23184_s29 + $0x600] ss:$48 sps:$4 sm:$0xff]  }
 0x20d   :  { %2151 = vmatmul.mubr.bf16.gmra.mrb[76].mxu0 %v18972_v3  ;;  %3975 = vmatprep.subr.bf16.mxu1 %v19019_v8  ;;  %v19084_v3 = vld [vmem:[%s23184_s29 + $0x5a8] ss:$48 sps:$4 sm:$0xff]  }
 0x20e   :  { %3890 = vmatpush1.bf16.msra.mxu0 %v18969_v2  ;;  %2158 = vmatprep.mubr.bf16.mxu0 %v18985_v6  ;;  %v21172_v2 = vpack.c.bf16 %v2291_v62, %v2288_v61  ;;  %v19092_v6 = vld [vmem:[%s23184_s29 + $0x60c] ss:$48 sps:$4 sm:$0xff]   ;;  %v19090_v8 = vld [vmem:[%s23184_s29 + $0x608] ss:$48 sps:$4 sm:$0xff]   ;;  %v19105_v62 = vld [vmem:[%s23184_s29 + $0x130] ss:$48 sps:$4 sm:$0xff]  }
 0x20f   :  { %3891 = vmatprep.subr.bf16.mxu0 %v18978_v5  ;;  %2248 = vmatmul.mubr.bf16.gmra.mrb[76].mxu1 %v18984_v7  ;;  %v19065_v5 = vld [vmem:[%s23184_s29 + $0x664] ss:$48 sps:$4 sm:$0xff]   ;;  %v19063_v7 = vld [vmem:[%s23184_s29 + $0x660] ss:$48 sps:$4 sm:$0xff]  }
 0x210   :  { %14911 = vmatprep.mubr.msk.bf16.mxu1 %vm1681_vm0, %v18997_v10  ;;  %3976 = vmatpush1.bf16.msra.mxu1 %v19017_v11  ;;  %v19071_v10 = vld [vmem:[%s23184_s29 + $0x6c4] ss:$48 sps:$4 sm:$0xff]   ;;  %v19069_v11 = vld [vmem:[%s23184_s29 + $0x6c0] ss:$48 sps:$4 sm:$0xff]  }
 0x211   :  { %3977 = vmatprep.subr.bf16.mxu1 %v19029_v12  ;;  %v19096_v12 = vld [vmem:[%s23184_s29 + $0x668] ss:$48 sps:$4 sm:$0xff]  }
 0x212   :  { %3892 = vmatpush1.bf16.msra.mxu0 %v18976_v9  ;;  %v19098_v9 = vld [vmem:[%s23184_s29 + $0x66c] ss:$48 sps:$4 sm:$0xff]  }
 0x213   :  { %3893 = vmatprep.subr.bf16.mxu0 %v18989_v13  ;;  %v19104_v13 = vld [vmem:[%s23184_s29 + $0x6cc] ss:$48 sps:$4 sm:$0xff]  }
 0x214   :  { %3978 = vmatpush1.bf16.msra.mxu1 %v19027_v16  ;;  %v19102_v16 = vld [vmem:[%s23184_s29 + $0x6c8] ss:$48 sps:$4 sm:$0xff]  }
 0x215   :  { %2159 = vmatmul.mubr.bf16.gmra.mrb[80].mxu0 %v18990_v15  ;;  %3979 = vmatprep.subr.bf16.mxu1 %v19037_v20  ;;  %v19075_v15 = vld [vmem:[%s23184_s29 + $0x720] ss:$48 sps:$4 sm:$0xff]  }
 0x216   :  { %3894 = vmatpush1.bf16.msra.mxu0 %v18987_v14  ;;  %2166 = vmatprep.mubr.bf16.mxu0 %v19003_v18  ;;  %v19077_v14 = vld [vmem:[%s23184_s29 + $0x724] ss:$48 sps:$4 sm:$0xff]  }
 0x217   :  { %3895 = vmatprep.subr.bf16.mxu0 %v18996_v17  ;;  %2256 = vmatmul.mubr.bf16.gmra.mrb[80].mxu1 %v19002_v19  ;;  %v19110_v17 = vld [vmem:[%s23184_s29 + $0x72c] ss:$48 sps:$4 sm:$0xff]   ;;  %v19083_v18 = vld [vmem:[%s23184_s29 + $0x784] ss:$48 sps:$4 sm:$0xff]   ;;  %v19081_v19 = vld [vmem:[%s23184_s29 + $0x780] ss:$48 sps:$4 sm:$0xff]  }
 0x218   :  { %14912 = vmatprep.mubr.msk.bf16.mxu1 %vm1681_vm0, %v19015_v21  ;;  %3980 = vmatpush1.bf16.msra.mxu1 %v19035_v22  ;;  %v2290_v20 = vld [vmem:[%s23185_s12 + $0x10] sm:$0xff]  ;;  %v2293_v21 = vld [vmem:[%s23185_s12 + $0x28] sm:$0x3]  ;;  %s23219_s12 = sld [smem:[#allocation44_spill]] }
 0x219   :  { %3981 = vmatprep.subr.bf16.mxu1 %v19047_v24  ;;  %v19108_v22 = vld [vmem:[%s23184_s29 + $0x728] ss:$48 sps:$4 sm:$0xff]   ;;  %v19089_v24 = vld [vmem:[%s23184_s29 + $0x14] ss:$48 sps:$4 sm:$0xff]  }
 0x21a   :  { %3896 = vmatpush1.bf16.msra.mxu0 %v18994_v23  ;;  %v19116_v23 = vld [vmem:[%s23184_s29 + $0x78c] ss:$48 sps:$4 sm:$0xff]  }
 0x21b   :  { %3897 = vmatprep.subr.bf16.mxu0 %v19007_v25  ;;  %v19087_v25 = vld [vmem:[%s23184_s29 + $0x10] ss:$48 sps:$4 sm:$0xff]  }
 0x21c   :  { %3982 = vmatpush1.bf16.msra.mxu1 %v19045_v28  ;;  %v19122_v28 = vld [vmem:[%s23184_s29 + $0x1c] ss:$48 sps:$4 sm:$0xff]  }
 0x21d   :  { %2167 = vmatmul.mubr.bf16.gmra.mrb[84].mxu0 %v19008_v27  ;;  %3983 = vmatprep.subr.bf16.mxu1 %v19055_v32  ;;  %v19114_v27 = vld [vmem:[%s23184_s29 + $0x788] ss:$48 sps:$4 sm:$0xff]   ;;  %v19093_v32 = vld [vmem:[%s23184_s29 + $0x70] ss:$48 sps:$4 sm:$0xff]  }
 0x21e   :  { %3898 = vmatpush1.bf16.msra.mxu0 %v19005_v26  ;;  %2174 = vmatprep.mubr.bf16.mxu0 %v19021_v30  ;;  %v21202_v26 = vpack.c.bf16 %v2293_v21, %v2290_v20  ;;  %v19144_v20 = vld [vmem:[%s23184_s29 + $0x198] ss:$48 sps:$4 sm:$0xff]  }
 0x21f   :  { %3899 = vmatprep.subr.bf16.mxu0 %v19014_v29  ;;  %2264 = vmatmul.mubr.bf16.gmra.mrb[84].mxu1 %v19020_v31  ;;  %v19095_v29 = vld [vmem:[%s23184_s29 + $0x74] ss:$48 sps:$4 sm:$0xff]   ;;  %v21208_v31 = vld [vmem:[%s23186_s5] ss:$0 sm:$0xff]  ;;  %s23220_s5 = sld [smem:[#allocation39_spill]] }
 0x220   :  { %14913 = vmatprep.mubr.msk.bf16.mxu1 %vm1681_vm0, %v19033_v33  ;;  %3984 = vmatpush1.bf16.msra.mxu1 %v19053_v35  ;;  %v19120_v35 = vld [vmem:[%s23184_s29 + $0x18] ss:$48 sps:$4 sm:$0xff]  }
 0x221   :  { %3985 = vmatprep.subr.bf16.mxu1 %v19062_v37 }
 0x222   :  { %3900 = vmatpush1.bf16.msra.mxu0 %v19012_v36 }
 0x223   :  { %3901 = vmatprep.subr.bf16.mxu0 %v19025_v38  ;;  %v19128_v38 = vld [vmem:[%s23184_s29 + $0x7c] ss:$48 sps:$4 sm:$0xff]  }
 0x224   :  { %3986 = vmatpush1.bf16.msra.mxu1 %v19060_v41  ;;  %v19101_v41 = vld [vmem:[%s23184_s29 + $0xd4] ss:$48 sps:$4 sm:$0xff]  }
 0x225   :  { %2175 = vmatmul.mubr.bf16.gmra.mrb[88].mxu0 %v19026_v40  ;;  %3987 = vmatprep.subr.bf16.mxu1 %v19068_v44 }
 0x226   :  { %3902 = vmatpush1.bf16.msra.mxu0 %v19023_v39  ;;  %2182 = vmatprep.mubr.bf16.mxu0 %v19039_v42 }
 0x227   :  { %3903 = vmatprep.subr.bf16.mxu0 %v19032_v43  ;;  %2272 = vmatmul.mubr.bf16.gmra.mrb[88].mxu1 %v19038_v46 }
 0x228   :  { %14914 = vmatprep.mubr.msk.bf16.mxu1 %vm1681_vm0, %v19051_v47  ;;  %3988 = vmatpush1.bf16.msra.mxu1 %v19066_v49  ;;  %v19126_v47 = vld [vmem:[%s23184_s29 + $0x78] ss:$48 sps:$4 sm:$0xff]  }
 0x229   :  { %3989 = vmatprep.subr.bf16.mxu1 %v19074_v50  ;;  %v19099_v50 = vld [vmem:[%s23184_s29 + $0xd0] ss:$48 sps:$4 sm:$0xff]  }
 0x22a   :  { %3904 = vmatpush1.bf16.msra.mxu0 %v19030_v45 }
 0x22b   :  { %3905 = vmatprep.subr.bf16.mxu0 %v19043_v48 }
 0x22c   :  { %3990 = vmatpush1.bf16.msra.mxu1 %v19072_v55 }
 0x22d   :  { %2183 = vmatmul.mubr.bf16.gmra.mrb[92].mxu0 %v19044_v54  ;;  %3991 = vmatprep.subr.bf16.mxu1 %v19080_v59  ;;  %v19107_v54 = vld [vmem:[%s23184_s29 + $0x134] ss:$48 sps:$4 sm:$0xff]   ;;  %v19132_v59 = vld [vmem:[%s23184_s29 + $0xd8] ss:$48 sps:$4 sm:$0xff]  }
 0x22e   :  { %3906 = vmatpush1.bf16.msra.mxu0 %v19041_v53  ;;  %3909 = vmatprep.mubr.bf16.mxu0 %v21161_v57 }
 0x22f   :  { %3907 = vmatprep.subr.bf16.mxu0 %v19050_v56  ;;  %2280 = vmatmul.mubr.bf16.gmra.mrb[92].mxu1 %v19056_v58 }
 0x230   :  { %3992 = vmatpush1.bf16.msra.mxu1 %v19078_v63  ;;  %3995 = vmatprep.mubr.bf16.mxu1 %v21161_v57  ;;  %v19140_v63 = vld [vmem:[%s23184_s29 + $0x13c] ss:$48 sps:$4 sm:$0xff]  }
 0x231   :  { %3993 = vmatprep.subr.bf16.mxu1 %v19086_v0 }
 0x232   :  { %3908 = vmatpush1.bf16.msra.mxu0 %v19048_v60 }
 0x233   :  { %3920 = vmatprep.subr.bf16.mxu0 %v19059_v1 }
 0x234   :  { %3994 = vmatpush1.bf16.msra.mxu1 %v19084_v3  ;;  %v19113_v3 = vld [vmem:[%s23184_s29 + $0x194] ss:$48 sps:$4 sm:$0xff]  }
 0x235   :  { %3910 = vmatmul.mubr.bf16.vlgmr.msra.gmra.mrb[96].mxu0 %v21172_v2  ;;  %4006 = vmatprep.subr.bf16.mxu1 %v19092_v6 }
 0x236   :  { %3921 = vmatpush1.bf16.msra.mxu0 %v19057_v4  ;;  %3952 = vmatprep.mubr.bf16.mxu0 %v20544_v34 }
 0x237   :  { %3922 = vmatprep.subr.bf16.mxu0 %v19065_v5  ;;  %3996 = vmatmul.mubr.bf16.vlgmr.msra.gmra.mrb[96].mxu1 %v21172_v2 }
 0x238   :  { %4007 = vmatpush1.bf16.msra.mxu1 %v19090_v8  ;;  %4038 = vmatprep.mubr.bf16.mxu1 %v20544_v34 }
 0x239   :  { %4008 = vmatprep.subr.bf16.mxu1 %v19098_v9  ;;  %v19138_v9 = vld [vmem:[%s23184_s29 + $0x138] ss:$48 sps:$4 sm:$0xff]  }
 0x23a   :  { %3923 = vmatpush1.bf16.msra.mxu0 %v19063_v7 }
 0x23b   :  { %3924 = vmatprep.subr.bf16.mxu0 %v19071_v10 }
 0x23c   :  { %4009 = vmatpush1.bf16.msra.mxu1 %v19096_v12  ;;  %v19111_v12 = vld [vmem:[%s23184_s29 + $0x190] ss:$48 sps:$4 sm:$0xff]  }
 0x23d   :  { %4010 = vmatprep.subr.bf16.mxu1 %v19104_v13  ;;  %v19146_v13 = vld [vmem:[%s23184_s29 + $0x19c] ss:$48 sps:$4 sm:$0xff]  }
 0x23e   :  { %3925 = vmatpush1.bf16.msra.mxu0 %v19069_v11 }
 0x23f   :  { %3926 = vmatprep.subr.bf16.mxu0 %v19077_v14 }
 0x240   :  { %4011 = vmatpush1.bf16.msra.mxu1 %v19102_v16  ;;  %v19119_v16 = vld [vmem:[%s23184_s29 + $0x1f4] ss:$48 sps:$4 sm:$0xff]  }
 0x241   :  { %4012 = vmatprep.subr.bf16.mxu1 %v19110_v17 }
 0x242   :  { %3927 = vmatpush1.bf16.msra.mxu0 %v19075_v15 }
 0x243   :  { %3928 = vmatprep.subr.bf16.mxu0 %v19083_v18 }
 0x244   :  { %4013 = vmatpush1.bf16.msra.mxu1 %v19108_v22 }
 0x245   :  { %4014 = vmatprep.subr.bf16.mxu1 %v19116_v23  ;;  %v19117_v23 = vld [vmem:[%s23184_s29 + $0x1f0] ss:$48 sps:$4 sm:$0xff]  }
 0x246   :  { %3929 = vmatpush1.bf16.msra.mxu0 %v19081_v19 }
 0x247   :  { %4049 = vmatprep.subr.bf16.mxu0 %v19089_v24  ;;  %v19152_v24 = vld [vmem:[%s23184_s29 + $0x1fc] ss:$48 sps:$4 sm:$0xff]  }
 0x248   :  { %v16125_v30 = vpop.f32.mrb[0].mxu0  ;;  %4015 = vmatpush1.bf16.msra.mxu1 %v19114_v27 }
 0x249   :  { %15167 = vmatmul.mubr.msk.bf16.vlgmr.msra.gmra.mrb[96].mxu0 %vm3873_vm1, %v21202_v26  ;;  %v16126_v33 = vpop.f32.mrb[1].mxu0  ;;  %4135 = vmatprep.subr.bf16.mxu1 %v19122_v28  ;;  %v19125_v28 = vld [vmem:[%s23184_s29 + $0x254] ss:$48 sps:$4 sm:$0xff]  }
 0x24a   :  { %v16127_v36 = vadd.f32 %v16126_v33, %v16125_v30  ;;  %4050 = vmatpush1.bf16.msra.mxu0 %v19087_v25  ;;  %v16128_v37 = vpop.f32.mrb[2].mxu0  ;;  %v16189_v39 = vpop.f32.mrb[0].mxu1  ;;  %4081 = vmatprep.mubr.bf16.mxu0 %v21161_v57 }
 0x24b   :  { %v16129_v40 = vpop.f32.mrb[3].mxu0  ;;  %4051 = vmatprep.subr.bf16.mxu0 %v19095_v29  ;;  %v16190_v44 = vpop.f32.mrb[1].mxu1  ;;  %15168 = vmatmul.mubr.msk.bf16.vlgmr.msra.gmra.mrb[96].mxu1 %vm3873_vm1, %v21202_v26 }
 0x24c   :  { %v1741_v42 = vadd.f32 %v16127_v36, %v21208_v31  ;;  %v16130_v43 = vadd.f32 %v16129_v40, %v16128_v37  ;;  %v16191_v45 = vadd.f32 %v16190_v44, %v16189_v39  ;;  %v16192_v46 = vpop.f32.mrb[2].mxu1  ;;  %4136 = vmatpush1.bf16.msra.mxu1 %v19120_v35  ;;  %4167 = vmatprep.mubr.bf16.mxu1 %v21161_v57  ;;  %v19150_v36 = vld [vmem:[%s23184_s29 + $0x1f8] ss:$48 sps:$4 sm:$0xff]   ;;  %v19123_v39 = vld [vmem:[%s23184_s29 + $0x250] ss:$48 sps:$4 sm:$0xff]  }
 0x24d   :  { %v16193_v49 = vpop.f32.mrb[3].mxu1  ;;  %4137 = vmatprep.subr.bf16.mxu1 %v19128_v38  ;;  %v19158_v40 = vld [vmem:[%s23184_s29 + $0x25c] ss:$48 sps:$4 sm:$0xff]  }
 0x24e   :  { %v1744_v48 = vadd.f32 %v16130_v43, %v21208_v31  ;;  %4052 = vmatpush1.bf16.msra.mxu0 %v19093_v32  ;;  %v21225_v52 = vadd.f32 %v16191_v45, %v1741_v42  ;;  %v16194_v53 = vadd.f32 %v16193_v49, %v16192_v46  ;;  %v19131_v43 = vld [vmem:[%s23184_s29 + $0x2b4] ss:$48 sps:$4 sm:$0xff]  }
 0x24f   :  { %4053 = vmatprep.subr.bf16.mxu0 %v19101_v41 }
 0x250   :  { %v16131_v55 = vpop.f32.mrb[4].mxu0  ;;  %v21228_v56 = vadd.f32 %v16194_v53, %v1744_v48  ;;  %4138 = vmatpush1.bf16.msra.mxu1 %v19126_v47  ;;  %v19156_v47 = vld [vmem:[%s23184_s29 + $0x258] ss:$48 sps:$4 sm:$0xff]  }
 0x251   :  { %v16132_v58 = vpop.f32.mrb[5].mxu0  ;;  %4139 = vmatprep.subr.bf16.mxu1 %v19134_v51  ;;  %v19164_v51 = vld [vmem:[%s23184_s29 + $0x2bc] ss:$48 sps:$4 sm:$0xff]  }
 0x252   :  { %v16133_v60 = vadd.f32 %v16132_v58, %v16131_v55  ;;  %4054 = vmatpush1.bf16.msra.mxu0 %v19099_v50  ;;  %v16134_v61 = vpop.f32.mrb[6].mxu0  ;;  %v16195_v0 = vpop.f32.mrb[4].mxu1  ;;  %v19129_v50 = vld [vmem:[%s23184_s29 + $0x2b0] ss:$48 sps:$4 sm:$0xff]   ;;  %v19137_v55 = vld [vmem:[%s23184_s29 + $0x314] ss:$48 sps:$4 sm:$0xff]  }
 0x253   :  { %v16135_v1 = vpop.f32.mrb[7].mxu0  ;;  %4055 = vmatprep.subr.bf16.mxu0 %v19107_v54  ;;  %v16196_v6 = vpop.f32.mrb[5].mxu1 }
 0x254   :  { %v1749_v4 = vadd.f32 %v16133_v60, %v21208_v31  ;;  %v16136_v5 = vadd.f32 %v16135_v1, %v16134_v61  ;;  %v16197_v7 = vadd.f32 %v16196_v6, %v16195_v0  ;;  %v16198_v8 = vpop.f32.mrb[6].mxu1  ;;  %4140 = vmatpush1.bf16.msra.mxu1 %v19132_v59 }
 0x255   :  { %v16199_v11 = vpop.f32.mrb[7].mxu1  ;;  %4141 = vmatprep.subr.bf16.mxu1 %v19140_v63  ;;  %v19162_v63 = vld [vmem:[%s23184_s29 + $0x2b8] ss:$48 sps:$4 sm:$0xff]  }
 0x256   :  { %v1752_v10 = vadd.f32 %v16136_v5, %v21208_v31  ;;  %4056 = vmatpush1.bf16.msra.mxu0 %v19105_v62  ;;  %v21239_v14 = vadd.f32 %v16197_v7, %v1749_v4  ;;  %v16200_v15 = vadd.f32 %v16199_v11, %v16198_v8  ;;  %v19170_v4 = vld [vmem:[%s23184_s29 + $0x31c] ss:$48 sps:$4 sm:$0xff]   ;;  %v19143_v7 = vld [vmem:[%s23184_s29 + $0x374] ss:$48 sps:$4 sm:$0xff]   ;;  %v19168_v11 = vld [vmem:[%s23184_s29 + $0x318] ss:$48 sps:$4 sm:$0xff]  }
 0x257   :  { %4057 = vmatprep.subr.bf16.mxu0 %v19113_v3  ;;  %v19135_v3 = vld [vmem:[%s23184_s29 + $0x310] ss:$48 sps:$4 sm:$0xff]  }
 0x258   :  { %v16137_v17 = vpop.f32.mrb[8].mxu0  ;;  %v21242_v18 = vadd.f32 %v16200_v15, %v1752_v10  ;;  %4142 = vmatpush1.bf16.msra.mxu1 %v19138_v9  ;;  %v19141_v15 = vld [vmem:[%s23184_s29 + $0x370] ss:$48 sps:$4 sm:$0xff]  }
 0x259   :  { %v16138_v19 = vpop.f32.mrb[9].mxu0  ;;  %4143 = vmatprep.subr.bf16.mxu1 %v19146_v13 }
 0x25a   :  { %v16139_v21 = vadd.f32 %v16138_v19, %v16137_v17  ;;  %4058 = vmatpush1.bf16.msra.mxu0 %v19111_v12  ;;  %v16140_v22 = vpop.f32.mrb[10].mxu0  ;;  %v16201_v25 = vpop.f32.mrb[8].mxu1 }
 0x25b   :  { %v16141_v27 = vpop.f32.mrb[11].mxu0  ;;  %4059 = vmatprep.subr.bf16.mxu0 %v19119_v16  ;;  %v16202_v32 = vpop.f32.mrb[9].mxu1  ;;  %v19176_v16 = vld [vmem:[%s23184_s29 + $0x37c] ss:$48 sps:$4 sm:$0xff]  }
 0x25c   :  { %v1757_v29 = vadd.f32 %v16139_v21, %v21208_v31  ;;  %v16142_v30 = vadd.f32 %v16141_v27, %v16140_v22  ;;  %v16203_v33 = vadd.f32 %v16202_v32, %v16201_v25  ;;  %v16204_v35 = vpop.f32.mrb[10].mxu1  ;;  %4144 = vmatpush1.bf16.msra.mxu1 %v19144_v20  ;;  %v19149_v20 = vld [vmem:[%s23184_s29 + $0x3d4] ss:$48 sps:$4 sm:$0xff]   ;;  %v19174_v27 = vld [vmem:[%s23184_s29 + $0x378] ss:$48 sps:$4 sm:$0xff]  }
 0x25d   :  { %v16205_v38 = vpop.f32.mrb[11].mxu1  ;;  %4145 = vmatprep.subr.bf16.mxu1 %v19152_v24  ;;  %v19182_v32 = vld [vmem:[%s23184_s29 + $0x3dc] ss:$48 sps:$4 sm:$0xff]  }
 0x25e   :  { %v1760_v37 = vadd.f32 %v16142_v30, %v21208_v31  ;;  %4060 = vmatpush1.bf16.msra.mxu0 %v19117_v23  ;;  %v21253_v41 = vadd.f32 %v16203_v33, %v1757_v29  ;;  %v16206_v42 = vadd.f32 %v16205_v38, %v16204_v35  ;;  %v19147_v30 = vld [vmem:[%s23184_s29 + $0x3d0] ss:$48 sps:$4 sm:$0xff]  }
 0x25f   :  { %4061 = vmatprep.subr.bf16.mxu0 %v19125_v28 }
 0x260   :  { %v16143_v44 = vpop.f32.mrb[12].mxu0  ;;  %v21256_v45 = vadd.f32 %v16206_v42, %v1760_v37  ;;  %4146 = vmatpush1.bf16.msra.mxu1 %v19150_v36  ;;  %v19155_v36 = vld [vmem:[%s23184_s29 + $0x434] ss:$48 sps:$4 sm:$0xff]  }
 0x261   :  { %v16144_v46 = vpop.f32.mrb[13].mxu0  ;;  %4147 = vmatprep.subr.bf16.mxu1 %v19158_v40  ;;  %v19180_v40 = vld [vmem:[%s23184_s29 + $0x3d8] ss:$48 sps:$4 sm:$0xff]  }
 0x262   :  { %v16145_v48 = vadd.f32 %v16144_v46, %v16143_v44  ;;  %4062 = vmatpush1.bf16.msra.mxu0 %v19123_v39  ;;  %v16146_v49 = vpop.f32.mrb[14].mxu0  ;;  %v16207_v53 = vpop.f32.mrb[12].mxu1  ;;  %v19153_v44 = vld [vmem:[%s23184_s29 + $0x430] ss:$48 sps:$4 sm:$0xff]   ;;  %v19188_v46 = vld [vmem:[%s23184_s29 + $0x43c] ss:$48 sps:$4 sm:$0xff]  }
 0x263   :  { %v16147_v54 = vpop.f32.mrb[15].mxu0  ;;  %4063 = vmatprep.subr.bf16.mxu0 %v19131_v43  ;;  %v16208_v60 = vpop.f32.mrb[13].mxu1 }
 0x264   :  { %v1765_v58 = vadd.f32 %v16145_v48, %v21208_v31  ;;  %v16148_v59 = vadd.f32 %v16147_v54, %v16146_v49  ;;  %v16209_v61 = vadd.f32 %v16208_v60, %v16207_v53  ;;  %v16210_v62 = vpop.f32.mrb[14].mxu1  ;;  %4148 = vmatpush1.bf16.msra.mxu1 %v19156_v47  ;;  %v19161_v49 = vld [vmem:[%s23184_s29 + $0x494] ss:$48 sps:$4 sm:$0xff]  }
 0x265   :  { %v16211_v1 = vpop.f32.mrb[15].mxu1  ;;  %4149 = vmatprep.subr.bf16.mxu1 %v19164_v51 }
 0x266   :  { %v1768_v0 = vadd.f32 %v16148_v59, %v21208_v31  ;;  %4064 = vmatpush1.bf16.msra.mxu0 %v19129_v50  ;;  %v21267_v5 = vadd.f32 %v16209_v61, %v1765_v58  ;;  %v16212_v6 = vadd.f32 %v16211_v1, %v16210_v62  ;;  %v19186_v58 = vld [vmem:[%s23184_s29 + $0x438] ss:$48 sps:$4 sm:$0xff]   ;;  %v19159_v61 = vld [vmem:[%s23184_s29 + $0x490] ss:$48 sps:$4 sm:$0xff]   ;;  %v19194_v62 = vld [vmem:[%s23184_s29 + $0x49c] ss:$48 sps:$4 sm:$0xff]  }
 0x267   :  { %4065 = vmatprep.subr.bf16.mxu0 %v19137_v55  ;;  %v19167_v1 = vld [vmem:[%s23184_s29 + $0x4f4] ss:$48 sps:$4 sm:$0xff]  }
 0x268   :  { %v16149_v8 = vpop.f32.mrb[16].mxu0  ;;  %v21270_v9 = vadd.f32 %v16212_v6, %v1768_v0  ;;  %4150 = vmatpush1.bf16.msra.mxu1 %v19162_v63 }
 0x269   :  { %v16150_v10 = vpop.f32.mrb[17].mxu0  ;;  %4151 = vmatprep.subr.bf16.mxu1 %v19170_v4 }
 0x26a   :  { %v16151_v12 = vadd.f32 %v16150_v10, %v16149_v8  ;;  %4066 = vmatpush1.bf16.msra.mxu0 %v19135_v3  ;;  %v16152_v13 = vpop.f32.mrb[18].mxu0  ;;  %v16213_v17 = vpop.f32.mrb[16].mxu1 }
 0x26b   :  { %v16153_v19 = vpop.f32.mrb[19].mxu0  ;;  %4067 = vmatprep.subr.bf16.mxu0 %v19143_v7  ;;  %v16214_v23 = vpop.f32.mrb[17].mxu1  ;;  %v19192_v7 = vld [vmem:[%s23184_s29 + $0x498] ss:$48 sps:$4 sm:$0xff]  }
 0x26c   :  { %v1773_v21 = vadd.f32 %v16151_v12, %v21208_v31  ;;  %v16154_v22 = vadd.f32 %v16153_v19, %v16152_v13  ;;  %v16215_v24 = vadd.f32 %v16214_v23, %v16213_v17  ;;  %v16216_v25 = vpop.f32.mrb[18].mxu1  ;;  %4152 = vmatpush1.bf16.msra.mxu1 %v19168_v11  ;;  %v19165_v11 = vld [vmem:[%s23184_s29 + $0x4f0] ss:$48 sps:$4 sm:$0xff]   ;;  %v19200_v12 = vld [vmem:[%s23184_s29 + $0x4fc] ss:$48 sps:$4 sm:$0xff]  }
 0x26d   :  { %v16217_v29 = vpop.f32.mrb[19].mxu1  ;;  %4153 = vmatprep.subr.bf16.mxu1 %v19176_v16  ;;  %v19173_v16 = vld [vmem:[%s23184_s29 + $0x554] ss:$48 sps:$4 sm:$0xff]   ;;  %v19198_v23 = vld [vmem:[%s23184_s29 + $0x4f8] ss:$48 sps:$4 sm:$0xff]  }
 0x26e   :  { %v1776_v28 = vadd.f32 %v16154_v22, %v21208_v31  ;;  %4068 = vmatpush1.bf16.msra.mxu0 %v19141_v15  ;;  %v21281_v33 = vadd.f32 %v16215_v24, %v1773_v21  ;;  %v16218_v35 = vadd.f32 %v16217_v29, %v16216_v25 }
 0x26f   :  { %4069 = vmatprep.subr.bf16.mxu0 %v19149_v20 }
 0x270   :  { %v16155_v37 = vpop.f32.mrb[20].mxu0  ;;  %v21284_v38 = vadd.f32 %v16218_v35, %v1776_v28  ;;  %4154 = vmatpush1.bf16.msra.mxu1 %v19174_v27  ;;  %v19171_v27 = vld [vmem:[%s23184_s29 + $0x550] ss:$48 sps:$4 sm:$0xff]   ;;  %v19206_v28 = vld [vmem:[%s23184_s29 + $0x55c] ss:$48 sps:$4 sm:$0xff]  }
 0x271   :  { %v16156_v39 = vpop.f32.mrb[21].mxu0  ;;  %4155 = vmatprep.subr.bf16.mxu1 %v19182_v32  ;;  %v19179_v32 = vld [vmem:[%s23184_s29 + $0x5b4] ss:$48 sps:$4 sm:$0xff]  }
 0x272   :  { %v16157_v42 = vadd.f32 %v16156_v39, %v16155_v37  ;;  %4070 = vmatpush1.bf16.msra.mxu0 %v19147_v30  ;;  %v16158_v43 = vpop.f32.mrb[22].mxu0  ;;  %v16219_v47 = vpop.f32.mrb[20].mxu1  ;;  %v19204_v39 = vld [vmem:[%s23184_s29 + $0x558] ss:$48 sps:$4 sm:$0xff]  }
 0x273   :  { %v16159_v48 = vpop.f32.mrb[23].mxu0  ;;  %4071 = vmatprep.subr.bf16.mxu0 %v19155_v36  ;;  %v16220_v53 = vpop.f32.mrb[21].mxu1 }
 0x274   :  { %v1781_v50 = vadd.f32 %v16157_v42, %v21208_v31  ;;  %v16160_v51 = vadd.f32 %v16159_v48, %v16158_v43  ;;  %v16221_v54 = vadd.f32 %v16220_v53, %v16219_v47  ;;  %v16222_v55 = vpop.f32.mrb[22].mxu1  ;;  %4156 = vmatpush1.bf16.msra.mxu1 %v19180_v40  ;;  %v19177_v43 = vld [vmem:[%s23184_s29 + $0x5b0] ss:$48 sps:$4 sm:$0xff]   ;;  %v19185_v48 = vld [vmem:[%s23184_s29 + $0x614] ss:$48 sps:$4 sm:$0xff]  }
 0x275   :  { %v16223_v60 = vpop.f32.mrb[23].mxu1  ;;  %4157 = vmatprep.subr.bf16.mxu1 %v19188_v46 }
 0x276   :  { %v1784_v59 = vadd.f32 %v16160_v51, %v21208_v31  ;;  %4072 = vmatpush1.bf16.msra.mxu0 %v19153_v44  ;;  %v21295_v63 = vadd.f32 %v16221_v54, %v1781_v50  ;;  %v16224_v0 = vadd.f32 %v16223_v60, %v16222_v55  ;;  %v19212_v44 = vld [vmem:[%s23184_s29 + $0x5bc] ss:$48 sps:$4 sm:$0xff]   ;;  %v19210_v55 = vld [vmem:[%s23184_s29 + $0x5b8] ss:$48 sps:$4 sm:$0xff]   ;;  %v19183_v60 = vld [vmem:[%s23184_s29 + $0x610] ss:$48 sps:$4 sm:$0xff]  }
 0x277   :  { %4073 = vmatprep.subr.bf16.mxu0 %v19161_v49 }
 0x278   :  { %v16161_v3 = vpop.f32.mrb[24].mxu0  ;;  %v21298_v4 = vadd.f32 %v16224_v0, %v1784_v59  ;;  %4158 = vmatpush1.bf16.msra.mxu1 %v19186_v58  ;;  %v19191_v0 = vld [vmem:[%s23184_s29 + $0x674] ss:$48 sps:$4 sm:$0xff]  }
 0x279   :  { %v16162_v6 = vpop.f32.mrb[25].mxu0  ;;  %4159 = vmatprep.subr.bf16.mxu1 %v19194_v62 }
 0x27a   :  { %v16163_v8 = vadd.f32 %v16162_v6, %v16161_v3  ;;  %4074 = vmatpush1.bf16.msra.mxu0 %v19159_v61  ;;  %v16164_v10 = vpop.f32.mrb[26].mxu0  ;;  %v16225_v13 = vpop.f32.mrb[24].mxu1 }
 0x27b   :  { %v16165_v15 = vpop.f32.mrb[27].mxu0  ;;  %4075 = vmatprep.subr.bf16.mxu0 %v19167_v1  ;;  %v16226_v20 = vpop.f32.mrb[25].mxu1  ;;  %v19218_v1 = vld [vmem:[%s23184_s29 + $0x61c] ss:$48 sps:$4 sm:$0xff]  }
 0x27c   :  { %v1789_v17 = vadd.f32 %v16163_v8, %v21208_v31  ;;  %v16166_v19 = vadd.f32 %v16165_v15, %v16164_v10  ;;  %v16227_v21 = vadd.f32 %v16226_v20, %v16225_v13  ;;  %v16228_v22 = vpop.f32.mrb[26].mxu1  ;;  %4160 = vmatpush1.bf16.msra.mxu1 %v19192_v7 }
 0x27d   :  { %v16229_v25 = vpop.f32.mrb[27].mxu1  ;;  %4161 = vmatprep.subr.bf16.mxu1 %v19200_v12  ;;  %v19224_v12 = vld [vmem:[%s23184_s29 + $0x67c] ss:$48 sps:$4 sm:$0xff]  }
 0x27e   :  { %v1792_v24 = vadd.f32 %v16166_v19, %v21208_v31  ;;  %4076 = vmatpush1.bf16.msra.mxu0 %v19165_v11  ;;  %v21309_v29 = vadd.f32 %v16227_v21, %v1789_v17  ;;  %v16230_v30 = vadd.f32 %v16229_v25, %v16228_v22  ;;  %v19189_v11 = vld [vmem:[%s23184_s29 + $0x670] ss:$48 sps:$4 sm:$0xff]  }
 0x27f   :  { %4077 = vmatprep.subr.bf16.mxu0 %v19173_v16  ;;  %v19197_v16 = vld [vmem:[%s23184_s29 + $0x6d4] ss:$48 sps:$4 sm:$0xff]  }
 0x280   :  { %v16167_v35 = vpop.f32.mrb[28].mxu0  ;;  %v21312_v36 = vadd.f32 %v16230_v30, %v1792_v24  ;;  %4162 = vmatpush1.bf16.msra.mxu1 %v19198_v23  ;;  %v19222_v23 = vld [vmem:[%s23184_s29 + $0x678] ss:$48 sps:$4 sm:$0xff]  }
 0x281   :  { %v16168_v37 = vpop.f32.mrb[29].mxu0  ;;  %4163 = vmatprep.subr.bf16.mxu1 %v19206_v28 }
 0x282   :  { %v16169_v40 = vadd.f32 %v16168_v37, %v16167_v35  ;;  %4078 = vmatpush1.bf16.msra.mxu0 %v19171_v27  ;;  %v16170_v42 = vpop.f32.mrb[30].mxu0  ;;  %v16231_v46 = vpop.f32.mrb[28].mxu1  ;;  %v19195_v27 = vld [vmem:[%s23184_s29 + $0x6d0] ss:$48 sps:$4 sm:$0xff]  }
 0x283   :  { %v16171_v47 = vpop.f32.mrb[31].mxu0  ;;  %4079 = vmatprep.subr.bf16.mxu0 %v19179_v32  ;;  %v16232_v51 = vpop.f32.mrb[29].mxu1  ;;  %v19203_v32 = vld [vmem:[%s23184_s29 + $0x734] ss:$48 sps:$4 sm:$0xff]  }
 0x284   :  { %v1797_v49 = vadd.f32 %v16169_v40, %v21208_v31  ;;  %v16172_v50 = vadd.f32 %v16171_v47, %v16170_v42  ;;  %v16233_v53 = vadd.f32 %v16232_v51, %v16231_v46  ;;  %v16234_v54 = vpop.f32.mrb[30].mxu1  ;;  %4164 = vmatpush1.bf16.msra.mxu1 %v19204_v39  ;;  %v19228_v40 = vld [vmem:[%s23184_s29 + $0x6d8] ss:$48 sps:$4 sm:$0xff]  }
 0x285   :  { %v16235_v59 = vpop.f32.mrb[31].mxu1  ;;  %4165 = vmatprep.subr.bf16.mxu1 %v19212_v44  ;;  %v19236_v44 = vld [vmem:[%s23184_s29 + $0x73c] ss:$48 sps:$4 sm:$0xff]  }
 0x286   :  { %v1800_v58 = vadd.f32 %v16172_v50, %v21208_v31  ;;  %4080 = vmatpush1.bf16.msra.mxu0 %v19177_v43  ;;  %v21322_v61 = vadd.f32 %v16233_v53, %v1797_v49  ;;  %v16236_v62 = vadd.f32 %v16235_v59, %v16234_v54  ;;  %v19216_v31 = vld [vmem:[%s23184_s29 + $0x618] ss:$48 sps:$4 sm:$0xff]   ;;  %v19201_v43 = vld [vmem:[%s23184_s29 + $0x730] ss:$48 sps:$4 sm:$0xff]  }
 0x287   :  { %4092 = vmatprep.subr.bf16.mxu0 %v19185_v48  ;;  %v19209_v48 = vld [vmem:[%s23184_s29 + $0x794] ss:$48 sps:$4 sm:$0xff]  }
 0x288   :  { %v16253_v3 = vpop.f32.mrb[32].mxu0  ;;  %v21326_v6 = vadd.f32 %v16236_v62, %v1800_v58  ;;  %4166 = vmatpush1.bf16.msra.mxu1 %v19210_v55  ;;  %v19234_v55 = vld [vmem:[%s23184_s29 + $0x738] ss:$48 sps:$4 sm:$0xff]   ;;  %v19242_v62 = vld [vmem:[%s23184_s29 + $0x79c] ss:$48 sps:$4 sm:$0xff]  }
 0x289   :  { %v16254_v7 = vpop.f32.mrb[33].mxu0  ;;  %4082 = vmatmul.mubr.bf16.vlgmr.msra.gmra.mrb[100].mxu0 %v21172_v2  ;;  %4178 = vmatprep.subr.bf16.mxu1 %v19218_v1  ;;  %v19215_v1 = vld [vmem:[%s23184_s29 + $0x24] ss:$48 sps:$4 sm:$0xff]  }
 0x28a   :  { %v16255_v8 = vadd.f32 %v16254_v7, %v16253_v3  ;;  %4093 = vmatpush1.bf16.msra.mxu0 %v19183_v60  ;;  %v16256_v10 = vpop.f32.mrb[34].mxu0  ;;  %4124 = vmatprep.mubr.bf16.mxu0 %v20544_v34  ;;  %v16317_v13 = vpop.f32.mrb[32].mxu1  ;;  %v19207_v60 = vld [vmem:[%s23184_s29 + $0x790] ss:$48 sps:$4 sm:$0xff]  }
 0x28b   :  { %v16257_v15 = vpop.f32.mrb[35].mxu0  ;;  %4094 = vmatprep.subr.bf16.mxu0 %v19191_v0  ;;  %v16318_v20 = vpop.f32.mrb[33].mxu1  ;;  %4168 = vmatmul.mubr.bf16.vlgmr.msra.gmra.mrb[100].mxu1 %v21172_v2 }
 0x28c   :  { %v1935_v17 = vadd.f32 %v16255_v8, %v21225_v52  ;;  %v16258_v19 = vadd.f32 %v16257_v15, %v16256_v10  ;;  %v16319_v21 = vadd.f32 %v16318_v20, %v16317_v13  ;;  %v16320_v22 = vpop.f32.mrb[34].mxu1  ;;  %4179 = vmatpush1.bf16.msra.mxu1 %v19216_v31  ;;  %4210 = vmatprep.mubr.bf16.mxu1 %v20544_v34  ;;  %v19230_v52 = vld [vmem:[%s23184_s29 + $0x6dc] ss:$48 sps:$4 sm:$0xff]   ;;  %v19240_v8 = vld [vmem:[%s23184_s29 + $0x798] ss:$48 sps:$4 sm:$0xff]  }
 0x28d   :  { %v16321_v25 = vpop.f32.mrb[35].mxu1  ;;  %4180 = vmatprep.subr.bf16.mxu1 %v19224_v12  ;;  %v19248_v12 = vld [vmem:[%s23184_s29 + $0x2c] ss:$48 sps:$4 sm:$0xff]  }
 0x28e   :  { %v1938_v24 = vadd.f32 %v16258_v19, %v21228_v56  ;;  %4095 = vmatpush1.bf16.msra.mxu0 %v19189_v11  ;;  %v21341_v28 = vadd.f32 %v16319_v21, %v1935_v17  ;;  %v16322_v30 = vadd.f32 %v16321_v25, %v16320_v22  ;;  %v19213_v11 = vld [vmem:[%s23184_s29 + $0x20] ss:$48 sps:$4 sm:$0xff]  }
 0x28f   :  { %4096 = vmatprep.subr.bf16.mxu0 %v19197_v16  ;;  %v19221_v16 = vld [vmem:[%s23184_s29 + $0x84] ss:$48 sps:$4 sm:$0xff]  }
 0x290   :  { %v16259_v35 = vpop.f32.mrb[36].mxu0  ;;  %v21344_v37 = vadd.f32 %v16322_v30, %v1938_v24  ;;  %4181 = vmatpush1.bf16.msra.mxu1 %v19222_v23  ;;  %v19246_v23 = vld [vmem:[%s23184_s29 + $0x28] ss:$48 sps:$4 sm:$0xff]  }
 0x291   :  { %v16260_v39 = vpop.f32.mrb[37].mxu0  ;;  %4182 = vmatprep.subr.bf16.mxu1 %v19230_v52  ;;  %v19254_v52 = vld [vmem:[%s23184_s29 + $0x8c] ss:$48 sps:$4 sm:$0xff]  }
 0x292   :  { %v16261_v56 = vadd.f32 %v16260_v39, %v16259_v35  ;;  %4097 = vmatpush1.bf16.msra.mxu0 %v19195_v27  ;;  %v16262_v42 = vpop.f32.mrb[38].mxu0  ;;  %v16323_v46 = vpop.f32.mrb[36].mxu1  ;;  %v19219_v27 = vld [vmem:[%s23184_s29 + $0x80] ss:$48 sps:$4 sm:$0xff]  }
 0x293   :  { %v16263_v47 = vpop.f32.mrb[39].mxu0  ;;  %4098 = vmatprep.subr.bf16.mxu0 %v19203_v32  ;;  %v16324_v51 = vpop.f32.mrb[37].mxu1  ;;  %v19227_v32 = vld [vmem:[%s23184_s29 + $0xe4] ss:$48 sps:$4 sm:$0xff]  }
 0x294   :  { %v1943_v49 = vadd.f32 %v16261_v56, %v21239_v14  ;;  %v16264_v50 = vadd.f32 %v16263_v47, %v16262_v42  ;;  %v16325_v53 = vadd.f32 %v16324_v51, %v16323_v46  ;;  %v16326_v54 = vpop.f32.mrb[38].mxu1  ;;  %4183 = vmatpush1.bf16.msra.mxu1 %v19228_v40  ;;  %v19225_v40 = vld [vmem:[%s23184_s29 + $0xe0] ss:$48 sps:$4 sm:$0xff]   ;;  %v19252_v56 = vld [vmem:[%s23184_s29 + $0x88] ss:$48 sps:$4 sm:$0xff]  }
 0x295   :  { %v16327_v59 = vpop.f32.mrb[39].mxu1  ;;  %4184 = vmatprep.subr.bf16.mxu1 %v19236_v44  ;;  %v19260_v44 = vld [vmem:[%s23184_s29 + $0xec] ss:$48 sps:$4 sm:$0xff]  }
 0x296   :  { %v1946_v58 = vadd.f32 %v16264_v50, %v21242_v18  ;;  %4099 = vmatpush1.bf16.msra.mxu0 %v19201_v43  ;;  %v21355_v0 = vadd.f32 %v16325_v53, %v1943_v49  ;;  %v16328_v14 = vadd.f32 %v16327_v59, %v16326_v54 }
 0x297   :  { %4100 = vmatprep.subr.bf16.mxu0 %v19209_v48  ;;  %v19233_v48 = vld [vmem:[%s23184_s29 + $0x144] ss:$48 sps:$4 sm:$0xff]  }
 0x298   :  { %v16265_v3 = vpop.f32.mrb[40].mxu0  ;;  %v21358_v7 = vadd.f32 %v16328_v14, %v1946_v58  ;;  %4185 = vmatpush1.bf16.msra.mxu1 %v19234_v55  ;;  %v19258_v55 = vld [vmem:[%s23184_s29 + $0xe8] ss:$48 sps:$4 sm:$0xff]   ;;  %v19239_v14 = vld [vmem:[%s23184_s29 + $0x1a4] ss:$48 sps:$4 sm:$0xff]  }
 0x299   :  { %v16266_v31 = vpop.f32.mrb[41].mxu0  ;;  %4186 = vmatprep.subr.bf16.mxu1 %v19242_v62 }
 0x29a   :  { %v16267_v18 = vadd.f32 %v16266_v31, %v16265_v3  ;;  %4101 = vmatpush1.bf16.msra.mxu0 %v19207_v60  ;;  %v16268_v10 = vpop.f32.mrb[42].mxu0  ;;  %v16329_v13 = vpop.f32.mrb[40].mxu1  ;;  %v19266_v60 = vld [vmem:[%s23184_s29 + $0x14c] ss:$48 sps:$4 sm:$0xff]   ;;  %v19237_v3 = vld [vmem:[%s23184_s29 + $0x1a0] ss:$48 sps:$4 sm:$0xff]  }
 0x29b   :  { %v16269_v15 = vpop.f32.mrb[43].mxu0  ;;  %4221 = vmatprep.subr.bf16.mxu0 %v19215_v1  ;;  %v16330_v20 = vpop.f32.mrb[41].mxu1 }
 0x29c   :  { %v1951_v17 = vadd.f32 %v16267_v18, %v21253_v41  ;;  %v16270_v19 = vadd.f32 %v16269_v15, %v16268_v10  ;;  %v16331_v21 = vadd.f32 %v16330_v20, %v16329_v13  ;;  %v16332_v22 = vpop.f32.mrb[42].mxu1  ;;  %4187 = vmatpush1.bf16.msra.mxu1 %v19240_v8  ;;  %v19264_v18 = vld [vmem:[%s23184_s29 + $0x148] ss:$48 sps:$4 sm:$0xff]   ;;  %v19272_v10 = vld [vmem:[%s23184_s29 + $0x1ac] ss:$48 sps:$4 sm:$0xff]  }
 0x29d   :  { %15169 = vmatmul.mubr.msk.bf16.vlgmr.msra.gmra.mrb[100].mxu0 %vm3873_vm1, %v21202_v26  ;;  %v16333_v25 = vpop.f32.mrb[43].mxu1  ;;  %4307 = vmatprep.subr.bf16.mxu1 %v19248_v12  ;;  %v19245_v15 = vld [vmem:[%s23184_s29 + $0x204] ss:$48 sps:$4 sm:$0xff]   ;;  %v19243_v20 = vld [vmem:[%s23184_s29 + $0x200] ss:$48 sps:$4 sm:$0xff]  }
 0x29e   :  { %v1954_v24 = vadd.f32 %v16270_v19, %v21256_v45  ;;  %4222 = vmatpush1.bf16.msra.mxu0 %v19213_v11  ;;  %v21371_v41 = vadd.f32 %v16331_v21, %v1951_v17  ;;  %v16334_v30 = vadd.f32 %v16333_v25, %v16332_v22  ;;  %4253 = vmatprep.mubr.bf16.mxu0 %v21161_v57 }
 0x29f   :  { %4223 = vmatprep.subr.bf16.mxu0 %v19221_v16  ;;  %15170 = vmatmul.mubr.msk.bf16.vlgmr.msra.gmra.mrb[100].mxu1 %vm3873_vm1, %v21202_v26 }
 0x2a0   :  { %v16271_v35 = vpop.f32.mrb[44].mxu0  ;;  %v21377_v45 = vadd.f32 %v16334_v30, %v1954_v24  ;;  %4308 = vmatpush1.bf16.msra.mxu1 %v19246_v23  ;;  %4339 = vmatprep.mubr.bf16.mxu1 %v21161_v57  ;;  %v19231_v57 = vld [vmem:[%s23184_s29 + $0x140] ss:$48 sps:$4 sm:$0xff]   ;;  %v19270_v23 = vld [vmem:[%s23184_s29 + $0x1a8] ss:$48 sps:$4 sm:$0xff]  }
 0x2a1   :  { %v16272_v39 = vpop.f32.mrb[45].mxu0  ;;  %4309 = vmatprep.subr.bf16.mxu1 %v19254_v52  ;;  %v19278_v24 = vld [vmem:[%s23184_s29 + $0x20c] ss:$48 sps:$4 sm:$0xff]   ;;  %v19251_v30 = vld [vmem:[%s23184_s29 + $0x264] ss:$48 sps:$4 sm:$0xff]  }
 0x2a2   :  { %v16273_v42 = vadd.f32 %v16272_v39, %v16271_v35  ;;  %4224 = vmatpush1.bf16.msra.mxu0 %v19219_v27  ;;  %v16274_v43 = vpop.f32.mrb[46].mxu0  ;;  %v16335_v46 = vpop.f32.mrb[44].mxu1  ;;  %v19249_v35 = vld [vmem:[%s23184_s29 + $0x260] ss:$48 sps:$4 sm:$0xff]  }
 0x2a3   :  { %v16275_v47 = vpop.f32.mrb[47].mxu0  ;;  %4225 = vmatprep.subr.bf16.mxu0 %v19227_v32  ;;  %v16336_v51 = vpop.f32.mrb[45].mxu1 }
 0x2a4   :  { %v1959_v49 = vadd.f32 %v16273_v42, %v21267_v5  ;;  %v16276_v50 = vadd.f32 %v16275_v47, %v16274_v43  ;;  %v16337_v53 = vadd.f32 %v16336_v51, %v16335_v46  ;;  %v16338_v54 = vpop.f32.mrb[46].mxu1  ;;  %4310 = vmatpush1.bf16.msra.mxu1 %v19252_v56  ;;  %v19257_v56 = vld [vmem:[%s23184_s29 + $0x2c4] ss:$48 sps:$4 sm:$0xff]   ;;  %v19276_v42 = vld [vmem:[%s23184_s29 + $0x208] ss:$48 sps:$4 sm:$0xff]  }
 0x2a5   :  { %v16339_v59 = vpop.f32.mrb[47].mxu1  ;;  %4311 = vmatprep.subr.bf16.mxu1 %v19260_v44  ;;  %v19284_v44 = vld [vmem:[%s23184_s29 + $0x26c] ss:$48 sps:$4 sm:$0xff]   ;;  %v19255_v51 = vld [vmem:[%s23184_s29 + $0x2c0] ss:$48 sps:$4 sm:$0xff]  }
 0x2a6   :  { %v1962_v58 = vadd.f32 %v16276_v50, %v21270_v9  ;;  %4226 = vmatpush1.bf16.msra.mxu0 %v19225_v40  ;;  %v21389_v62 = vadd.f32 %v16337_v53, %v1959_v49  ;;  %v16340_v5 = vadd.f32 %v16339_v59, %v16338_v54  ;;  %v19290_v59 = vld [vmem:[%s23184_s29 + $0x2cc] ss:$48 sps:$4 sm:$0xff]  }
 0x2a7   :  { %4227 = vmatprep.subr.bf16.mxu0 %v19233_v48 }
 0x2a8   :  { %v16277_v1 = vpop.f32.mrb[48].mxu0  ;;  %v21393_v31 = vadd.f32 %v16340_v5, %v1962_v58  ;;  %4312 = vmatpush1.bf16.msra.mxu1 %v19258_v55  ;;  %v19263_v5 = vld [vmem:[%s23184_s29 + $0x324] ss:$48 sps:$4 sm:$0xff]  }
 0x2a9   :  { %v16278_v8 = vpop.f32.mrb[49].mxu0  ;;  %4313 = vmatprep.subr.bf16.mxu1 %v19266_v60 }
 0x2aa   :  { %v16279_v9 = vadd.f32 %v16278_v8, %v16277_v1  ;;  %4228 = vmatpush1.bf16.msra.mxu0 %v19231_v57  ;;  %v16280_v11 = vpop.f32.mrb[50].mxu0  ;;  %v16341_v12 = vpop.f32.mrb[48].mxu1  ;;  %v19282_v57 = vld [vmem:[%s23184_s29 + $0x268] ss:$48 sps:$4 sm:$0xff]   ;;  %v19261_v1 = vld [vmem:[%s23184_s29 + $0x320] ss:$48 sps:$4 sm:$0xff]  }
 0x2ab   :  { %v16281_v13 = vpop.f32.mrb[51].mxu0  ;;  %4229 = vmatprep.subr.bf16.mxu0 %v19239_v14  ;;  %v16342_v19 = vpop.f32.mrb[49].mxu1 }
 0x2ac   :  { %v1967_v16 = vadd.f32 %v16279_v9, %v21281_v33  ;;  %v16282_v17 = vadd.f32 %v16281_v13, %v16280_v11  ;;  %v16343_v21 = vadd.f32 %v16342_v19, %v16341_v12  ;;  %v16344_v22 = vpop.f32.mrb[50].mxu1  ;;  %4314 = vmatpush1.bf16.msra.mxu1 %v19264_v18  ;;  %v19296_v9 = vld [vmem:[%s23184_s29 + $0x32c] ss:$48 sps:$4 sm:$0xff]   ;;  %v19269_v13 = vld [vmem:[%s23184_s29 + $0x384] ss:$48 sps:$4 sm:$0xff]  }
 0x2ad   :  { %v16345_v27 = vpop.f32.mrb[51].mxu1  ;;  %4315 = vmatprep.subr.bf16.mxu1 %v19272_v10  ;;  %v19267_v19 = vld [vmem:[%s23184_s29 + $0x380] ss:$48 sps:$4 sm:$0xff]  }
 0x2ae   :  { %v1970_v25 = vadd.f32 %v16282_v17, %v21284_v38  ;;  %4230 = vmatpush1.bf16.msra.mxu0 %v19237_v3  ;;  %v21403_v52 = vadd.f32 %v16343_v21, %v1967_v16  ;;  %v16346_v33 = vadd.f32 %v16345_v27, %v16344_v22  ;;  %v19288_v3 = vld [vmem:[%s23184_s29 + $0x2c8] ss:$48 sps:$4 sm:$0xff]  }
 0x2af   :  { %4231 = vmatprep.subr.bf16.mxu0 %v19245_v15 }
 0x2b0   :  { %v16283_v32 = vpop.f32.mrb[52].mxu0  ;;  %v21407_v39 = vadd.f32 %v16346_v33, %v1970_v25  ;;  %4316 = vmatpush1.bf16.msra.mxu1 %v19270_v23  ;;  %v19302_v25 = vld [vmem:[%s23184_s29 + $0x38c] ss:$48 sps:$4 sm:$0xff]   ;;  %v19275_v33 = vld [vmem:[%s23184_s29 + $0x3e4] ss:$48 sps:$4 sm:$0xff]  }
 0x2b1   :  { %v16284_v40 = vpop.f32.mrb[53].mxu0  ;;  %4317 = vmatprep.subr.bf16.mxu1 %v19278_v24 }
 0x2b2   :  { %v16285_v38 = vadd.f32 %v16284_v40, %v16283_v32  ;;  %4232 = vmatpush1.bf16.msra.mxu0 %v19243_v20  ;;  %v16286_v43 = vpop.f32.mrb[54].mxu0  ;;  %v16347_v46 = vpop.f32.mrb[52].mxu1  ;;  %v19294_v20 = vld [vmem:[%s23184_s29 + $0x328] ss:$48 sps:$4 sm:$0xff]   ;;  %v19273_v32 = vld [vmem:[%s23184_s29 + $0x3e0] ss:$48 sps:$4 sm:$0xff]  }
 0x2b3   :  { %v16287_v47 = vpop.f32.mrb[55].mxu0  ;;  %4233 = vmatprep.subr.bf16.mxu0 %v19251_v30  ;;  %v16348_v50 = vpop.f32.mrb[53].mxu1 }
 0x2b4   :  { %v1975_v48 = vadd.f32 %v16285_v38, %v21295_v63  ;;  %v16288_v49 = vadd.f32 %v16287_v47, %v16286_v43  ;;  %v16349_v53 = vadd.f32 %v16348_v50, %v16347_v46  ;;  %v16350_v54 = vpop.f32.mrb[54].mxu1  ;;  %4318 = vmatpush1.bf16.msra.mxu1 %v19276_v42  ;;  %v19281_v46 = vld [vmem:[%s23184_s29 + $0x444] ss:$48 sps:$4 sm:$0xff]   ;;  %v19279_v50 = vld [vmem:[%s23184_s29 + $0x440] ss:$48 sps:$4 sm:$0xff]  }
 0x2b5   :  { %v16351_v58 = vpop.f32.mrb[55].mxu1  ;;  %4319 = vmatprep.subr.bf16.mxu1 %v19284_v44 }
 0x2b6   :  { %v1978_v55 = vadd.f32 %v16288_v49, %v21298_v4  ;;  %4234 = vmatpush1.bf16.msra.mxu0 %v19249_v35  ;;  %v21417_v60 = vadd.f32 %v16349_v53, %v1975_v48  ;;  %v16352_v63 = vadd.f32 %v16351_v58, %v16350_v54  ;;  %v19300_v35 = vld [vmem:[%s23184_s29 + $0x388] ss:$48 sps:$4 sm:$0xff]  }
 0x2b7   :  { %4235 = vmatprep.subr.bf16.mxu0 %v19257_v56 }
 0x2b8   :  { %v16289_v14 = vpop.f32.mrb[56].mxu0  ;;  %v21422_v8 = vadd.f32 %v16352_v63, %v1978_v55  ;;  %4320 = vmatpush1.bf16.msra.mxu1 %v19282_v57  ;;  %v19314_v57 = vld [vmem:[%s23184_s29 + $0x44c] ss:$48 sps:$4 sm:$0xff]   ;;  %v19287_v63 = vld [vmem:[%s23184_s29 + $0x4a4] ss:$48 sps:$4 sm:$0xff]  }
 0x2b9   :  { %v16290_v18 = vpop.f32.mrb[57].mxu0  ;;  %4321 = vmatprep.subr.bf16.mxu1 %v19290_v59 }
 0x2ba   :  { %v16291_v4 = vadd.f32 %v16290_v18, %v16289_v14  ;;  %4236 = vmatpush1.bf16.msra.mxu0 %v19255_v51  ;;  %v16292_v10 = vpop.f32.mrb[58].mxu0  ;;  %v16353_v11 = vpop.f32.mrb[56].mxu1  ;;  %v19306_v51 = vld [vmem:[%s23184_s29 + $0x3e8] ss:$48 sps:$4 sm:$0xff]   ;;  %v19285_v14 = vld [vmem:[%s23184_s29 + $0x4a0] ss:$48 sps:$4 sm:$0xff]  }
 0x2bb   :  { %v16293_v12 = vpop.f32.mrb[59].mxu0  ;;  %4237 = vmatprep.subr.bf16.mxu0 %v19263_v5  ;;  %v16354_v17 = vpop.f32.mrb[57].mxu1  ;;  %v19312_v18 = vld [vmem:[%s23184_s29 + $0x448] ss:$48 sps:$4 sm:$0xff]  }
 0x2bc   :  { %v1983_v15 = vadd.f32 %v16291_v4, %v21309_v29  ;;  %v16294_v16 = vadd.f32 %v16293_v12, %v16292_v10  ;;  %v16355_v21 = vadd.f32 %v16354_v17, %v16353_v11  ;;  %v16356_v22 = vpop.f32.mrb[58].mxu1  ;;  %4322 = vmatpush1.bf16.msra.mxu1 %v19288_v3  ;;  %v19320_v10 = vld [vmem:[%s23184_s29 + $0x4ac] ss:$48 sps:$4 sm:$0xff]   ;;  %v19293_v12 = vld [vmem:[%s23184_s29 + $0x504] ss:$48 sps:$4 sm:$0xff]  }
 0x2bd   :  { %v16357_v24 = vpop.f32.mrb[59].mxu1  ;;  %4323 = vmatprep.subr.bf16.mxu1 %v19296_v9  ;;  %v19291_v17 = vld [vmem:[%s23184_s29 + $0x500] ss:$48 sps:$4 sm:$0xff]  }
 0x2be   :  { %v1986_v23 = vadd.f32 %v16294_v16, %v21312_v36  ;;  %4238 = vmatpush1.bf16.msra.mxu0 %v19261_v1  ;;  %v21431_v27 = vadd.f32 %v16355_v21, %v1983_v15  ;;  %v16358_v29 = vadd.f32 %v16357_v24, %v16356_v22  ;;  %v19308_v36 = vld [vmem:[%s23184_s29 + $0x3ec] ss:$48 sps:$4 sm:$0xff]  }
 0x2bf   :  { %4239 = vmatprep.subr.bf16.mxu0 %v19269_v13  ;;  %v19326_v24 = vld [vmem:[%s23184_s29 + $0x50c] ss:$48 sps:$4 sm:$0xff]  }
 0x2c0   :  { %v16295_v30 = vpop.f32.mrb[60].mxu0  ;;  %v21436_v40 = vadd.f32 %v16358_v29, %v1986_v23  ;;  %4324 = vmatpush1.bf16.msra.mxu1 %v19294_v20  ;;  %v19318_v20 = vld [vmem:[%s23184_s29 + $0x4a8] ss:$48 sps:$4 sm:$0xff]  }
 0x2c1   :  { %v16296_v56 = vpop.f32.mrb[61].mxu0  ;;  %4325 = vmatprep.subr.bf16.mxu1 %v19302_v25  ;;  %v19299_v25 = vld [vmem:[%s23184_s29 + $0x564] ss:$48 sps:$4 sm:$0xff]  }
 0x2c2   :  { %v16297_v42 = vadd.f32 %v16296_v56, %v16295_v30  ;;  %4240 = vmatpush1.bf16.msra.mxu0 %v19267_v19  ;;  %v16298_v38 = vpop.f32.mrb[62].mxu0  ;;  %v16359_v43 = vpop.f32.mrb[60].mxu1  ;;  %v19297_v56 = vld [vmem:[%s23184_s29 + $0x560] ss:$48 sps:$4 sm:$0xff]  }
 0x2c3   :  { %v16299_v44 = vpop.f32.mrb[63].mxu0  ;;  %4241 = vmatprep.subr.bf16.mxu0 %v19275_v33  ;;  %v16360_v49 = vpop.f32.mrb[61].mxu1  ;;  %v19324_v33 = vld [vmem:[%s23184_s29 + $0x508] ss:$48 sps:$4 sm:$0xff]  }
 0x2c4   :  { %v1991_v47 = vadd.f32 %v16297_v42, %v21322_v61  ;;  %v16300_v48 = vadd.f32 %v16299_v44, %v16298_v38  ;;  %v16361_v53 = vadd.f32 %v16360_v49, %v16359_v43  ;;  %v16362_v54 = vpop.f32.mrb[62].mxu1  ;;  %4326 = vmatpush1.bf16.msra.mxu1 %v19300_v35  ;;  %v19305_v38 = vld [vmem:[%s23184_s29 + $0x5c4] ss:$48 sps:$4 sm:$0xff]  }
 0x2c5   :  { %v16363_v58 = vpop.f32.mrb[63].mxu1  ;;  %4327 = vmatprep.subr.bf16.mxu1 %v19308_v36 }
 0x2c6   :  { %v1994_v55 = vadd.f32 %v16300_v48, %v21326_v6  ;;  %4242 = vmatpush1.bf16.msra.mxu0 %v19273_v32  ;;  %v21445_v59 = vadd.f32 %v16361_v53, %v1991_v47  ;;  %v16364_v61 = vadd.f32 %v16363_v58, %v16362_v54  ;;  %v19330_v47 = vld [vmem:[%s23184_s29 + $0x568] ss:$48 sps:$4 sm:$0xff]   ;;  %v19338_v54 = vld [vmem:[%s23184_s29 + $0x5cc] ss:$48 sps:$4 sm:$0xff]  }
 0x2c7   :  { %4243 = vmatprep.subr.bf16.mxu0 %v19281_v46 }
 0x2c8   :  { %v16381_v5 = vpop.f32.mrb[64].mxu0  ;;  %v21449_v1 = vadd.f32 %v16364_v61, %v1994_v55  ;;  %4328 = vmatpush1.bf16.msra.mxu1 %v19306_v51  ;;  %v19303_v51 = vld [vmem:[%s23184_s29 + $0x5c0] ss:$48 sps:$4 sm:$0xff]   ;;  %v19336_v61 = vld [vmem:[%s23184_s29 + $0x5c8] ss:$48 sps:$4 sm:$0xff]  }
 0x2c9   :  { %v16382_v3 = vpop.f32.mrb[65].mxu0  ;;  %4329 = vmatprep.subr.bf16.mxu1 %v19314_v57  ;;  %v19311_v57 = vld [vmem:[%s23184_s29 + $0x624] ss:$48 sps:$4 sm:$0xff]  }
 0x2ca   :  { %v16383_v6 = vadd.f32 %v16382_v3, %v16381_v5  ;;  %4244 = vmatpush1.bf16.msra.mxu0 %v19279_v50  ;;  %v16384_v4 = vpop.f32.mrb[66].mxu0  ;;  %v2225_v11 = vpop.f32.mrb[64].mxu1 }
 0x2cb   :  { %v16385_v9 = vpop.f32.mrb[67].mxu0  ;;  %4245 = vmatprep.subr.bf16.mxu0 %v19287_v63  ;;  %v2227_v16 = vpop.f32.mrb[65].mxu1 }
 0x2cc   :  { %v16386_v13 = vadd.f32 %v16385_v9, %v16384_v4  ;;  %v2129_v15 = vadd.f32 %v16383_v6, %v21341_v28  ;;  %v2228_v19 = vpop.f32.mrb[66].mxu1  ;;  %4330 = vmatpush1.bf16.msra.mxu1 %v19312_v18  ;;  %v19317_v18 = vld [vmem:[%s23184_s29 + $0x684] ss:$48 sps:$4 sm:$0xff]   ;;  %v19344_v6 = vld [vmem:[%s23184_s29 + $0x62c] ss:$48 sps:$4 sm:$0xff]  }
 0x2cd   :  { %v2230_v23 = vpop.f32.mrb[67].mxu1  ;;  %4331 = vmatprep.subr.bf16.mxu1 %v19320_v10  ;;  %v19315_v16 = vld [vmem:[%s23184_s29 + $0x680] ss:$48 sps:$4 sm:$0xff]  }
 0x2ce   :  { %v21457_v21 = vadd.f32 %v2225_v11, %v2129_v15  ;;  %4246 = vmatpush1.bf16.msra.mxu0 %v19285_v14  ;;  %v2132_v22 = vadd.f32 %v16386_v13, %v21344_v37  ;;  %v19332_v37 = vld [vmem:[%s23184_s29 + $0x56c] ss:$48 sps:$4 sm:$0xff]   ;;  %v19309_v14 = vld [vmem:[%s23184_s29 + $0x620] ss:$48 sps:$4 sm:$0xff]   ;;  %v19348_v23 = vld [vmem:[%s23184_s29 + $0x688] ss:$48 sps:$4 sm:$0xff]  }
 0x2cf   :  { %4247 = vmatprep.subr.bf16.mxu0 %v19293_v12  ;;  %v19342_v12 = vld [vmem:[%s23184_s29 + $0x628] ss:$48 sps:$4 sm:$0xff]  }
 0x2d0   :  { %v21462_v28 = vadd.f32 %v2228_v19, %v2132_v22  ;;  %v16387_v29 = vpop.f32.mrb[68].mxu0  ;;  %4332 = vmatpush1.bf16.msra.mxu1 %v19318_v20  ;;  %v19350_v19 = vld [vmem:[%s23184_s29 + $0x68c] ss:$48 sps:$4 sm:$0xff]  }
 0x2d1   :  { %v16388_v30 = vpop.f32.mrb[69].mxu0  ;;  %4333 = vmatprep.subr.bf16.mxu1 %v19326_v24 }
 0x2d2   :  { %v16389_v32 = vadd.f32 %v16388_v30, %v16387_v29  ;;  %4248 = vmatpush1.bf16.msra.mxu0 %v19291_v17  ;;  %v16390_v35 = vpop.f32.mrb[70].mxu0  ;;  %v2233_v42 = vpop.f32.mrb[68].mxu1  ;;  %v19321_v29 = vld [vmem:[%s23184_s29 + $0x6e0] ss:$48 sps:$4 sm:$0xff]  }
 0x2d3   :  { %v16391_v36 = vpop.f32.mrb[71].mxu0  ;;  %4249 = vmatprep.subr.bf16.mxu0 %v19299_v25  ;;  %v2235_v46 = vpop.f32.mrb[69].mxu1 }
 0x2d4   :  { %v16392_v43 = vadd.f32 %v16391_v36, %v16390_v35  ;;  %v2137_v44 = vadd.f32 %v16389_v32, %v21355_v0  ;;  %v2236_v48 = vpop.f32.mrb[70].mxu1  ;;  %4334 = vmatpush1.bf16.msra.mxu1 %v19324_v33  ;;  %v19356_v33 = vld [vmem:[%s23184_s29 + $0x6ec] ss:$48 sps:$4 sm:$0xff]   ;;  %v19329_v35 = vld [vmem:[%s23184_s29 + $0x744] ss:$48 sps:$4 sm:$0xff]  }
 0x2d5   :  { %v2238_v53 = vpop.f32.mrb[71].mxu1  ;;  %4335 = vmatprep.subr.bf16.mxu1 %v19332_v37  ;;  %v19354_v36 = vld [vmem:[%s23184_s29 + $0x6e8] ss:$48 sps:$4 sm:$0xff]  }
 0x2d6   :  { %v21470_v49 = vadd.f32 %v2233_v42, %v2137_v44  ;;  %4250 = vmatpush1.bf16.msra.mxu0 %v19297_v56  ;;  %v2140_v50 = vadd.f32 %v16392_v43, %v21358_v7  ;;  %v19327_v44 = vld [vmem:[%s23184_s29 + $0x740] ss:$48 sps:$4 sm:$0xff]  }
 0x2d7   :  { %4251 = vmatprep.subr.bf16.mxu0 %v19305_v38 }
 0x2d8   :  { %v21476_v0 = vadd.f32 %v2236_v48, %v2140_v50  ;;  %v16393_v55 = vpop.f32.mrb[72].mxu0  ;;  %4336 = vmatpush1.bf16.msra.mxu1 %v19330_v47  ;;  %v19362_v47 = vld [vmem:[%s23184_s29 + $0x74c] ss:$48 sps:$4 sm:$0xff]   ;;  %v19335_v48 = vld [vmem:[%s23184_s29 + $0x7a4] ss:$48 sps:$4 sm:$0xff]  }
 0x2d9   :  { %v16394_v58 = vpop.f32.mrb[73].mxu0  ;;  %4337 = vmatprep.subr.bf16.mxu1 %v19338_v54  ;;  %v19360_v54 = vld [vmem:[%s23184_s29 + $0x748] ss:$48 sps:$4 sm:$0xff]  }
 0x2da   :  { %v16395_v63 = vadd.f32 %v16394_v58, %v16393_v55  ;;  %4252 = vmatpush1.bf16.msra.mxu0 %v19303_v51  ;;  %v16396_v5 = vpop.f32.mrb[74].mxu0  ;;  %v2241_v3 = vpop.f32.mrb[72].mxu1  ;;  %v19333_v51 = vld [vmem:[%s23184_s29 + $0x7a0] ss:$48 sps:$4 sm:$0xff]   ;;  %v19368_v58 = vld [vmem:[%s23184_s29 + $0x7ac] ss:$48 sps:$4 sm:$0xff]  }
 0x2db   :  { %v16397_v7 = vpop.f32.mrb[75].mxu0  ;;  %4264 = vmatprep.subr.bf16.mxu0 %v19311_v57  ;;  %v2243_v9 = vpop.f32.mrb[73].mxu1 }
 0x2dc   :  { %v16398_v4 = vadd.f32 %v16397_v7, %v16396_v5  ;;  %v2145_v10 = vadd.f32 %v16395_v63, %v21371_v41  ;;  %v2244_v11 = vpop.f32.mrb[74].mxu1  ;;  %4338 = vmatpush1.bf16.msra.mxu1 %v19336_v61  ;;  %v19323_v41 = vld [vmem:[%s23184_s29 + $0x6e4] ss:$48 sps:$4 sm:$0xff]  }
 0x2dd   :  { %4254 = vmatmul.mubr.bf16.vlgmr.msra.gmra.mrb[104].mxu0 %v21172_v2  ;;  %v2246_v17 = vpop.f32.mrb[75].mxu1  ;;  %4350 = vmatprep.subr.bf16.mxu1 %v19344_v6 }
 0x2de   :  { %v21485_v13 = vadd.f32 %v2241_v3, %v2145_v10  ;;  %4265 = vmatpush1.bf16.msra.mxu0 %v19309_v14  ;;  %v2148_v15 = vadd.f32 %v16398_v4, %v21377_v45  ;;  %4296 = vmatprep.mubr.bf16.mxu0 %v20544_v34  ;;  %v19339_v10 = vld [vmem:[%s23187_s20] ss:$12 sps:$4 sm:$0xff]   ;;  %v19345_v17 = vld [vmem:[%s23187_s20 + $0x18] ss:$12 sps:$4 sm:$0xff]  }
 0x2df   :  { %4266 = vmatprep.subr.bf16.mxu0 %v19317_v18  ;;  %4340 = vmatmul.mubr.bf16.vlgmr.msra.gmra.mrb[104].mxu1 %v21172_v2  ;;  %v19366_v18 = vld [vmem:[%s23184_s29 + $0x7a8] ss:$48 sps:$4 sm:$0xff]   ;;  %s23218_s29 = sld [smem:[#allocation43_spill]] }
 0x2e0   :  { %v21492_v20 = vadd.f32 %v2244_v11, %v2148_v15  ;;  %v16399_v22 = vpop.f32.mrb[76].mxu0  ;;  %4351 = vmatpush1.bf16.msra.mxu1 %v19342_v12  ;;  %4382 = vmatprep.mubr.bf16.mxu1 %v20544_v34  ;;  %v19372_v11 = vld [vmem:[%s23187_s20 + $0xc8] ss:$12 sps:$4 sm:$0xff]  }
 0x2e1   :  { %v16400_v24 = vpop.f32.mrb[77].mxu0  ;;  %4352 = vmatprep.subr.bf16.mxu1 %v19350_v19  ;;  %v19347_v12 = vld [vmem:[%s23187_s20 + $0x1c] ss:$12 sps:$4 sm:$0xff]  }
 0x2e2   :  { %v16401_v45 = vadd.f32 %v16400_v24, %v16399_v22  ;;  %4267 = vmatpush1.bf16.msra.mxu0 %v19315_v16  ;;  %v16402_v25 = vpop.f32.mrb[78].mxu0  ;;  %v2249_v32 = vpop.f32.mrb[76].mxu1  ;;  %v19373_v19 = vld [vmem:[%s23187_s20 + $0x8] ss:$12 sps:$4 sm:$0xff]   ;;  %v19377_v22 = vld [vmem:[%s23187_s20 + $0xe0] ss:$12 sps:$4 sm:$0xff]  }
 0x2e3   :  { %v16403_v30 = vpop.f32.mrb[79].mxu0  ;;  %4268 = vmatprep.subr.bf16.mxu0 %v19323_v41  ;;  %v2251_v37 = vpop.f32.mrb[77].mxu1 }
 0x2e4   :  { %v16404_v2 = vadd.f32 %v16403_v30, %v16402_v25  ;;  %v2153_v56 = vadd.f32 %v16401_v45, %v21389_v62  ;;  %v2252_v42 = vpop.f32.mrb[78].mxu1  ;;  %4353 = vmatpush1.bf16.msra.mxu1 %v19348_v23  ;;  %v19353_v45 = vld [vmem:[%s23187_s20 + $0x34] ss:$12 sps:$4 sm:$0xff]  }
 0x2e5   :  { %v2254_v46 = vpop.f32.mrb[79].mxu1  ;;  %4354 = vmatprep.subr.bf16.mxu1 %v19356_v33 }
 0x2e6   :  { %v21502_v38 = vadd.f32 %v2249_v32, %v2153_v56  ;;  %4269 = vmatpush1.bf16.msra.mxu0 %v19321_v29  ;;  %v2156_v43 = vadd.f32 %v16404_v2, %v21393_v31  ;;  %v19341_v31 = vld [vmem:[%s23187_s20 + $0x4] ss:$12 sps:$4 sm:$0xff]  }
 0x2e7   :  { %4270 = vmatprep.subr.bf16.mxu0 %v19329_v35  ;;  %v19351_v32 = vld [vmem:[%s23187_s20 + $0x30] ss:$12 sps:$4 sm:$0xff]   ;;  %v19378_v35 = vld [vmem:[%s23187_s20 + $0x20] ss:$12 sps:$4 sm:$0xff]   ;;  %v19383_v46 = vld [vmem:[%s23187_s20 + $0x38] ss:$12 sps:$4 sm:$0xff]  }
 0x2e8   :  { %v21508_v62 = vadd.f32 %v2252_v42, %v2156_v43  ;;  %v16405_v50 = vpop.f32.mrb[80].mxu0  ;;  %4355 = vmatpush1.bf16.msra.mxu1 %v19354_v36  ;;  %v19382_v36 = vld [vmem:[%s23187_s20 + $0xf8] ss:$12 sps:$4 sm:$0xff]   ;;  %v19357_v43 = vld [vmem:[%s23187_s20 + $0x48] ss:$12 sps:$4 sm:$0xff]  }
 0x2e9   :  { %v16406_v53 = vpop.f32.mrb[81].mxu0  ;;  %4356 = vmatprep.subr.bf16.mxu1 %v19362_v47  ;;  %v19387_v47 = vld [vmem:[%s23187_s20 + $0x110] ss:$12 sps:$4 sm:$0xff]  }
 0x2ea   :  { %v16407_v57 = vadd.f32 %v16406_v53, %v16405_v50  ;;  %4271 = vmatpush1.bf16.msra.mxu0 %v19327_v44  ;;  %v16408_v55 = vpop.f32.mrb[82].mxu0  ;;  %v2257_v63 = vpop.f32.mrb[80].mxu1  ;;  %v19365_v53 = vld [vmem:[%s23187_s20 + $0x64] ss:$12 sps:$4 sm:$0xff]  }
 0x2eb   :  { %v16409_v61 = vpop.f32.mrb[83].mxu0  ;;  %4272 = vmatprep.subr.bf16.mxu0 %v19335_v48  ;;  %v2259_v7 = vpop.f32.mrb[81].mxu1 }
 0x2ec   :  { %v16410_v5 = vadd.f32 %v16409_v61, %v16408_v55  ;;  %v2161_v14 = vadd.f32 %v16407_v57, %v21403_v52  ;;  %v2260_v3 = vpop.f32.mrb[82].mxu1  ;;  %4357 = vmatpush1.bf16.msra.mxu1 %v19360_v54  ;;  %v19388_v61 = vld [vmem:[%s23187_s20 + $0x50] ss:$12 sps:$4 sm:$0xff]  }
 0x2ed   :  { %v2262_v9 = vpop.f32.mrb[83].mxu1  ;;  %4358 = vmatprep.subr.bf16.mxu1 %v19368_v58 }
 0x2ee   :  { %v21516_v6 = vadd.f32 %v2257_v63, %v2161_v14  ;;  %4273 = vmatpush1.bf16.msra.mxu0 %v19333_v51  ;;  %v2164_v4 = vadd.f32 %v16410_v5, %v21407_v39  ;;  %v19392_v63 = vld [vmem:[%s23187_s20 + $0x128] ss:$12 sps:$4 sm:$0xff]  }
 0x2ef   :  { %6366 = vmatprep.subr.bf16.mxu0 %v19341_v31  ;;  %v19363_v31 = vld [vmem:[%s23187_s20 + $0x60] ss:$12 sps:$4 sm:$0xff]  }
 0x2f0   :  { %v21522_v52 = vadd.f32 %v2260_v3, %v2164_v4  ;;  %v16411_v15 = vpop.f32.mrb[84].mxu0  ;;  %4359 = vmatpush1.bf16.msra.mxu1 %v19366_v18  ;;  %v19371_v3 = vld [vmem:[%s23187_s20 + $0x7c] ss:$12 sps:$4 sm:$0xff]   ;;  %v19369_v4 = vld [vmem:[%s23187_s20 + $0x78] ss:$12 sps:$4 sm:$0xff]  }
 0x2f1   :  { %15171 = vmatmul.mubr.msk.bf16.vlgmr.msra.gmra.mrb[104].mxu0 %vm3873_vm1, %v21202_v26  ;;  %v16412_v16 = vpop.f32.mrb[85].mxu0  ;;  %16429 = vmatprep.subr.bf16.mxu1 %v19372_v11  ;;  %v19376_v9 = vld [vmem:[%s23187_s20 + $0x94] ss:$12 sps:$4 sm:$0xff]  }
 0x2f2   :  { %v16413_v39 = vadd.f32 %v16412_v16, %v16411_v15  ;;  %6367 = vmatpush1.bf16.msra.mxu0 %v19339_v10  ;;  %v16414_v41 = vpop.f32.mrb[86].mxu0  ;;  %v2265_v24 = vpop.f32.mrb[84].mxu1  ;;  %v19393_v11 = vld [vmem:[%s23187_s20 + $0x68] ss:$12 sps:$4 sm:$0xff]  }
 0x2f3   :  { %v16415_v23 = vpop.f32.mrb[87].mxu0  ;;  %6368 = vmatprep.subr.bf16.mxu0 %v19347_v12  ;;  %v2267_v33 = vpop.f32.mrb[85].mxu1  ;;  %15172 = vmatmul.mubr.msk.bf16.vlgmr.msra.gmra.mrb[104].mxu1 %vm3873_vm1, %v21202_v26 }
 0x2f4   :  { %v16416_v25 = vadd.f32 %v16415_v23, %v16414_v41  ;;  %v2169_v29 = vadd.f32 %v16413_v39, %v21417_v60  ;;  %v2268_v30 = vpop.f32.mrb[86].mxu1  ;;  %16430 = vmatpush3.bf16.msra.mxu1 %v19373_v19  ;;  %v19359_v60 = vld [vmem:[%s23187_s20 + $0x4c] ss:$12 sps:$4 sm:$0xff]  }
 0x2f5   :  { %v2270_v37 = vpop.f32.mrb[87].mxu1  ;;  %16431 = vmatprep.subr.bf16.mxu1 %v19377_v22  ;;  %v19374_v22 = vld [vmem:[%s23187_s20 + $0x90] ss:$12 sps:$4 sm:$0xff]  }
 0x2f6   :  { %v21535_v2 = vadd.f32 %v2265_v24, %v2169_v29  ;;  %6369 = vmatpush1.bf16.msra.mxu0 %v19345_v17  ;;  %v2172_v56 = vadd.f32 %v16416_v25, %v21422_v8  ;;  %v19398_v24 = vld [vmem:[%s23187_s20 + $0x80] ss:$12 sps:$4 sm:$0xff]   ;;  %v19402_v29 = vld [vmem:[%s23187_s20 + $0x158] ss:$12 sps:$4 sm:$0xff]  }
 0x2f7   :  { %6370 = vmatprep.subr.bf16.mxu0 %v19353_v45  ;;  %v19386_v37 = vld [vmem:[%s23187_s20 + $0xc4] ss:$12 sps:$4 sm:$0xff]  }
 0x2f8   :  { %v21540_v42 = vadd.f32 %v2268_v30, %v2172_v56  ;;  %v16417_v26 = vpop.f32.mrb[88].mxu0  ;;  %16432 = vmatpush3.bf16.msra.mxu1 %v19378_v35  ;;  %v19379_v35 = vld [vmem:[%s23187_s20 + $0xa8] ss:$12 sps:$4 sm:$0xff]   ;;  %v19407_v56 = vld [vmem:[%s23187_s20 + $0x170] ss:$12 sps:$4 sm:$0xff]  }
 0x2f9   :  { %v16418_v44 = vpop.f32.mrb[89].mxu0  ;;  %16433 = vmatprep.subr.bf16.mxu1 %v19382_v36  ;;  %v19391_v36 = vld [vmem:[%s23187_s20 + $0xdc] ss:$12 sps:$4 sm:$0xff]  }
 0x2fa   :  { %v16419_v48 = vadd.f32 %v16418_v44, %v16417_v26  ;;  %6371 = vmatpush1.bf16.msra.mxu0 %v19351_v32  ;;  %v16420_v8 = vpop.f32.mrb[90].mxu0  ;;  %v2273_v51 = vpop.f32.mrb[88].mxu1  ;;  %v19403_v32 = vld [vmem:[%s23187_s20 + $0x98] ss:$12 sps:$4 sm:$0xff]   ;;  %v19408_v26 = vld [vmem:[%s23187_s20 + $0xb0] ss:$12 sps:$4 sm:$0xff]  }
 0x2fb   :  { %v16421_v50 = vpop.f32.mrb[91].mxu0  ;;  %6372 = vmatprep.subr.bf16.mxu0 %v19359_v60  ;;  %v2275_v55 = vpop.f32.mrb[89].mxu1  ;;  %v2553_v60 = vlaneseq }
 0x2fc   :  { %v16422_v54 = vadd.f32 %v16421_v50, %v16420_v8  ;;  %v2177_v57 = vadd.f32 %v16419_v48, %v21431_v27  ;;  %v2276_v58 = vpop.f32.mrb[90].mxu1  ;;  %16434 = vmatpush3.bf16.msra.mxu1 %v19383_v46  ;;  %v19389_v46 = vld [vmem:[%s23187_s20 + $0xd8] ss:$12 sps:$4 sm:$0xff]   ;;  %v19394_v50 = vld [vmem:[%s23187_s20 + $0xf0] ss:$12 sps:$4 sm:$0xff]  }
 0x2fd   :  { %v2278_v7 = vpop.f32.mrb[91].mxu1  ;;  %16435 = vmatprep.subr.bf16.mxu1 %v19387_v47  ;;  %v21578_v44 = vshrl.u32 %v2553_v60, 7  ;;  %v19396_v47 = vld [vmem:[%s23187_s20 + $0xf4] ss:$12 sps:$4 sm:$0xff]  }
 0x2fe   :  { %v21550_v5 = vadd.f32 %v2273_v51, %v2177_v57  ;;  %6373 = vmatpush1.bf16.msra.mxu0 %v19357_v43  ;;  %v2180_v14 = vadd.f32 %v16422_v54, %v21436_v40  ;;  %v19397_v40 = vld [vmem:[%s23187_s20 + $0x140] ss:$12 sps:$4 sm:$0xff]   ;;  %v19412_v43 = vld [vmem:[%s23187_s20 + $0x248] ss:$12 sps:$4 sm:$0xff]  }
 0x2ff   :  { %6374 = vmatprep.subr.bf16.mxu0 %v19365_v53  ;;  %v21583_v48 = vld [vmem:[%s23188_s21] sm:$0xff]  ;;  %v21586_v8 = vsub.s32 0, %v21578_v44  ;;  %v21590_v51 = vsub.s32 1, %v21578_v44  ;;  %v19401_v53 = vld [vmem:[%s23187_s20 + $0x10c] ss:$12 sps:$4 sm:$0xff]   ;;  %v21595_v57 = vsub.s32 2, %v21578_v44 }
 0x300   :  { %v21554_v27 = vadd.f32 %v2276_v58, %v2180_v14  ;;  %v16423_v18 = vpop.f32.mrb[92].mxu0  ;;  %16436 = vmatpush3.bf16.msra.mxu1 %v19388_v61  ;;  %v19399_v54 = vld [vmem:[%s23187_s20 + $0x108] ss:$12 sps:$4 sm:$0xff]   ;;  %v21601_v58 = vsub.s32 3, %v21578_v44 }
 0x301   :  { %v16424_v10 = vpop.f32.mrb[93].mxu0  ;;  %16437 = vmatprep.subr.bf16.mxu1 %v19392_v63  ;;  %v2556_v55 = vrot.slane %v21583_v48, %v21586_v8  ;;  %v2560_v61 = vrot.slane %v21583_v48, %v21590_v51  ;;  %v2564_v14 = vrot.slane %v21583_v48, %v21595_v57 }
 0x302   :  { %v16425_v12 = vadd.f32 %v16424_v10, %v16423_v18  ;;  %6375 = vmatpush1.bf16.msra.mxu0 %v19363_v31  ;;  %v16426_v15 = vpop.f32.mrb[94].mxu0  ;;  %v2281_v17 = vpop.f32.mrb[92].mxu1  ;;  %v19406_v31 = vld [vmem:[%s23187_s20 + $0x124] ss:$12 sps:$4 sm:$0xff]   ;;  %v2568_v18 = vrot.slane %v21583_v48, %v21601_v58 }
 0x303   :  { %v16427_v16 = vpop.f32.mrb[95].mxu0  ;;  %6376 = vmatprep.subr.bf16.mxu0 %v19371_v3  ;;  %v2283_v41 = vpop.f32.mrb[93].mxu1 }
 0x304   :  { %v16428_v19 = vadd.f32 %v16427_v16, %v16426_v15  ;;  %v2185_v39 = vadd.f32 %v16425_v12, %v21445_v59  ;;  %v2284_v23 = vpop.f32.mrb[94].mxu1  ;;  %16438 = vmatpush3.bf16.msra.mxu1 %v19393_v11  ;;  %v19381_v59 = vld [vmem:[%s23187_s20 + $0xac] ss:$12 sps:$4 sm:$0xff]   ;;  %v19411_v11 = vld [vmem:[%s23187_s20 + $0x13c] ss:$12 sps:$4 sm:$0xff]  }
 0x305   :  { %16439 = vmatprep.subr.bf16.mxu1 %v19397_v40  ;;  %v2286_v33 = vpop.f32.mrb[95].mxu1 }
 0x306   :  { %v21563_v45 = vadd.f32 %v2281_v17, %v2185_v39  ;;  %6377 = vmatpush1.bf16.msra.mxu0 %v19369_v4  ;;  %v2188_v25 = vadd.f32 %v16428_v19, %v21449_v1  ;;  %v19384_v1 = vld [vmem:[%s23187_s20 + $0xc0] ss:$12 sps:$4 sm:$0xff]   ;;  %v19409_v19 = vld [vmem:[%s23187_s20 + $0x138] ss:$12 sps:$4 sm:$0xff]  }
 0x307   :  { %6378 = vmatprep.subr.bf16.mxu0 %v19376_v9  ;;  %v19404_v9 = vld [vmem:[%s23187_s20 + $0x120] ss:$12 sps:$4 sm:$0xff]  }
 0x308   :  { %v21568_v30 = vadd.f32 %v2284_v23, %v2188_v25  ;;  %16440 = vmatpush3.bf16.msra.mxu1 %v19398_v24 }
 0x309   :  { %16441 = vmatprep.subr.bf16.mxu1 %v19402_v29 }
 0x30a   :  { %6379 = vmatpush1.bf16.msra.mxu0 %v19374_v22 }
 0x30b   :  { %6380 = vmatprep.subr.bf16.mxu0 %v19381_v59 }
 0x30c   :  { %16442 = vmatpush3.bf16.msra.mxu1 %v19403_v32 }
 0x30d   :  { %16443 = vmatprep.subr.bf16.mxu1 %v19407_v56  ;;  %v19413_v56 = vld [vmem:[%s23187_s20 + $0x188] ss:$12 sps:$4 sm:$0xff]  }
 0x30e   :  { %6381 = vmatpush1.bf16.msra.mxu0 %v19379_v35 }
 0x30f   :  { %6382 = vmatprep.subr.bf16.mxu0 %v19386_v37  ;;  %v19416_v37 = vld [vmem:[%s23187_s20 + $0x154] ss:$12 sps:$4 sm:$0xff]  }
 0x310   :  { %16444 = vmatpush3.bf16.msra.mxu1 %v19408_v26  ;;  %v19414_v26 = vld [vmem:[%s23187_s20 + $0x150] ss:$12 sps:$4 sm:$0xff]  }
 0x311   :  { %16451 = vmatprep.subr.bf16.mxu1 %v19412_v43 }
 0x312   :  { %6383 = vmatpush1.bf16.msra.mxu0 %v19384_v1 }
 0x313   :  { %6384 = vmatprep.subr.bf16.mxu0 %v19391_v36 }
 0x316   :  { %6385 = vmatpush1.bf16.msra.mxu0 %v19389_v46 }
 0x317   :  { %6386 = vmatprep.subr.bf16.mxu0 %v19396_v47  ;;  %v19417_v47 = vld [vmem:[%s23187_s20 + $0x260] ss:$12 sps:$4 sm:$0xff]  }
 0x31a   :  { %6387 = vmatpush1.bf16.msra.mxu0 %v19394_v50  ;;  %v19421_v50 = vld [vmem:[%s23187_s20 + $0x16c] ss:$12 sps:$4 sm:$0xff]  }
 0x31b   :  { %6388 = vmatprep.subr.bf16.mxu0 %v19401_v53 }
 0x31c   :  { %v3954_v63 = vpop.f32.mrb[96].mxu0 }
 0x31d   :  { %v18551_v7 = vadd.f32 %v3954_v63, %v2556_v55  ;;  %v3956_v3 = vpop.f32.mrb[97].mxu0  ;;  %v19426_v63 = vld [vmem:[%s23187_s20 + $0x184] ss:$12 sps:$4 sm:$0xff]  }
 0x31e   :  { %v18552_v4 = vadd.f32 %v3956_v3, %v2560_v61  ;;  %v3958_v10 = vpop.f32.mrb[98].mxu0  ;;  %6389 = vmatpush1.bf16.msra.mxu0 %v19399_v54  ;;  %v4040_v40 = vpop.f32.mrb[96].mxu1  ;;  %v19418_v54 = vld [vmem:[%s23187_s20 + $0x1a0] ss:$12 sps:$4 sm:$0xff]   ;;  %v19427_v3 = vld [vmem:[%s23187_s20 + $0x290] ss:$12 sps:$4 sm:$0xff]  }
 0x31f   :  { %v18553_v12 = vadd.f32 %v3958_v10, %v2556_v55  ;;  %v3960_v15 = vpop.f32.mrb[99].mxu0  ;;  %6390 = vmatprep.subr.bf16.mxu0 %v19406_v31  ;;  %v4393_v16 = vmax.f32 %v18551_v7, 0.0  ;;  %v18555_v39 = vadd.f32 %v4040_v40, %v2564_v14  ;;  %v4042_v41 = vpop.f32.mrb[97].mxu1  ;;  %v19419_v31 = vld [vmem:[%s23187_s20 + $0x168] ss:$12 sps:$4 sm:$0xff]  }
 0x320   :  { %v18554_v17 = vadd.f32 %v3960_v15, %v2560_v61  ;;  %v18556_v23 = vadd.f32 %v4042_v41, %v2568_v18  ;;  %v4044_v24 = vpop.f32.mrb[98].mxu1  ;;  %v4394_v25 = vmax.f32 %v18552_v4, 0.0  ;;  %v19422_v61 = vld [vmem:[%s23187_s20 + $0x278] ss:$12 sps:$4 sm:$0xff]   ;;  %v19424_v7 = vld [vmem:[%s23187_s20 + $0x180] ss:$12 sps:$4 sm:$0xff]  }
 0x321   :  { %v4405_v22 = vmax.f32 %v18553_v12, 0.0  ;;  %v4395_v33 = vmax.f32 %v18555_v39, 0.0  ;;  %v18557_v59 = vadd.f32 %v4044_v24, %v2564_v14  ;;  %v4046_v32 = vpop.f32.mrb[99].mxu1  ;;  %v19423_v14 = vld [vmem:[%s23187_s20 + $0x1b8] ss:$12 sps:$4 sm:$0xff]  }
 0x322   :  { %v4406_v29 = vmax.f32 %v18554_v17, 0.0  ;;  %6391 = vmatpush1.bf16.msra.mxu0 %v19404_v9  ;;  %v4396_v1 = vmax.f32 %v18556_v23, 0.0  ;;  %v18558_v36 = vadd.f32 %v4046_v32, %v2568_v18  ;;  %v19431_v18 = vld [vmem:[%s23187_s20 + $0x19c] ss:$12 sps:$4 sm:$0xff]   ;;  %v19429_v10 = vld [vmem:[%s23187_s20 + $0x198] ss:$12 sps:$4 sm:$0xff]  }
 0x323   :  { %v4801_v35 = vpack.c.bf16 %v4405_v22, %v4393_v16  ;;  %6392 = vmatprep.subr.bf16.mxu0 %v19411_v11  ;;  %v4407_v43 = vmax.f32 %v18557_v59, 0.0  ;;  %v19428_v4 = vld [vmem:[%s23187_s20 + $0x1d0] ss:$12 sps:$4 sm:$0xff]   ;;  %v19432_v9 = vld [vmem:[%s23187_s20 + $0x2a8] ss:$12 sps:$4 sm:$0xff]  }
 0x324   :  { %v4802_v60 = vpack.c.bf16 %v4406_v29, %v4394_v25  ;;  %v4408_v46 = vmax.f32 %v18558_v36, 0.0  ;;  %v19433_v11 = vld [vmem:[%s23187_s20 + $0x1e8] ss:$12 sps:$4 sm:$0xff]   ;;  %v19434_v15 = vld [vmem:[%s23187_s20 + $0x1b0] ss:$12 sps:$4 sm:$0xff]  }
 0x325   :  { %v21617_v53 = vpack.c.bf16 %v4407_v43, %v4395_v33  ;;  %v19436_v12 = vld [vmem:[%s23187_s20 + $0x1b4] ss:$12 sps:$4 sm:$0xff]   ;;  %v19441_v17 = vld [vmem:[%s23187_s20 + $0x1cc] ss:$12 sps:$4 sm:$0xff]   ;;  %v19446_v22 = vld [vmem:[%s23187_s20 + $0x1e4] ss:$12 sps:$4 sm:$0xff]  }
 0x326   :  { %6393 = vmatpush1.bf16.msra.mxu0 %v19409_v19  ;;  %6398 = vmatprep.mubr.bf16.mxu0 %v4802_v60  ;;  %v4804_v55 = vpack.c.bf16 %v4408_v46, %v4396_v1  ;;  %v19437_v40 = vld [vmem:[%s23187_s20 + $0x2c0] ss:$12 sps:$4 sm:$0xff]   ;;  %v19439_v19 = vld [vmem:[%s23187_s20 + $0x1c8] ss:$12 sps:$4 sm:$0xff]   ;;  %v19442_v39 = vld [vmem:[%s23187_s20 + $0x2d8] ss:$12 sps:$4 sm:$0xff]  }
 0x327   :  { %6656 = vmatprep.mubr.bf16.mxu1 %v4802_v60  ;;  %6394 = vmatprep.subr.bf16.mxu0 %v19416_v37  ;;  %v19438_v16 = vld [vmem:[%s23187_s20 + $0x200] ss:$12 sps:$4 sm:$0xff]   ;;  %v19443_v41 = vld [vmem:[%s23187_s20 + $0x218] ss:$12 sps:$4 sm:$0xff]   ;;  %v19447_v24 = vld [vmem:[%s23187_s20 + $0x2f0] ss:$12 sps:$4 sm:$0xff]  }
 0x328   :  { %6657 = vmatmul.mubr.bf16.vlgmr.msra.gmra.mrb[108].mxu1 %v4801_v35  ;;  %v19444_v23 = vld [vmem:[%s23187_s20 + $0x1e0] ss:$12 sps:$4 sm:$0xff]   ;;  %v19448_v25 = vld [vmem:[%s23187_s20 + $0x230] ss:$12 sps:$4 sm:$0xff]   ;;  %v19449_v33 = vld [vmem:[%s23187_s20 + $0x1f8] ss:$12 sps:$4 sm:$0xff]  }
 0x329   :  { %16452 = vmatpush3.bf16.msra.mxu1 %v19413_v56  ;;  %6697 = vmatprep.mubr.bf16.mxu1 %v4804_v55  ;;  %v19451_v29 = vld [vmem:[%s23187_s20 + $0x1fc] ss:$12 sps:$4 sm:$0xff]   ;;  %v19454_v59 = vld [vmem:[%s23187_s20 + $0x214] ss:$12 sps:$4 sm:$0xff]   ;;  %v19457_v1 = vld [vmem:[%s23187_s20 + $0x22c] ss:$12 sps:$4 sm:$0xff]  }
 0x32a   :  { %6395 = vmatpush1.bf16.msra.mxu0 %v19414_v26  ;;  %16453 = vmatprep.subr.bf16.mxu1 %v19417_v47  ;;  %v19467_v32 = vld [vmem:[%s23187_s20 + $0x3c8] ss:$12 sps:$4 sm:$0xff]   ;;  %v19452_v56 = vld [vmem:[%s23187_s20 + $0x210] ss:$12 sps:$4 sm:$0xff]   ;;  %v19472_v37 = vld [vmem:[%s23187_s20 + $0x3e0] ss:$12 sps:$4 sm:$0xff]  }
 0x32b   :  { %6396 = vmatprep.subr.bf16.mxu0 %v19421_v50  ;;  %v19473_v36 = vld [vmem:[%s23187_s20 + $0x320] ss:$12 sps:$4 sm:$0xff]   ;;  %v19455_v60 = vld [vmem:[%s23187_s20 + $0x228] ss:$12 sps:$4 sm:$0xff]   ;;  %v19477_v26 = vld [vmem:[%s23187_s20 + $0x3f8] ss:$12 sps:$4 sm:$0xff]  }
 0x32c   :  { %v19460_v43 = vld [vmem:[%s23187_s20 + $0x244] ss:$12 sps:$4 sm:$0xff]   ;;  %v19458_v46 = vld [vmem:[%s23187_s20 + $0x240] ss:$12 sps:$4 sm:$0xff]  }
 0x32d   :  { %16454 = vmatpush3.bf16.msra.mxu1 %v19418_v54  ;;  %v19478_v47 = vld [vmem:[%s23187_s20 + $0x338] ss:$12 sps:$4 sm:$0xff]   ;;  %v19482_v50 = vld [vmem:[%s23187_s20 + $0x410] ss:$12 sps:$4 sm:$0xff]  }
 0x32e   :  { %6397 = vmatpush1.bf16.msra.mxu0 %v19419_v31  ;;  %16455 = vmatprep.subr.bf16.mxu1 %v19422_v61  ;;  %v19463_v54 = vld [vmem:[%s23187_s20 + $0x25c] ss:$12 sps:$4 sm:$0xff]   ;;  %v19466_v61 = vld [vmem:[%s23187_s20 + $0x274] ss:$12 sps:$4 sm:$0xff]  }
 0x32f   :  { %6409 = vmatprep.subr.bf16.mxu0 %v19426_v63  ;;  %v19483_v31 = vld [vmem:[%s23187_s20 + $0x350] ss:$12 sps:$4 sm:$0xff]   ;;  %v19487_v63 = vld [vmem:[%s23187_s20 + $0x428] ss:$12 sps:$4 sm:$0xff]  }
 0x331   :  { %16456 = vmatpush3.bf16.msra.mxu1 %v19423_v14  ;;  %6399 = vmatmul.mubr.bf16.vlgmr.msra.gmra.mrb[108].mxu0 %v4801_v35  ;;  %v19468_v35 = vld [vmem:[%s23187_s20 + $0x308] ss:$12 sps:$4 sm:$0xff]   ;;  %v19464_v14 = vld [vmem:[%s23187_s20 + $0x270] ss:$12 sps:$4 sm:$0xff]  }
 0x332   :  { %6410 = vmatpush1.bf16.msra.mxu0 %v19424_v7  ;;  %16457 = vmatprep.subr.bf16.mxu1 %v19427_v3  ;;  %v19488_v7 = vld [vmem:[%s23187_s20 + $0x368] ss:$12 sps:$4 sm:$0xff]   ;;  %v19471_v3 = vld [vmem:[%s23187_s20 + $0x28c] ss:$12 sps:$4 sm:$0xff]  }
 0x333   :  { %6411 = vmatprep.subr.bf16.mxu0 %v19431_v18  ;;  %6441 = vmatprep.mubr.bf16.mxu0 %v4804_v55  ;;  %v19461_v55 = vld [vmem:[%s23187_s20 + $0x258] ss:$12 sps:$4 sm:$0xff]   ;;  %v19492_v18 = vld [vmem:[%s23187_s20 + $0x440] ss:$12 sps:$4 sm:$0xff]  }
 0x335   :  { %16458 = vmatpush3.bf16.msra.mxu1 %v19428_v4  ;;  %v19469_v4 = vld [vmem:[%s23187_s20 + $0x288] ss:$12 sps:$4 sm:$0xff]  }
 0x336   :  { %6412 = vmatpush1.bf16.msra.mxu0 %v19429_v10  ;;  %16459 = vmatprep.subr.bf16.mxu1 %v19432_v9  ;;  %v19493_v10 = vld [vmem:[%s23187_s20 + $0x380] ss:$12 sps:$4 sm:$0xff]   ;;  %v19476_v9 = vld [vmem:[%s23187_s20 + $0x2a4] ss:$12 sps:$4 sm:$0xff]  }
 0x337   :  { %6413 = vmatprep.subr.bf16.mxu0 %v19436_v12  ;;  %v19474_v12 = vld [vmem:[%s23187_s20 + $0x2a0] ss:$12 sps:$4 sm:$0xff]  }
 0x339   :  { %16460 = vmatpush3.bf16.msra.mxu1 %v19433_v11  ;;  %v19497_v11 = vld [vmem:[%s23187_s20 + $0x458] ss:$12 sps:$4 sm:$0xff]  }
 0x33a   :  { %6414 = vmatpush1.bf16.msra.mxu0 %v19434_v15  ;;  %16461 = vmatprep.subr.bf16.mxu1 %v19437_v40  ;;  %v19498_v15 = vld [vmem:[%s23187_s20 + $0x398] ss:$12 sps:$4 sm:$0xff]   ;;  %v19481_v40 = vld [vmem:[%s23187_s20 + $0x2bc] ss:$12 sps:$4 sm:$0xff]  }
 0x33b   :  { %6415 = vmatprep.subr.bf16.mxu0 %v19441_v17  ;;  %v19479_v17 = vld [vmem:[%s23187_s20 + $0x2b8] ss:$12 sps:$4 sm:$0xff]  }
 0x33d   :  { %16462 = vmatpush3.bf16.msra.mxu1 %v19438_v16  ;;  %v19502_v16 = vld [vmem:[%s23187_s20 + $0x470] ss:$12 sps:$4 sm:$0xff]  }
 0x33e   :  { %6416 = vmatpush1.bf16.msra.mxu0 %v19439_v19  ;;  %16463 = vmatprep.subr.bf16.mxu1 %v19442_v39  ;;  %v19503_v19 = vld [vmem:[%s23187_s20 + $0x3b0] ss:$12 sps:$4 sm:$0xff]   ;;  %v19486_v39 = vld [vmem:[%s23187_s20 + $0x2d4] ss:$12 sps:$4 sm:$0xff]  }
 0x33f   :  { %6417 = vmatprep.subr.bf16.mxu0 %v19446_v22  ;;  %v19484_v22 = vld [vmem:[%s23187_s20 + $0x2d0] ss:$12 sps:$4 sm:$0xff]  }
 0x341   :  { %16464 = vmatpush3.bf16.msra.mxu1 %v19443_v41  ;;  %v19507_v41 = vld [vmem:[%s23187_s20 + $0x548] ss:$12 sps:$4 sm:$0xff]  }
 0x342   :  { %6418 = vmatpush1.bf16.msra.mxu0 %v19444_v23  ;;  %16465 = vmatprep.subr.bf16.mxu1 %v19447_v24  ;;  %v19491_v23 = vld [vmem:[%s23187_s20 + $0x2ec] ss:$12 sps:$4 sm:$0xff]   ;;  %v21683_v24 = vsub.s32 4, %v21578_v44 }
 0x343   :  { %6419 = vmatprep.subr.bf16.mxu0 %v19451_v29  ;;  %v21687_v29 = vsub.s32 5, %v21578_v44 }
 0x345   :  { %16466 = vmatpush3.bf16.msra.mxu1 %v19448_v25  ;;  %v19489_v25 = vld [vmem:[%s23187_s20 + $0x2e8] ss:$12 sps:$4 sm:$0xff]  }
 0x346   :  { %6420 = vmatpush1.bf16.msra.mxu0 %v19449_v33  ;;  %16473 = vmatprep.subr.bf16.mxu1 %v19467_v32  ;;  %v19496_v33 = vld [vmem:[%s23187_s20 + $0x304] ss:$12 sps:$4 sm:$0xff]   ;;  %v21692_v32 = vsub.s32 6, %v21578_v44 }
 0x347   :  { %6421 = vmatprep.subr.bf16.mxu0 %v19454_v59  ;;  %v19494_v59 = vld [vmem:[%s23187_s20 + $0x300] ss:$12 sps:$4 sm:$0xff]  }
 0x348   :  { %6698 = vmatmul.mubr.bf16.vlgmr.msra.gmra.mrb[112].mxu1 %v21617_v53 }
 0x349   :  { %16474 = vmatpush3.bf16.msra.mxu1 %v19468_v35  ;;  %v2572_v35 = vrot.slane %v21583_v48, %v21683_v24 }
 0x34a   :  { %6422 = vmatpush1.bf16.msra.mxu0 %v19452_v56  ;;  %16475 = vmatprep.subr.bf16.mxu1 %v19472_v37  ;;  %v19501_v56 = vld [vmem:[%s23187_s20 + $0x31c] ss:$12 sps:$4 sm:$0xff]   ;;  %v21698_v37 = vsub.s32 7, %v21578_v44 }
 0x34b   :  { %6423 = vmatprep.subr.bf16.mxu0 %v19457_v1  ;;  %v2576_v1 = vrot.slane %v21583_v48, %v21687_v29 }
 0x34d   :  { %16476 = vmatpush3.bf16.msra.mxu1 %v19473_v36 }
 0x34e   :  { %6424 = vmatpush1.bf16.msra.mxu0 %v19455_v60  ;;  %16477 = vmatprep.subr.bf16.mxu1 %v19477_v26  ;;  %v2580_v60 = vrot.slane %v21583_v48, %v21692_v32 }
 0x34f   :  { %6425 = vmatprep.subr.bf16.mxu0 %v19460_v43 }
 0x351   :  { %16478 = vmatpush3.bf16.msra.mxu1 %v19478_v47 }
 0x352   :  { %6426 = vmatpush1.bf16.msra.mxu0 %v19458_v46  ;;  %16479 = vmatprep.subr.bf16.mxu1 %v19482_v50  ;;  %v2584_v46 = vrot.slane %v21583_v48, %v21698_v37  ;;  %v19499_v50 = vld [vmem:[%s23187_s20 + $0x318] ss:$12 sps:$4 sm:$0xff]  }
 0x353   :  { %6427 = vmatprep.subr.bf16.mxu0 %v19463_v54  ;;  %v19506_v54 = vld [vmem:[%s23187_s20 + $0x334] ss:$12 sps:$4 sm:$0xff]  }
 0x355   :  { %16480 = vmatpush3.bf16.msra.mxu1 %v19483_v31 }
 0x356   :  { %6428 = vmatpush1.bf16.msra.mxu0 %v19461_v55  ;;  %16481 = vmatprep.subr.bf16.mxu1 %v19487_v63 }
 0x357   :  { %6429 = vmatprep.subr.bf16.mxu0 %v19466_v61 }
 0x359   :  { %16482 = vmatpush3.bf16.msra.mxu1 %v19488_v7 }
 0x35a   :  { %6430 = vmatpush1.bf16.msra.mxu0 %v19464_v14  ;;  %16483 = vmatprep.subr.bf16.mxu1 %v19492_v18  ;;  %v19504_v14 = vld [vmem:[%s23187_s20 + $0x330] ss:$12 sps:$4 sm:$0xff]  }
 0x35b   :  { %6431 = vmatprep.subr.bf16.mxu0 %v19471_v3 }
 0x35d   :  { %16484 = vmatpush3.bf16.msra.mxu1 %v19493_v10 }
 0x35e   :  { %6432 = vmatpush1.bf16.msra.mxu0 %v19469_v4  ;;  %16485 = vmatprep.subr.bf16.mxu1 %v19497_v11 }
 0x35f   :  { %6433 = vmatprep.subr.bf16.mxu0 %v19476_v9 }
 0x361   :  { %16486 = vmatpush3.bf16.msra.mxu1 %v19498_v15 }
 0x362   :  { %6434 = vmatpush1.bf16.msra.mxu0 %v19474_v12  ;;  %16487 = vmatprep.subr.bf16.mxu1 %v19502_v16  ;;  %v19508_v16 = vld [vmem:[%s23187_s20 + $0x488] ss:$12 sps:$4 sm:$0xff]  }
 0x363   :  { %6435 = vmatprep.subr.bf16.mxu0 %v19481_v40 }
 0x365   :  { %16488 = vmatpush3.bf16.msra.mxu1 %v19503_v19 }
 0x366   :  { %6436 = vmatpush1.bf16.msra.mxu0 %v19479_v17  ;;  %16495 = vmatprep.subr.bf16.mxu1 %v19507_v41  ;;  %v19511_v17 = vld [vmem:[%s23187_s20 + $0x34c] ss:$12 sps:$4 sm:$0xff]  }
 0x367   :  { %6437 = vmatprep.subr.bf16.mxu0 %v19486_v39 }
 0x36a   :  { %6438 = vmatpush1.bf16.msra.mxu0 %v19484_v22  ;;  %v19509_v22 = vld [vmem:[%s23187_s20 + $0x348] ss:$12 sps:$4 sm:$0xff]  }
 0x36b   :  { %6439 = vmatprep.subr.bf16.mxu0 %v19491_v23  ;;  %v19512_v23 = vld [vmem:[%s23187_s20 + $0x560] ss:$12 sps:$4 sm:$0xff]  }
 0x36e   :  { %6440 = vmatpush1.bf16.msra.mxu0 %v19489_v25 }
 0x36f   :  { %6452 = vmatprep.subr.bf16.mxu0 %v19496_v33 }
 0x370   :  { %v4126_v36 = vpop.f32.mrb[100].mxu0 }
 0x371   :  { %v18559_v26 = vadd.f32 %v4126_v36, %v2572_v35  ;;  %v4128_v43 = vpop.f32.mrb[101].mxu0  ;;  %6442 = vmatmul.mubr.bf16.vlgmr.msra.gmra.mrb[108].mxu0 %v21617_v53  ;;  %v19514_v36 = vld [vmem:[%s23187_s20 + $0x360] ss:$12 sps:$4 sm:$0xff]  }
 0x372   :  { %v18560_v47 = vadd.f32 %v4128_v43, %v2576_v1  ;;  %v4130_v44 = vpop.f32.mrb[102].mxu0  ;;  %6453 = vmatpush1.bf16.msra.mxu0 %v19494_v59  ;;  %v4212_v61 = vpop.f32.mrb[100].mxu1  ;;  %v19518_v43 = vld [vmem:[%s23187_s20 + $0x4b8] ss:$12 sps:$4 sm:$0xff]  }
 0x373   :  { %v18561_v55 = vadd.f32 %v4130_v44, %v2572_v35  ;;  %v4132_v31 = vpop.f32.mrb[103].mxu0  ;;  %6454 = vmatprep.subr.bf16.mxu0 %v19501_v56  ;;  %v18563_v7 = vadd.f32 %v4212_v61, %v2580_v60  ;;  %v4214_v3 = vpop.f32.mrb[101].mxu1  ;;  %v4397_v18 = vmax.f32 %v18559_v26, 0.0  ;;  %v19513_v35 = vld [vmem:[%s23187_s20 + $0x4a0] ss:$12 sps:$4 sm:$0xff]  }
 0x374   :  { %v18562_v63 = vadd.f32 %v4132_v31, %v2576_v1  ;;  %v18564_v4 = vadd.f32 %v4214_v3, %v2584_v46  ;;  %v4216_v48 = vpop.f32.mrb[102].mxu1  ;;  %v4398_v10 = vmax.f32 %v18560_v47, 0.0  ;;  %v19516_v56 = vld [vmem:[%s23187_s20 + $0x364] ss:$12 sps:$4 sm:$0xff]   ;;  %v19521_v26 = vld [vmem:[%s23187_s20 + $0x37c] ss:$12 sps:$4 sm:$0xff]  }
 0x375   :  { %v4409_v53 = vmax.f32 %v18561_v55, 0.0  ;;  %v4399_v11 = vmax.f32 %v18563_v7, 0.0  ;;  %v18565_v12 = vadd.f32 %v4216_v48, %v2580_v60  ;;  %v4218_v15 = vpop.f32.mrb[103].mxu1  ;;  %v19517_v60 = vld [vmem:[%s23187_s20 + $0x578] ss:$12 sps:$4 sm:$0xff]  }
 0x376   :  { %v4410_v9 = vmax.f32 %v18562_v63, 0.0  ;;  %6455 = vmatpush1.bf16.msra.mxu0 %v19499_v50  ;;  %v4400_v19 = vmax.f32 %v18564_v4, 0.0  ;;  %v18566_v39 = vadd.f32 %v4218_v15, %v2584_v46  ;;  %v19519_v46 = vld [vmem:[%s23187_s20 + $0x378] ss:$12 sps:$4 sm:$0xff]   ;;  %v19522_v47 = vld [vmem:[%s23187_s20 + $0x590] ss:$12 sps:$4 sm:$0xff]  }
 0x377   :  { %v21710_v40 = vpack.c.bf16 %v4409_v53, %v4397_v18  ;;  %6456 = vmatprep.subr.bf16.mxu0 %v19506_v54  ;;  %v4411_v25 = vmax.f32 %v18565_v12, 0.0  ;;  %v19526_v44 = vld [vmem:[%s23187_s20 + $0x394] ss:$12 sps:$4 sm:$0xff]   ;;  %v19523_v50 = vld [vmem:[%s23187_s20 + $0x4d0] ss:$12 sps:$4 sm:$0xff]  }
 0x378   :  { %v4806_v41 = vpack.c.bf16 %v4410_v9, %v4398_v10  ;;  %v4412_v33 = vmax.f32 %v18566_v39, 0.0  ;;  %v19524_v54 = vld [vmem:[%s23187_s20 + $0x390] ss:$12 sps:$4 sm:$0xff]   ;;  %v19527_v55 = vld [vmem:[%s23187_s20 + $0x5a8] ss:$12 sps:$4 sm:$0xff]  }
 0x379   :  { %v21716_v59 = vpack.c.bf16 %v4411_v25, %v4399_v11  ;;  %v19531_v31 = vld [vmem:[%s23187_s20 + $0x3ac] ss:$12 sps:$4 sm:$0xff]   ;;  %v19528_v61 = vld [vmem:[%s23187_s20 + $0x4e8] ss:$12 sps:$4 sm:$0xff]   ;;  %v19536_v7 = vld [vmem:[%s23187_s20 + $0x3c4] ss:$12 sps:$4 sm:$0xff]  }
 0x37a   :  { %6457 = vmatpush1.bf16.msra.mxu0 %v19504_v14  ;;  %6484 = vmatprep.mubr.bf16.mxu0 %v4806_v41  ;;  %v21720_v1 = vpack.c.bf16 %v4412_v33, %v4400_v19  ;;  %v19529_v63 = vld [vmem:[%s23187_s20 + $0x3a8] ss:$12 sps:$4 sm:$0xff]   ;;  %v19532_v14 = vld [vmem:[%s23187_s20 + $0x5c0] ss:$12 sps:$4 sm:$0xff]   ;;  %v19537_v53 = vld [vmem:[%s23187_s20 + $0x5d8] ss:$12 sps:$4 sm:$0xff]  }
 0x37b   :  { %6738 = vmatprep.mubr.bf16.mxu1 %v4806_v41  ;;  %6458 = vmatprep.subr.bf16.mxu0 %v19511_v17  ;;  %v19533_v3 = vld [vmem:[%s23187_s20 + $0x500] ss:$12 sps:$4 sm:$0xff]   ;;  %v19541_v4 = vld [vmem:[%s23187_s20 + $0x3dc] ss:$12 sps:$4 sm:$0xff]   ;;  %v19538_v48 = vld [vmem:[%s23187_s20 + $0x518] ss:$12 sps:$4 sm:$0xff]  }
 0x37c   :  { %6739 = vmatmul.mubr.bf16.vlgmr.msra.gmra.mrb[116].mxu1 %v21710_v40  ;;  %v19534_v18 = vld [vmem:[%s23187_s20 + $0x3c0] ss:$12 sps:$4 sm:$0xff]   ;;  %v19539_v10 = vld [vmem:[%s23187_s20 + $0x3d8] ss:$12 sps:$4 sm:$0xff]   ;;  %v19542_v9 = vld [vmem:[%s23187_s20 + $0x5f0] ss:$12 sps:$4 sm:$0xff]  }
 0x37d   :  { %16496 = vmatpush3.bf16.msra.mxu1 %v19508_v16  ;;  %6779 = vmatprep.mubr.bf16.mxu1 %v21720_v1  ;;  %v19546_v11 = vld [vmem:[%s23187_s20 + $0x3f4] ss:$12 sps:$4 sm:$0xff]   ;;  %v19543_v12 = vld [vmem:[%s23187_s20 + $0x530] ss:$12 sps:$4 sm:$0xff]   ;;  %v19549_v16 = vld [vmem:[%s23187_s20 + $0x40c] ss:$12 sps:$4 sm:$0xff]  }
 0x37e   :  { %6459 = vmatpush1.bf16.msra.mxu0 %v19509_v22  ;;  %16497 = vmatprep.subr.bf16.mxu1 %v19512_v23  ;;  %v19544_v15 = vld [vmem:[%s23187_s20 + $0x3f0] ss:$12 sps:$4 sm:$0xff]   ;;  %v19562_v17 = vld [vmem:[%s23187_s20 + $0x6c8] ss:$12 sps:$4 sm:$0xff]   ;;  %v19567_v41 = vld [vmem:[%s23187_s20 + $0x6e0] ss:$12 sps:$4 sm:$0xff]  }
 0x37f   :  { %6460 = vmatprep.subr.bf16.mxu0 %v19516_v56  ;;  %v19563_v19 = vld [vmem:[%s23187_s20 + $0x608] ss:$12 sps:$4 sm:$0xff]   ;;  %v19552_v22 = vld [vmem:[%s23187_s20 + $0x424] ss:$12 sps:$4 sm:$0xff]   ;;  %v19550_v23 = vld [vmem:[%s23187_s20 + $0x420] ss:$12 sps:$4 sm:$0xff]  }
 0x380   :  { %v19547_v39 = vld [vmem:[%s23187_s20 + $0x408] ss:$12 sps:$4 sm:$0xff]   ;;  %v19568_v33 = vld [vmem:[%s23187_s20 + $0x620] ss:$12 sps:$4 sm:$0xff]   ;;  %v19553_v56 = vld [vmem:[%s23187_s20 + $0x438] ss:$12 sps:$4 sm:$0xff]  }
 0x381   :  { %16498 = vmatpush3.bf16.msra.mxu1 %v19513_v35  ;;  %v19555_v25 = vld [vmem:[%s23187_s20 + $0x43c] ss:$12 sps:$4 sm:$0xff]   ;;  %v19572_v35 = vld [vmem:[%s23187_s20 + $0x6f8] ss:$12 sps:$4 sm:$0xff]  }
 0x382   :  { %6461 = vmatpush1.bf16.msra.mxu0 %v19514_v36  ;;  %16499 = vmatprep.subr.bf16.mxu1 %v19517_v60  ;;  %v19573_v36 = vld [vmem:[%s23187_s20 + $0x638] ss:$12 sps:$4 sm:$0xff]   ;;  %v19558_v60 = vld [vmem:[%s23187_s20 + $0x454] ss:$12 sps:$4 sm:$0xff]  }
 0x383   :  { %6462 = vmatprep.subr.bf16.mxu0 %v19521_v26  ;;  %v19577_v26 = vld [vmem:[%s23187_s20 + $0x710] ss:$12 sps:$4 sm:$0xff]  }
 0x385   :  { %16500 = vmatpush3.bf16.msra.mxu1 %v19518_v43  ;;  %v19578_v43 = vld [vmem:[%s23187_s20 + $0x650] ss:$12 sps:$4 sm:$0xff]  }
 0x386   :  { %6463 = vmatpush1.bf16.msra.mxu0 %v19519_v46  ;;  %16501 = vmatprep.subr.bf16.mxu1 %v19522_v47  ;;  %v19556_v46 = vld [vmem:[%s23187_s20 + $0x450] ss:$12 sps:$4 sm:$0xff]   ;;  %v19561_v47 = vld [vmem:[%s23187_s20 + $0x46c] ss:$12 sps:$4 sm:$0xff]  }
 0x387   :  { %6464 = vmatprep.subr.bf16.mxu0 %v19526_v44  ;;  %v19582_v44 = vld [vmem:[%s23187_s20 + $0x728] ss:$12 sps:$4 sm:$0xff]  }
 0x389   :  { %16502 = vmatpush3.bf16.msra.mxu1 %v19523_v50  ;;  %v19583_v50 = vld [vmem:[%s23187_s20 + $0x668] ss:$12 sps:$4 sm:$0xff]  }
 0x38a   :  { %6465 = vmatpush1.bf16.msra.mxu0 %v19524_v54  ;;  %16503 = vmatprep.subr.bf16.mxu1 %v19527_v55  ;;  %v19559_v54 = vld [vmem:[%s23187_s20 + $0x468] ss:$12 sps:$4 sm:$0xff]   ;;  %v19566_v55 = vld [vmem:[%s23187_s20 + $0x484] ss:$12 sps:$4 sm:$0xff]  }
 0x38b   :  { %6466 = vmatprep.subr.bf16.mxu0 %v19531_v31  ;;  %v19587_v31 = vld [vmem:[%s23187_s20 + $0x740] ss:$12 sps:$4 sm:$0xff]  }
 0x38d   :  { %16504 = vmatpush3.bf16.msra.mxu1 %v19528_v61  ;;  %v19588_v61 = vld [vmem:[%s23187_s20 + $0x680] ss:$12 sps:$4 sm:$0xff]  }
 0x38e   :  { %6467 = vmatpush1.bf16.msra.mxu0 %v19529_v63  ;;  %16505 = vmatprep.subr.bf16.mxu1 %v19532_v14  ;;  %v19564_v63 = vld [vmem:[%s23187_s20 + $0x480] ss:$12 sps:$4 sm:$0xff]   ;;  %v19592_v14 = vld [vmem:[%s23187_s20 + $0x758] ss:$12 sps:$4 sm:$0xff]  }
 0x38f   :  { %6468 = vmatprep.subr.bf16.mxu0 %v19536_v7  ;;  %v19571_v7 = vld [vmem:[%s23187_s20 + $0x49c] ss:$12 sps:$4 sm:$0xff]  }
 0x391   :  { %16506 = vmatpush3.bf16.msra.mxu1 %v19533_v3  ;;  %v19569_v3 = vld [vmem:[%s23187_s20 + $0x498] ss:$12 sps:$4 sm:$0xff]  }
 0x392   :  { %6469 = vmatpush1.bf16.msra.mxu0 %v19534_v18  ;;  %16507 = vmatprep.subr.bf16.mxu1 %v19537_v53  ;;  %v19593_v18 = vld [vmem:[%s23187_s20 + $0x698] ss:$12 sps:$4 sm:$0xff]   ;;  %v19576_v53 = vld [vmem:[%s23187_s20 + $0x4b4] ss:$12 sps:$4 sm:$0xff]  }
 0x393   :  { %6470 = vmatprep.subr.bf16.mxu0 %v19541_v4  ;;  %v19597_v4 = vld [vmem:[%s23187_s20 + $0x770] ss:$12 sps:$4 sm:$0xff]  }
 0x395   :  { %16508 = vmatpush3.bf16.msra.mxu1 %v19538_v48  ;;  %v19598_v48 = vld [vmem:[%s23187_s20 + $0x6b0] ss:$12 sps:$4 sm:$0xff]  }
 0x396   :  { %6471 = vmatpush1.bf16.msra.mxu0 %v19539_v10  ;;  %16509 = vmatprep.subr.bf16.mxu1 %v19542_v9  ;;  %v19574_v10 = vld [vmem:[%s23187_s20 + $0x4b0] ss:$12 sps:$4 sm:$0xff]   ;;  %v19602_v9 = vld [vmem:[%s23187_s20 + $0x848] ss:$12 sps:$4 sm:$0xff]  }
 0x397   :  { %6472 = vmatprep.subr.bf16.mxu0 %v19546_v11  ;;  %v19579_v11 = vld [vmem:[%s23187_s20 + $0x4c8] ss:$12 sps:$4 sm:$0xff]  }
 0x399   :  { %16510 = vmatpush3.bf16.msra.mxu1 %v19543_v12  ;;  %v19586_v12 = vld [vmem:[%s23187_s20 + $0x4e4] ss:$12 sps:$4 sm:$0xff]  }
 0x39a   :  { %6473 = vmatpush1.bf16.msra.mxu0 %v19544_v15  ;;  %16517 = vmatprep.subr.bf16.mxu1 %v19562_v17  ;;  %v19584_v15 = vld [vmem:[%s23187_s20 + $0x4e0] ss:$12 sps:$4 sm:$0xff]  }
 0x39b   :  { %6474 = vmatprep.subr.bf16.mxu0 %v19549_v16  ;;  %v19591_v16 = vld [vmem:[%s23187_s20 + $0x4fc] ss:$12 sps:$4 sm:$0xff]  }
 0x39c   :  { %6780 = vmatmul.mubr.bf16.vlgmr.msra.gmra.mrb[120].mxu1 %v21716_v59 }
 0x39d   :  { %16518 = vmatpush3.bf16.msra.mxu1 %v19563_v19 }
 0x39e   :  { %6475 = vmatpush1.bf16.msra.mxu0 %v19547_v39  ;;  %16519 = vmatprep.subr.bf16.mxu1 %v19567_v41  ;;  %v19589_v39 = vld [vmem:[%s23187_s20 + $0x4f8] ss:$12 sps:$4 sm:$0xff]   ;;  %v19596_v41 = vld [vmem:[%s23187_s20 + $0x514] ss:$12 sps:$4 sm:$0xff]  }
 0x39f   :  { %6476 = vmatprep.subr.bf16.mxu0 %v19552_v22 }
 0x3a1   :  { %16520 = vmatpush3.bf16.msra.mxu1 %v19568_v33 }
 0x3a2   :  { %6477 = vmatpush1.bf16.msra.mxu0 %v19550_v23  ;;  %16521 = vmatprep.subr.bf16.mxu1 %v19572_v35 }
 0x3a3   :  { %6478 = vmatprep.subr.bf16.mxu0 %v19555_v25 }
 0x3a5   :  { %16522 = vmatpush3.bf16.msra.mxu1 %v19573_v36 }
 0x3a6   :  { %6479 = vmatpush1.bf16.msra.mxu0 %v19553_v56  ;;  %16523 = vmatprep.subr.bf16.mxu1 %v19577_v26 }
 0x3a7   :  { %6480 = vmatprep.subr.bf16.mxu0 %v19558_v60  ;;  %v19594_v60 = vld [vmem:[%s23187_s20 + $0x510] ss:$12 sps:$4 sm:$0xff]  }
 0x3a9   :  { %16524 = vmatpush3.bf16.msra.mxu1 %v19578_v43 }
 0x3aa   :  { %6481 = vmatpush1.bf16.msra.mxu0 %v19556_v46  ;;  %16525 = vmatprep.subr.bf16.mxu1 %v19582_v44  ;;  %v19601_v46 = vld [vmem:[%s23187_s20 + $0x52c] ss:$12 sps:$4 sm:$0xff]  }
 0x3ab   :  { %6482 = vmatprep.subr.bf16.mxu0 %v19561_v47 }
 0x3ad   :  { %16526 = vmatpush3.bf16.msra.mxu1 %v19583_v50 }
 0x3ae   :  { %6483 = vmatpush1.bf16.msra.mxu0 %v19559_v54  ;;  %16527 = vmatprep.subr.bf16.mxu1 %v19587_v31  ;;  %v19599_v54 = vld [vmem:[%s23187_s20 + $0x528] ss:$12 sps:$4 sm:$0xff]  }
 0x3af   :  { %6495 = vmatprep.subr.bf16.mxu0 %v19566_v55 }
 0x3b1   :  { %6485 = vmatmul.mubr.bf16.vlgmr.msra.gmra.mrb[108].mxu0 %v21710_v40  ;;  %16528 = vmatpush3.bf16.msra.mxu1 %v19588_v61  ;;  %v19581_v40 = vld [vmem:[%s23187_s20 + $0x4cc] ss:$12 sps:$4 sm:$0xff]  }
 0x3b2   :  { %6496 = vmatpush1.bf16.msra.mxu0 %v19564_v63  ;;  %16529 = vmatprep.subr.bf16.mxu1 %v19592_v14 }
 0x3b3   :  { %6497 = vmatprep.subr.bf16.mxu0 %v19571_v7  ;;  %6527 = vmatprep.mubr.bf16.mxu0 %v21720_v1  ;;  %v2550_v1 = vld [vmem:[%s23188_s21 + $0x8] sm:$0xf]  ;;  %s23222_s21 = sld [smem:[#allocation35_spill]] }
 0x3b4   :  { %v2588_v17 = vrot.slane %v2550_v1, %v21586_v8  ;;  %v2592_v19 = vrot.slane %v2550_v1, %v21590_v51  ;;  %v2596_v23 = vrot.slane %v2550_v1, %v21595_v57  ;;  %v2600_v35 = vrot.slane %v2550_v1, %v21601_v58  ;;  %v19604_v1 = vld [vmem:[%s23187_s20 + $0x540] ss:$12 sps:$4 sm:$0xff]  }
 0x3b5   :  { %16530 = vmatpush3.bf16.msra.mxu1 %v19593_v18  ;;  %v19603_v18 = vld [vmem:[%s23187_s20 + $0x788] ss:$12 sps:$4 sm:$0xff]  }
 0x3b6   :  { %6498 = vmatpush1.bf16.msra.mxu0 %v19569_v3  ;;  %16531 = vmatprep.subr.bf16.mxu1 %v19597_v4 }
 0x3b7   :  { %6499 = vmatprep.subr.bf16.mxu0 %v19576_v53  ;;  %v19606_v53 = vld [vmem:[%s23187_s20 + $0x544] ss:$12 sps:$4 sm:$0xff]  }
 0x3b9   :  { %16532 = vmatpush3.bf16.msra.mxu1 %v19598_v48 }
 0x3ba   :  { %6500 = vmatpush1.bf16.msra.mxu0 %v19574_v10  ;;  %16539 = vmatprep.subr.bf16.mxu1 %v19602_v9  ;;  %v19607_v9 = vld [vmem:[%s23187_s20 + $0x860] ss:$12 sps:$4 sm:$0xff]  }
 0x3bb   :  { %6501 = vmatprep.subr.bf16.mxu0 %v19581_v40 }
 0x3be   :  { %6502 = vmatpush1.bf16.msra.mxu0 %v19579_v11 }
 0x3bf   :  { %6503 = vmatprep.subr.bf16.mxu0 %v19586_v12 }
 0x3c2   :  { %6504 = vmatpush1.bf16.msra.mxu0 %v19584_v15 }
 0x3c3   :  { %6505 = vmatprep.subr.bf16.mxu0 %v19591_v16 }
 0x3c4   :  { %v4298_v22 = vpop.f32.mrb[104].mxu0 }
 0x3c5   :  { %v18567_v25 = vadd.f32 %v4298_v22, %v2588_v17  ;;  %v4300_v33 = vpop.f32.mrb[105].mxu0 }
 0x3c6   :  { %v18568_v56 = vadd.f32 %v4300_v33, %v2592_v19  ;;  %v4302_v36 = vpop.f32.mrb[106].mxu0  ;;  %6506 = vmatpush1.bf16.msra.mxu0 %v19589_v39  ;;  %v4384_v47 = vpop.f32.mrb[104].mxu1  ;;  %v19608_v39 = vld [vmem:[%s23187_s20 + $0x7a0] ss:$12 sps:$4 sm:$0xff]   ;;  %v19613_v33 = vld [vmem:[%s23187_s20 + $0x7b8] ss:$12 sps:$4 sm:$0xff]  }
 0x3c7   :  { %v18569_v26 = vadd.f32 %v4302_v36, %v2588_v17  ;;  %v4304_v43 = vpop.f32.mrb[107].mxu0  ;;  %6507 = vmatprep.subr.bf16.mxu0 %v19596_v41  ;;  %v4401_v44 = vmax.f32 %v18567_v25, 0.0  ;;  %v18571_v55 = vadd.f32 %v4384_v47, %v2596_v23  ;;  %v4386_v31 = vpop.f32.mrb[105].mxu1  ;;  %v19611_v17 = vld [vmem:[%s23187_s20 + $0x55c] ss:$12 sps:$4 sm:$0xff]  }
 0x3c8   :  { %v18570_v50 = vadd.f32 %v4304_v43, %v2592_v19  ;;  %v18572_v63 = vadd.f32 %v4386_v31, %v2600_v35  ;;  %v4388_v14 = vpop.f32.mrb[106].mxu1  ;;  %v4402_v7 = vmax.f32 %v18568_v56, 0.0  ;;  %v19612_v25 = vld [vmem:[%s23187_s20 + $0x878] ss:$12 sps:$4 sm:$0xff]   ;;  %v19614_v56 = vld [vmem:[%s23187_s20 + $0x570] ss:$12 sps:$4 sm:$0xff]  }
 0x3c9   :  { %v4413_v61 = vmax.f32 %v18569_v26, 0.0  ;;  %v4403_v4 = vmax.f32 %v18571_v55, 0.0  ;;  %v18573_v48 = vadd.f32 %v4388_v14, %v2596_v23  ;;  %v4390_v10 = vpop.f32.mrb[107].mxu1  ;;  %v19609_v23 = vld [vmem:[%s23187_s20 + $0x558] ss:$12 sps:$4 sm:$0xff]  }
 0x3ca   :  { %v4414_v3 = vmax.f32 %v18570_v50, 0.0  ;;  %6508 = vmatpush1.bf16.msra.mxu0 %v19594_v60  ;;  %v4404_v11 = vmax.f32 %v18572_v63, 0.0  ;;  %v18574_v12 = vadd.f32 %v4390_v10, %v2600_v35  ;;  %v19616_v35 = vld [vmem:[%s23187_s20 + $0x574] ss:$12 sps:$4 sm:$0xff]   ;;  %v19617_v36 = vld [vmem:[%s23187_s20 + $0x890] ss:$12 sps:$4 sm:$0xff]  }
 0x3cb   :  { %v21802_v40 = vpack.c.bf16 %v4413_v61, %v4401_v44  ;;  %6509 = vmatprep.subr.bf16.mxu0 %v19601_v46  ;;  %v4415_v16 = vmax.f32 %v18573_v48, 0.0  ;;  %v19618_v60 = vld [vmem:[%s23187_s20 + $0x7d0] ss:$12 sps:$4 sm:$0xff]   ;;  %v19621_v26 = vld [vmem:[%s23187_s20 + $0x58c] ss:$12 sps:$4 sm:$0xff]  }
 0x3cc   :  { %v21805_v15 = vpack.c.bf16 %v4414_v3, %v4402_v7  ;;  %v4416_v19 = vmax.f32 %v18574_v12, 0.0  ;;  %v19622_v43 = vld [vmem:[%s23187_s20 + $0x8a8] ss:$12 sps:$4 sm:$0xff]   ;;  %v19626_v44 = vld [vmem:[%s23187_s20 + $0x5a4] ss:$12 sps:$4 sm:$0xff]  }
 0x3cd   :  { %v21811_v41 = vpack.c.bf16 %v4415_v16, %v4403_v4  ;;  %v19619_v46 = vld [vmem:[%s23187_s20 + $0x588] ss:$12 sps:$4 sm:$0xff]   ;;  %v19627_v50 = vld [vmem:[%s23187_s20 + $0x8c0] ss:$12 sps:$4 sm:$0xff]   ;;  %v19632_v61 = vld [vmem:[%s23187_s20 + $0x8d8] ss:$12 sps:$4 sm:$0xff]  }
 0x3ce   :  { %6510 = vmatpush1.bf16.msra.mxu0 %v19599_v54  ;;  %6820 = vmatprep.mubr.bf16.mxu1 %v21805_v15  ;;  %v21814_v22 = vpack.c.bf16 %v4416_v19, %v4404_v11  ;;  %v19623_v47 = vld [vmem:[%s23187_s20 + $0x7e8] ss:$12 sps:$4 sm:$0xff]   ;;  %v19624_v54 = vld [vmem:[%s23187_s20 + $0x5a0] ss:$12 sps:$4 sm:$0xff]   ;;  %v19629_v63 = vld [vmem:[%s23187_s20 + $0x5b8] ss:$12 sps:$4 sm:$0xff]  }
 0x3cf   :  { %6821 = vmatmul.mubr.bf16.vlgmr.msra.gmra.mrb[124].mxu1 %v21802_v40  ;;  %6511 = vmatprep.subr.bf16.mxu0 %v19606_v53  ;;  %v19628_v55 = vld [vmem:[%s23187_s20 + $0x800] ss:$12 sps:$4 sm:$0xff]   ;;  %v19631_v31 = vld [vmem:[%s23187_s20 + $0x5bc] ss:$12 sps:$4 sm:$0xff]   ;;  %v19633_v14 = vld [vmem:[%s23187_s20 + $0x818] ss:$12 sps:$4 sm:$0xff]  }
 0x3d0   :  { %16540 = vmatpush3.bf16.msra.mxu1 %v19603_v18  ;;  %6861 = vmatprep.mubr.bf16.mxu1 %v21814_v22  ;;  %v19636_v7 = vld [vmem:[%s23187_s20 + $0x5d4] ss:$12 sps:$4 sm:$0xff]   ;;  %v19637_v3 = vld [vmem:[%s23187_s20 + $0x8f0] ss:$12 sps:$4 sm:$0xff]   ;;  %v19641_v4 = vld [vmem:[%s23187_s20 + $0x5ec] ss:$12 sps:$4 sm:$0xff]  }
 0x3d1   :  { %16541 = vmatprep.subr.bf16.mxu1 %v19607_v9  ;;  %v19634_v18 = vld [vmem:[%s23187_s20 + $0x5d0] ss:$12 sps:$4 sm:$0xff]   ;;  %v19639_v48 = vld [vmem:[%s23187_s20 + $0x5e8] ss:$12 sps:$4 sm:$0xff]   ;;  %v19642_v9 = vld [vmem:[%s23187_s20 + $0x600] ss:$12 sps:$4 sm:$0xff]  }
 0x3d2   :  { %6512 = vmatpush1.bf16.msra.mxu0 %v19604_v1  ;;  %v19638_v53 = vld [vmem:[%s23187_s20 + $0x830] ss:$12 sps:$4 sm:$0xff]   ;;  %v19645_v12 = vld [vmem:[%s23187_s20 + $0x618] ss:$12 sps:$4 sm:$0xff]   ;;  %v19650_v1 = vld [vmem:[%s23187_s20 + $0x634] ss:$12 sps:$4 sm:$0xff]  }
 0x3d3   :  { %6513 = vmatprep.subr.bf16.mxu0 %v19611_v17  ;;  %v19644_v10 = vld [vmem:[%s23187_s20 + $0x604] ss:$12 sps:$4 sm:$0xff]   ;;  %v19647_v11 = vld [vmem:[%s23187_s20 + $0x61c] ss:$12 sps:$4 sm:$0xff]   ;;  %v19653_v17 = vld [vmem:[%s23187_s20 + $0x64c] ss:$12 sps:$4 sm:$0xff]  }
 0x3d4   :  { %16542 = vmatpush3.bf16.msra.mxu1 %v19608_v39  ;;  %v19648_v16 = vld [vmem:[%s23187_s20 + $0x630] ss:$12 sps:$4 sm:$0xff]   ;;  %v19651_v19 = vld [vmem:[%s23187_s20 + $0x648] ss:$12 sps:$4 sm:$0xff]  }
 0x3d5   :  { %16543 = vmatprep.subr.bf16.mxu1 %v19612_v25  ;;  %v19656_v39 = vld [vmem:[%s23187_s20 + $0x664] ss:$12 sps:$4 sm:$0xff]   ;;  %v19654_v25 = vld [vmem:[%s23187_s20 + $0x660] ss:$12 sps:$4 sm:$0xff]  }
 0x3d6   :  { %6514 = vmatpush1.bf16.msra.mxu0 %v19609_v23 }
 0x3d7   :  { %6515 = vmatprep.subr.bf16.mxu0 %v19616_v35  ;;  %v19659_v35 = vld [vmem:[%s23187_s20 + $0x67c] ss:$12 sps:$4 sm:$0xff]  }
 0x3d8   :  { %16544 = vmatpush3.bf16.msra.mxu1 %v19613_v33 }
 0x3d9   :  { %16545 = vmatprep.subr.bf16.mxu1 %v19617_v36 }
 0x3da   :  { %6516 = vmatpush1.bf16.msra.mxu0 %v19614_v56 }
 0x3db   :  { %6517 = vmatprep.subr.bf16.mxu0 %v19621_v26  ;;  %v19662_v26 = vld [vmem:[%s23187_s20 + $0x694] ss:$12 sps:$4 sm:$0xff]  }
 0x3dc   :  { %16546 = vmatpush3.bf16.msra.mxu1 %v19618_v60  ;;  %v19657_v60 = vld [vmem:[%s23187_s20 + $0x678] ss:$12 sps:$4 sm:$0xff]  }
 0x3dd   :  { %16547 = vmatprep.subr.bf16.mxu1 %v19622_v43  ;;  %v19660_v43 = vld [vmem:[%s23187_s20 + $0x690] ss:$12 sps:$4 sm:$0xff]  }
 0x3de   :  { %6518 = vmatpush1.bf16.msra.mxu0 %v19619_v46  ;;  %v19665_v46 = vld [vmem:[%s23187_s20 + $0x6ac] ss:$12 sps:$4 sm:$0xff]  }
 0x3df   :  { %6519 = vmatprep.subr.bf16.mxu0 %v19626_v44  ;;  %v19668_v44 = vld [vmem:[%s23187_s20 + $0x6c4] ss:$12 sps:$4 sm:$0xff]  }
 0x3e0   :  { %16548 = vmatpush3.bf16.msra.mxu1 %v19623_v47  ;;  %v19663_v47 = vld [vmem:[%s23187_s20 + $0x6a8] ss:$12 sps:$4 sm:$0xff]  }
 0x3e1   :  { %16549 = vmatprep.subr.bf16.mxu1 %v19627_v50  ;;  %v19666_v50 = vld [vmem:[%s23187_s20 + $0x6c0] ss:$12 sps:$4 sm:$0xff]  }
 0x3e2   :  { %6520 = vmatpush1.bf16.msra.mxu0 %v19624_v54  ;;  %v19671_v54 = vld [vmem:[%s23187_s20 + $0x6dc] ss:$12 sps:$4 sm:$0xff]  }
 0x3e3   :  { %6521 = vmatprep.subr.bf16.mxu0 %v19631_v31  ;;  %v19674_v31 = vld [vmem:[%s23187_s20 + $0x6f4] ss:$12 sps:$4 sm:$0xff]  }
 0x3e4   :  { %16550 = vmatpush3.bf16.msra.mxu1 %v19628_v55  ;;  %v19669_v55 = vld [vmem:[%s23187_s20 + $0x6d8] ss:$12 sps:$4 sm:$0xff]  }
 0x3e5   :  { %16551 = vmatprep.subr.bf16.mxu1 %v19632_v61  ;;  %v21867_v61 = vld [vmem:[%s23189_s18] sm:$0x7]  ;;  %s23223_s18 = sld [smem:[#allocation42_spill]] }
 0x3e6   :  { %6522 = vmatpush1.bf16.msra.mxu0 %v19629_v63  ;;  %v19672_v63 = vld [vmem:[%s23187_s20 + $0x6f0] ss:$12 sps:$4 sm:$0xff]  }
 0x3e7   :  { %6523 = vmatprep.subr.bf16.mxu0 %v19636_v7  ;;  %v4826_v7 = vrot.slane %v21867_v61, %v21595_v57 }
 0x3e8   :  { %16552 = vmatpush3.bf16.msra.mxu1 %v19633_v14  ;;  %v19677_v14 = vld [vmem:[%s23187_s20 + $0x70c] ss:$12 sps:$4 sm:$0xff]  }
 0x3e9   :  { %16553 = vmatprep.subr.bf16.mxu1 %v19637_v3  ;;  %v19675_v3 = vld [vmem:[%s23187_s20 + $0x708] ss:$12 sps:$4 sm:$0xff]  }
 0x3ea   :  { %6524 = vmatpush1.bf16.msra.mxu0 %v19634_v18 }
 0x3eb   :  { %6525 = vmatprep.subr.bf16.mxu0 %v19641_v4 }
 0x3ec   :  { %16554 = vmatpush3.bf16.msra.mxu1 %v19638_v53  ;;  %v19680_v53 = vld [vmem:[%s23187_s20 + $0x724] ss:$12 sps:$4 sm:$0xff]  }
 0x3ee   :  { %6526 = vmatpush1.bf16.msra.mxu0 %v19639_v48 }
 0x3ef   :  { %6862 = vmatmul.mubr.bf16.vlgmr.msra.gmra.mrb[128].mxu1 %v21811_v41  ;;  %6538 = vmatprep.subr.bf16.mxu0 %v19644_v10 }
 0x3f1   :  { %6528 = vmatmul.mubr.bf16.vlgmr.msra.gmra.mrb[108].mxu0 %v21716_v59 }
 0x3f2   :  { %6539 = vmatpush1.bf16.msra.mxu0 %v19642_v9  ;;  %6570 = vmatprep.mubr.bf16.mxu0 %v21805_v15 }
 0x3f3   :  { %6540 = vmatprep.subr.bf16.mxu0 %v19647_v11 }
 0x3f6   :  { %6541 = vmatpush1.bf16.msra.mxu0 %v19645_v12  ;;  %v19678_v12 = vld [vmem:[%s23187_s20 + $0x720] ss:$12 sps:$4 sm:$0xff]  }
 0x3f7   :  { %6542 = vmatprep.subr.bf16.mxu0 %v19650_v1 }
 0x3fa   :  { %6543 = vmatpush1.bf16.msra.mxu0 %v19648_v16 }
 0x3fb   :  { %v16445_v23 = vpop.f32.mrb[108].mxu1  ;;  %6544 = vmatprep.subr.bf16.mxu0 %v19653_v17 }
 0x3fc   :  { %v16446_v59 = vpop.f32.mrb[109].mxu1 }
 0x3fd   :  { %v16447_v33 = vadd.f32 %v16446_v59, %v16445_v23  ;;  %v16448_v15 = vpop.f32.mrb[110].mxu1  ;;  %v19681_v23 = vld [vmem:[%s23187_s20 + $0x738] ss:$12 sps:$4 sm:$0xff]   ;;  %v19686_v59 = vld [vmem:[%s23187_s20 + $0x754] ss:$12 sps:$4 sm:$0xff]  }
 0x3fe   :  { %v16449_v56 = vpop.f32.mrb[111].mxu1  ;;  %6545 = vmatpush1.bf16.msra.mxu0 %v19651_v19  ;;  %v19683_v19 = vld [vmem:[%s23187_s20 + $0x73c] ss:$12 sps:$4 sm:$0xff]  }
 0x3ff   :  { %v16450_v36 = vadd.f32 %v16449_v56, %v16448_v15  ;;  %6546 = vmatprep.subr.bf16.mxu0 %v19656_v39  ;;  %v6659_v48 = vadd.f32 %v16447_v33, %v4826_v7  ;;  %v19689_v33 = vld [vmem:[%s23187_s20 + $0x76c] ss:$12 sps:$4 sm:$0xff]   ;;  %v19687_v15 = vld [vmem:[%s23187_s20 + $0x768] ss:$12 sps:$4 sm:$0xff]  }
 0x400   :  { %v19690_v56 = vld [vmem:[%s23187_s20 + $0x780] ss:$12 sps:$4 sm:$0xff]  }
 0x401   :  { %v6662_v1 = vadd.f32 %v16450_v36, %v4826_v7  ;;  %v19695_v36 = vld [vmem:[%s23187_s20 + $0x79c] ss:$12 sps:$4 sm:$0xff]   ;;  %v19738_v7 = vld [vmem:[%s23190_s22] ss:$16 sps:$4 sm:$0xff]  }
 0x402   :  { %6547 = vmatpush1.bf16.msra.mxu0 %v19654_v25  ;;  %v19684_v25 = vld [vmem:[%s23187_s20 + $0x750] ss:$12 sps:$4 sm:$0xff]  }
 0x403   :  { %6548 = vmatprep.subr.bf16.mxu0 %v19659_v35  ;;  %v19692_v35 = vld [vmem:[%s23187_s20 + $0x784] ss:$12 sps:$4 sm:$0xff]  }
 0x406   :  { %6549 = vmatpush1.bf16.msra.mxu0 %v19657_v60  ;;  %v19693_v60 = vld [vmem:[%s23187_s20 + $0x798] ss:$12 sps:$4 sm:$0xff]  }
 0x407   :  { %6550 = vmatprep.subr.bf16.mxu0 %v19662_v26  ;;  %v19698_v26 = vld [vmem:[%s23187_s20 + $0x7b4] ss:$12 sps:$4 sm:$0xff]  }
 0x40a   :  { %6551 = vmatpush1.bf16.msra.mxu0 %v19660_v43  ;;  %v19696_v43 = vld [vmem:[%s23187_s20 + $0x7b0] ss:$12 sps:$4 sm:$0xff]  }
 0x40b   :  { %6552 = vmatprep.subr.bf16.mxu0 %v19665_v46  ;;  %v19701_v46 = vld [vmem:[%s23187_s20 + $0x7cc] ss:$12 sps:$4 sm:$0xff]  }
 0x40e   :  { %6553 = vmatpush1.bf16.msra.mxu0 %v19663_v47  ;;  %v19699_v47 = vld [vmem:[%s23187_s20 + $0x7c8] ss:$12 sps:$4 sm:$0xff]  }
 0x40f   :  { %6554 = vmatprep.subr.bf16.mxu0 %v19668_v44  ;;  %v19702_v44 = vld [vmem:[%s23187_s20 + $0x7e0] ss:$12 sps:$4 sm:$0xff]  }
 0x412   :  { %6555 = vmatpush1.bf16.msra.mxu0 %v19666_v50  ;;  %v19705_v50 = vld [vmem:[%s23187_s20 + $0x7f8] ss:$12 sps:$4 sm:$0xff]  }
 0x413   :  { %6556 = vmatprep.subr.bf16.mxu0 %v19671_v54  ;;  %v19710_v54 = vld [vmem:[%s23187_s20 + $0x814] ss:$12 sps:$4 sm:$0xff]  }
 0x416   :  { %6557 = vmatpush1.bf16.msra.mxu0 %v19669_v55  ;;  %v19708_v55 = vld [vmem:[%s23187_s20 + $0x810] ss:$12 sps:$4 sm:$0xff]  }
 0x417   :  { %6558 = vmatprep.subr.bf16.mxu0 %v19674_v31  ;;  %v19713_v31 = vld [vmem:[%s23187_s20 + $0x82c] ss:$12 sps:$4 sm:$0xff]  }
 0x41a   :  { %6559 = vmatpush1.bf16.msra.mxu0 %v19672_v63  ;;  %v19711_v63 = vld [vmem:[%s23187_s20 + $0x828] ss:$12 sps:$4 sm:$0xff]  }
 0x41b   :  { %v16467_v18 = vpop.f32.mrb[112].mxu1  ;;  %6560 = vmatprep.subr.bf16.mxu0 %v19677_v14  ;;  %v19716_v14 = vld [vmem:[%s23187_s20 + $0x844] ss:$12 sps:$4 sm:$0xff]  }
 0x41c   :  { %v16468_v4 = vpop.f32.mrb[113].mxu1 }
 0x41d   :  { %v16469_v10 = vadd.f32 %v16468_v4, %v16467_v18  ;;  %v16470_v9 = vpop.f32.mrb[114].mxu1  ;;  %v19743_v18 = vld [vmem:[%s23190_s22 + $0x24] ss:$16 sps:$4 sm:$0xff]  }
 0x41e   :  { %v16471_v11 = vpop.f32.mrb[115].mxu1  ;;  %6561 = vmatpush1.bf16.msra.mxu0 %v19675_v3  ;;  %v19740_v3 = vld [vmem:[%s23190_s22 + $0x4] ss:$16 sps:$4 sm:$0xff]  }
 0x41f   :  { %v21876_v16 = vadd.f32 %v16469_v10, %v6659_v48  ;;  %v16472_v17 = vadd.f32 %v16471_v11, %v16470_v9  ;;  %6562 = vmatprep.subr.bf16.mxu0 %v19680_v53  ;;  %v19714_v53 = vld [vmem:[%s23187_s20 + $0x840] ss:$12 sps:$4 sm:$0xff]   ;;  %7477 = vmatprep.subr.bf16.mxu1 %v19740_v3  ;;  %v19719_v48 = vld [vmem:[%s23187_s20 + $0x85c] ss:$12 sps:$4 sm:$0xff]   ;;  %v19746_v11 = vld [vmem:[%s23190_s22 + $0x44] ss:$16 sps:$4 sm:$0xff]  }
 0x420   :  { %7478 = vmatpush1.bf16.msra.mxu1 %v19738_v7  ;;  %v19741_v10 = vld [vmem:[%s23190_s22 + $0x20] ss:$16 sps:$4 sm:$0xff]   ;;  %v19764_v3 = vld [vmem:[%s23190_s22 + $0x104] ss:$16 sps:$4 sm:$0xff]  }
 0x421   :  { %v21879_v39 = vadd.f32 %v16472_v17, %v6662_v1  ;;  %7479 = vmatprep.subr.bf16.mxu1 %v19743_v18  ;;  %v19759_v7 = vld [vmem:[%s23190_s22 + $0xe0] ss:$16 sps:$4 sm:$0xff]   ;;  %v19735_v18 = vld [vmem:[%s23187_s20 + $0x8e8] ss:$12 sps:$4 sm:$0xff]  }
 0x422   :  { %6563 = vmatpush1.bf16.msra.mxu0 %v19678_v12 }
 0x423   :  { %6564 = vmatprep.subr.bf16.mxu0 %v19683_v19  ;;  %v19717_v19 = vld [vmem:[%s23187_s20 + $0x858] ss:$12 sps:$4 sm:$0xff]  }
 0x424   :  { %7480 = vmatpush1.bf16.msra.mxu1 %v19741_v10  ;;  %v19765_v10 = vld [vmem:[%s23190_s22 + $0x120] ss:$16 sps:$4 sm:$0xff]  }
 0x425   :  { %7481 = vmatprep.subr.bf16.mxu1 %v19746_v11  ;;  %v19770_v11 = vld [vmem:[%s23190_s22 + $0x144] ss:$16 sps:$4 sm:$0xff]  }
 0x426   :  { %6565 = vmatpush1.bf16.msra.mxu0 %v19681_v23 }
 0x427   :  { %6566 = vmatprep.subr.bf16.mxu0 %v19686_v59 }
 0x42a   :  { %6567 = vmatpush1.bf16.msra.mxu0 %v19684_v25  ;;  %v19722_v25 = vld [vmem:[%s23187_s20 + $0x874] ss:$12 sps:$4 sm:$0xff]  }
 0x42b   :  { %6568 = vmatprep.subr.bf16.mxu0 %v19689_v33  ;;  %v19744_v33 = vld [vmem:[%s23190_s22 + $0x40] ss:$16 sps:$4 sm:$0xff]  }
 0x42c   :  { %7482 = vmatpush1.bf16.msra.mxu1 %v19744_v33  ;;  %v19773_v33 = vld [vmem:[%s23190_s22 + $0x164] ss:$16 sps:$4 sm:$0xff]  }
 0x42e   :  { %6569 = vmatpush1.bf16.msra.mxu0 %v19687_v15  ;;  %v19749_v15 = vld [vmem:[%s23190_s22 + $0x64] ss:$16 sps:$4 sm:$0xff]  }
 0x42f   :  { %6581 = vmatprep.subr.bf16.mxu0 %v19692_v35  ;;  %7483 = vmatprep.subr.bf16.mxu1 %v19749_v15 }
 0x431   :  { %6571 = vmatmul.mubr.bf16.vlgmr.msra.gmra.mrb[108].mxu0 %v21802_v40  ;;  %v19704_v40 = vld [vmem:[%s23187_s20 + $0x7e4] ss:$12 sps:$4 sm:$0xff]  }
 0x432   :  { %6582 = vmatpush1.bf16.msra.mxu0 %v19690_v56  ;;  %6613 = vmatprep.mubr.bf16.mxu0 %v21814_v22  ;;  %v19707_v22 = vld [vmem:[%s23187_s20 + $0x7fc] ss:$12 sps:$4 sm:$0xff]  }
 0x433   :  { %6583 = vmatprep.subr.bf16.mxu0 %v19695_v36  ;;  %v19720_v56 = vld [vmem:[%s23187_s20 + $0x870] ss:$12 sps:$4 sm:$0xff]  }
 0x434   :  { %v19747_v36 = vld [vmem:[%s23190_s22 + $0x60] ss:$16 sps:$4 sm:$0xff]  }
 0x435   :  { %7484 = vmatpush1.bf16.msra.mxu1 %v19747_v36  ;;  %v19774_v36 = vld [vmem:[%s23190_s22 + $0x180] ss:$16 sps:$4 sm:$0xff]  }
 0x436   :  { %6584 = vmatpush1.bf16.msra.mxu0 %v19693_v60  ;;  %v19752_v60 = vld [vmem:[%s23190_s22 + $0x84] ss:$16 sps:$4 sm:$0xff]  }
 0x437   :  { %6585 = vmatprep.subr.bf16.mxu0 %v19698_v26  ;;  %v19723_v26 = vld [vmem:[%s23187_s20 + $0x888] ss:$12 sps:$4 sm:$0xff]   ;;  %7485 = vmatprep.subr.bf16.mxu1 %v19752_v60  ;;  %v19777_v60 = vld [vmem:[%s23190_s22 + $0x1a0] ss:$16 sps:$4 sm:$0xff]  }
 0x43a   :  { %6586 = vmatpush1.bf16.msra.mxu0 %v19696_v43  ;;  %v19728_v43 = vld [vmem:[%s23187_s20 + $0x8a4] ss:$12 sps:$4 sm:$0xff]  }
 0x43b   :  { %6587 = vmatprep.subr.bf16.mxu0 %v19701_v46  ;;  %v19755_v46 = vld [vmem:[%s23190_s22 + $0xa4] ss:$16 sps:$4 sm:$0xff]  }
 0x43e   :  { %6588 = vmatpush1.bf16.msra.mxu0 %v19699_v47  ;;  %v19726_v47 = vld [vmem:[%s23187_s20 + $0x8a0] ss:$12 sps:$4 sm:$0xff]  }
 0x43f   :  { %6589 = vmatprep.subr.bf16.mxu0 %v19704_v40  ;;  %v19731_v40 = vld [vmem:[%s23187_s20 + $0x8bc] ss:$12 sps:$4 sm:$0xff]  }
 0x442   :  { %6590 = vmatpush1.bf16.msra.mxu0 %v19702_v44  ;;  %v19753_v44 = vld [vmem:[%s23190_s22 + $0xa0] ss:$16 sps:$4 sm:$0xff]  }
 0x443   :  { %6591 = vmatprep.subr.bf16.mxu0 %v19707_v22  ;;  %v19758_v22 = vld [vmem:[%s23190_s22 + $0xc4] ss:$16 sps:$4 sm:$0xff]  }
 0x446   :  { %6592 = vmatpush1.bf16.msra.mxu0 %v19705_v50  ;;  %v19729_v50 = vld [vmem:[%s23187_s20 + $0x8b8] ss:$12 sps:$4 sm:$0xff]  }
 0x447   :  { %6593 = vmatprep.subr.bf16.mxu0 %v19710_v54  ;;  %v19734_v54 = vld [vmem:[%s23187_s20 + $0x8d4] ss:$12 sps:$4 sm:$0xff]  }
 0x44a   :  { %6594 = vmatpush1.bf16.msra.mxu0 %v19708_v55  ;;  %v19756_v55 = vld [vmem:[%s23190_s22 + $0xc0] ss:$16 sps:$4 sm:$0xff]  }
 0x44b   :  { %6595 = vmatprep.subr.bf16.mxu0 %v19713_v31  ;;  %v19761_v31 = vld [vmem:[%s23190_s22 + $0xe4] ss:$16 sps:$4 sm:$0xff]  }
 0x44e   :  { %6596 = vmatpush1.bf16.msra.mxu0 %v19711_v63  ;;  %v19732_v63 = vld [vmem:[%s23187_s20 + $0x8d0] ss:$12 sps:$4 sm:$0xff]  }
 0x44f   :  { %v16489_v4 = vpop.f32.mrb[116].mxu1  ;;  %6597 = vmatprep.subr.bf16.mxu0 %v19716_v14  ;;  %v19737_v14 = vld [vmem:[%s23187_s20 + $0x8ec] ss:$12 sps:$4 sm:$0xff]  }
 0x450   :  { %v16490_v9 = vpop.f32.mrb[117].mxu1 }
 0x451   :  { %v16491_v12 = vadd.f32 %v16490_v9, %v16489_v4  ;;  %v16492_v1 = vpop.f32.mrb[118].mxu1  ;;  %v19767_v4 = vld [vmem:[%s23190_s22 + $0x124] ss:$16 sps:$4 sm:$0xff]  }
 0x452   :  { %v16493_v17 = vpop.f32.mrb[119].mxu1  ;;  %6598 = vmatpush1.bf16.msra.mxu0 %v19714_v53  ;;  %v19762_v53 = vld [vmem:[%s23190_s22 + $0x100] ss:$16 sps:$4 sm:$0xff]  }
 0x453   :  { %v21914_v23 = vadd.f32 %v16491_v12, %v21876_v16  ;;  %v16494_v59 = vadd.f32 %v16493_v17, %v16492_v1  ;;  %6599 = vmatprep.subr.bf16.mxu0 %v19719_v48  ;;  %v19725_v16 = vld [vmem:[%s23187_s20 + $0x88c] ss:$12 sps:$4 sm:$0xff]   ;;  %s23221_s20 = sld [smem:[#allocation40_spill]] }
 0x455   :  { %v21920_v35 = vadd.f32 %v16494_v59, %v21879_v39  ;;  %v19750_v39 = vld [vmem:[%s23190_s22 + $0x80] ss:$16 sps:$4 sm:$0xff]  }
 0x456   :  { %6600 = vmatpush1.bf16.msra.mxu0 %v19717_v19  ;;  %7486 = vmatpush1.bf16.msra.mxu1 %v19750_v39 }
 0x457   :  { %6601 = vmatprep.subr.bf16.mxu0 %v19722_v25  ;;  %7487 = vmatprep.subr.bf16.mxu1 %v19755_v46  ;;  %v19768_v25 = vld [vmem:[%s23190_s22 + $0x140] ss:$16 sps:$4 sm:$0xff]  }
 0x45a   :  { %6602 = vmatpush1.bf16.msra.mxu0 %v19720_v56  ;;  %7488 = vmatpush1.bf16.msra.mxu1 %v19753_v44  ;;  %v19771_v56 = vld [vmem:[%s23190_s22 + $0x160] ss:$16 sps:$4 sm:$0xff]  }
 0x45b   :  { %6603 = vmatprep.subr.bf16.mxu0 %v19725_v16  ;;  %7489 = vmatprep.subr.bf16.mxu1 %v19758_v22  ;;  %v19776_v16 = vld [vmem:[%s23190_s22 + $0x184] ss:$16 sps:$4 sm:$0xff]  }
 0x45e   :  { %6604 = vmatpush1.bf16.msra.mxu0 %v19723_v26  ;;  %7490 = vmatpush1.bf16.msra.mxu1 %v19756_v55 }
 0x45f   :  { %6605 = vmatprep.subr.bf16.mxu0 %v19728_v43  ;;  %7491 = vmatprep.subr.bf16.mxu1 %v19761_v31 }
 0x462   :  { %6606 = vmatpush1.bf16.msra.mxu0 %v19726_v47  ;;  %7492 = vmatpush1.bf16.msra.mxu1 %v19759_v7  ;;  %v19780_v7 = vld [vmem:[%s23190_s22 + $0x1c0] ss:$16 sps:$4 sm:$0xff]  }
 0x463   :  { %6607 = vmatprep.subr.bf16.mxu0 %v19731_v40  ;;  %7493 = vmatprep.subr.bf16.mxu1 %v19764_v3 }
 0x466   :  { %6608 = vmatpush1.bf16.msra.mxu0 %v19729_v50  ;;  %7494 = vmatpush1.bf16.msra.mxu1 %v19762_v53 }
 0x467   :  { %6609 = vmatprep.subr.bf16.mxu0 %v19734_v54  ;;  %7495 = vmatprep.subr.bf16.mxu1 %v19767_v4  ;;  %v19785_v4 = vld [vmem:[%s23190_s22 + $0x1e4] ss:$16 sps:$4 sm:$0xff]  }
 0x46a   :  { %6610 = vmatpush1.bf16.msra.mxu0 %v19732_v63  ;;  %7496 = vmatpush1.bf16.msra.mxu1 %v19765_v10 }
 0x46b   :  { %6611 = vmatprep.subr.bf16.mxu0 %v19737_v14  ;;  %7497 = vmatprep.subr.bf16.mxu1 %v19770_v11  ;;  %v19782_v14 = vld [vmem:[%s23190_s22 + $0x1c4] ss:$16 sps:$4 sm:$0xff]   ;;  %v4818_v11 = vrot.slane %v21867_v61, %v21586_v8 }
 0x46e   :  { %6612 = vmatpush1.bf16.msra.mxu0 %v19735_v18  ;;  %7498 = vmatpush1.bf16.msra.mxu1 %v19768_v25 }
 0x46f   :  { %v16511_v48 = vpop.f32.mrb[120].mxu1  ;;  %7499 = vmatprep.subr.bf16.mxu1 %v19773_v33 }
 0x470   :  { %v16512_v9 = vpop.f32.mrb[121].mxu1 }
 0x471   :  { %v16513_v12 = vadd.f32 %v16512_v9, %v16511_v48  ;;  %v16514_v1 = vpop.f32.mrb[122].mxu1  ;;  %6614 = vmatmul.mubr.bf16.vlgmr.msra.gmra.mrb[108].mxu0 %v21811_v41  ;;  %v19779_v41 = vld [vmem:[%s23190_s22 + $0x1a4] ss:$16 sps:$4 sm:$0xff]   ;;  %v19783_v48 = vld [vmem:[%s23190_s22 + $0x1e0] ss:$16 sps:$4 sm:$0xff]  }
 0x472   :  { %v16515_v17 = vpop.f32.mrb[123].mxu1  ;;  %7500 = vmatpush1.bf16.msra.mxu1 %v19771_v56  ;;  %v19788_v9 = vld [vmem:[%s23190_s22 + $0x204] ss:$16 sps:$4 sm:$0xff]  }
 0x473   :  { %v6782_v19 = vadd.f32 %v16513_v12, %v21914_v23  ;;  %v16516_v59 = vadd.f32 %v16515_v17, %v16514_v1  ;;  %7501 = vmatprep.subr.bf16.mxu1 %v19776_v16  ;;  %v4822_v12 = vrot.slane %v21867_v61, %v21590_v51 }
 0x475   :  { %v6785_v15 = vadd.f32 %v16516_v59, %v21920_v35 }
 0x476   :  { %7502 = vmatpush1.bf16.msra.mxu1 %v19774_v36 }
 0x477   :  { %7503 = vmatprep.subr.bf16.mxu1 %v19779_v41 }
 0x47a   :  { %7504 = vmatpush1.bf16.msra.mxu1 %v19777_v60 }
 0x47b   :  { %7505 = vmatprep.subr.bf16.mxu1 %v19782_v14  ;;  %v19800_v14 = vld [vmem:[%s23190_s22 + $0x284] ss:$16 sps:$4 sm:$0xff]  }
 0x47e   :  { %7506 = vmatpush1.bf16.msra.mxu1 %v19780_v7  ;;  %v19891_v7 = vld [vmem:[%s20828_s6 + $0x30] ss:$8 sps:$4 sm:$0xff]  }
 0x47f   :  { %7507 = vmatprep.subr.bf16.mxu1 %v19785_v4  ;;  %v19894_v4 = vld [vmem:[%s20828_s6 + $0x40] ss:$8 sps:$4 sm:$0xff]  }
 0x482   :  { %7508 = vmatpush1.bf16.msra.mxu1 %v19783_v48  ;;  %v19899_v48 = vld [vmem:[%s20828_s6 + $0x54] ss:$8 sps:$4 sm:$0xff]  }
 0x483   :  { %7520 = vmatprep.subr.bf16.mxu1 %v19788_v9  ;;  %v19801_v9 = vld [vmem:[%s23190_s22 + $0x2a0] ss:$16 sps:$4 sm:$0xff]  }
 0x4a2   :  { %v16533_v23 = vpop.f32.mrb[124].mxu1 }
 0x4a3   :  { %v16534_v26 = vpop.f32.mrb[125].mxu1 }
 0x4a4   :  { %v16535_v43 = vadd.f32 %v16534_v26, %v16533_v23  ;;  %v16536_v39 = vpop.f32.mrb[126].mxu1  ;;  %v19786_v26 = vld [vmem:[%s23190_s22 + $0x200] ss:$16 sps:$4 sm:$0xff]  }
 0x4a5   :  { %v16537_v46 = vpop.f32.mrb[127].mxu1 }
 0x4a6   :  { %v6823_v35 = vadd.f32 %v16535_v43, %v6782_v19  ;;  %v16538_v47 = vadd.f32 %v16537_v46, %v16536_v39  ;;  %v19791_v43 = vld [vmem:[%s23190_s22 + $0x224] ss:$16 sps:$4 sm:$0xff]   ;;  %v19882_v39 = vld [vmem:[%s20828_s6] ss:$8 sps:$4 sm:$0xff]  }
 0x4a7   :  { %v19884_v46 = vld [vmem:[%s20828_s6 + $0x4] ss:$8 sps:$4 sm:$0xff]  }
 0x4a8   :  { %v6826_v40 = vadd.f32 %v16538_v47, %v6785_v15  ;;  %v19887_v47 = vld [vmem:[%s20828_s6 + $0x14] ss:$8 sps:$4 sm:$0xff]   ;;  %8057 = vmatprep.subr.bf16.mxu0 %v19884_v46  ;;  %v19909_v46 = vld [vmem:[%s20828_s6 + $0x90] ss:$8 sps:$4 sm:$0xff]  }
 0x4a9   :  { %8058 = vmatpush1.bf16.msra.mxu0 %v19882_v39  ;;  %v19818_v39 = vld [vmem:[%s23190_s22 + $0x4c] ss:$16 sps:$4 sm:$0xff]  }
 0x4aa   :  { %8059 = vmatprep.subr.bf16.mxu0 %v19887_v47  ;;  %v19816_v47 = vld [vmem:[%s23190_s22 + $0x48] ss:$16 sps:$4 sm:$0xff]  }
 0x4c2   :  { %v16555_v44 = vpop.f32.mrb[128].mxu1 }
 0x4c3   :  { %v16556_v22 = vpop.f32.mrb[129].mxu1 }
 0x4c4   :  { %v16557_v50 = vadd.f32 %v16556_v22, %v16555_v44  ;;  %v16558_v54 = vpop.f32.mrb[130].mxu1  ;;  %v19885_v44 = vld [vmem:[%s20828_s6 + $0x10] ss:$8 sps:$4 sm:$0xff]   ;;  %v19890_v22 = vld [vmem:[%s20828_s6 + $0x24] ss:$8 sps:$4 sm:$0xff]  }
 0x4c5   :  { %v16559_v55 = vpop.f32.mrb[131].mxu1  ;;  %8060 = vmatpush1.bf16.msra.mxu0 %v19885_v44  ;;  %v19912_v44 = vld [vmem:[%s20828_s6 + $0xa0] ss:$8 sps:$4 sm:$0xff]  }
 0x4c6   :  { %v6864_v31 = vadd.f32 %v16557_v50, %v6823_v35  ;;  %v16560_v63 = vadd.f32 %v16559_v55, %v16558_v54  ;;  %v19789_v35 = vld [vmem:[%s23190_s22 + $0x220] ss:$16 sps:$4 sm:$0xff]   ;;  %v19797_v54 = vld [vmem:[%s23190_s22 + $0x264] ss:$16 sps:$4 sm:$0xff]   ;;  %8061 = vmatprep.subr.bf16.mxu0 %v19890_v22  ;;  %v19819_v22 = vld [vmem:[%s23190_s22 + $0x68] ss:$16 sps:$4 sm:$0xff]  }
 0x4c7   :  { %v19792_v50 = vld [vmem:[%s23190_s22 + $0x240] ss:$16 sps:$4 sm:$0xff]  }
 0x4c8   :  { %v6867_v3 = vadd.f32 %v16560_v63, %v6826_v40  ;;  %v6872_v18 = vmax.f32 %v6864_v31, 0.0  ;;  %v19794_v40 = vld [vmem:[%s23190_s22 + $0x244] ss:$16 sps:$4 sm:$0xff]   ;;  %v19888_v55 = vld [vmem:[%s20828_s6 + $0x20] ss:$8 sps:$4 sm:$0xff]  }
 0x4c9   :  { %v19893_v31 = vld [vmem:[%s20828_s6 + $0x34] ss:$8 sps:$4 sm:$0xff]   ;;  %v19795_v63 = vld [vmem:[%s23190_s22 + $0x260] ss:$16 sps:$4 sm:$0xff]   ;;  %8062 = vmatpush1.bf16.msra.mxu0 %v19888_v55  ;;  %v19920_v55 = vld [vmem:[%s20828_s6 + $0xc4] ss:$8 sps:$4 sm:$0xff]  }
 0x4ca   :  { %v6875_v53 = vmax.f32 %v6867_v3, 0.0  ;;  %8063 = vmatprep.subr.bf16.mxu0 %v19893_v31  ;;  %v19896_v3 = vld [vmem:[%s20828_s6 + $0x44] ss:$8 sps:$4 sm:$0xff]   ;;  %v19822_v31 = vld [vmem:[%s23190_s22 + $0x88] ss:$16 sps:$4 sm:$0xff]  }
 0x4cc   :  { %v21961_v10 = vpack.c.bf16 %v6875_v53, %v6872_v18  ;;  %v19798_v18 = vld [vmem:[%s23190_s22 + $0x280] ss:$16 sps:$4 sm:$0xff]   ;;  %v19803_v53 = vld [vmem:[%s23190_s22 + $0x2a4] ss:$16 sps:$4 sm:$0xff]  }
 0x4cd   :  { %8064 = vmatpush1.bf16.msra.mxu0 %v19891_v7  ;;  %v19923_v7 = vld [vmem:[%s20828_s6 + $0xd4] ss:$8 sps:$4 sm:$0xff]  }
 0x4ce   :  { %8065 = vmatprep.subr.bf16.mxu0 %v19896_v3  ;;  %v19825_v3 = vld [vmem:[%s23190_s22 + $0xa8] ss:$16 sps:$4 sm:$0xff]  }
 0x4d1   :  { %8066 = vmatpush1.bf16.msra.mxu0 %v19894_v4  ;;  %v19828_v4 = vld [vmem:[%s23190_s22 + $0xc8] ss:$16 sps:$4 sm:$0xff]  }
 0x4d2   :  { %8067 = vmatprep.subr.bf16.mxu0 %v19899_v48  ;;  %v19833_v48 = vld [vmem:[%s23190_s22 + $0xec] ss:$16 sps:$4 sm:$0xff]  }
 0x544   :  { %v6615_v1 = vpop.f32.mrb[108].mxu0 }
 0x545   :  { %v18575_v17 = vadd.f32 %v6615_v1, %v4818_v11  ;;  %v6617_v19 = vpop.f32.mrb[109].mxu0  ;;  %v19902_v1 = vld [vmem:[%s20828_s6 + $0x64] ss:$8 sps:$4 sm:$0xff]  }
 0x546   :  { %v18576_v59 = vadd.f32 %v6617_v19, %v4822_v12  ;;  %v6619_v25 = vpop.f32.mrb[110].mxu0  ;;  %v19809_v19 = vld [vmem:[%s23190_s22 + $0x2e4] ss:$16 sps:$4 sm:$0xff]  }
 0x547   :  { %v18577_v33 = vadd.f32 %v6619_v25, %v4818_v11  ;;  %v6621_v15 = vpop.f32.mrb[111].mxu0  ;;  %v6870_v16 = vmax.f32 %v18575_v17, 0.0  ;;  %v19806_v11 = vld [vmem:[%s23190_s22 + $0x2c4] ss:$16 sps:$4 sm:$0xff]   ;;  %v19804_v17 = vld [vmem:[%s23190_s22 + $0x2c0] ss:$16 sps:$4 sm:$0xff]  }
 0x548   :  { %v18578_v56 = vadd.f32 %v6621_v15, %v4822_v12  ;;  %v6871_v41 = vmax.f32 %v18576_v59, 0.0  ;;  %v19897_v12 = vld [vmem:[%s20828_s6 + $0x50] ss:$8 sps:$4 sm:$0xff]   ;;  %v19900_v59 = vld [vmem:[%s20828_s6 + $0x60] ss:$8 sps:$4 sm:$0xff]  }
 0x549   :  { %v6873_v36 = vmax.f32 %v18577_v33, 0.0  ;;  %8068 = vmatpush1.bf16.msra.mxu0 %v19897_v12  ;;  %v19905_v25 = vld [vmem:[%s20828_s6 + $0x74] ss:$8 sps:$4 sm:$0xff]   ;;  %v19807_v33 = vld [vmem:[%s23190_s22 + $0x2e0] ss:$16 sps:$4 sm:$0xff]  }
 0x54a   :  { %v6874_v60 = vmax.f32 %v18578_v56, 0.0  ;;  %8069 = vmatprep.subr.bf16.mxu0 %v19902_v1  ;;  %v19812_v15 = vld [vmem:[%s23190_s22 + $0xc] ss:$16 sps:$4 sm:$0xff]   ;;  %v19903_v56 = vld [vmem:[%s20828_s6 + $0x70] ss:$8 sps:$4 sm:$0xff]  }
 0x54b   :  { %v21968_v23 = vpack.c.bf16 %v6873_v36, %v6870_v16  ;;  %v19908_v16 = vld [vmem:[%s20828_s6 + $0x84] ss:$8 sps:$4 sm:$0xff]   ;;  %v19810_v36 = vld [vmem:[%s23190_s22 + $0x8] ss:$16 sps:$4 sm:$0xff]  }
 0x54c   :  { %v21970_v61 = vpack.c.bf16 %v6874_v60, %v6871_v41  ;;  %v19815_v41 = vld [vmem:[%s23190_s22 + $0x2c] ss:$16 sps:$4 sm:$0xff]   ;;  %v19906_v60 = vld [vmem:[%s20828_s6 + $0x80] ss:$8 sps:$4 sm:$0xff]  }
 0x54d   :  { %8070 = vmatpush1.bf16.msra.mxu0 %v19900_v59  ;;  %v19834_v12 = vld [vmem:[%s23190_s22 + $0x108] ss:$16 sps:$4 sm:$0xff]   ;;  %v19839_v1 = vld [vmem:[%s23190_s22 + $0x12c] ss:$16 sps:$4 sm:$0xff]  }
 0x54e   :  { %7509 = vmatprep.mubr.bf16.mxu1 %v21970_v61  ;;  %8071 = vmatprep.subr.bf16.mxu0 %v19905_v25  ;;  %v19840_v59 = vld [vmem:[%s23190_s22 + $0x148] ss:$16 sps:$4 sm:$0xff]   ;;  %v19845_v25 = vld [vmem:[%s23190_s22 + $0x16c] ss:$16 sps:$4 sm:$0xff]  }
 0x54f   :  { %7510 = vmatmul.mubr.bf16.vlgmr.msra.gmra.mrb[132].mxu1 %v21968_v23 }
 0x550   :  { %7521 = vmatpush1.bf16.msra.mxu1 %v19786_v26  ;;  %7552 = vmatprep.mubr.bf16.mxu1 %v20544_v34  ;;  %v19911_v26 = vld [vmem:[%s20828_s6 + $0x94] ss:$8 sps:$4 sm:$0xff]  }
 0x551   :  { %7522 = vmatprep.subr.bf16.mxu1 %v19791_v43  ;;  %8072 = vmatpush1.bf16.msra.mxu0 %v19903_v56  ;;  %v19813_v43 = vld [vmem:[%s23190_s22 + $0x28] ss:$16 sps:$4 sm:$0xff]  }
 0x552   :  { %8073 = vmatprep.subr.bf16.mxu0 %v19908_v16  ;;  %v19846_v56 = vld [vmem:[%s23190_s22 + $0x188] ss:$16 sps:$4 sm:$0xff]   ;;  %v19851_v16 = vld [vmem:[%s23190_s22 + $0x1ac] ss:$16 sps:$4 sm:$0xff]  }
 0x554   :  { %7523 = vmatpush1.bf16.msra.mxu1 %v19789_v35  ;;  %v19914_v35 = vld [vmem:[%s20828_s6 + $0xa4] ss:$8 sps:$4 sm:$0xff]  }
 0x555   :  { %7524 = vmatprep.subr.bf16.mxu1 %v19794_v40  ;;  %8074 = vmatpush1.bf16.msra.mxu0 %v19906_v60  ;;  %v19821_v40 = vld [vmem:[%s23190_s22 + $0x6c] ss:$16 sps:$4 sm:$0xff]   ;;  %v19852_v60 = vld [vmem:[%s23190_s22 + $0x1c8] ss:$16 sps:$4 sm:$0xff]  }
 0x556   :  { %8075 = vmatprep.subr.bf16.mxu0 %v19911_v26  ;;  %v19857_v26 = vld [vmem:[%s23190_s22 + $0x1ec] ss:$16 sps:$4 sm:$0xff]  }
 0x558   :  { %7525 = vmatpush1.bf16.msra.mxu1 %v19792_v50  ;;  %v19824_v50 = vld [vmem:[%s23190_s22 + $0x8c] ss:$16 sps:$4 sm:$0xff]  }
 0x559   :  { %7526 = vmatprep.subr.bf16.mxu1 %v19797_v54  ;;  %8076 = vmatpush1.bf16.msra.mxu0 %v19909_v46  ;;  %v19915_v54 = vld [vmem:[%s20828_s6 + $0xb0] ss:$8 sps:$4 sm:$0xff]  }
 0x55a   :  { %8077 = vmatprep.subr.bf16.mxu0 %v19914_v35  ;;  %v19858_v46 = vld [vmem:[%s23190_s22 + $0x208] ss:$16 sps:$4 sm:$0xff]   ;;  %v19863_v35 = vld [vmem:[%s23190_s22 + $0x22c] ss:$16 sps:$4 sm:$0xff]  }
 0x55c   :  { %7527 = vmatpush1.bf16.msra.mxu1 %v19795_v63  ;;  %v19827_v63 = vld [vmem:[%s23190_s22 + $0xac] ss:$16 sps:$4 sm:$0xff]  }
 0x55d   :  { %7528 = vmatprep.subr.bf16.mxu1 %v19800_v14  ;;  %8078 = vmatpush1.bf16.msra.mxu0 %v19912_v44  ;;  %v19918_v14 = vld [vmem:[%s20828_s6 + $0xc0] ss:$8 sps:$4 sm:$0xff]  }
 0x55e   :  { %v19864_v44 = vld [vmem:[%s23190_s22 + $0x248] ss:$16 sps:$4 sm:$0xff]  }
 0x560   :  { %7529 = vmatpush1.bf16.msra.mxu1 %v19798_v18  ;;  %v19830_v18 = vld [vmem:[%s23190_s22 + $0xcc] ss:$16 sps:$4 sm:$0xff]  }
 0x561   :  { %7530 = vmatprep.subr.bf16.mxu1 %v19803_v53  ;;  %v19921_v53 = vld [vmem:[%s20828_s6 + $0xd0] ss:$8 sps:$4 sm:$0xff]  }
 0x564   :  { %7531 = vmatpush1.bf16.msra.mxu1 %v19801_v9  ;;  %v19831_v9 = vld [vmem:[%s23190_s22 + $0xe8] ss:$16 sps:$4 sm:$0xff]  }
 0x565   :  { %7532 = vmatprep.subr.bf16.mxu1 %v19806_v11  ;;  %v19836_v11 = vld [vmem:[%s23190_s22 + $0x10c] ss:$16 sps:$4 sm:$0xff]  }
 0x568   :  { %7533 = vmatpush1.bf16.msra.mxu1 %v19804_v17  ;;  %v19837_v17 = vld [vmem:[%s23190_s22 + $0x128] ss:$16 sps:$4 sm:$0xff]  }
 0x569   :  { %7534 = vmatprep.subr.bf16.mxu1 %v19809_v19  ;;  %v19842_v19 = vld [vmem:[%s23190_s22 + $0x14c] ss:$16 sps:$4 sm:$0xff]  }
 0x56c   :  { %7535 = vmatpush1.bf16.msra.mxu1 %v19807_v33  ;;  %v19843_v33 = vld [vmem:[%s23190_s22 + $0x168] ss:$16 sps:$4 sm:$0xff]  }
 0x56d   :  { %7563 = vmatprep.subr.bf16.mxu1 %v19812_v15  ;;  %v19848_v15 = vld [vmem:[%s23190_s22 + $0x18c] ss:$16 sps:$4 sm:$0xff]  }
 0x56f   :  { %7553 = vmatmul.mubr.bf16.vlgmr.msra.gmra.mrb[132].mxu1 %v21961_v10 }
 0x570   :  { %7564 = vmatpush1.bf16.msra.mxu1 %v19810_v36  ;;  %7595 = vmatprep.mubr.bf16.mxu1 %v21970_v61  ;;  %v19917_v61 = vld [vmem:[%s20828_s6 + $0xb4] ss:$8 sps:$4 sm:$0xff]   ;;  %v19849_v36 = vld [vmem:[%s23190_s22 + $0x1a8] ss:$16 sps:$4 sm:$0xff]  }
 0x571   :  { %7565 = vmatprep.subr.bf16.mxu1 %v19815_v41  ;;  %8079 = vmatprep.subr.bf16.mxu0 %v19917_v61  ;;  %v19854_v41 = vld [vmem:[%s23190_s22 + $0x1cc] ss:$16 sps:$4 sm:$0xff]  }
 0x572   :  { %8080 = vmatpush1.bf16.msra.mxu0 %v19915_v54  ;;  %v19869_v61 = vld [vmem:[%s23190_s22 + $0x26c] ss:$16 sps:$4 sm:$0xff]  }
 0x573   :  { %8081 = vmatprep.subr.bf16.mxu0 %v19920_v55  ;;  %v19875_v54 = vld [vmem:[%s23190_s22 + $0x2ac] ss:$16 sps:$4 sm:$0xff]   ;;  %v19873_v55 = vld [vmem:[%s23190_s22 + $0x2a8] ss:$16 sps:$4 sm:$0xff]  }
 0x574   :  { %7566 = vmatpush1.bf16.msra.mxu1 %v19813_v43  ;;  %v19855_v43 = vld [vmem:[%s23190_s22 + $0x1e8] ss:$16 sps:$4 sm:$0xff]  }
 0x575   :  { %7567 = vmatprep.subr.bf16.mxu1 %v19818_v39  ;;  %v19860_v39 = vld [vmem:[%s23190_s22 + $0x20c] ss:$16 sps:$4 sm:$0xff]  }
 0x576   :  { %8082 = vmatpush1.bf16.msra.mxu0 %v19918_v14  ;;  %v19926_v14 = vld [vmem:[%s20828_s6 + $0xe4] ss:$8 sps:$4 sm:$0xff]  }
 0x577   :  { %8083 = vmatprep.subr.bf16.mxu0 %v19923_v7  ;;  %v19881_v7 = vld [vmem:[%s23190_s22 + $0x2ec] ss:$16 sps:$4 sm:$0xff]  }
 0x578   :  { %7568 = vmatpush1.bf16.msra.mxu1 %v19816_v47  ;;  %v19861_v47 = vld [vmem:[%s23190_s22 + $0x228] ss:$16 sps:$4 sm:$0xff]  }
 0x579   :  { %7569 = vmatprep.subr.bf16.mxu1 %v19821_v40  ;;  %v19866_v40 = vld [vmem:[%s23190_s22 + $0x24c] ss:$16 sps:$4 sm:$0xff]  }
 0x57a   :  { %8084 = vmatpush1.bf16.msra.mxu0 %v19921_v53  ;;  %v19929_v53 = vld [vmem:[%s20828_s6 + $0xf4] ss:$8 sps:$4 sm:$0xff]  }
 0x57b   :  { %8085 = vmatprep.subr.bf16.mxu0 %v19926_v14 }
 0x57c   :  { %7570 = vmatpush1.bf16.msra.mxu1 %v19819_v22  ;;  %v19867_v22 = vld [vmem:[%s23190_s22 + $0x268] ss:$16 sps:$4 sm:$0xff]  }
 0x57d   :  { %7571 = vmatprep.subr.bf16.mxu1 %v19824_v50  ;;  %v19870_v50 = vld [vmem:[%s23190_s22 + $0x288] ss:$16 sps:$4 sm:$0xff]  }
 0x580   :  { %7572 = vmatpush1.bf16.msra.mxu1 %v19822_v31  ;;  %v19878_v31 = vld [vmem:[%s23190_s22 + $0x2cc] ss:$16 sps:$4 sm:$0xff]  }
 0x581   :  { %7573 = vmatprep.subr.bf16.mxu1 %v19827_v63  ;;  %v19876_v63 = vld [vmem:[%s23190_s22 + $0x2c8] ss:$16 sps:$4 sm:$0xff]  }
 0x584   :  { %7574 = vmatpush1.bf16.msra.mxu1 %v19825_v3  ;;  %v19924_v3 = vld [vmem:[%s20828_s6 + $0xe0] ss:$8 sps:$4 sm:$0xff]  }
 0x585   :  { %7575 = vmatprep.subr.bf16.mxu1 %v19830_v18  ;;  %8086 = vmatpush1.bf16.msra.mxu0 %v19924_v3  ;;  %v19879_v18 = vld [vmem:[%s23190_s22 + $0x2e8] ss:$16 sps:$4 sm:$0xff]   ;;  %v8157_v3 = vld [vmem:[%s20838_s3 + $0x50] sm:$0xff] }
 0x586   :  { %8087 = vmatprep.subr.bf16.mxu0 %v19929_v53 }
 0x588   :  { %7576 = vmatpush1.bf16.msra.mxu1 %v19828_v4  ;;  %v19927_v4 = vld [vmem:[%s20828_s6 + $0xf0] ss:$8 sps:$4 sm:$0xff]  }
 0x589   :  { %7577 = vmatprep.subr.bf16.mxu1 %v19833_v48  ;;  %8088 = vmatpush1.bf16.msra.mxu0 %v19927_v4  ;;  %v19932_v48 = vld [vmem:[%s20828_s6 + $0x104] ss:$8 sps:$4 sm:$0xff]  }
 0x58a   :  { %8100 = vmatprep.subr.bf16.mxu0 %v19932_v48  ;;  %v8175_v4 = vld [vmem:[%s20838_s3 + $0xe0] sm:$0xff]  ;;  %v8176_v48 = vld [vmem:[%s20838_s3 + $0xe8] sm:$0xff] }
 0x58c   :  { %7578 = vmatpush1.bf16.msra.mxu1 %v19831_v9  ;;  %v8163_v9 = vld [vmem:[%s20838_s3 + $0x80] sm:$0xff] }
 0x58d   :  { %7579 = vmatprep.subr.bf16.mxu1 %v19836_v11  ;;  %v8164_v11 = vld [vmem:[%s20838_s3 + $0x88] sm:$0xff] }
 0x590   :  { %7580 = vmatpush1.bf16.msra.mxu1 %v19834_v12  ;;  %v8147_v12 = vld [vmem:[%s20838_s3] sm:$0xff] }
 0x591   :  { %7581 = vmatprep.subr.bf16.mxu1 %v19839_v1  ;;  %v17947_v1 = vpack.c.bf16 %v8164_v11, %v8163_v9 }
 0x594   :  { %7582 = vmatpush1.bf16.msra.mxu1 %v19837_v17  ;;  %v8148_v17 = vld [vmem:[%s20838_s3 + $0x8] sm:$0xff] }
 0x595   :  { %7583 = vmatprep.subr.bf16.mxu1 %v19842_v19  ;;  %v8165_v19 = vld [vmem:[%s20838_s3 + $0x90] sm:$0xff] }
 0x598   :  { %7584 = vmatpush1.bf16.msra.mxu1 %v19840_v59  ;;  %v8166_v59 = vld [vmem:[%s20838_s3 + $0x98] sm:$0xff] }
 0x599   :  { %7585 = vmatprep.subr.bf16.mxu1 %v19845_v25  ;;  %v17949_v25 = vpack.c.bf16 %v8148_v17, %v8147_v12 }
 0x59c   :  { %7586 = vmatpush1.bf16.msra.mxu1 %v19843_v33  ;;  %v17951_v33 = vpack.c.bf16 %v8166_v59, %v8165_v19 }
 0x59d   :  { %7587 = vmatprep.subr.bf16.mxu1 %v19848_v15  ;;  %v8149_v15 = vld [vmem:[%s20838_s3 + $0x10] sm:$0xff] }
 0x5a0   :  { %7588 = vmatpush1.bf16.msra.mxu1 %v19846_v56  ;;  %v8150_v56 = vld [vmem:[%s20838_s3 + $0x18] sm:$0xff] }
 0x5a1   :  { %7589 = vmatprep.subr.bf16.mxu1 %v19851_v16  ;;  %v8167_v16 = vld [vmem:[%s20838_s3 + $0xa0] sm:$0xff] }
 0x5a4   :  { %7590 = vmatpush1.bf16.msra.mxu1 %v19849_v36  ;;  %v17953_v36 = vpack.c.bf16 %v8150_v56, %v8149_v15 }
 0x5a5   :  { %7591 = vmatprep.subr.bf16.mxu1 %v19854_v41 }
 0x5a8   :  { %7592 = vmatpush1.bf16.msra.mxu1 %v19852_v60  ;;  %v8151_v60 = vld [vmem:[%s20838_s3 + $0x20] sm:$0xff] }
 0x5a9   :  { %7593 = vmatprep.subr.bf16.mxu1 %v19857_v26  ;;  %v8152_v26 = vld [vmem:[%s20838_s3 + $0x28] sm:$0xff] }
 0x5ac   :  { %7594 = vmatpush1.bf16.msra.mxu1 %v19855_v43  ;;  %v8169_v43 = vld [vmem:[%s20838_s3 + $0xb0] sm:$0xff] }
 0x5ad   :  { %7606 = vmatprep.subr.bf16.mxu1 %v19860_v39  ;;  %v8170_v39 = vld [vmem:[%s20838_s3 + $0xb8] sm:$0xff] }
 0x5af   :  { %7596 = vmatmul.mubr.bf16.vlgmr.msra.gmra.mrb[136].mxu1 %v21968_v23  ;;  %v19872_v23 = vld [vmem:[%s23190_s22 + $0x28c] ss:$16 sps:$4 sm:$0xff]   ;;  %s23224_s22 = sld [smem:[#allocation38_spill]] }
 0x5b0   :  { %7607 = vmatpush1.bf16.msra.mxu1 %v19858_v46  ;;  %7638 = vmatprep.mubr.bf16.mxu1 %v20544_v34  ;;  %v17957_v46 = vpack.c.bf16 %v8152_v26, %v8151_v60 }
 0x5b1   :  { %7608 = vmatprep.subr.bf16.mxu1 %v19863_v35  ;;  %v17959_v35 = vpack.c.bf16 %v8170_v39, %v8169_v43  ;;  %v19930_v43 = vld [vmem:[%s20828_s6 + $0x100] ss:$8 sps:$4 sm:$0xff]   ;;  %v19935_v39 = vld [vmem:[%s20828_s6 + $0x114] ss:$8 sps:$4 sm:$0xff]  }
 0x5b4   :  { %7609 = vmatpush1.bf16.msra.mxu1 %v19861_v47  ;;  %v8153_v47 = vld [vmem:[%s20838_s3 + $0x30] sm:$0xff] }
 0x5b5   :  { %7610 = vmatprep.subr.bf16.mxu1 %v19866_v40  ;;  %v8154_v40 = vld [vmem:[%s20838_s3 + $0x38] sm:$0xff] }
 0x5b8   :  { %7611 = vmatpush1.bf16.msra.mxu1 %v19864_v44  ;;  %v8171_v44 = vld [vmem:[%s20838_s3 + $0xc0] sm:$0xff] }
 0x5b9   :  { %7612 = vmatprep.subr.bf16.mxu1 %v19869_v61  ;;  %v8172_v61 = vld [vmem:[%s20838_s3 + $0xc8] sm:$0xff] }
 0x5bc   :  { %7613 = vmatpush1.bf16.msra.mxu1 %v19867_v22  ;;  %v17961_v22 = vpack.c.bf16 %v8154_v40, %v8153_v47  ;;  %v19936_v47 = vld [vmem:[%s20828_s6 + $0x120] ss:$8 sps:$4 sm:$0xff]   ;;  %v19941_v40 = vld [vmem:[%s20828_s6 + $0x134] ss:$8 sps:$4 sm:$0xff]  }
 0x5bd   :  { %7614 = vmatprep.subr.bf16.mxu1 %v19872_v23  ;;  %v17963_v23 = vpack.c.bf16 %v8172_v61, %v8171_v44  ;;  %v19939_v44 = vld [vmem:[%s20828_s6 + $0x130] ss:$8 sps:$4 sm:$0xff]   ;;  %v19944_v61 = vld [vmem:[%s20828_s6 + $0x144] ss:$8 sps:$4 sm:$0xff]  }
 0x5c0   :  { %7615 = vmatpush1.bf16.msra.mxu1 %v19870_v50  ;;  %v8155_v50 = vld [vmem:[%s20838_s3 + $0x40] sm:$0xff] }
 0x5c1   :  { %7616 = vmatprep.subr.bf16.mxu1 %v19875_v54  ;;  %v8156_v54 = vld [vmem:[%s20838_s3 + $0x48] sm:$0xff] }
 0x5c2   :  { %v17965_v14 = vpack.c.bf16 %v8156_v54, %v8155_v50  ;;  %v19945_v50 = vld [vmem:[%s20828_s6 + $0x150] ss:$8 sps:$4 sm:$0xff]   ;;  %v19950_v54 = vld [vmem:[%s20828_s6 + $0x164] ss:$8 sps:$4 sm:$0xff]  }
 0x5c4   :  { %7617 = vmatpush1.bf16.msra.mxu1 %v19873_v55  ;;  %v8173_v55 = vld [vmem:[%s20838_s3 + $0xd0] sm:$0xff] }
 0x5c5   :  { %7618 = vmatprep.subr.bf16.mxu1 %v19878_v31  ;;  %v8174_v31 = vld [vmem:[%s20838_s3 + $0xd8] sm:$0xff] }
 0x5c8   :  { %7619 = vmatpush1.bf16.msra.mxu1 %v19876_v63  ;;  %v22099_v63 = vld [vmem:[%s23191_s23] sm:$0xf]  ;;  %s23225_s23 = sld [smem:[#allocation67_spill]] }
 0x5c9   :  { %7620 = vmatprep.subr.bf16.mxu1 %v19881_v7  ;;  %v17967_v7 = vpack.c.bf16 %v8174_v31, %v8173_v55  ;;  %v6980_v53 = vrot.slane %v22099_v63, %v21586_v8  ;;  %v6984_v9 = vrot.slane %v22099_v63, %v21590_v51  ;;  %v19948_v55 = vld [vmem:[%s20828_s6 + $0x160] ss:$8 sps:$4 sm:$0xff]   ;;  %v19953_v31 = vld [vmem:[%s20828_s6 + $0x174] ss:$8 sps:$4 sm:$0xff]  }
 0x5cc   :  { %7621 = vmatpush1.bf16.msra.mxu1 %v19879_v18  ;;  %v8158_v18 = vld [vmem:[%s20838_s3 + $0x58] sm:$0xff] }
 0x5cd   :  { %17948 = vmatprep.subr.bf16.mxu1 %v17947_v1  ;;  %v17969_v11 = vpack.c.bf16 %v8158_v18, %v8157_v3  ;;  %v17971_v1 = vpack.c.bf16 %v8176_v48, %v8175_v4  ;;  %v19954_v3 = vld [vmem:[%s20828_s6 + $0x180] ss:$8 sps:$4 sm:$0xff]   ;;  %v19959_v18 = vld [vmem:[%s20828_s6 + $0x194] ss:$8 sps:$4 sm:$0xff]   ;;  %v19962_v4 = vld [vmem:[%s20828_s6 + $0x1a4] ss:$8 sps:$4 sm:$0xff]  }
 0x5ce   :  { %v19960_v48 = vld [vmem:[%s20828_s6 + $0x1a0] ss:$8 sps:$4 sm:$0xff]  }
 0x5cf   :  { %7639 = vmatmul.mubr.bf16.vlgmr.msra.gmra.mrb[136].mxu1 %v21961_v10  ;;  %v8168_v10 = vld [vmem:[%s20838_s3 + $0xa8] sm:$0xff] }
 0x5d0   :  { %17950 = vmatpush3.bf16.msra.mxu1 %v17949_v25  ;;  %v17955_v41 = vpack.c.bf16 %v8168_v10, %v8167_v16 }
 0x5d1   :  { %17952 = vmatprep.subr.bf16.mxu1 %v17951_v33 }
 0x5d4   :  { %17954 = vmatpush3.bf16.msra.mxu1 %v17953_v36 }
 0x5d5   :  { %17956 = vmatprep.subr.bf16.mxu1 %v17955_v41 }
 0x5d8   :  { %17958 = vmatpush3.bf16.msra.mxu1 %v17957_v46  ;;  %v19933_v46 = vld [vmem:[%s20828_s6 + $0x110] ss:$8 sps:$4 sm:$0xff]  }
 0x5d9   :  { %17960 = vmatprep.subr.bf16.mxu1 %v17959_v35  ;;  %v19938_v35 = vld [vmem:[%s20828_s6 + $0x124] ss:$8 sps:$4 sm:$0xff]  }
 0x5dc   :  { %17962 = vmatpush3.bf16.msra.mxu1 %v17961_v22  ;;  %v19942_v22 = vld [vmem:[%s20828_s6 + $0x140] ss:$8 sps:$4 sm:$0xff]  }
 0x5dd   :  { %17964 = vmatprep.subr.bf16.mxu1 %v17963_v23  ;;  %v19947_v23 = vld [vmem:[%s20828_s6 + $0x154] ss:$8 sps:$4 sm:$0xff]  }
 0x5e0   :  { %17966 = vmatpush3.bf16.msra.mxu1 %v17965_v14  ;;  %v19951_v14 = vld [vmem:[%s20828_s6 + $0x170] ss:$8 sps:$4 sm:$0xff]  }
 0x5e1   :  { %17968 = vmatprep.subr.bf16.mxu1 %v17967_v7  ;;  %v19956_v7 = vld [vmem:[%s20828_s6 + $0x184] ss:$8 sps:$4 sm:$0xff]  }
 0x5e4   :  { %17970 = vmatpush3.bf16.msra.mxu1 %v17969_v11  ;;  %v19963_v11 = vld [vmem:[%s20828_s6 + $0x1b0] ss:$8 sps:$4 sm:$0xff]  }
 0x5e5   :  { %17972 = vmatprep.subr.bf16.mxu1 %v17971_v1  ;;  %v19966_v1 = vld [vmem:[%s20828_s6 + $0x1c0] ss:$8 sps:$4 sm:$0xff]  }
 0x642   :  { %v7554_v12 = vpop.f32.mrb[132].mxu1 }
 0x643   :  { %v18579_v17 = vadd.f32 %v7554_v12, %v6980_v53  ;;  %v7556_v19 = vpop.f32.mrb[133].mxu1  ;;  %v19968_v12 = vld [vmem:[%s20828_s6 + $0x1c4] ss:$8 sps:$4 sm:$0xff]  }
 0x644   :  { %v18580_v59 = vadd.f32 %v7556_v19, %v6984_v9  ;;  %v7558_v25 = vpop.f32.mrb[134].mxu1  ;;  %v19969_v19 = vld [vmem:[%s20828_s6 + $0x1d0] ss:$8 sps:$4 sm:$0xff]  }
 0x645   :  { %v18581_v33 = vadd.f32 %v7558_v25, %v6980_v53  ;;  %v7560_v15 = vpop.f32.mrb[135].mxu1  ;;  %v7649_v16 = vmax.f32 %v18579_v17, 0.0  ;;  %v19957_v53 = vld [vmem:[%s20828_s6 + $0x190] ss:$8 sps:$4 sm:$0xff]   ;;  %v19971_v17 = vld [vmem:[%s20828_s6 + $0x1d4] ss:$8 sps:$4 sm:$0xff]  }
 0x646   :  { %v18582_v56 = vadd.f32 %v7560_v15, %v6984_v9  ;;  %v7650_v36 = vmax.f32 %v18580_v59, 0.0  ;;  %v19965_v9 = vld [vmem:[%s20828_s6 + $0x1b4] ss:$8 sps:$4 sm:$0xff]   ;;  %v19974_v59 = vld [vmem:[%s20828_s6 + $0x1e4] ss:$8 sps:$4 sm:$0xff]  }
 0x647   :  { %v7653_v10 = vmax.f32 %v18581_v33, 0.0  ;;  %v19972_v25 = vld [vmem:[%s20828_s6 + $0x1e0] ss:$8 sps:$4 sm:$0xff]   ;;  %v19977_v33 = vld [vmem:[%s20828_s6 + $0x1f4] ss:$8 sps:$4 sm:$0xff]  }
 0x648   :  { %v7654_v41 = vmax.f32 %v18582_v56, 0.0  ;;  %v19975_v15 = vld [vmem:[%s20828_s6 + $0x1f0] ss:$8 sps:$4 sm:$0xff]   ;;  %v6988_v56 = vrot.slane %v22099_v63, %v21595_v57  ;;  %s23192_s6 = sld [smem:[#allocation58_spill]] }
 0x649   :  { %v7721_v60 = vpack.c.bf16 %v7653_v10, %v7649_v16  ;;  %v6992_v16 = vrot.slane %v22099_v63, %v21601_v58 }
 0x64a   :  { %v7722_v26 = vpack.c.bf16 %v7654_v41, %v7650_v36 }
 0x64c   :  { %8089 = vmatprep.mubr.bf16.mxu0 %v7722_v26 }
 0x64d   :  { %8090 = vmatmul.mubr.bf16.vlgmr.msra.gmra.mrb[112].mxu0 %v7721_v60 }
 0x64e   :  { %8101 = vmatpush1.bf16.msra.mxu0 %v19930_v43 }
 0x64f   :  { %8102 = vmatprep.subr.bf16.mxu0 %v19935_v39 }
 0x652   :  { %8103 = vmatpush1.bf16.msra.mxu0 %v19933_v46 }
 0x653   :  { %8104 = vmatprep.subr.bf16.mxu0 %v19938_v35 }
 0x656   :  { %8105 = vmatpush1.bf16.msra.mxu0 %v19936_v47 }
 0x657   :  { %8106 = vmatprep.subr.bf16.mxu0 %v19941_v40 }
 0x65a   :  { %8107 = vmatpush1.bf16.msra.mxu0 %v19939_v44 }
 0x65b   :  { %8108 = vmatprep.subr.bf16.mxu0 %v19944_v61 }
 0x65e   :  { %8109 = vmatpush1.bf16.msra.mxu0 %v19942_v22  ;;  %v8159_v22 = vld [vmem:[%s20838_s3 + $0x60] sm:$0xff] }
 0x65f   :  { %8110 = vmatprep.subr.bf16.mxu0 %v19947_v23  ;;  %v8160_v23 = vld [vmem:[%s20838_s3 + $0x68] sm:$0xff] }
 0x662   :  { %8111 = vmatpush1.bf16.msra.mxu0 %v19945_v50  ;;  %v17973_v50 = vpack.c.bf16 %v8160_v23, %v8159_v22  ;;  %v15622_v22 = vld [vmem:[#allocation10] ss:$0 sm:$0xff] }
 0x663   :  { %8112 = vmatprep.subr.bf16.mxu0 %v19950_v54  ;;  %v8177_v54 = vld [vmem:[%s20838_s3 + $0xf0] sm:$0xff] }
 0x664   :  { %17974 = vmatpush3.bf16.msra.mxu1 %v17973_v50 }
 0x666   :  { %8113 = vmatpush1.bf16.msra.mxu0 %v19948_v55  ;;  %v8178_v55 = vld [vmem:[%s20838_s3 + $0xf8] sm:$0xff] }
 0x667   :  { %8114 = vmatprep.subr.bf16.mxu0 %v19953_v31  ;;  %v17975_v31 = vpack.c.bf16 %v8178_v55, %v8177_v54 }
 0x669   :  { %17976 = vmatprep.subr.bf16.mxu1 %v17975_v31 }
 0x66a   :  { %8115 = vmatpush1.bf16.msra.mxu0 %v19951_v14  ;;  %v8161_v14 = vld [vmem:[%s20838_s3 + $0x70] sm:$0xff] }
 0x66b   :  { %8116 = vmatprep.subr.bf16.mxu0 %v19956_v7  ;;  %v8162_v7 = vld [vmem:[%s20838_s3 + $0x78] sm:$0xff]  ;;  %s23195_s3 = sld [smem:[#allocation59_spill]] }
 0x66e   :  { %8117 = vmatpush1.bf16.msra.mxu0 %v19954_v3  ;;  %v17977_v3 = vpack.c.bf16 %v8162_v7, %v8161_v14  ;;  %v8464_v7 = vld [vmem:[%s23196_s8 + $0x10] sm:$0xff] }
 0x66f   :  { %8118 = vmatprep.subr.bf16.mxu0 %v19959_v18  ;;  %v8265_v18 = vld [vmem:[%s23192_s6] sm:$0x7f]  ;;  %s23226_s6 = sld [smem:[#allocation36_spill]] }
 0x670   :  { %17978 = vmatpush3.bf16.msra.mxu1 %v17977_v3  ;;  %v8465_v3 = vld [vmem:[%s23196_s8 + $0x18] sm:$0xff] }
 0x671   :  { %17181 = vmatprep.subr.msk.mxu1 %vm8280_vm2, %v8265_v18 }
 0x672   :  { %8119 = vmatpush1.bf16.msra.mxu0 %v19957_v53  ;;  %v7725_v53 = vld [vmem:[%s23193_s26] sm:$0x3]  ;;  %s23227_s26 = sld [smem:[#allocation68_spill]] }
 0x673   :  { %8120 = vmatprep.subr.bf16.mxu0 %v19962_v4  ;;  %v7730_v4 = vrot.slane %v7725_v53, %v21586_v8 }
 0x676   :  { %8121 = vmatpush1.bf16.msra.mxu0 %v19960_v48  ;;  %v7734_v48 = vrot.slane %v7725_v53, %v21590_v51  ;;  %v8454_v53 = vld [vmem:[%s23197_s19] sm:$0xff] }
 0x677   :  { %8122 = vmatprep.subr.bf16.mxu0 %v19965_v9 }
 0x67a   :  { %8123 = vmatpush1.bf16.msra.mxu0 %v19963_v11 }
 0x67b   :  { %8124 = vmatprep.subr.bf16.mxu0 %v19968_v12 }
 0x67e   :  { %8125 = vmatpush1.bf16.msra.mxu0 %v19966_v1 }
 0x67f   :  { %8126 = vmatprep.subr.bf16.mxu0 %v19971_v17 }
 0x682   :  { %8127 = vmatpush1.bf16.msra.mxu0 %v19969_v19 }
 0x683   :  { %8128 = vmatprep.subr.bf16.mxu0 %v19974_v59 }
 0x686   :  { %8129 = vmatpush1.bf16.msra.mxu0 %v19972_v25 }
 0x687   :  { %8130 = vmatprep.subr.bf16.mxu0 %v19977_v33 }
 0x68a   :  { %8131 = vmatpush1.bf16.msra.mxu0 %v19975_v15 }
 0x6a2   :  { %v7640_v10 = vpop.f32.mrb[136].mxu1 }
 0x6a3   :  { %v18583_v36 = vadd.f32 %v7640_v10, %v6988_v56  ;;  %v7642_v41 = vpop.f32.mrb[137].mxu1  ;;  %v8263_v10 = vld [vmem:[%s23194_s28] sm:$0xff] }
 0x6a4   :  { %v18584_v60 = vadd.f32 %v7642_v41, %v6992_v16  ;;  %v7644_v26 = vpop.f32.mrb[138].mxu1  ;;  %v8361_v41 = vld [vmem:[%s23195_s3] sm:$0xff] }
 0x6a5   :  { %v18585_v43 = vadd.f32 %v7644_v26, %v6988_v56  ;;  %v7646_v39 = vpop.f32.mrb[139].mxu1  ;;  %v7651_v35 = vmax.f32 %v18583_v36, 0.0  ;;  %v8264_v36 = vld [vmem:[%s23194_s28 + $0x8] sm:$0x3]  ;;  %s20549_s28 = smov [#allocation23]  }
 0x6a6   :  { %v18586_v46 = vadd.f32 %v7646_v39, %v6992_v16  ;;  %v7652_v40 = vmax.f32 %v18584_v60, 0.0  ;;  %v8362_v60 = vld [vmem:[%s23195_s3 + $0x8] sm:$0xff]  ;;  %s14648_s3 = sshll.u32 %s20549_s28, 4  ;;  %s14649_s3 = int_to_ptr.vmem [resolvable:$true] %s14648_s3 }
 0x6a7   :  { %v7655_v47 = vmax.f32 %v18585_v43, 0.0  ;;  %v17979_v26 = vpack.c.bf16 %v8362_v60, %v8361_v41  ;;  %v8462_v43 = vld [vmem:[%s23196_s8] sm:$0xff]  ;;  %v8463_v39 = vld [vmem:[%s23196_s8 + $0x8] sm:$0xff]  ;;  %s20436_s8 = scalar_lea.vmem %s14649_s3, 32  ;;  %p20441_p7 = scmp.lt.s32.totalorder %s14649_s3, %s14649_s3 }
 0x6a8   :  { %v7656_v44 = vmax.f32 %v18586_v46, 0.0  ;;  %v17983_v46 = vpack.c.bf16 %v8463_v39, %v8462_v43  ;;  %v8459_v41 = vld [vmem:[%s23197_s19 + $0x28] sm:$0xff]  ;;  %v8461_v43 = vld [vmem:[%s23197_s19 + $0x38] sm:$0xff]  ;;  %p20437_p6 = scmp.ne.s32.totalorder %s14649_s3, %s20436_s8  ;;  %p20442_p8 = scmp.lt.s32.totalorder %s20436_s8, %s20436_s8 }
 0x6a9   :  { %v7723_v61 = vpack.c.bf16 %v7655_v47, %v7651_v35 }
 0x6aa   :  { %v7724_v63 = vpack.c.bf16 %v7656_v44, %v7652_v40  ;;  %p20443_p9 = por %p20442_p8, %p20441_p7 }
 0x6ac   :  { %8132 = vmatprep.mubr.bf16.mxu0 %v7724_v63  ;;  %p20444_p10 = pnand %p20443_p9, %p20437_p6 }
 0x6ad   :  { %8133 = vmatmul.mubr.bf16.vlgmr.msra.gmra.mrb[112].mxu0 %v7723_v61 }
 0x780   :  { %v8134_v9 = vpop.f32.mrb[112].mxu0 }
 0x781   :  { %v18587_v11 = vadd.f32 %v8134_v9, %v7730_v4  ;;  %v8136_v12 = vpop.f32.mrb[113].mxu0  ;;  %v15626_v9 = vld [vmem:[#allocation11] ss:$0 sm:$0xff] }
 0x782   :  { %v18588_v1 = vadd.f32 %v8136_v12, %v7734_v48  ;;  %v8138_v17 = vpop.f32.mrb[114].mxu0 }
 0x783   :  { %v8140_v19 = vpop.f32.mrb[115].mxu0  ;;  %v8143_v33 = vmax.f32 %v18587_v11, 0.0  ;;  %v18589_v15 = vadd.f32 %v8138_v17, %v7730_v4  ;;  %v8455_v4 = vld [vmem:[%s23197_s19 + $0x8] sm:$0xff]  ;;  %v15621_v11 = vld [vmem:[#allocation22] ss:$0 sm:$0xff] }
 0x784   :  { %v8144_v59 = vmax.f32 %v18588_v1, 0.0  ;;  %v18590_v25 = vadd.f32 %v8140_v19, %v7734_v48  ;;  %v17991_v48 = vpack.c.bf16 %v8455_v4, %v8454_v53  ;;  %v8650_v53 = vld [vmem:[%s23198_s14 + $0x50] sm:$0xff]  ;;  %v8651_v4 = vld [vmem:[%s23198_s14 + $0x58] sm:$0xff] }
 0x785   :  { %v8145_v16 = vmax.f32 %v18589_v15, 0.0 }
 0x786   :  { %v8146_v56 = vmax.f32 %v18590_v25, 0.0  ;;  %8250 = vmatprep.mubr.f32.mxu1 %v8144_v59  ;;  %v8456_v25 = vld [vmem:[%s23197_s19 + $0x10] sm:$0xff] }
 0x787   :  { %8251 = vmatmul.mubr.f32.vlgmr.msra.gmra.mrb[140].mxu1 %v8143_v33  ;;  %v8457_v33 = vld [vmem:[%s23197_s19 + $0x18] sm:$0xff] }
 0x788   :  { %8255 = vmatprep.mubr.f32.mxu1 %v8146_v56  ;;  %17182 = vmatpush3.msk.msra.mxu1 %vm8280_vm2, %v8265_v18  ;;  %v17987_v18 = vpack.c.bf16 %v8465_v3, %v8464_v7  ;;  %v8648_v7 = vld [vmem:[%s23198_s14 + $0x40] sm:$0xff]  ;;  %v8649_v3 = vld [vmem:[%s23198_s14 + $0x48] sm:$0xff] }
 0x789   :  { %17980 = vmatprep.subr.bf16.mxu1 %v17979_v26 }
 0x78b   :  { %8256 = vmatmul.mubr.f32.gmra.mrb[142].mxu1 %v8145_v16  ;;  %v17995_v16 = vpack.c.bf16 %v8457_v33, %v8456_v25  ;;  %v8744_v25 = vld [vmem:[%s23199_s1 + $0x8] sm:$0xff] }
 0x78c   :  { %17183 = vmatprep.mubr.msk.f32.mxu1 %vm8273_vm3, %v8263_v10 }
 0x78f   :  { %17184 = vmatmul.mubr.msk.f32.vlgmr.msra.gmra.mrb[144].mxu1 %vm8273_vm3, %v8264_v36  ;;  %v8458_v36 = vld [vmem:[%s23197_s19 + $0x20] sm:$0xff] }
 0x790   :  { %17982 = vmatpush3.bf16.msra.mxu1 %v17979_v26  ;;  %v17999_v60 = vpack.c.bf16 %v8459_v41, %v8458_v36  ;;  %v8460_v26 = vld [vmem:[%s23197_s19 + $0x30] sm:$0xff]  ;;  %v8932_v36 = vld [vmem:[%s23200_s24 + $0x18] sm:$0xff] }
 0x791   :  { %17984 = vmatprep.subr.bf16.mxu1 %v17983_v46  ;;  %v18003_v39 = vpack.c.bf16 %v8461_v43, %v8460_v26  ;;  %v8934_v26 = vld [vmem:[%s23200_s24 + $0x28] sm:$0xff] }
 0x85a   :  { %v16593_v35 = vpop.f32.mrb[140].mxu1 }
 0x85b   :  { %v16594_v47 = vpop.f32.mrb[141].mxu1 }
 0x85c   :  { %v16595_v40 = vadd.f32 %v16594_v47, %v16593_v35  ;;  %v8641_v35 = vld [vmem:[%s23198_s14 + $0x8] sm:$0xff] }
 0x85e   :  { %v16596_v44 = vpop.f32.mrb[142].mxu1  ;;  %v8253_v19 = vadd.f32 %v16595_v40, %v15621_v11 }
 0x85f   :  { %v16597_v61 = vpop.f32.mrb[143].mxu1 }
 0x860   :  { %v16598_v63 = vadd.f32 %v16597_v61, %v16596_v44  ;;  %v8261_v10 = vmax.f32 %v8253_v19, 0.0  ;;  %v8642_v44 = vld [vmem:[%s23198_s14 + $0x10] sm:$0xff]  ;;  %v8643_v61 = vld [vmem:[%s23198_s14 + $0x18] sm:$0xff] }
 0x862   :  { %v17185_v23 = vpop.f32.mrb[144].mxu1  ;;  %v8258_v47 = vadd.f32 %v16598_v63, %v15621_v11  ;;  %v8653_v11 = vld [vmem:[%s23198_s14 + $0x68] sm:$0xff] }
 0x863   :  { %v8356_v50 = vadd.f32 %v17185_v23, %v15622_v22  ;;  %v8350_v54 = vpop.f32.mrb[145].mxu1  ;;  %v18011_v23 = vpack.c.bf16 %v8643_v61, %v8642_v44  ;;  %v8745_v44 = vld [vmem:[%s23199_s1 + $0x10] sm:$0xff]  ;;  %v8746_v61 = vld [vmem:[%s23199_s1 + $0x18] sm:$0xff] }
 0x864   :  { %v8351_v55 = vadd.f32 %v15622_v22, %v8350_v54  ;;  %v8262_v22 = vmax.f32 %v8258_v47, 0.0  ;;  %v8645_v54 = vld [vmem:[%s23198_s14 + $0x28] sm:$0xff] }
 0x865   :  { %v8360_v14 = vmax.f32 %v8356_v50, 0.0  ;;  %v8644_v50 = vld [vmem:[%s23198_s14 + $0x20] sm:$0xff] }
 0x866   :  { %v8359_v31 = vmax.f32 %v8351_v55, 0.0  ;;  %v18015_v63 = vpack.c.bf16 %v8645_v54, %v8644_v50  ;;  %v8646_v55 = vld [vmem:[%s23198_s14 + $0x30] sm:$0xff]  ;;  %v18043_v50 = vpack.c.bf16 %v8746_v61, %v8745_v44  ;;  %v8747_v54 = vld [vmem:[%s23199_s1 + $0x20] sm:$0xff] }
 0x868   :  { %17190 = vmatprep.mubr.msk.f32.mxu1 %vm8370_vm4, %v8359_v31  ;;  %v8647_v31 = vld [vmem:[%s23198_s14 + $0x38] sm:$0xff] }
 0x869   :  { %17191 = vmatmul.mubr.msk.f32.vlgmr.msra.gmra.mrb[146].mxu1 %vm8370_vm4, %v8360_v14  ;;  %v18019_v14 = vpack.c.bf16 %v8647_v31, %v8646_v55  ;;  %v8749_v31 = vld [vmem:[%s23199_s1 + $0x30] sm:$0xff] }
 0x86a   :  { %17986 = vmatpush3.bf16.msra.mxu1 %v17983_v46  ;;  %v8640_v46 = vld [vmem:[%s23198_s14] sm:$0xff] }
 0x86b   :  { %17988 = vmatprep.subr.bf16.mxu1 %v17987_v18  ;;  %v18007_v40 = vpack.c.bf16 %v8641_v35, %v8640_v46 }
 0x86e   :  { %17990 = vmatpush3.bf16.msra.mxu1 %v17987_v18  ;;  %v18023_v18 = vpack.c.bf16 %v8649_v3, %v8648_v7  ;;  %v8935_v3 = vld [vmem:[%s23200_s24 + $0x30] sm:$0xff] }
 0x86f   :  { %17992 = vmatprep.subr.bf16.mxu1 %v17991_v48 }
 0x93c   :  { %v17192_v12 = vpop.f32.mrb[146].mxu1 }
 0x93d   :  { %v8449_v1 = vadd.f32 %v17192_v12, %v15626_v9  ;;  %v8443_v17 = vpop.f32.mrb[147].mxu1 }
 0x93e   :  { %v8444_v59 = vadd.f32 %v15626_v9, %v8443_v17  ;;  %v8652_v9 = vld [vmem:[%s23198_s14 + $0x60] sm:$0xff]  ;;  %v8655_v17 = vld [vmem:[%s23198_s14 + $0x78] sm:$0xff] }
 0x93f   :  { %v8453_v56 = vmax.f32 %v8449_v1, 0.0  ;;  %v18031_v12 = vpack.c.bf16 %v8653_v11, %v8652_v9  ;;  %v8654_v1 = vld [vmem:[%s23198_s14 + $0x70] sm:$0xff]  ;;  %v15634_v11 = vld [vmem:[#allocation14] ss:$0 sm:$0xff] }
 0x940   :  { %v8452_v15 = vmax.f32 %v8444_v59, 0.0  ;;  %v18035_v19 = vpack.c.bf16 %v8655_v17, %v8654_v1  ;;  %v8743_v59 = vld [vmem:[%s23199_s1] sm:$0xff] }
 0x941   :  { %v18039_v33 = vpack.c.bf16 %v8744_v25, %v8743_v59  ;;  %v8841_v59 = vld [vmem:[%s23201_s2 + $0x10] sm:$0xff]  ;;  %v8842_v25 = vld [vmem:[%s23201_s2 + $0x18] sm:$0xff] }
 0x942   :  { %17201 = vmatprep.mubr.msk.f32.mxu1 %vm1681_vm0, %v8452_v15  ;;  %v8929_v15 = vld [vmem:[%s23200_s24] sm:$0xff] }
 0x943   :  { %17202 = vmatmul.mubr.msk.f32.vlgmr.msra.gmra.mrb[148].mxu1 %vm1681_vm0, %v8453_v56  ;;  %v8930_v56 = vld [vmem:[%s23200_s24 + $0x8] sm:$0xff] }
 0x944   :  { %17994 = vmatpush3.bf16.msra.mxu1 %v17991_v48  ;;  %17220 = vmatprep.mubr.msk.f32.mxu1 %vm8547_vm5, %v8261_v10  ;;  %v18027_v48 = vpack.c.bf16 %v8651_v4, %v8650_v53  ;;  %v8931_v10 = vld [vmem:[%s23200_s24 + $0x10] sm:$0xff]  ;;  %v8839_v4 = vld [vmem:[%s23201_s2] sm:$0xff] }
 0x945   :  { %17996 = vmatprep.subr.bf16.mxu1 %v17995_v16  ;;  %v18075_v41 = vpack.c.bf16 %v8932_v36, %v8931_v10  ;;  %v8844_v10 = vld [vmem:[%s23201_s2 + $0x28] sm:$0xff] }
 0x948   :  { %17998 = vmatpush3.bf16.msra.mxu1 %v17995_v16  ;;  %v18071_v16 = vpack.c.bf16 %v8930_v56, %v8929_v15  ;;  %v18059_v56 = vpack.c.bf16 %v8842_v25, %v8841_v59 }
 0x949   :  { %18000 = vmatprep.subr.bf16.mxu1 %v17999_v60 }
 0x94a   :  { %18072 = vmatprep.subr.bf16.mxu0 %v18071_v16 }
 0x94b   :  { %18074 = vmatpush3.bf16.msra.mxu0 %v18071_v16  ;;  %v8843_v16 = vld [vmem:[%s23201_s2 + $0x20] sm:$0xff] }
 0x94c   :  { %18002 = vmatpush3.bf16.msra.mxu1 %v17999_v60  ;;  %18076 = vmatprep.subr.bf16.mxu0 %v18075_v41  ;;  %v8933_v60 = vld [vmem:[%s23200_s24 + $0x20] sm:$0xff]  ;;  %v18063_v36 = vpack.c.bf16 %v8844_v10, %v8843_v16 }
 0x94d   :  { %18004 = vmatprep.subr.bf16.mxu1 %v18003_v39  ;;  %v18079_v43 = vpack.c.bf16 %v8934_v26, %v8933_v60  ;;  %v8846_v60 = vld [vmem:[%s23201_s2 + $0x38] sm:$0xff] }
 0x94f   :  { %18078 = vmatpush3.bf16.msra.mxu0 %v18075_v41  ;;  %v8845_v41 = vld [vmem:[%s23201_s2 + $0x30] sm:$0xff] }
 0x950   :  { %18006 = vmatpush3.bf16.msra.mxu1 %v18003_v39  ;;  %18080 = vmatprep.subr.bf16.mxu0 %v18079_v43  ;;  %v15633_v39 = vld [vmem:[#allocation13] ss:$0 sm:$0xff]  ;;  %v18067_v26 = vpack.c.bf16 %v8846_v60, %v8845_v41 }
 0x951   :  { %18008 = vmatprep.subr.bf16.mxu1 %v18007_v40 }
 0x953   :  { %17221 = vmatmul.mubr.msk.f32.vlgmr.msra.gmra.mrb[148].mxu1 %vm8547_vm5, %v8262_v22  ;;  %18082 = vmatpush3.bf16.msra.mxu0 %v18079_v43  ;;  %v15641_v43 = vld [vmem:[%s23202_s17] ss:$0 sm:$0xff] }
 0x954   :  { %18010 = vmatpush3.bf16.msra.mxu1 %v18007_v40 }
 0x955   :  { %18012 = vmatprep.subr.bf16.mxu1 %v18011_v23 }
 0x958   :  { %18014 = vmatpush3.bf16.msra.mxu1 %v18011_v23 }
 0x959   :  { %18016 = vmatprep.subr.bf16.mxu1 %v18015_v63 }
 0x95c   :  { %18018 = vmatpush3.bf16.msra.mxu1 %v18015_v63  ;;  %v8748_v63 = vld [vmem:[%s23199_s1 + $0x28] sm:$0xff] }
 0x95d   :  { %18020 = vmatprep.subr.bf16.mxu1 %v18019_v14  ;;  %v18047_v55 = vpack.c.bf16 %v8748_v63, %v8747_v54  ;;  %v15638_v54 = vld [vmem:[%s23204_s10] ss:$0 sm:$0xff] }
 0x960   :  { %18022 = vmatpush3.bf16.msra.mxu1 %v18019_v14  ;;  %v8750_v14 = vld [vmem:[%s23199_s1 + $0x38] sm:$0xff] }
 0x961   :  { %18024 = vmatprep.subr.bf16.mxu1 %v18023_v18  ;;  %v18051_v7 = vpack.c.bf16 %v8750_v14, %v8749_v31 }
 0x964   :  { %18026 = vmatpush3.bf16.msra.mxu1 %v18023_v18  ;;  %v8936_v18 = vld [vmem:[%s23200_s24 + $0x38] sm:$0xff] }
 0x965   :  { %18028 = vmatprep.subr.bf16.mxu1 %v18027_v48  ;;  %v18083_v53 = vpack.c.bf16 %v8936_v18, %v8935_v3  ;;  %v16067_v18 = vld [vmem:[%s23225_s23 + $0x60] sm:$0xff] }
 0x967   :  { %18084 = vmatprep.subr.bf16.mxu0 %v18083_v53 }
 0x968   :  { %18030 = vmatpush3.bf16.msra.mxu1 %v18027_v48  ;;  %v8840_v48 = vld [vmem:[%s23201_s2 + $0x8] sm:$0xff]  ;;  %18086 = vmatpush3.bf16.msra.mxu0 %v18083_v53 }
 0x969   :  { %18032 = vmatprep.subr.bf16.mxu1 %v18031_v12  ;;  %v18055_v9 = vpack.c.bf16 %v8840_v48, %v8839_v4  ;;  %v22257_v48 = vld [vmem:[%s23205_s11] sm:$0xff] }
 0x96c   :  { %18034 = vmatpush3.bf16.msra.mxu1 %v18031_v12 }
 0x96d   :  { %18036 = vmatprep.subr.bf16.mxu1 %v18035_v19 }
 0x970   :  { %18038 = vmatpush3.bf16.msra.mxu1 %v18035_v19 }
 0x971   :  { %18040 = vmatprep.subr.bf16.mxu1 %v18039_v33 }
 0xa26   :  { %v17222_v46 = vpop.f32.mrb[148].mxu1 }
 0xa27   :  { %v8637_v35 = vadd.f32 %v17222_v46, %v15633_v39  ;;  %v8620_v47 = vpop.f32.mrb[149].mxu1 }
 0xa28   :  { %v8636_v40 = vadd.f32 %v15633_v39, %v8620_v47  ;;  %v15635_v39 = vld [vmem:[%s23203_s7] ss:$0 sm:$0xff] }
 0xa29   :  { %v8639_v23 = vmax.f32 %v8637_v35, 0.0 }
 0xa2a   :  { %v8638_v22 = vmax.f32 %v8636_v40, 0.0 }
 0xa2c   :  { %17255 = vmatprep.mubr.f32.mxu1 %v8638_v22 }
 0xa2d   :  { %17256 = vmatmul.mubr.f32.vlgmr.msra.gmra.mrb[150].mxu1 %v8639_v23 }
 0xa2e   :  { %18042 = vmatpush3.bf16.msra.mxu1 %v18039_v33 }
 0xa2f   :  { %18044 = vmatprep.subr.bf16.mxu1 %v18043_v50 }
 0xa32   :  { %18046 = vmatpush3.bf16.msra.mxu1 %v18043_v50 }
 0xa33   :  { %18048 = vmatprep.subr.bf16.mxu1 %v18047_v55 }
 0xa36   :  { %18050 = vmatpush3.bf16.msra.mxu1 %v18047_v55 }
 0xa37   :  { %18052 = vmatprep.subr.bf16.mxu1 %v18051_v7 }
 0xa3a   :  { %18054 = vmatpush3.bf16.msra.mxu1 %v18051_v7 }
 0xa3b   :  { %18056 = vmatprep.subr.bf16.mxu1 %v18055_v9 }
 0xb00   :  { %v17257_v12 = vpop.f32.mrb[150].mxu1 }
 0xb01   :  { %v8735_v1 = vadd.f32 %v17257_v12, %v15634_v11  ;;  %v8729_v17 = vpop.f32.mrb[151].mxu1 }
 0xb02   :  { %v8730_v19 = vadd.f32 %v15634_v11, %v8729_v17  ;;  %v22260_v11 = vld [vmem:[%s23205_s11 + $0x8] sm:$0x3] }
 0xb03   :  { %v22214_v15 = vmax.f32 %v8735_v1, 0.0 }
 0xb04   :  { %v22212_v33 = vmax.f32 %v8730_v19, 0.0 }
 0xb06   :  { %17274 = vmatprep.mubr.msk.f32.mxu1 %vm8547_vm5, %v22212_v33  ;;  %17312 = vmatprep.mubr.msk.f32.mxu0 %vm8547_vm5, %v22212_v33 }
 0xb07   :  { %17275 = vmatmul.mubr.msk.f32.vlgmr.msra.gmra.mrb[152].mxu1 %vm8547_vm5, %v22214_v15  ;;  %17313 = vmatmul.mubr.msk.f32.vlgmr.msra.gmra.mrb[116].mxu0 %vm8547_vm5, %v22214_v15 }
 0xb08   :  { %18058 = vmatpush3.bf16.msra.mxu1 %v18055_v9  ;;  %17293 = vmatprep.mubr.msk.f32.mxu1 %vm8547_vm5, %v22212_v33 }
 0xb09   :  { %18060 = vmatprep.subr.bf16.mxu1 %v18059_v56 }
 0xb0c   :  { %18062 = vmatpush3.bf16.msra.mxu1 %v18059_v56 }
 0xb0d   :  { %18064 = vmatprep.subr.bf16.mxu1 %v18063_v36 }
 0xb10   :  { %18066 = vmatpush3.bf16.msra.mxu1 %v18063_v36 }
 0xb11   :  { %18068 = vmatprep.subr.bf16.mxu1 %v18067_v26 }
 0xb14   :  { %18070 = vmatpush3.bf16.msra.mxu1 %v18067_v26 }
 0xb17   :  { %17294 = vmatmul.mubr.msk.f32.vlgmr.msra.gmra.mrb[154].mxu1 %vm8547_vm5, %v22214_v15 }
 0xbda   :  { %v17276_v46 = vpop.f32.mrb[152].mxu1  ;;  %v17314_v35 = vpop.f32.mrb[116].mxu0 }
 0xbdb   :  { %v9016_v47 = vadd.f32 %v17314_v35, %v15641_v43  ;;  %v8830_v40 = vpop.f32.mrb[153].mxu1  ;;  %v9010_v44 = vpop.f32.mrb[117].mxu0  ;;  %v8836_v53 = vadd.f32 %v17276_v46, %v15635_v39  ;;  %v15654_v46 = vld [vmem:[%s23199_s1 + $0x40] sm:$0xff]  ;;  %v15655_v35 = vld [vmem:[%s23199_s1 + $0x48] sm:$0xff] }
 0xbdc   :  { %v8831_v61 = vadd.f32 %v15635_v39, %v8830_v40  ;;  %v9011_v22 = vadd.f32 %v15641_v43, %v9010_v44  ;;  %v9217_v40 = vld [vmem:[%s23210_s25] sm:$0xff]  ;;  %v9218_v44 = vld [vmem:[%s23210_s25 + $0x8] sm:$0xff] }
 0xbdd   :  { %v9020_v4 = vmul.f32 0.17677669, %v8836_v53 }
 0xbde   :  { %v9019_v23 = vmul.f32 0.17677669, %v8831_v61  ;;  %v18093_v50 = vpack.c.bf16 %v9016_v47, %v9011_v22  ;;  %v18107_v47 = vpack.c.bf16 %v15655_v35, %v15654_v46  ;;  %v9219_v61 = vld [vmem:[%s23210_s25 + $0x10] sm:$0xff]  ;;  %v18099_v22 = vpack.c.bf16 %v9218_v44, %v9217_v40  ;;  %v15685_v35 = vld [vmem:[%s23200_s24 + $0x78] sm:$0xff]  ;;  %v15666_v40 = vld [vmem:[%s23201_s2 + $0x40] sm:$0xff] }
 0xbdf   :  { %v15684_v46 = vld [vmem:[%s23200_s24 + $0x70] sm:$0xff]  ;;  %v15667_v44 = vld [vmem:[%s23201_s2 + $0x48] sm:$0xff] }
 0xbe0   :  { %17319 = vmatprep.mubr.msk.f32.mxu1 %vm1681_vm0, %v9019_v23  ;;  %v9220_v23 = vld [vmem:[%s23210_s25 + $0x18] sm:$0xff]  ;;  %18100 = vmatprep.subr.bf16.mxu0 %v18099_v22 }
 0xbe1   :  { %18102 = vmatpush3.bf16.msra.mxu0 %v18099_v22  ;;  %v15668_v22 = vld [vmem:[%s23201_s2 + $0x50] sm:$0xff] }
 0xbea   :  { %v17295_v63 = vpop.f32.mrb[154].mxu1 }
 0xbeb   :  { %v8926_v55 = vadd.f32 %v17295_v63, %v15638_v54  ;;  %v8920_v31 = vpop.f32.mrb[155].mxu1 }
 0xbec   :  { %v8921_v14 = vadd.f32 %v15638_v54, %v8920_v31 }
 0xbee   :  { %v18087_v3 = vpack.c.bf16 %v8926_v55, %v8921_v14  ;;  %v15656_v14 = vld [vmem:[%s23199_s1 + $0x50] sm:$0xff] }
 0xbf0   :  { %18089 = vmatprep.subr.msk.bf16.mxu1 %vm22238_vm7, %v18087_v3 }
 0xbf1   :  { %18092 = vmatpush3.bf16.xpose.msk.msra.mxu1 %vm22238_vm7, %v18087_v3  ;;  %v15657_v3 = vld [vmem:[%s23199_s1 + $0x58] sm:$0xff] }
 0xbf2   :  { %18095 = vmatprep.subr.msk.bf16.mxu1 %vm22243_vm9, %v18093_v50 }
 0xbf8   :  { %17320 = vmatmul.mubr.msk.f32.vlgmr.msra.gmra.mrb[156].mxu1 %vm1681_vm0, %v9020_v4 }
 0xbf9   :  { %18098 = vmatpush3.bf16.msk.msra.mxu1 %vm22243_vm9, %v18093_v50  ;;  %v18103_v50 = vpack.c.bf16 %v9220_v23, %v9219_v61  ;;  %v18123_v61 = vpack.c.bf16 %v15667_v44, %v15666_v40  ;;  %v15669_v23 = vld [vmem:[%s23201_s2 + $0x58] sm:$0xff] }
 0xbfa   :  { %18108 = vmatprep.subr.bf16.mxu1 %v18107_v47 }
 0xbfb   :  { %18104 = vmatprep.subr.bf16.mxu0 %v18103_v50 }
 0xbfc   :  { %18106 = vmatpush3.bf16.msra.mxu0 %v18103_v50 }
 0xbfd   :  { %18124 = vmatprep.subr.bf16.mxu0 %v18123_v61 }
 0xccb   :  { %v17321_v9 = vpop.f32.mrb[156].mxu1 }
 0xccc   :  { %v9099_v12 = vpop.f32.mrb[157].mxu1  ;;  %v9105_v17 = vadd.f32 %v17321_v9, %v22260_v11  ;;  %v18111_v9 = vpack.c.bf16 %v15657_v3, %v15656_v14  ;;  %v15672_v3 = vld [vmem:[%s23201_s2 + $0x70] sm:$0xff] }
 0xccd   :  { %v9100_v1 = vadd.f32 %v9099_v12, %v22257_v48  ;;  %v15658_v12 = vld [vmem:[%s23199_s1 + $0x60] sm:$0xff] }
 0xcce   :  { %v9113_v59 = vsel %vm9112_vm11, %v9105_v17, -inf }
 0xccf   :  { %v9109_v19 = vsel %vm9108_vm10, %v9100_v1, -inf }
 0xcd0   :  { %9110 = vmax.xlane.f32.xlu0 %v9109_v19  ;;  %v15660_v19 = vld [vmem:[%s23199_s1 + $0x70] sm:$0xff] }
 0xcd4   :  { %9114 = vmax.xlane.f32.xlu0 %v9113_v59  ;;  %v15661_v59 = vld [vmem:[%s23199_s1 + $0x78] sm:$0xff] }
 0xd5d   :  { %v9111_v25 = vpop.xlane.xlu0 %9110 }
 0xd5e   :  { %v9116_v56 = vsub.f32 %v9100_v1, %v9111_v25  ;;  %v15659_v1 = vld [vmem:[%s23199_s1 + $0x68] sm:$0xff]  ;;  %v18119_v25 = vpack.c.bf16 %v15661_v59, %v15660_v19 }
 0xd60   :  { %v9118_v16 = vmul.f32 1.442695, %v9116_v56  ;;  %v15678_v56 = vld [vmem:[%s23200_s24 + $0x40] sm:$0xff] }
 0xd61   :  { %v9115_v10 = vpop.xlane.xlu0 %9114 }
 0xd62   :  { %20106 = vpow2.f32 %v9118_v16  ;;  %v9117_v36 = vsub.f32 %v9105_v17, %v9115_v10  ;;  %v18115_v17 = vpack.c.bf16 %v15659_v1, %v15658_v12  ;;  %v15679_v16 = vld [vmem:[%s23200_s24 + $0x48] sm:$0xff] }
 0xd63   :  { %v18139_v10 = vpack.c.bf16 %v15679_v16, %v15678_v56 }
 0xd64   :  { %v9120_v41 = vmul.f32 1.442695, %v9117_v36  ;;  %v15680_v36 = vld [vmem:[%s23200_s24 + $0x50] sm:$0xff] }
 0xd66   :  { %20108 = vpow2.f32 %v9120_v41  ;;  %v15681_v41 = vld [vmem:[%s23200_s24 + $0x58] sm:$0xff] }
 0xd6c   :  { %v20107_v60 = vpop.eup %20106 }
 0xd6d   :  { %v9122_v26 = vsel %vm9108_vm10, %v20107_v60, 0.0 }
 0xd6e   :  { %9123 = vadd.xlane.f32.xlu1 %v9122_v26  ;;  %v15682_v26 = vld [vmem:[%s23200_s24 + $0x60] sm:$0xff] }
 0xd70   :  { %v20109_v43 = vpop.eup %20108 }
 0xd71   :  { %v9125_v39 = vsel %vm9112_vm11, %v20109_v43, 0.0 }
 0xd72   :  { %9126 = vadd.xlane.f32.xlu1 %v9125_v39 }
 0xdfb   :  { %v9124_v54 = vpop.xlane.xlu1 %9123 }
 0xdfc   :  { %20110 = vrcp.f32 %v9124_v54 }
 0xdff   :  { %v9127_v63 = vpop.xlane.xlu1 %9126 }
 0xe00   :  { %20112 = vrcp.f32 %v9127_v63  ;;  %v18127_v63 = vpack.c.bf16 %v15669_v23, %v15668_v22 }
 0xe06   :  { %v20111_v55 = vpop.eup %20110 }
 0xe07   :  { %v9129_v31 = vmul.f32 %v20111_v55, %v20107_v60  ;;  %v18143_v60 = vpack.c.bf16 %v15681_v41, %v15680_v36  ;;  %v15670_v55 = vld [vmem:[%s23201_s2 + $0x60] sm:$0xff] }
 0xe09   :  { %17326 = vmatprep.mubr.msk.f32.mxu1 %vm9108_vm10, %v9129_v31  ;;  %v15671_v31 = vld [vmem:[%s23201_s2 + $0x68] sm:$0xff] }
 0xe0a   :  { %v20113_v53 = vpop.eup %20112  ;;  %v18131_v14 = vpack.c.bf16 %v15671_v31, %v15670_v55 }
 0xe0b   :  { %v9131_v4 = vmul.f32 %v20113_v53, %v20109_v43  ;;  %v15683_v43 = vld [vmem:[%s23200_s24 + $0x68] sm:$0xff]  ;;  %v15673_v53 = vld [vmem:[%s23201_s2 + $0x78] sm:$0xff] }
 0xe0c   :  { %v18147_v39 = vpack.c.bf16 %v15683_v43, %v15682_v26 }
 0xe0d   :  { %17327 = vmatmul.mubr.msk.f32.vlgmr.msra.gmra.mrb[158].mxu1 %vm9108_vm10, %v9131_v4  ;;  %v18135_v4 = vpack.c.bf16 %v15673_v53, %v15672_v3 }
 0xe0e   :  { %18110 = vmatpush3.bf16.msra.mxu1 %v18107_v47  ;;  %17356 = vmatprep.mubr.msk.f32.mxu1 %vm8547_vm5, %v22212_v33  ;;  %v18151_v47 = vpack.c.bf16 %v15685_v35, %v15684_v46 }
 0xe0f   :  { %18112 = vmatprep.subr.bf16.mxu1 %v18111_v9 }
 0xe12   :  { %18114 = vmatpush3.bf16.msra.mxu1 %v18111_v9  ;;  %v15663_v9 = vld [vmem:[%s23203_s7 + $0x1] ss:$0 sm:$0xff] }
 0xe13   :  { %18116 = vmatprep.subr.bf16.mxu1 %v18115_v17 }
 0xe16   :  { %18118 = vmatpush3.bf16.msra.mxu1 %v18115_v17 }
 0xe17   :  { %18120 = vmatprep.subr.bf16.mxu1 %v18119_v25 }
 0xe1a   :  { %18122 = vmatpush3.bf16.msra.mxu1 %v18119_v25  ;;  %v15687_v25 = vld [vmem:[%s23202_s17 + $0x1] ss:$0 sm:$0xff] }
 0xe1b   :  { %18140 = vmatprep.subr.bf16.mxu1 %v18139_v10 }
 0xe1d   :  { %17357 = vmatmul.mubr.msk.f32.vlgmr.msra.gmra.mrb[160].mxu1 %vm8547_vm5, %v22214_v15 }
 0xe1e   :  { %18142 = vmatpush3.bf16.msra.mxu1 %v18139_v10  ;;  %17394 = vmatprep.mubr.msk.f32.mxu1 %vm8547_vm5, %v22212_v33 }
 0xe1f   :  { %18144 = vmatprep.subr.bf16.mxu1 %v18143_v60 }
 0xe22   :  { %18146 = vmatpush3.bf16.msra.mxu1 %v18143_v60  ;;  %v15675_v60 = vld [vmem:[%s23204_s10 + $0x1] ss:$0 sm:$0xff] }
 0xe23   :  { %18148 = vmatprep.subr.bf16.mxu1 %v18147_v39 }
 0xe26   :  { %18150 = vmatpush3.bf16.msra.mxu1 %v18147_v39 }
 0xe27   :  { %18152 = vmatprep.subr.bf16.mxu1 %v18151_v47 }
 0xe2a   :  { %18154 = vmatpush3.bf16.msra.mxu1 %v18151_v47 }
 0xe2d   :  { %17395 = vmatmul.mubr.msk.f32.vlgmr.msra.gmra.mrb[162].mxu1 %vm8547_vm5, %v22214_v15 }
 0xee0   :  { %v17328_v50 = vpop.f32.mrb[158].mxu1 }
 0xee1   :  { %v9208_v54 = vpop.f32.mrb[159].mxu1 }
 0xee2   :  { %17337 = vmatprep.mubr.msk.f32.mxu0 %vm1681_vm0, %v9208_v54 }
 0xee3   :  { %17338 = vmatmul.mubr.msk.f32.vlgmr.msra.gmra.mrb[118].mxu0 %vm1681_vm0, %v17328_v50 }
 0xee4   :  { %18126 = vmatpush3.bf16.msra.mxu0 %v18123_v61  ;;  %17375 = vmatprep.mubr.msk.f32.mxu0 %vm8547_vm5, %v22212_v33 }
 0xee5   :  { %18128 = vmatprep.subr.bf16.mxu0 %v18127_v63 }
 0xee8   :  { %18130 = vmatpush3.bf16.msra.mxu0 %v18127_v63 }
 0xee9   :  { %18132 = vmatprep.subr.bf16.mxu0 %v18131_v14 }
 0xeec   :  { %18134 = vmatpush3.bf16.msra.mxu0 %v18131_v14 }
 0xeed   :  { %18136 = vmatprep.subr.bf16.mxu0 %v18135_v4 }
 0xef0   :  { %v17358_v12 = vpop.f32.mrb[160].mxu1  ;;  %18138 = vmatpush3.bf16.msra.mxu0 %v18135_v4 }
 0xef1   :  { %v9399_v1 = vadd.f32 %v17358_v12, %v15663_v9  ;;  %v9393_v17 = vpop.f32.mrb[161].mxu1  ;;  %v15698_v12 = vld [vmem:[%s23210_s25 + $0x28] sm:$0xff] }
 0xef2   :  { %v9394_v19 = vadd.f32 %v15663_v9, %v9393_v17  ;;  %v15697_v9 = vld [vmem:[%s23210_s25 + $0x20] sm:$0xff] }
 0xef3   :  { %17376 = vmatmul.mubr.msk.f32.vlgmr.msra.gmra.mrb[120].mxu0 %vm8547_vm5, %v22214_v15  ;;  %v9587_v47 = vmul.f32 0.17677669, %v9399_v1  ;;  %v15699_v1 = vld [vmem:[%s23210_s25 + $0x30] sm:$0xff]  ;;  %v18167_v17 = vpack.c.bf16 %v15698_v12, %v15697_v9  ;;  %v9926_v9 = vld [vmem:[%s23212_s15 + $0x48] sm:$0xff] }
 0xef4   :  { %v9586_v59 = vmul.f32 0.17677669, %v9394_v19  ;;  %v15700_v19 = vld [vmem:[%s23210_s25 + $0x38] sm:$0xff] }
 0xef6   :  { %17401 = vmatprep.mubr.msk.f32.mxu0 %vm1681_vm0, %v9586_v59  ;;  %v18171_v59 = vpack.c.bf16 %v15700_v19, %v15699_v1  ;;  %v9933_v19 = vld [vmem:[%s23212_s15 + $0x80] sm:$0xff] }
 0xf00   :  { %v17396_v56 = vpop.f32.mrb[162].mxu1 }
 0xf01   :  { %v9583_v16 = vadd.f32 %v17396_v56, %v15687_v25  ;;  %v9577_v10 = vpop.f32.mrb[163].mxu1 }
 0xf02   :  { %v9578_v36 = vadd.f32 %v15687_v25, %v9577_v10 }
 0xf04   :  { %v18161_v41 = vpack.c.bf16 %v9583_v16, %v9578_v36 }
 0xf06   :  { %18163 = vmatprep.subr.msk.bf16.mxu1 %vm22243_vm9, %v18161_v41 }
 0xf07   :  { %18166 = vmatpush3.bf16.msk.msra.mxu1 %vm22243_vm9, %v18161_v41 }
 0xfc6   :  { %v17377_v26 = vpop.f32.mrb[120].mxu0 }
 0xfc7   :  { %v9491_v43 = vadd.f32 %v17377_v26, %v15675_v60  ;;  %v9485_v39 = vpop.f32.mrb[121].mxu0 }
 0xfc8   :  { %v9486_v46 = vadd.f32 %v15675_v60, %v9485_v39 }
 0xfca   :  { %v18155_v35 = vpack.c.bf16 %v9491_v43, %v9486_v46  ;;  %v15653_v43 = vld [vmem:[%s23211_s30] ss:$0 sm:$0xff] }
 0xfcc   :  { %18157 = vmatprep.subr.msk.bf16.mxu0 %vm22238_vm7, %v18155_v35 }
 0xfcd   :  { %18160 = vmatpush3.bf16.xpose.msk.msra.mxu0 %vm22238_vm7, %v18155_v35 }
 0xfce   :  { %18168 = vmatprep.subr.bf16.mxu0 %v18167_v17 }
 0xfd4   :  { %17402 = vmatmul.mubr.msk.f32.vlgmr.msra.gmra.mrb[122].mxu0 %vm1681_vm0, %v9587_v47 }
 0xfd5   :  { %18170 = vmatpush3.bf16.msra.mxu0 %v18167_v17 }
 0xfd6   :  { %18172 = vmatprep.subr.bf16.mxu0 %v18171_v59 }
 0xfd9   :  { %18174 = vmatpush3.bf16.msra.mxu0 %v18171_v59  ;;  %v9941_v59 = vld [vmem:[%s23212_s15 + $0xc0] sm:$0xff] }
0x10a7   :  { %v17403_v40 = vpop.f32.mrb[122].mxu0 }
0x10a8   :  { %v9672_v44 = vadd.f32 %v17403_v40, %v22260_v11  ;;  %v9666_v61 = vpop.f32.mrb[123].mxu0 }
0x10a9   :  { %v9667_v22 = vadd.f32 %v9666_v61, %v22257_v48 }
0x10aa   :  { %v9678_v23 = vsel %vm9112_vm11, %v9672_v44, -inf }
0x10ab   :  { %9679 = vmax.xlane.f32.xlu1 %v9678_v23  ;;  %v9675_v50 = vsel %vm9108_vm10, %v9667_v22, -inf }
0x10ac   :  { %9676 = vmax.xlane.f32.xlu0 %v9675_v50 }
0x1138   :  { %v9680_v54 = vpop.xlane.xlu1 %9679 }
0x1139   :  { %v9682_v63 = vsub.f32 %v9672_v44, %v9680_v54  ;;  %v9677_v55 = vpop.xlane.xlu0 %9676 }
0x113a   :  { %v9681_v31 = vsub.f32 %v9667_v22, %v9677_v55 }
0x113b   :  { %v9685_v14 = vmul.f32 1.442695, %v9682_v63 }
0x113c   :  { %v9683_v3 = vmul.f32 1.442695, %v9681_v31 }
0x113d   :  { %20114 = vpow2.f32 %v9685_v14 }
0x113e   :  { %20116 = vpow2.f32 %v9683_v3 }
0x1147   :  { %v20115_v11 = vpop.eup %20114 }
0x1148   :  { %v20117_v48 = vpop.eup %20116  ;;  %v9690_v53 = vsel %vm9112_vm11, %v20115_v11, 0.0 }
0x1149   :  { %9691 = vadd.xlane.f32.xlu1 %v9690_v53  ;;  %v9687_v4 = vsel %vm9108_vm10, %v20117_v48, 0.0  ;;  %v9918_v53 = vld [vmem:[%s23212_s15 + $0x8] sm:$0xff] }
0x114a   :  { %9688 = vadd.xlane.f32.xlu0 %v9687_v4  ;;  %v15707_v1 = vcombine.low %v9918_v53, %v9926_v9  ;;  %v15708_v17 = vcombine.high %v9918_v53, %v9926_v9 }
0x114c   :  { %10432 = vmatprep.subr.bf16.mxu0 %v15708_v17 }
0x11d6   :  { %v9692_v25 = vpop.xlane.xlu1 %9691 }
0x11d7   :  { %20118 = vrcp.f32 %v9692_v25  ;;  %v9689_v56 = vpop.xlane.xlu0 %9688  ;;  %v9934_v25 = vld [vmem:[%s23212_s15 + $0x88] sm:$0xff] }
0x11d8   :  { %20120 = vrcp.f32 %v9689_v56  ;;  %v15722_v56 = vcombine.high %v9933_v19, %v9941_v59 }
0x11e1   :  { %v20119_v16 = vpop.eup %20118 }
0x11e2   :  { %v20121_v10 = vpop.eup %20120  ;;  %v9696_v41 = vmul.f32 %v20119_v16, %v20115_v11  ;;  %v9917_v11 = vld [vmem:[%s23212_s15] sm:$0xff]  ;;  %v9942_v16 = vld [vmem:[%s23212_s15 + $0xc8] sm:$0xff] }
0x11e3   :  { %v9694_v36 = vmul.f32 %v20121_v10, %v20117_v48  ;;  %v9925_v48 = vld [vmem:[%s23212_s15 + $0x40] sm:$0xff]  ;;  %v15721_v10 = vcombine.low %v9933_v19, %v9941_v59 }
0x11e4   :  { %v15706_v4 = vcombine.high %v9917_v11, %v9925_v48  ;;  %v15705_v12 = vcombine.low %v9917_v11, %v9925_v48  ;;  %v9928_v48 = vld [vmem:[%s23212_s15 + $0x58] sm:$0xff] }
0x11e5   :  { %17408 = vmatprep.mubr.msk.f32.mxu1 %vm9108_vm10, %v9694_v36  ;;  %v15723_v36 = vcombine.low %v9934_v25, %v9942_v16 }
0x11e6   :  { %17409 = vmatmul.mubr.msk.f32.vlgmr.msra.gmra.mrb[164].mxu1 %vm9108_vm10, %v9696_v41  ;;  %10389 = vmatprep.subr.bf16.mxu1 %v15706_v4  ;;  %v15724_v41 = vcombine.high %v9934_v25, %v9942_v16  ;;  %v15703_v16 = vld [vmem:[#allocation2] ss:$0 sm:$0xff] }
0x11e7   :  { %10421 = vmatprep.mubr.bf16.mxu1 %v20544_v34  ;;  %10390 = vmatpush1.bf16.msra.mxu1 %v15705_v12 }
0x11e8   :  { %10391 = vmatprep.subr.bf16.mxu1 %v15722_v56 }
0x11eb   :  { %10392 = vmatpush1.bf16.msra.mxu1 %v15721_v10 }
0x12b9   :  { %v17410_v60 = vpop.f32.mrb[164].mxu1 }
0x12ba   :  { %v9772_v26 = vpop.f32.mrb[165].mxu1 }
0x12bb   :  { %17419 = vmatprep.mubr.msk.f32.mxu0 %vm1681_vm0, %v9772_v26  ;;  %v9957_v26 = vld [vmem:[%s23212_s15 + $0x140] sm:$0xff] }
0x12bc   :  { %17420 = vmatmul.mubr.msk.f32.vlgmr.msra.gmra.mrb[118].mxu0 %vm1681_vm0, %v17410_v60  ;;  %v9949_v60 = vld [vmem:[%s23212_s15 + $0x100] sm:$0xff] }
0x12bd   :  { %10464 = vmatprep.mubr.bf16.mxu0 %v20544_v34  ;;  %10433 = vmatpush1.bf16.msra.mxu0 %v15707_v1 }
0x12be   :  { %10434 = vmatprep.subr.bf16.mxu0 %v15724_v41  ;;  %v15704_v41 = vld [vmem:[%s23213_s4] ss:$0 sm:$0xff] }
0x12c1   :  { %10435 = vmatpush1.bf16.msra.mxu0 %v15723_v36 }
0x138f   :  { %v17421_v39 = vpop.f32.mrb[118].mxu0 }
0x1390   :  { %v18591_v46 = vadd.f32 %v17421_v39, %v15653_v43  ;;  %v9858_v35 = vpop.f32.mrb[119].mxu0  ;;  %v15738_v39 = vcombine.high %v9949_v60, %v9957_v26 }
0x1391   :  { %v18592_v47 = vadd.f32 %v15653_v43, %v9858_v35  ;;  %v9950_v43 = vld [vmem:[%s23212_s15 + $0x108] sm:$0xff]  ;;  %v15737_v35 = vcombine.low %v9949_v60, %v9957_v26 }
0x1392   :  { %v9870_v40 = vadd.f32 %v18591_v46, %v22214_v15  ;;  %v9958_v46 = vld [vmem:[%s23212_s15 + $0x148] sm:$0xff]  ;;  %10393 = vmatprep.subr.bf16.mxu1 %v15738_v39  ;;  %v9935_v39 = vld [vmem:[%s23212_s15 + $0x90] sm:$0xff] }
0x1393   :  { %v9869_v44 = vadd.f32 %v18592_v47, %v22212_v33  ;;  %v15739_v47 = vcombine.low %v9950_v43, %v9958_v46  ;;  %10394 = vmatpush1.bf16.msra.mxu1 %v15737_v35  ;;  %v9943_v35 = vld [vmem:[%s23212_s15 + $0xd0] sm:$0xff] }
0x1394   :  { %v9875_v61 = vsel %vm9874_vm12, %v9870_v40, 0.0 }
0x1395   :  { %9876 = vadd.xlane.f32.xlu1 %v9875_v61  ;;  %v9871_v22 = vsel %vm8547_vm5, %v9869_v44, 0.0  ;;  %v9973_v61 = vld [vmem:[%s23212_s15 + $0x1c0] sm:$0xff] }
0x1396   :  { %9872 = vadd.xlane.f32.xlu0 %v9871_v22  ;;  %v9966_v22 = vld [vmem:[%s23212_s15 + $0x188] sm:$0xff] }
0x1422   :  { %v9877_v23 = vpop.xlane.xlu1 %9876 }
0x1423   :  { %v9880_v50 = vmul.f32 0.015625, %v9877_v23  ;;  %v9873_v54 = vpop.xlane.xlu0 %9872 }
0x1424   :  { %v9879_v63 = vmul.f32 0.015625, %v9873_v54 }
0x1425   :  { %v22346_v55 = vsub.f32 %v9870_v40, %v9880_v50  ;;  %v15740_v40 = vcombine.high %v9950_v43, %v9958_v46  ;;  %v9974_v50 = vld [vmem:[%s23212_s15 + $0x1c8] sm:$0xff] }
0x1426   :  { %v22348_v31 = vsub.f32 %v9869_v44, %v9879_v63  ;;  %v9965_v44 = vld [vmem:[%s23212_s15 + $0x180] sm:$0xff]  ;;  %v15755_v63 = vcombine.low %v9966_v22, %v9974_v50 }
0x1427   :  { %v9884_v33 = vmul.f32 %v22346_v55, %v22346_v55  ;;  %10436 = vmatprep.subr.bf16.mxu0 %v15740_v40  ;;  %v15754_v23 = vcombine.high %v9965_v44, %v9973_v61  ;;  %v15753_v54 = vcombine.low %v9965_v44, %v9973_v61  ;;  %v9944_v40 = vld [vmem:[%s23212_s15 + $0xd8] sm:$0xff] }
0x1428   :  { %v9883_v15 = vmul.f32 %v22348_v31, %v22348_v31  ;;  %10437 = vmatpush1.bf16.msra.mxu0 %v15739_v47  ;;  %v9936_v47 = vld [vmem:[%s23212_s15 + $0x98] sm:$0xff] }
0x1429   :  { %v9888_v14 = vsel %vm9874_vm12, %v9884_v33, 0.0  ;;  %v15756_v33 = vcombine.high %v9966_v22, %v9974_v50  ;;  %10395 = vmatprep.subr.bf16.mxu1 %v15754_v23  ;;  %v15728_v22 = vcombine.high %v9936_v47, %v9944_v40  ;;  %v9951_v23 = vld [vmem:[%s23212_s15 + $0x110] sm:$0xff]  ;;  %v9952_v50 = vld [vmem:[%s23212_s15 + $0x118] sm:$0xff] }
0x142a   :  { %9889 = vadd.xlane.f32.xlu1 %v9888_v14  ;;  %v9885_v3 = vsel %vm8547_vm5, %v9883_v15, 0.0  ;;  %10396 = vmatpush1.bf16.msra.mxu1 %v15753_v54  ;;  %v9919_v15 = vld [vmem:[%s23212_s15 + $0x10] sm:$0xff]  ;;  %v9960_v54 = vld [vmem:[%s23212_s15 + $0x158] sm:$0xff] }
0x142b   :  { %9886 = vadd.xlane.f32.xlu0 %v9885_v3  ;;  %10438 = vmatprep.subr.bf16.mxu0 %v15756_v33  ;;  %v9927_v14 = vld [vmem:[%s23212_s15 + $0x50] sm:$0xff]  ;;  %v9920_v3 = vld [vmem:[%s23212_s15 + $0x18] sm:$0xff]  ;;  %v15727_v33 = vcombine.low %v9936_v47, %v9944_v40 }
0x142c   :  { %10439 = vmatpush1.bf16.msra.mxu0 %v15755_v63  ;;  %v15710_v11 = vcombine.high %v9919_v15, %v9927_v14  ;;  %v15709_v53 = vcombine.low %v9919_v15, %v9927_v14  ;;  %v15711_v4 = vcombine.low %v9920_v3, %v9928_v48  ;;  %v15712_v9 = vcombine.high %v9920_v3, %v9928_v48  ;;  %v9967_v3 = vld [vmem:[%s23212_s15 + $0x190] sm:$0xff]  ;;  %v9968_v48 = vld [vmem:[%s23212_s15 + $0x198] sm:$0xff] }
0x142d   :  { %v15725_v63 = vcombine.low %v9935_v39, %v9943_v35  ;;  %v15744_v14 = vcombine.high %v9952_v50, %v9960_v54 }
0x142e   :  { %10475 = vmatprep.subr.bf16.mxu1 %v15710_v11  ;;  %10518 = vmatprep.subr.bf16.mxu0 %v15712_v9  ;;  %v9975_v11 = vld [vmem:[%s23212_s15 + $0x1d0] sm:$0xff]  ;;  %v9976_v9 = vld [vmem:[%s23212_s15 + $0x1d8] sm:$0xff] }
0x14b7   :  { %v9890_v12 = vpop.xlane.xlu1 %9889 }
0x14b8   :  { %v9892_v1 = vmul.f32 0.015625, %v9890_v12  ;;  %v9887_v17 = vpop.xlane.xlu0 %9886  ;;  %v15758_v12 = vcombine.high %v9967_v3, %v9975_v11 }
0x14b9   :  { %v9891_v19 = vmul.f32 0.015625, %v9887_v17  ;;  %v9921_v17 = vld [vmem:[%s23212_s15 + $0x20] sm:$0xff] }
0x14ba   :  { %v9894_v59 = vadd.f32 1e-05, %v9892_v1  ;;  %v15760_v1 = vcombine.high %v9968_v48, %v9976_v9 }
0x14bb   :  { %v9893_v25 = vadd.f32 1e-05, %v9891_v19  ;;  %v9929_v19 = vld [vmem:[%s23212_s15 + $0x60] sm:$0xff] }
0x14bc   :  { %20122 = vrsqrt.f32 %v9894_v59  ;;  %v9922_v59 = vld [vmem:[%s23212_s15 + $0x28] sm:$0xff] }
0x14bd   :  { %20124 = vrsqrt.f32 %v9893_v25  ;;  %v9930_v25 = vld [vmem:[%s23212_s15 + $0x68] sm:$0xff] }
0x14c6   :  { %v20123_v56 = vpop.eup %20122 }
0x14c7   :  { %v20125_v10 = vpop.eup %20124  ;;  %v9898_v36 = vmul.f32 %v20123_v56, %v22346_v55  ;;  %v15726_v55 = vcombine.high %v9935_v39, %v9943_v35  ;;  %v15757_v56 = vcombine.low %v9967_v3, %v9975_v11  ;;  %v15713_v39 = vcombine.low %v9921_v17, %v9929_v19  ;;  %v9970_v3 = vld [vmem:[%s23212_s15 + $0x1a8] sm:$0xff] }
0x14c8   :  { %v9897_v60 = vmul.f32 %v20125_v10, %v22348_v31  ;;  %v9959_v31 = vld [vmem:[%s23212_s15 + $0x150] sm:$0xff]  ;;  %v15714_v10 = vcombine.high %v9921_v17, %v9929_v19  ;;  %v15715_v35 = vcombine.low %v9922_v59, %v9930_v25  ;;  %v9978_v11 = vld [vmem:[%s23212_s15 + $0x1e8] sm:$0xff]  ;;  %v9924_v17 = vld [vmem:[%s23212_s15 + $0x38] sm:$0xff] }
0x14c9   :  { %v9907_v26 = vmul.f32 %v15703_v16, %v9898_v36  ;;  %v15742_v15 = vcombine.high %v9951_v23, %v9959_v31  ;;  %v15716_v36 = vcombine.high %v9922_v59, %v9930_v25  ;;  %v9932_v19 = vld [vmem:[%s23212_s15 + $0x78] sm:$0xff]  ;;  %v15763_v25 = vcombine.low %v9970_v3, %v9978_v11 }
0x14ca   :  { %v9906_v43 = vmul.f32 %v15703_v16, %v9897_v60  ;;  %v15759_v16 = vcombine.low %v9968_v48, %v9976_v9  ;;  %v9945_v60 = vld [vmem:[%s23212_s15 + $0xe0] sm:$0xff] }
0x14cb   :  { %v22380_v46 = vadd.f32 %v15704_v41, %v9907_v26  ;;  %v9938_v26 = vld [vmem:[%s23212_s15 + $0xa8] sm:$0xff] }
0x14cc   :  { %v22385_v44 = vadd.f32 %v15704_v41, %v9906_v43  ;;  %v9937_v41 = vld [vmem:[%s23212_s15 + $0xa0] sm:$0xff]  ;;  %v9946_v43 = vld [vmem:[%s23212_s15 + $0xe8] sm:$0xff] }
0x14cd   :  { %v15730_v47 = vcombine.high %v9937_v41, %v9945_v60  ;;  %v15732_v40 = vcombine.high %v9938_v26, %v9946_v43 }
0x14ce   :  { %v22389_v61 = vpack.c.bf16 %v22380_v46, %v22385_v44 }
0x14d0   :  { %15769 = vmatmul.mubr.msk.bf16.vlgmr.msra.gmra.mrb[168].mxu1 %vm8547_vm5, %v22389_v61  ;;  %15770 = vmatmul.mubr.msk.bf16.vlgmr.msra.gmra.mrb[124].mxu0 %vm8547_vm5, %v22389_v61 }
0x14d1   :  { %10476 = vmatpush1.bf16.msra.mxu1 %v15709_v53  ;;  %10519 = vmatpush1.bf16.msra.mxu0 %v15711_v4  ;;  %v15741_v53 = vcombine.low %v9951_v23, %v9959_v31  ;;  %v15743_v4 = vcombine.low %v9952_v50, %v9960_v54  ;;  %v9954_v23 = vld [vmem:[%s23212_s15 + $0x128] sm:$0xff]  ;;  %v15729_v50 = vcombine.low %v9937_v41, %v9945_v60  ;;  %v9940_v41 = vld [vmem:[%s23212_s15 + $0xb8] sm:$0xff] }
0x14d2   :  { %10477 = vmatprep.subr.bf16.mxu1 %v15726_v55  ;;  %10520 = vmatprep.subr.bf16.mxu0 %v15728_v22  ;;  %v9953_v55 = vld [vmem:[%s23212_s15 + $0x120] sm:$0xff]  ;;  %v9962_v31 = vld [vmem:[%s23212_s15 + $0x168] sm:$0xff]  ;;  %v15731_v54 = vcombine.low %v9938_v26, %v9946_v43  ;;  %v9948_v60 = vld [vmem:[%s23212_s15 + $0xf8] sm:$0xff]  ;;  %v15719_v43 = vcombine.low %v9924_v17, %v9932_v19 }
0x14d3   :  { %10507 = vmatprep.mubr.bf16.mxu1 %v20544_v34  ;;  %10550 = vmatprep.mubr.bf16.mxu0 %v20544_v34  ;;  %v9961_v22 = vld [vmem:[%s23212_s15 + $0x160] sm:$0xff]  ;;  %v15747_v9 = vcombine.low %v9954_v23, %v9962_v31 }
0x14d4   :  { %v15745_v48 = vcombine.low %v9953_v55, %v9961_v22 }
0x14d5   :  { %10478 = vmatpush1.bf16.msra.mxu1 %v15725_v63  ;;  %10521 = vmatpush1.bf16.msra.mxu0 %v15727_v33  ;;  %v15746_v63 = vcombine.high %v9953_v55, %v9961_v22  ;;  %v15748_v33 = vcombine.high %v9954_v23, %v9962_v31  ;;  %v9956_v55 = vld [vmem:[%s23212_s15 + $0x138] sm:$0xff]  ;;  %v15735_v31 = vcombine.low %v9940_v41, %v9948_v60 }
0x14d6   :  { %10479 = vmatprep.subr.bf16.mxu1 %v15742_v15  ;;  %10522 = vmatprep.subr.bf16.mxu0 %v15744_v14  ;;  %v9969_v15 = vld [vmem:[%s23212_s15 + $0x1a0] sm:$0xff]  ;;  %v9964_v22 = vld [vmem:[%s23212_s15 + $0x178] sm:$0xff] }
0x14d7   :  { %v9977_v14 = vld [vmem:[%s23212_s15 + $0x1e0] sm:$0xff] }
0x14d8   :  { %v15761_v59 = vcombine.low %v9969_v15, %v9977_v14 }
0x14d9   :  { %10480 = vmatpush1.bf16.msra.mxu1 %v15741_v53  ;;  %10523 = vmatpush1.bf16.msra.mxu0 %v15743_v4  ;;  %v15762_v53 = vcombine.high %v9969_v15, %v9977_v14  ;;  %v15764_v4 = vcombine.high %v9970_v3, %v9978_v11  ;;  %v9972_v15 = vld [vmem:[%s23212_s15 + $0x1b8] sm:$0xff]  ;;  %v15751_v11 = vcombine.low %v9956_v55, %v9964_v22 }
0x14da   :  { %10481 = vmatprep.subr.bf16.mxu1 %v15758_v12  ;;  %10524 = vmatprep.subr.bf16.mxu0 %v15760_v1  ;;  %v9923_v12 = vld [vmem:[%s23212_s15 + $0x30] sm:$0xff]  ;;  %v9980_v14 = vld [vmem:[%s23212_s15 + $0x1f8] sm:$0xff] }
0x14db   :  { %v9931_v1 = vld [vmem:[%s23212_s15 + $0x70] sm:$0xff] }
0x14dc   :  { %v15717_v26 = vcombine.low %v9923_v12, %v9931_v1 }
0x14dd   :  { %10482 = vmatpush1.bf16.msra.mxu1 %v15757_v56  ;;  %10525 = vmatpush1.bf16.msra.mxu0 %v15759_v16  ;;  %v15718_v56 = vcombine.high %v9923_v12, %v9931_v1  ;;  %v15720_v16 = vcombine.high %v9924_v17, %v9932_v19  ;;  %v19979_v12 = vld [vmem:[%s23214_s13 + $0xc0] sm:$0xff]   ;;  %v19982_v19 = vld [vmem:[%s23214_s13 + $0x48] sm:$0xff]  }
0x14de   :  { %10561 = vmatprep.subr.bf16.mxu1 %v15714_v10  ;;  %10604 = vmatprep.subr.bf16.mxu0 %v15716_v36  ;;  %v9939_v10 = vld [vmem:[%s23212_s15 + $0xb0] sm:$0xff]  ;;  %v19980_v1 = vld [vmem:[%s23214_s13] sm:$0xff]  }
0x14df   :  { %v9947_v36 = vld [vmem:[%s23212_s15 + $0xf0] sm:$0xff]  ;;  %v19981_v17 = vld [vmem:[%s23214_s13 + $0x80] sm:$0xff]  }
0x14e0   :  { %15771 = vmatmul.mubr.msk.bf16.vlgmr.msra.gmra.mrb[172].mxu1 %vm8547_vm5, %v22389_v61  ;;  %15772 = vmatmul.mubr.msk.bf16.vlgmr.msra.gmra.mrb[128].mxu0 %vm8547_vm5, %v22389_v61  ;;  %v15733_v23 = vcombine.low %v9939_v10, %v9947_v36 }
0x14e1   :  { %10562 = vmatpush1.bf16.msra.mxu1 %v15713_v39  ;;  %10605 = vmatpush1.bf16.msra.mxu0 %v15715_v35  ;;  %v15734_v39 = vcombine.high %v9939_v10, %v9947_v36  ;;  %v15736_v35 = vcombine.high %v9940_v41, %v9948_v60  ;;  %v19987_v10 = vld [vmem:[%s23214_s13 + $0xd0] sm:$0xff]   ;;  %v19991_v60 = vld [vmem:[%s23214_s13 + $0xd8] sm:$0xff]  }
0x14e2   :  { %10563 = vmatprep.subr.bf16.mxu1 %v15730_v47  ;;  %10606 = vmatprep.subr.bf16.mxu0 %v15732_v40  ;;  %v9955_v47 = vld [vmem:[%s23212_s15 + $0x130] sm:$0xff] }
0x14e3   :  { %10593 = vmatprep.mubr.bf16.mxu1 %v20544_v34  ;;  %10636 = vmatprep.mubr.bf16.mxu0 %v20544_v34  ;;  %v9963_v40 = vld [vmem:[%s23212_s15 + $0x170] sm:$0xff] }
0x14e4   :  { %v15749_v3 = vcombine.low %v9955_v47, %v9963_v40  ;;  %v19988_v36 = vld [vmem:[%s23214_s13 + $0x10] sm:$0xff]  }
0x14e5   :  { %10564 = vmatpush1.bf16.msra.mxu1 %v15729_v50  ;;  %10607 = vmatpush1.bf16.msra.mxu0 %v15731_v54  ;;  %v15750_v50 = vcombine.high %v9955_v47, %v9963_v40  ;;  %v15752_v54 = vcombine.high %v9956_v55, %v9964_v22  ;;  %v19989_v41 = vld [vmem:[%s23214_s13 + $0x90] sm:$0xff]   ;;  %v19996_v47 = vld [vmem:[%s23214_s13 + $0x20] sm:$0xff]   ;;  %v19998_v55 = vld [vmem:[%s23214_s13 + $0x68] sm:$0xff]  }
0x14e6   :  { %10565 = vmatprep.subr.bf16.mxu1 %v15746_v63  ;;  %10608 = vmatprep.subr.bf16.mxu0 %v15748_v33  ;;  %v9971_v63 = vld [vmem:[%s23212_s15 + $0x1b0] sm:$0xff]  ;;  %v19997_v40 = vld [vmem:[%s23214_s13 + $0xa0] sm:$0xff]   ;;  %v19999_v22 = vld [vmem:[%s23214_s13 + $0xe8] sm:$0xff]  }
0x14e7   :  { %v9979_v33 = vld [vmem:[%s23212_s15 + $0x1f0] sm:$0xff] }
0x14e9   :  { %10566 = vmatpush1.bf16.msra.mxu1 %v15745_v48  ;;  %10609 = vmatpush1.bf16.msra.mxu0 %v15747_v9  ;;  %v15766_v48 = vcombine.high %v9971_v63, %v9979_v33  ;;  %v15768_v9 = vcombine.high %v9972_v15, %v9980_v14 }
0x14ea   :  { %10567 = vmatprep.subr.bf16.mxu1 %v15762_v53  ;;  %10610 = vmatprep.subr.bf16.mxu0 %v15764_v4  ;;  %v15765_v53 = vcombine.low %v9971_v63, %v9979_v33  ;;  %v15767_v4 = vcombine.low %v9972_v15, %v9980_v14  ;;  %v20004_v63 = vld [vmem:[%s23214_s13 + $0x30] sm:$0xff]   ;;  %v20006_v15 = vld [vmem:[%s23214_s13 + $0x78] sm:$0xff]  }
0x14eb   :  { %v20005_v33 = vld [vmem:[%s23214_s13 + $0xb0] sm:$0xff]   ;;  %v20007_v14 = vld [vmem:[%s23214_s13 + $0xf8] sm:$0xff]  }
0x14ed   :  { %10568 = vmatpush1.bf16.msra.mxu1 %v15761_v59  ;;  %10611 = vmatpush1.bf16.msra.mxu0 %v15763_v25  ;;  %v19983_v59 = vld [vmem:[%s23214_s13 + $0xc8] sm:$0xff]  }
0x14ee   :  { %10647 = vmatprep.subr.bf16.mxu1 %v15718_v56  ;;  %10690 = vmatprep.subr.bf16.mxu0 %v15720_v16  ;;  %v19984_v25 = vld [vmem:[%s23214_s13 + $0x8] sm:$0xff]   ;;  %v19986_v16 = vld [vmem:[%s23214_s13 + $0x50] sm:$0xff]  }
0x14ef   :  { %v19985_v56 = vld [vmem:[%s23214_s13 + $0x88] sm:$0xff]  }
0x14f0   :  { %15773 = vmatmul.mubr.msk.bf16.vlgmr.msra.gmra.mrb[176].mxu1 %vm8547_vm5, %v22389_v61  ;;  %15774 = vmatmul.mubr.msk.bf16.vlgmr.msra.gmra.mrb[132].mxu0 %vm8547_vm5, %v22389_v61 }
0x14f1   :  { %10648 = vmatpush1.bf16.msra.mxu1 %v15717_v26  ;;  %10691 = vmatpush1.bf16.msra.mxu0 %v15719_v43  ;;  %v19992_v26 = vld [vmem:[%s23214_s13 + $0x18] sm:$0xff]  }
0x14f2   :  { %10649 = vmatprep.subr.bf16.mxu1 %v15734_v39  ;;  %10692 = vmatprep.subr.bf16.mxu0 %v15736_v35  ;;  %v19993_v43 = vld [vmem:[%s23214_s13 + $0x98] sm:$0xff]   ;;  %v19994_v39 = vld [vmem:[%s23214_s13 + $0x60] sm:$0xff]  }
0x14f3   :  { %10679 = vmatprep.mubr.bf16.mxu1 %v20544_v34  ;;  %10722 = vmatprep.mubr.bf16.mxu0 %v20544_v34  ;;  %v19978_v34 = vld [vmem:[%s23214_s13 + $0x40] sm:$0xff]  }
0x14f4   :  { %v19995_v35 = vld [vmem:[%s23214_s13 + $0xe0] sm:$0xff]  }
0x14f5   :  { %10650 = vmatpush1.bf16.msra.mxu1 %v15733_v23  ;;  %10693 = vmatpush1.bf16.msra.mxu0 %v15735_v31  ;;  %v20000_v23 = vld [vmem:[%s23214_s13 + $0x28] sm:$0xff]  }
0x14f6   :  { %10651 = vmatprep.subr.bf16.mxu1 %v15750_v50  ;;  %10694 = vmatprep.subr.bf16.mxu0 %v15752_v54  ;;  %v20001_v31 = vld [vmem:[%s23214_s13 + $0xa8] sm:$0xff]   ;;  %v20002_v50 = vld [vmem:[%s23214_s13 + $0x70] sm:$0xff]  }
0x14f7   :  { %v20003_v54 = vld [vmem:[%s23214_s13 + $0xf0] sm:$0xff]  }
0x14f9   :  { %10652 = vmatpush1.bf16.msra.mxu1 %v15749_v3  ;;  %10695 = vmatpush1.bf16.msra.mxu0 %v15751_v11  ;;  %v20008_v3 = vld [vmem:[%s23214_s13 + $0x38] sm:$0xff]  }
0x14fa   :  { %10653 = vmatprep.subr.bf16.mxu1 %v15766_v48  ;;  %10696 = vmatprep.subr.bf16.mxu0 %v15768_v9  ;;  %v20009_v11 = vld [vmem:[%s23214_s13 + $0xb8] sm:$0xff]   ;;  %v20010_v48 = vld [vmem:[%s23214_s13 + $0x140] sm:$0xff]  }
0x14fb   :  { %v20011_v9 = vld [vmem:[%s23214_s13 + $0x1c0] sm:$0xff]  }
0x14fd   :  { %10654 = vmatpush1.bf16.msra.mxu1 %v15765_v53  ;;  %10697 = vmatpush1.bf16.msra.mxu0 %v15767_v4  ;;  %v9982_v53 = vld [vmem:[%s23215_s16] sm:$0xff] }
0x14fe   :  { %16728 = vmatprep.subr.bf16.mxu1 %v19978_v34  ;;  %16750 = vmatprep.subr.bf16.mxu0 %v19979_v12  ;;  %v9989_v4 = vrot.slane %v9982_v53, %v21586_v8  ;;  %v9997_v34 = vrot.slane %v9982_v53, %v21595_v57  ;;  %v9993_v12 = vrot.slane %v9982_v53, %v21590_v51 }
0x1500   :  { %15775 = vmatmul.mubr.msk.bf16.vlgmr.msra.gmra.mrb[180].mxu1 %vm8547_vm5, %v22389_v61  ;;  %15776 = vmatmul.mubr.msk.bf16.vlgmr.msra.gmra.mrb[136].mxu0 %vm8547_vm5, %v22389_v61  ;;  %v19990_v61 = vld [vmem:[%s23214_s13 + $0x58] sm:$0xff]  }
0x1501   :  { %16729 = vmatpush3.bf16.msra.mxu1 %v19980_v1  ;;  %16751 = vmatpush3.bf16.msra.mxu0 %v19981_v17  ;;  %v10001_v1 = vrot.slane %v9982_v53, %v21601_v58 }
0x1502   :  { %16730 = vmatprep.subr.bf16.mxu1 %v19982_v19  ;;  %16752 = vmatprep.subr.bf16.mxu0 %v19983_v59 }
0x1505   :  { %16731 = vmatpush3.bf16.msra.mxu1 %v19984_v25  ;;  %16753 = vmatpush3.bf16.msra.mxu0 %v19985_v56 }
0x1506   :  { %16732 = vmatprep.subr.bf16.mxu1 %v19986_v16  ;;  %16754 = vmatprep.subr.bf16.mxu0 %v19987_v10 }
0x1509   :  { %16733 = vmatpush3.bf16.msra.mxu1 %v19988_v36  ;;  %16755 = vmatpush3.bf16.msra.mxu0 %v19989_v41 }
0x150a   :  { %16734 = vmatprep.subr.bf16.mxu1 %v19990_v61  ;;  %16756 = vmatprep.subr.bf16.mxu0 %v19991_v60 }
0x150d   :  { %16735 = vmatpush3.bf16.msra.mxu1 %v19992_v26  ;;  %16757 = vmatpush3.bf16.msra.mxu0 %v19993_v43 }
0x150e   :  { %16736 = vmatprep.subr.bf16.mxu1 %v19994_v39  ;;  %16758 = vmatprep.subr.bf16.mxu0 %v19995_v35 }
0x1511   :  { %16737 = vmatpush3.bf16.msra.mxu1 %v19996_v47  ;;  %16759 = vmatpush3.bf16.msra.mxu0 %v19997_v40 }
0x1512   :  { %16738 = vmatprep.subr.bf16.mxu1 %v19998_v55  ;;  %16760 = vmatprep.subr.bf16.mxu0 %v19999_v22 }
0x1515   :  { %16739 = vmatpush3.bf16.msra.mxu1 %v20000_v23  ;;  %16761 = vmatpush3.bf16.msra.mxu0 %v20001_v31 }
0x1516   :  { %16740 = vmatprep.subr.bf16.mxu1 %v20002_v50  ;;  %16762 = vmatprep.subr.bf16.mxu0 %v20003_v54 }
0x1519   :  { %16741 = vmatpush3.bf16.msra.mxu1 %v20004_v63  ;;  %16763 = vmatpush3.bf16.msra.mxu0 %v20005_v33 }
0x151a   :  { %16742 = vmatprep.subr.bf16.mxu1 %v20006_v15  ;;  %16764 = vmatprep.subr.bf16.mxu0 %v20007_v14 }
0x151d   :  { %16743 = vmatpush3.bf16.msra.mxu1 %v20008_v3  ;;  %16765 = vmatpush3.bf16.msra.mxu0 %v20009_v11  ;;  %v20012_v11 = vld [vmem:[%s23214_s13 + $0x100] sm:$0xff]  }
0x151e   :  { %16772 = vmatprep.subr.bf16.mxu1 %v20010_v48  ;;  %16794 = vmatprep.subr.bf16.mxu0 %v20011_v9  ;;  %v20013_v48 = vld [vmem:[%s23214_s13 + $0x180] sm:$0xff]   ;;  %v20014_v9 = vld [vmem:[%s23214_s13 + $0x148] sm:$0xff]  }
0x15a3   :  { %v10423_v17 = vpop.f32.mrb[168].mxu1  ;;  %v10466_v19 = vpop.f32.mrb[124].mxu0 }
0x15a4   :  { %v10424_v59 = vadd.f32 %v10423_v17, %v9989_v4  ;;  %v10467_v25 = vadd.f32 %v10466_v19, %v9997_v34  ;;  %v10425_v56 = vpop.f32.mrb[169].mxu1  ;;  %v10468_v16 = vpop.f32.mrb[125].mxu0  ;;  %v10013_v17 = vrot.slane %v9982_v53, %v21692_v32  ;;  %v20018_v19 = vld [vmem:[%s23214_s13 + $0x150] sm:$0xff]  }
0x15a5   :  { %v10426_v10 = vadd.f32 %v10425_v56, %v9993_v12  ;;  %v10469_v36 = vadd.f32 %v10468_v16, %v10001_v1  ;;  %v10427_v41 = vpop.f32.mrb[170].mxu1  ;;  %v10470_v61 = vpop.f32.mrb[126].mxu0  ;;  %v10017_v56 = vrot.slane %v9982_v53, %v21698_v37 }
0x15a6   :  { %v10428_v60 = vadd.f32 %v10427_v41, %v9989_v4  ;;  %v10471_v26 = vadd.f32 %v10470_v61, %v9997_v34  ;;  %v10429_v43 = vpop.f32.mrb[171].mxu1  ;;  %v10472_v39 = vpop.f32.mrb[127].mxu0  ;;  %v10733_v40 = vmax.f32 %v10424_v59, 0.0  ;;  %v10735_v55 = vmax.f32 %v10467_v25, 0.0  ;;  %v20015_v4 = vld [vmem:[%s23214_s13 + $0x1c8] sm:$0xff]   ;;  %v20019_v59 = vld [vmem:[%s23214_s13 + $0x1d0] sm:$0xff]  }
0x15a7   :  { %v10430_v35 = vadd.f32 %v10429_v43, %v9993_v12  ;;  %v10473_v47 = vadd.f32 %v10472_v39, %v10001_v1  ;;  %v10734_v31 = vmax.f32 %v10426_v10, 0.0  ;;  %v10736_v50 = vmax.f32 %v10469_v36, 0.0  ;;  %v20016_v34 = vld [vmem:[%s23214_s13 + $0x108] sm:$0xff]   ;;  %v20020_v36 = vld [vmem:[%s23214_s13 + $0x110] sm:$0xff]   ;;  %v20022_v39 = vld [vmem:[%s23214_s13 + $0x158] sm:$0xff]  }
0x15a8   :  { %v10749_v22 = vmax.f32 %v10428_v60, 0.0  ;;  %v10751_v23 = vmax.f32 %v10471_v26, 0.0  ;;  %v20017_v12 = vld [vmem:[%s23214_s13 + $0x188] sm:$0xff]   ;;  %v10005_v1 = vrot.slane %v9982_v53, %v21683_v24  ;;  %v10009_v25 = vrot.slane %v9982_v53, %v21687_v29  ;;  %v20021_v41 = vld [vmem:[%s23214_s13 + $0x190] sm:$0xff]  }
0x15a9   :  { %v10750_v54 = vmax.f32 %v10430_v35, 0.0  ;;  %v10752_v63 = vmax.f32 %v10473_v47, 0.0  ;;  %v20023_v35 = vld [vmem:[%s23214_s13 + $0x1d8] sm:$0xff]  }
0x15aa   :  { %v11021_v33 = vpack.c.bf16 %v10749_v22, %v10733_v40  ;;  %v11023_v15 = vpack.c.bf16 %v10751_v23, %v10735_v55 }
0x15ab   :  { %v11022_v14 = vpack.c.bf16 %v10750_v54, %v10734_v31  ;;  %v11024_v3 = vpack.c.bf16 %v10752_v63, %v10736_v50 }
0x15ad   :  { %11844 = vmatprep.mubr.bf16.mxu1 %v11022_v14  ;;  %11885 = vmatprep.mubr.bf16.mxu0 %v11024_v3 }
0x15ae   :  { %11845 = vmatmul.mubr.bf16.vlgmr.msra.gmra.mrb[184].mxu1 %v11021_v33  ;;  %11886 = vmatmul.mubr.bf16.vlgmr.msra.gmra.mrb[140].mxu0 %v11023_v15  ;;  %v20024_v33 = vld [vmem:[%s23214_s13 + $0x118] sm:$0xff]  }
0x15af   :  { %16773 = vmatpush3.bf16.msra.mxu1 %v20012_v11  ;;  %16795 = vmatpush3.bf16.msra.mxu0 %v20013_v48  ;;  %v20025_v15 = vld [vmem:[%s23214_s13 + $0x198] sm:$0xff]  }
0x15b0   :  { %16774 = vmatprep.subr.bf16.mxu1 %v20014_v9  ;;  %16796 = vmatprep.subr.bf16.mxu0 %v20015_v4  ;;  %v20026_v9 = vld [vmem:[%s23214_s13 + $0x160] sm:$0xff]  }
0x15b1   :  { %v20027_v4 = vld [vmem:[%s23214_s13 + $0x1e0] sm:$0xff]  }
0x15b3   :  { %v10509_v16 = vpop.f32.mrb[172].mxu1  ;;  %v10552_v10 = vpop.f32.mrb[128].mxu0  ;;  %16775 = vmatpush3.bf16.msra.mxu1 %v20016_v34  ;;  %16797 = vmatpush3.bf16.msra.mxu0 %v20017_v12 }
0x15b4   :  { %v10510_v61 = vadd.f32 %v10509_v16, %v10005_v1  ;;  %v10553_v60 = vadd.f32 %v10552_v10, %v10013_v17  ;;  %v10511_v26 = vpop.f32.mrb[173].mxu1  ;;  %v10554_v43 = vpop.f32.mrb[129].mxu0  ;;  %16776 = vmatprep.subr.bf16.mxu1 %v20018_v19  ;;  %16798 = vmatprep.subr.bf16.mxu0 %v20019_v59  ;;  %v20028_v16 = vld [vmem:[%s23214_s13 + $0x120] sm:$0xff]  }
0x15b5   :  { %v10512_v47 = vadd.f32 %v10511_v26, %v10009_v25  ;;  %v10555_v40 = vadd.f32 %v10554_v43, %v10017_v56  ;;  %v10513_v55 = vpop.f32.mrb[174].mxu1  ;;  %v10556_v53 = vpop.f32.mrb[130].mxu0  ;;  %v20029_v10 = vld [vmem:[%s23214_s13 + $0x1a0] sm:$0xff]   ;;  %v20033_v26 = vld [vmem:[%s23214_s13 + $0x1a8] sm:$0xff]  }
0x15b6   :  { %v10514_v22 = vadd.f32 %v10513_v55, %v10005_v1  ;;  %v10557_v23 = vadd.f32 %v10556_v53, %v10013_v17  ;;  %v10515_v31 = vpop.f32.mrb[175].mxu1  ;;  %v10558_v50 = vpop.f32.mrb[131].mxu0  ;;  %v10737_v14 = vmax.f32 %v10510_v61, 0.0  ;;  %v10739_v3 = vmax.f32 %v10553_v60, 0.0  ;;  %v22521_v61 = vld [vmem:[%s23215_s16 + $0x8] sm:$0xff] }
0x15b7   :  { %v10516_v54 = vadd.f32 %v10515_v31, %v10009_v25  ;;  %v10559_v63 = vadd.f32 %v10558_v50, %v10017_v56  ;;  %16777 = vmatpush3.bf16.msra.mxu1 %v20020_v36  ;;  %16799 = vmatpush3.bf16.msra.mxu0 %v20021_v41  ;;  %v10738_v34 = vmax.f32 %v10512_v47, 0.0  ;;  %v10740_v12 = vmax.f32 %v10555_v40, 0.0  ;;  %v20030_v36 = vld [vmem:[%s23214_s13 + $0x168] sm:$0xff]   ;;  %v20035_v47 = vld [vmem:[%s23214_s13 + $0x1f0] sm:$0xff]  }
0x15b8   :  { %v10753_v11 = vmax.f32 %v10514_v22, 0.0  ;;  %v10755_v48 = vmax.f32 %v10557_v23, 0.0  ;;  %16778 = vmatprep.subr.bf16.mxu1 %v20022_v39  ;;  %16800 = vmatprep.subr.bf16.mxu0 %v20023_v35  ;;  %v20031_v41 = vld [vmem:[%s23214_s13 + $0x1e8] sm:$0xff]   ;;  %v10021_v43 = vrot.slane %v22521_v61, %v21586_v8  ;;  %v10029_v39 = vrot.slane %v22521_v61, %v21595_v57  ;;  %v20034_v35 = vld [vmem:[%s23214_s13 + $0x170] sm:$0xff]  }
0x15b9   :  { %v10754_v1 = vmax.f32 %v10516_v54, 0.0  ;;  %v10756_v17 = vmax.f32 %v10559_v63, 0.0  ;;  %v20032_v60 = vld [vmem:[%s23214_s13 + $0x128] sm:$0xff]   ;;  %v10025_v40 = vrot.slane %v22521_v61, %v21590_v51  ;;  %v10033_v55 = vrot.slane %v22521_v61, %v21601_v58  ;;  %v20036_v23 = vld [vmem:[%s23214_s13 + $0x130] sm:$0xff]   ;;  %v20038_v63 = vld [vmem:[%s23214_s13 + $0x178] sm:$0xff]  }
0x15ba   :  { %v22512_v19 = vpack.c.bf16 %v10753_v11, %v10737_v14  ;;  %v22514_v59 = vpack.c.bf16 %v10755_v48, %v10739_v3  ;;  %v20037_v31 = vld [vmem:[%s23214_s13 + $0x1b0] sm:$0xff]  }
0x15bb   :  { %v11026_v25 = vpack.c.bf16 %v10754_v1, %v10738_v34  ;;  %v11028_v56 = vpack.c.bf16 %v10756_v17, %v10740_v12  ;;  %16779 = vmatpush3.bf16.msra.mxu1 %v20024_v33  ;;  %16801 = vmatpush3.bf16.msra.mxu0 %v20025_v15  ;;  %v20039_v33 = vld [vmem:[%s23214_s13 + $0x1f8] sm:$0xff]  }
0x15bc   :  { %16780 = vmatprep.subr.bf16.mxu1 %v20026_v9  ;;  %16802 = vmatprep.subr.bf16.mxu0 %v20027_v4  ;;  %v20040_v12 = vld [vmem:[%s23214_s13 + $0x138] sm:$0xff]  }
0x15bd   :  { %11926 = vmatprep.mubr.bf16.mxu1 %v11026_v25  ;;  %11967 = vmatprep.mubr.bf16.mxu0 %v11028_v56  ;;  %v20041_v1 = vld [vmem:[%s23214_s13 + $0x1b8] sm:$0xff]  }
0x15bf   :  { %16781 = vmatpush3.bf16.msra.mxu1 %v20028_v16  ;;  %16803 = vmatpush3.bf16.msra.mxu0 %v20029_v10  ;;  %v20042_v10 = vld [vmem:[%s23214_s13 + $0x240] sm:$0xff]  }
0x15c0   :  { %16782 = vmatprep.subr.bf16.mxu1 %v20030_v36  ;;  %16804 = vmatprep.subr.bf16.mxu0 %v20031_v41  ;;  %v20043_v36 = vld [vmem:[%s23214_s13 + $0x2c0] sm:$0xff]  }
0x15c3   :  { %v10595_v53 = vpop.f32.mrb[176].mxu1  ;;  %v10638_v22 = vpop.f32.mrb[132].mxu0  ;;  %16783 = vmatpush3.bf16.msra.mxu1 %v20032_v60  ;;  %16805 = vmatpush3.bf16.msra.mxu0 %v20033_v26 }
0x15c4   :  { %v10596_v8 = vadd.f32 %v10595_v53, %v10021_v43  ;;  %v10639_v50 = vadd.f32 %v10638_v22, %v10029_v39  ;;  %v10597_v54 = vpop.f32.mrb[177].mxu1  ;;  %v10640_v57 = vpop.f32.mrb[133].mxu0  ;;  %16784 = vmatprep.subr.bf16.mxu1 %v20034_v35  ;;  %16806 = vmatprep.subr.bf16.mxu0 %v20035_v47  ;;  %v20045_v53 = vld [vmem:[%s23214_s13 + $0x280] sm:$0xff]   ;;  %v20046_v22 = vld [vmem:[%s23214_s13 + $0x248] sm:$0xff]  }
0x15c5   :  { %v10598_v51 = vadd.f32 %v10597_v54, %v10025_v40  ;;  %v10641_v15 = vadd.f32 %v10640_v57, %v10033_v55  ;;  %v10599_v14 = vpop.f32.mrb[178].mxu1  ;;  %v10642_v58 = vpop.f32.mrb[134].mxu0  ;;  %v20049_v54 = vld [vmem:[%s23214_s13 + $0x288] sm:$0xff]   ;;  %v20050_v57 = vld [vmem:[%s23214_s13 + $0x250] sm:$0xff]  }
0x15c6   :  { %v10600_v3 = vadd.f32 %v10599_v14, %v10021_v43  ;;  %v10643_v11 = vadd.f32 %v10642_v58, %v10029_v39  ;;  %v10601_v48 = vpop.f32.mrb[179].mxu1  ;;  %v10644_v9 = vpop.f32.mrb[135].mxu0  ;;  %v10741_v17 = vmax.f32 %v10596_v8, 0.0  ;;  %v10743_v25 = vmax.f32 %v10639_v50, 0.0 }
0x15c7   :  { %v10602_v4 = vadd.f32 %v10601_v48, %v10025_v40  ;;  %v10645_v34 = vadd.f32 %v10644_v9, %v10033_v55  ;;  %16785 = vmatpush3.bf16.msra.mxu1 %v20036_v23  ;;  %16807 = vmatpush3.bf16.msra.mxu0 %v20037_v31  ;;  %v10742_v41 = vmax.f32 %v10598_v51, 0.0  ;;  %v10744_v60 = vmax.f32 %v10641_v15, 0.0  ;;  %v20044_v55 = vld [vmem:[%s23214_s13 + $0x200] sm:$0xff]   ;;  %v20047_v23 = vld [vmem:[%s23214_s13 + $0x2c8] sm:$0xff]  }
0x15c8   :  { %v10757_v56 = vmax.f32 %v10600_v3, 0.0  ;;  %v10759_v16 = vmax.f32 %v10643_v11, 0.0  ;;  %16786 = vmatprep.subr.bf16.mxu1 %v20038_v63  ;;  %16808 = vmatprep.subr.bf16.mxu0 %v20039_v33  ;;  %v20048_v31 = vld [vmem:[%s23214_s13 + $0x208] sm:$0xff]   ;;  %v10037_v8 = vrot.slane %v22521_v61, %v21683_v24  ;;  %v10045_v50 = vrot.slane %v22521_v61, %v21692_v32  ;;  %v20051_v63 = vld [vmem:[%s23214_s13 + $0x2d0] sm:$0xff]   ;;  %v20054_v11 = vld [vmem:[%s23214_s13 + $0x258] sm:$0xff]  }
0x15c9   :  { %v10758_v26 = vmax.f32 %v10602_v4, 0.0  ;;  %v10760_v43 = vmax.f32 %v10645_v34, 0.0  ;;  %v20052_v24 = vld [vmem:[%s23214_s13 + $0x210] sm:$0xff]  }
0x15ca   :  { %v22543_v39 = vpack.c.bf16 %v10757_v56, %v10741_v17  ;;  %v22545_v35 = vpack.c.bf16 %v10759_v16, %v10743_v25  ;;  %v20053_v3 = vld [vmem:[%s23214_s13 + $0x290] sm:$0xff]   ;;  %v20056_v56 = vld [vmem:[%s23214_s13 + $0x218] sm:$0xff]  }
0x15cb   :  { %v11030_v47 = vpack.c.bf16 %v10758_v26, %v10742_v41  ;;  %v11032_v40 = vpack.c.bf16 %v10760_v43, %v10744_v60  ;;  %16787 = vmatpush3.bf16.msra.mxu1 %v20040_v12  ;;  %16809 = vmatpush3.bf16.msra.mxu0 %v20041_v1  ;;  %v20057_v60 = vld [vmem:[%s23214_s13 + $0x298] sm:$0xff]   ;;  %v20058_v26 = vld [vmem:[%s23214_s13 + $0x260] sm:$0xff]  }
0x15cc   :  { %16816 = vmatprep.subr.bf16.mxu1 %v20042_v10  ;;  %16838 = vmatprep.subr.bf16.mxu0 %v20043_v36 }
0x15ce   :  { %11927 = vmatmul.mubr.bf16.vlgmr.msra.gmra.mrb[188].mxu1 %v22512_v19  ;;  %11968 = vmatmul.mubr.bf16.vlgmr.msra.gmra.mrb[144].mxu0 %v22514_v59  ;;  %v10041_v19 = vrot.slane %v22521_v61, %v21687_v29  ;;  %v10049_v59 = vrot.slane %v22521_v61, %v21698_v37  ;;  %v20055_v37 = vld [vmem:[%s23214_s13 + $0x2d8] sm:$0xff]  }
0x15cf   :  { %16817 = vmatpush3.bf16.msra.mxu1 %v20044_v55  ;;  %12008 = vmatprep.mubr.bf16.mxu1 %v11030_v47 }
0x15d0   :  { %16839 = vmatpush3.bf16.msra.mxu0 %v20045_v53  ;;  %12049 = vmatprep.mubr.bf16.mxu0 %v11032_v40  ;;  %v20059_v53 = vld [vmem:[%s23214_s13 + $0x2e0] sm:$0xff]  }
0x15d1   :  { %16818 = vmatprep.subr.bf16.mxu1 %v20046_v22  ;;  %16840 = vmatprep.subr.bf16.mxu0 %v20047_v23 }
0x15d3   :  { %v10681_v33 = vpop.f32.mrb[180].mxu1  ;;  %v10724_v51 = vpop.f32.mrb[136].mxu0  ;;  %16819 = vmatpush3.bf16.msra.mxu1 %v20048_v31 }
0x15d4   :  { %v10682_v15 = vadd.f32 %v10681_v33, %v10037_v8  ;;  %v10725_v32 = vadd.f32 %v10724_v51, %v10045_v50  ;;  %16841 = vmatpush3.bf16.msra.mxu0 %v20049_v54  ;;  %v10683_v14 = vpop.f32.mrb[181].mxu1  ;;  %v10726_v58 = vpop.f32.mrb[137].mxu0  ;;  %16820 = vmatprep.subr.bf16.mxu1 %v20050_v57  ;;  %v20061_v54 = vld [vmem:[%s23214_s13 + $0x2a0] sm:$0xff]   ;;  %v20062_v57 = vld [vmem:[%s23214_s13 + $0x268] sm:$0xff]   ;;  %v20066_v33 = vld [vmem:[%s23214_s13 + $0x270] sm:$0xff]  }
0x15d5   :  { %v10684_v48 = vadd.f32 %v10683_v14, %v10041_v19  ;;  %v10727_v29 = vadd.f32 %v10726_v58, %v10049_v59  ;;  %v10685_v9 = vpop.f32.mrb[182].mxu1  ;;  %v10728_v4 = vpop.f32.mrb[138].mxu0  ;;  %16842 = vmatprep.subr.bf16.mxu0 %v20051_v63  ;;  %v20065_v63 = vld [vmem:[%s23214_s13 + $0x2a8] sm:$0xff]   ;;  %v20067_v51 = vld [vmem:[%s23214_s13 + $0x2f0] sm:$0xff]   ;;  %v20071_v14 = vld [vmem:[%s23214_s13 + $0x2f8] sm:$0xff]  }
0x15d6   :  { %v10686_v61 = vadd.f32 %v10685_v9, %v10037_v8  ;;  %v10729_v34 = vadd.f32 %v10728_v4, %v10045_v50  ;;  %v10687_v12 = vpop.f32.mrb[183].mxu1  ;;  %v10730_v1 = vpop.f32.mrb[139].mxu0  ;;  %v10745_v16 = vmax.f32 %v10682_v15, 0.0  ;;  %v10747_v10 = vmax.f32 %v10725_v32, 0.0  ;;  %v20060_v50 = vld [vmem:[%s23214_s13 + $0x220] sm:$0xff]   ;;  %v20069_v15 = vld [vmem:[%s23214_s13 + $0x2b0] sm:$0xff]  }
0x15d7   :  { %v10688_v17 = vadd.f32 %v10687_v12, %v10041_v19  ;;  %v10731_v25 = vadd.f32 %v10730_v1, %v10049_v59  ;;  %16821 = vmatpush3.bf16.msra.mxu1 %v20052_v24  ;;  %v10746_v43 = vmax.f32 %v10684_v48, 0.0  ;;  %v10748_v47 = vmax.f32 %v10727_v29, 0.0  ;;  %v20063_v19 = vld [vmem:[%s23214_s13 + $0x2e8] sm:$0xff]   ;;  %v20068_v24 = vld [vmem:[%s23214_s13 + $0x230] sm:$0xff]   ;;  %v20070_v32 = vld [vmem:[%s23214_s13 + $0x278] sm:$0xff]  }
0x15d8   :  { %v10761_v36 = vmax.f32 %v10686_v61, 0.0  ;;  %v10763_v41 = vmax.f32 %v10729_v34, 0.0  ;;  %16843 = vmatpush3.bf16.msra.mxu0 %v20053_v3  ;;  %16822 = vmatprep.subr.bf16.mxu1 %v20054_v11  ;;  %v20064_v59 = vld [vmem:[%s23214_s13 + $0x228] sm:$0xff]   ;;  %v20072_v58 = vld [vmem:[%s23214_s13 + $0x238] sm:$0xff]   ;;  %v20074_v11 = vld [vmem:[%s23214_s13 + $0x340] sm:$0xff]  }
0x15d9   :  { %v10762_v40 = vmax.f32 %v10688_v17, 0.0  ;;  %v10764_v55 = vmax.f32 %v10731_v25, 0.0  ;;  %16844 = vmatprep.subr.bf16.mxu0 %v20055_v37  ;;  %v20073_v3 = vld [vmem:[%s23214_s13 + $0x2b8] sm:$0xff]   ;;  %v20075_v48 = vld [vmem:[%s23214_s13 + $0x3c0] sm:$0xff]   ;;  %v20078_v4 = vld [vmem:[%s23214_s13 + $0x348] sm:$0xff]  }
0x15da   :  { %v22573_v22 = vpack.c.bf16 %v10761_v36, %v10745_v16  ;;  %v22575_v23 = vpack.c.bf16 %v10763_v41, %v10747_v10  ;;  %v20076_v29 = vld [vmem:[%s23214_s13 + $0x300] sm:$0xff]   ;;  %v20079_v37 = vld [vmem:[%s23214_s13 + $0x3c8] sm:$0xff]   ;;  %v20082_v12 = vld [vmem:[%s23214_s13 + $0x350] sm:$0xff]  }
0x15db   :  { %v11034_v31 = vpack.c.bf16 %v10762_v40, %v10746_v43  ;;  %v11036_v8 = vpack.c.bf16 %v10764_v55, %v10748_v47  ;;  %16823 = vmatpush3.bf16.msra.mxu1 %v20056_v56  ;;  %v20077_v9 = vld [vmem:[%s23214_s13 + $0x380] sm:$0xff]   ;;  %v20080_v61 = vld [vmem:[%s23214_s13 + $0x308] sm:$0xff]   ;;  %v20083_v1 = vld [vmem:[%s23214_s13 + $0x3d0] sm:$0xff]  }
0x15dc   :  { %16845 = vmatpush3.bf16.msra.mxu0 %v20057_v60  ;;  %16824 = vmatprep.subr.bf16.mxu1 %v20058_v26  ;;  %v20081_v34 = vld [vmem:[%s23214_s13 + $0x388] sm:$0xff]   ;;  %v20086_v17 = vld [vmem:[%s23214_s13 + $0x358] sm:$0xff]   ;;  %v20090_v10 = vld [vmem:[%s23214_s13 + $0x360] sm:$0xff]  }
0x15dd   :  { %16846 = vmatprep.subr.bf16.mxu0 %v20059_v53  ;;  %v20087_v25 = vld [vmem:[%s23214_s13 + $0x3d8] sm:$0xff]   ;;  %v20091_v36 = vld [vmem:[%s23214_s13 + $0x3e0] sm:$0xff]   ;;  %v20094_v26 = vld [vmem:[%s23214_s13 + $0x368] sm:$0xff]  }
0x15de   :  { %v20088_v56 = vld [vmem:[%s23214_s13 + $0x318] sm:$0xff]   ;;  %v20092_v41 = vld [vmem:[%s23214_s13 + $0x320] sm:$0xff]   ;;  %v20095_v43 = vld [vmem:[%s23214_s13 + $0x3e8] sm:$0xff]  }
0x15df   :  { %16825 = vmatpush3.bf16.msra.mxu1 %v20060_v50  ;;  %v20089_v16 = vld [vmem:[%s23214_s13 + $0x398] sm:$0xff]   ;;  %v20093_v60 = vld [vmem:[%s23214_s13 + $0x3a0] sm:$0xff]   ;;  %v20096_v47 = vld [vmem:[%s23214_s13 + $0x328] sm:$0xff]  }
0x15e0   :  { %16847 = vmatpush3.bf16.msra.mxu0 %v20061_v54  ;;  %16826 = vmatprep.subr.bf16.mxu1 %v20062_v57  ;;  %v20097_v40 = vld [vmem:[%s23214_s13 + $0x3a8] sm:$0xff]   ;;  %v20098_v55 = vld [vmem:[%s23214_s13 + $0x370] sm:$0xff]   ;;  %v20102_v50 = vld [vmem:[%s23214_s13 + $0x378] sm:$0xff]  }
0x15e1   :  { %16848 = vmatprep.subr.bf16.mxu0 %v20063_v19  ;;  %v20099_v53 = vld [vmem:[%s23214_s13 + $0x3f0] sm:$0xff]   ;;  %v20103_v54 = vld [vmem:[%s23214_s13 + $0x3f8] sm:$0xff]   ;;  %v12285_v57 = vld [vmem:[%s23216_s0] sm:$0xff] }
0x15e2   :  { %v12286_v19 = vld [vmem:[%s23216_s0 + $0x8] sm:$0xff] }
0x15e3   :  { %16827 = vmatpush3.bf16.msra.mxu1 %v20064_v59  ;;  %v20104_v59 = vld [vmem:[%s23214_s13 + $0x338] sm:$0xff]  }
0x15e4   :  { %16849 = vmatpush3.bf16.msra.mxu0 %v20065_v63  ;;  %16828 = vmatprep.subr.bf16.mxu1 %v20066_v33  ;;  %v20105_v63 = vld [vmem:[%s23214_s13 + $0x3b8] sm:$0xff]   ;;  %v18191_v33 = vpack.c.bf16 %v12286_v19, %v12285_v57 }
0x15e5   :  { %16850 = vmatprep.subr.bf16.mxu0 %v20067_v51  ;;  %v12287_v51 = vld [vmem:[%s23216_s0 + $0x10] sm:$0xff] }
0x15e7   :  { %16829 = vmatpush3.bf16.msra.mxu1 %v20068_v24  ;;  %v12288_v24 = vld [vmem:[%s23216_s0 + $0x18] sm:$0xff] }
0x15e8   :  { %16851 = vmatpush3.bf16.msra.mxu0 %v20069_v15  ;;  %16830 = vmatprep.subr.bf16.mxu1 %v20070_v32  ;;  %v18195_v15 = vpack.c.bf16 %v12288_v24, %v12287_v51  ;;  %v12289_v32 = vld [vmem:[%s23216_s0 + $0x20] sm:$0xff] }
0x15e9   :  { %16852 = vmatprep.subr.bf16.mxu0 %v20071_v14  ;;  %v12290_v14 = vld [vmem:[%s23216_s0 + $0x28] sm:$0xff] }
0x15eb   :  { %16831 = vmatpush3.bf16.msra.mxu1 %v20072_v58  ;;  %v18199_v58 = vpack.c.bf16 %v12290_v14, %v12289_v32 }
0x15ec   :  { %16853 = vmatpush3.bf16.msra.mxu0 %v20073_v3  ;;  %16860 = vmatprep.subr.bf16.mxu1 %v20074_v11  ;;  %v12291_v3 = vld [vmem:[%s23216_s0 + $0x30] sm:$0xff]  ;;  %v12292_v11 = vld [vmem:[%s23216_s0 + $0x38] sm:$0xff] }
0x15ed   :  { %16882 = vmatprep.subr.bf16.mxu0 %v20075_v48  ;;  %v18203_v48 = vpack.c.bf16 %v12292_v11, %v12291_v3 }
0x15ee   :  { %12009 = vmatmul.mubr.bf16.vlgmr.msra.gmra.mrb[192].mxu1 %v22543_v39  ;;  %v20084_v39 = vld [vmem:[%s23214_s13 + $0x310] sm:$0xff]  }
0x15ef   :  { %12050 = vmatmul.mubr.bf16.vlgmr.msra.gmra.mrb[148].mxu0 %v22545_v35  ;;  %16861 = vmatpush3.bf16.msra.mxu1 %v20076_v29  ;;  %v20085_v35 = vld [vmem:[%s23214_s13 + $0x390] sm:$0xff]   ;;  %v15777_v29 = vld [vmem:[#allocation8] ss:$0 sm:$0xff] }
0x15f0   :  { %12090 = vmatprep.mubr.bf16.mxu1 %v11034_v31  ;;  %16883 = vmatpush3.bf16.msra.mxu0 %v20077_v9  ;;  %v20100_v31 = vld [vmem:[%s23214_s13 + $0x330] sm:$0xff]  }
0x15f1   :  { %12131 = vmatprep.mubr.bf16.mxu0 %v11036_v8  ;;  %16862 = vmatprep.subr.bf16.mxu1 %v20078_v4  ;;  %v20101_v8 = vld [vmem:[%s23214_s13 + $0x3b0] sm:$0xff]  }
0x15f2   :  { %16884 = vmatprep.subr.bf16.mxu0 %v20079_v37 }
0x15f3   :  { %16863 = vmatpush3.bf16.msra.mxu1 %v20080_v61 }
0x15f4   :  { %16885 = vmatpush3.bf16.msra.mxu0 %v20081_v34  ;;  %16864 = vmatprep.subr.bf16.mxu1 %v20082_v12 }
0x15f5   :  { %16886 = vmatprep.subr.bf16.mxu0 %v20083_v1 }
0x15f7   :  { %16865 = vmatpush3.bf16.msra.mxu1 %v20084_v39 }
0x15f8   :  { %16887 = vmatpush3.bf16.msra.mxu0 %v20085_v35  ;;  %16866 = vmatprep.subr.bf16.mxu1 %v20086_v17 }
0x15f9   :  { %16888 = vmatprep.subr.bf16.mxu0 %v20087_v25 }
0x15fb   :  { %16867 = vmatpush3.bf16.msra.mxu1 %v20088_v56 }
0x15fc   :  { %16889 = vmatpush3.bf16.msra.mxu0 %v20089_v16  ;;  %16868 = vmatprep.subr.bf16.mxu1 %v20090_v10 }
0x15fd   :  { %16890 = vmatprep.subr.bf16.mxu0 %v20091_v36 }
0x15ff   :  { %16869 = vmatpush3.bf16.msra.mxu1 %v20092_v41 }
0x1600   :  { %16891 = vmatpush3.bf16.msra.mxu0 %v20093_v60  ;;  %16870 = vmatprep.subr.bf16.mxu1 %v20094_v26 }
0x1601   :  { %16892 = vmatprep.subr.bf16.mxu0 %v20095_v43 }
0x1603   :  { %16871 = vmatpush3.bf16.msra.mxu1 %v20096_v47 }
0x1604   :  { %16893 = vmatpush3.bf16.msra.mxu0 %v20097_v40  ;;  %16872 = vmatprep.subr.bf16.mxu1 %v20098_v55 }
0x1605   :  { %16894 = vmatprep.subr.bf16.mxu0 %v20099_v53 }
0x1607   :  { %16873 = vmatpush3.bf16.msra.mxu1 %v20100_v31 }
0x1608   :  { %16895 = vmatpush3.bf16.msra.mxu0 %v20101_v8  ;;  %16874 = vmatprep.subr.bf16.mxu1 %v20102_v50 }
0x1609   :  { %16896 = vmatprep.subr.bf16.mxu0 %v20103_v54 }
0x160b   :  { %16875 = vmatpush3.bf16.msra.mxu1 %v20104_v59 }
0x160c   :  { %16897 = vmatpush3.bf16.msra.mxu0 %v20105_v63 }
0x160d   :  { %18192 = vmatprep.subr.bf16.mxu0 %v18191_v33 }
0x160e   :  { %12091 = vmatmul.mubr.bf16.vlgmr.msra.gmra.mrb[196].mxu1 %v22573_v22 }
0x160f   :  { %12132 = vmatmul.mubr.bf16.vlgmr.msra.gmra.mrb[152].mxu0 %v22575_v23 }
0x1610   :  { %18194 = vmatpush3.bf16.msra.mxu0 %v18191_v33  ;;  %17457 = vmatprep.mubr.msk.f32.mxu0 %vm8547_vm5, %v21457_v21 }
0x1611   :  { %18196 = vmatprep.subr.bf16.mxu0 %v18195_v15 }
0x1614   :  { %18198 = vmatpush3.bf16.msra.mxu0 %v18195_v15 }
0x1615   :  { %18200 = vmatprep.subr.bf16.mxu0 %v18199_v58 }
0x1618   :  { %18202 = vmatpush3.bf16.msra.mxu0 %v18199_v58 }
0x1619   :  { %18204 = vmatprep.subr.bf16.mxu0 %v18203_v48 }
0x161c   :  { %18206 = vmatpush3.bf16.msra.mxu0 %v18203_v48 }
0x161f   :  { %17458 = vmatmul.mubr.msk.f32.vlgmr.msra.gmra.mrb[156].mxu0 %vm8547_vm5, %v21462_v28 }
0x1620   :  { %17460 = vmatprep.mubr.msk.f32.mxu0 %vm8547_vm5, %v21470_v49 }
0x1623   :  { %17461 = vmatmul.mubr.msk.f32.gmra.mrb[158].mxu0 %vm8547_vm5, %v21476_v0 }
0x1624   :  { %17463 = vmatprep.mubr.msk.f32.mxu0 %vm8547_vm5, %v21485_v13 }
0x1627   :  { %17464 = vmatmul.mubr.msk.f32.gmra.mrb[160].mxu0 %vm8547_vm5, %v21492_v20 }
0x1628   :  { %17466 = vmatprep.mubr.msk.f32.mxu0 %vm8547_vm5, %v21502_v38 }
0x162b   :  { %17467 = vmatmul.mubr.msk.f32.gmra.mrb[162].mxu0 %vm8547_vm5, %v21508_v62 }
0x162c   :  { %17469 = vmatprep.mubr.msk.f32.mxu0 %vm8547_vm5, %v21516_v6 }
0x162f   :  { %17470 = vmatmul.mubr.msk.f32.gmra.mrb[164].mxu0 %vm8547_vm5, %v21522_v52 }
0x1630   :  { %17472 = vmatprep.mubr.msk.f32.mxu0 %vm8547_vm5, %v21535_v2 }
0x1633   :  { %17473 = vmatmul.mubr.msk.f32.gmra.mrb[166].mxu0 %vm8547_vm5, %v21540_v42 }
0x1634   :  { %17475 = vmatprep.mubr.msk.f32.mxu0 %vm8547_vm5, %v21550_v5 }
0x1637   :  { %17476 = vmatmul.mubr.msk.f32.gmra.mrb[168].mxu0 %vm8547_vm5, %v21554_v27 }
0x1638   :  { %17478 = vmatprep.mubr.msk.f32.mxu0 %vm8547_vm5, %v21563_v45 }
0x163b   :  { %17479 = vmatmul.mubr.msk.f32.gmra.mrb[170].mxu0 %vm8547_vm5, %v21568_v30 }
0x1681   :  { %v16744_v22 = vpop.f32.mrb[184].mxu1  ;;  %v16766_v23 = vpop.f32.mrb[140].mxu0 }
0x1682   :  { %v16745_v9 = vpop.f32.mrb[185].mxu1  ;;  %v16767_v4 = vpop.f32.mrb[141].mxu0 }
0x1683   :  { %v16746_v37 = vadd.f32 %v16745_v9, %v16744_v22  ;;  %v16768_v61 = vadd.f32 %v16767_v4, %v16766_v23  ;;  %v16747_v34 = vpop.f32.mrb[186].mxu1  ;;  %v16769_v12 = vpop.f32.mrb[142].mxu0 }
0x1684   :  { %v16748_v1 = vpop.f32.mrb[187].mxu1  ;;  %v16770_v39 = vpop.f32.mrb[143].mxu0 }
0x1685   :  { %v11847_v35 = vadd.f32 %v16746_v37, %v15777_v29  ;;  %v16749_v17 = vadd.f32 %v16748_v1, %v16747_v34  ;;  %v16771_v25 = vadd.f32 %v16770_v39, %v16769_v12 }
0x1687   :  { %v11888_v56 = vadd.f32 %v16768_v61, %v11847_v35  ;;  %v11850_v16 = vadd.f32 %v16749_v17, %v15777_v29 }
0x1689   :  { %v11891_v10 = vadd.f32 %v16771_v25, %v11850_v16 }
0x16a1   :  { %v16788_v36 = vpop.f32.mrb[188].mxu1  ;;  %v16810_v41 = vpop.f32.mrb[144].mxu0 }
0x16a2   :  { %v16789_v60 = vpop.f32.mrb[189].mxu1  ;;  %v16811_v26 = vpop.f32.mrb[145].mxu0 }
0x16a3   :  { %v16790_v43 = vadd.f32 %v16789_v60, %v16788_v36  ;;  %v16812_v47 = vadd.f32 %v16811_v26, %v16810_v41  ;;  %v16791_v40 = vpop.f32.mrb[190].mxu1  ;;  %v16813_v55 = vpop.f32.mrb[146].mxu0 }
0x16a4   :  { %v16792_v53 = vpop.f32.mrb[191].mxu1  ;;  %v16814_v31 = vpop.f32.mrb[147].mxu0 }
0x16a5   :  { %v11929_v8 = vadd.f32 %v16790_v43, %v11888_v56  ;;  %v16793_v50 = vadd.f32 %v16792_v53, %v16791_v40  ;;  %v16815_v54 = vadd.f32 %v16814_v31, %v16813_v55  ;;  %v15911_v53 = vld [vmem:[%s23217_s27] ss:$0 sm:$0xff] }
0x16a7   :  { %v11970_v57 = vadd.f32 %v16812_v47, %v11929_v8  ;;  %v11932_v19 = vadd.f32 %v16793_v50, %v11891_v10 }
0x16a9   :  { %v11973_v59 = vadd.f32 %v16815_v54, %v11932_v19 }
0x16c1   :  { %v16832_v63 = vpop.f32.mrb[192].mxu1 }
0x16c2   :  { %v16854_v33 = vpop.f32.mrb[148].mxu0  ;;  %v16833_v51 = vpop.f32.mrb[193].mxu1 }
0x16c3   :  { %v16834_v24 = vadd.f32 %v16833_v51, %v16832_v63  ;;  %v16855_v15 = vpop.f32.mrb[149].mxu0  ;;  %v16835_v32 = vpop.f32.mrb[194].mxu1 }
0x16c4   :  { %v16856_v14 = vadd.f32 %v16855_v15, %v16854_v33  ;;  %v16857_v58 = vpop.f32.mrb[150].mxu0  ;;  %v16836_v3 = vpop.f32.mrb[195].mxu1 }
0x16c5   :  { %v12011_v11 = vadd.f32 %v16834_v24, %v11970_v57  ;;  %v16837_v48 = vadd.f32 %v16836_v3, %v16835_v32  ;;  %v16858_v22 = vpop.f32.mrb[151].mxu0 }
0x16c6   :  { %v16859_v23 = vadd.f32 %v16858_v22, %v16857_v58 }
0x16c7   :  { %v12052_v29 = vadd.f32 %v16856_v14, %v12011_v11  ;;  %v12014_v9 = vadd.f32 %v16837_v48, %v11973_v59 }
0x16c9   :  { %v12055_v4 = vadd.f32 %v16859_v23, %v12014_v9 }
0x16e1   :  { %v16876_v37 = vpop.f32.mrb[196].mxu1 }
0x16e2   :  { %v16898_v61 = vpop.f32.mrb[152].mxu0  ;;  %v16877_v34 = vpop.f32.mrb[197].mxu1 }
0x16e3   :  { %v16878_v12 = vadd.f32 %v16877_v34, %v16876_v37  ;;  %v16899_v1 = vpop.f32.mrb[153].mxu0  ;;  %v16879_v39 = vpop.f32.mrb[198].mxu1 }
0x16e4   :  { %v16900_v35 = vadd.f32 %v16899_v1, %v16898_v61  ;;  %v16901_v17 = vpop.f32.mrb[154].mxu0  ;;  %v16880_v25 = vpop.f32.mrb[199].mxu1 }
0x16e5   :  { %v12093_v56 = vadd.f32 %v16878_v12, %v12052_v29  ;;  %v16881_v16 = vadd.f32 %v16880_v25, %v16879_v39  ;;  %v16902_v10 = vpop.f32.mrb[155].mxu0 }
0x16e6   :  { %v16903_v36 = vadd.f32 %v16902_v10, %v16901_v17 }
0x16e7   :  { %v12134_v41 = vadd.f32 %v16900_v35, %v12093_v56  ;;  %v12096_v60 = vadd.f32 %v16881_v16, %v12055_v4 }
0x16e9   :  { %v12137_v26 = vadd.f32 %v16903_v36, %v12096_v60  ;;  %v22668_v43 = vadd.f32 %v12134_v41, %v22385_v44 }
0x16eb   :  { %v12142_v47 = vsel %vm8547_vm5, %v22668_v43, 0.0  ;;  %v22673_v40 = vadd.f32 %v12137_v26, %v22380_v46 }
0x16ec   :  { %12143 = vadd.xlane.f32.xlu0 %v12142_v47 }
0x16ed   :  { %v12145_v55 = vsel %vm9874_vm12, %v22673_v40, 0.0 }
0x16ee   :  { %12146 = vadd.xlane.f32.xlu1 %v12145_v55 }
0x16f2   :  { %v17459_v31 = vpop.f32.mrb[156].mxu0 }
0x16f3   :  { %v12420_v8 = vadd.f32 %v17459_v31, %v15911_v53  ;;  %v12414_v50 = vpop.f32.mrb[157].mxu0 }
0x16f4   :  { %v12415_v54 = vadd.f32 %v15911_v53, %v12414_v50 }
0x16f6   :  { %v18223_v57 = vpack.c.bf16 %v12420_v8, %v12415_v54  ;;  %v17462_v19 = vpop.f32.mrb[158].mxu0 }
0x16f7   :  { %v12430_v44 = vadd.f32 %v17462_v19, %v15911_v53  ;;  %v12424_v59 = vpop.f32.mrb[159].mxu0 }
0x16f8   :  { %v12425_v63 = vadd.f32 %v15911_v53, %v12424_v59  ;;  %18225 = vmatprep.subr.msk.bf16.mxu0 %vm22238_vm7, %v18223_v57  ;;  %v12190_v59 = vld [vmem:[%s23218_s29 + $0x8] sm:$0xff] }
0x16f9   :  { %18228 = vmatpush3.bf16.xpose.msk.msra.mxu0 %vm22238_vm7, %v18223_v57 }
0x16fa   :  { %v18229_v46 = vpack.c.bf16 %v12430_v44, %v12425_v63  ;;  %v17465_v33 = vpop.f32.mrb[160].mxu0  ;;  %v12189_v44 = vld [vmem:[%s23218_s29] sm:$0xff] }
0x16fb   :  { %v12440_v51 = vadd.f32 %v17465_v33, %v15911_v53  ;;  %v12434_v24 = vpop.f32.mrb[161].mxu0  ;;  %v18175_v63 = vpack.c.bf16 %v12190_v59, %v12189_v44  ;;  %v12193_v33 = vld [vmem:[%s23218_s29 + $0x20] sm:$0xff] }
0x16fc   :  { %v12435_v15 = vadd.f32 %v15911_v53, %v12434_v24  ;;  %18231 = vmatprep.subr.msk.bf16.mxu0 %vm22238_vm7, %v18229_v46 }
0x16fd   :  { %18176 = vmatprep.subr.bf16.mxu1 %v18175_v63 }
0x16fe   :  { %v18235_v32 = vpack.c.bf16 %v12440_v51, %v12435_v15  ;;  %v17468_v14 = vpop.f32.mrb[162].mxu0  ;;  %18178 = vmatpush3.bf16.msra.mxu1 %v18175_v63  ;;  %v12194_v51 = vld [vmem:[%s23218_s29 + $0x28] sm:$0xff]  ;;  %v12195_v15 = vld [vmem:[%s23218_s29 + $0x30] sm:$0xff] }
0x16ff   :  { %v12450_v58 = vadd.f32 %v17468_v14, %v15911_v53  ;;  %v12444_v3 = vpop.f32.mrb[163].mxu0  ;;  %v18183_v24 = vpack.c.bf16 %v12194_v51, %v12193_v33  ;;  %v16006_v63 = vld [vmem:[%s23219_s12 + $0x50] sm:$0xff]  ;;  %v16008_v51 = vld [vmem:[%s23219_s12 + $0x60] sm:$0xff] }
0x1700   :  { %v12445_v11 = vadd.f32 %v15911_v53, %v12444_v3  ;;  %v12494_v3 = vld [vmem:[%s23219_s12 + $0x8] sm:$0xff] }
0x1701   :  { %18234 = vmatpush3.bf16.xpose.msk.msra.mxu0 %vm22238_vm7, %v18229_v46 }
0x1702   :  { %v18241_v48 = vpack.c.bf16 %v12450_v58, %v12445_v11  ;;  %v17471_v22 = vpop.f32.mrb[164].mxu0  ;;  %18237 = vmatprep.subr.msk.bf16.mxu0 %vm22238_vm7, %v18235_v32  ;;  %v12493_v58 = vld [vmem:[%s23219_s12] sm:$0xff] }
0x1703   :  { %v12460_v23 = vadd.f32 %v17471_v22, %v15911_v53  ;;  %v12454_v29 = vpop.f32.mrb[165].mxu0  ;;  %v18207_v11 = vpack.c.bf16 %v12494_v3, %v12493_v58  ;;  %v22784_v3 = vld [vmem:[%s23221_s20] ss:$0 sm:$0xff] }
0x1704   :  { %v12455_v9 = vadd.f32 %v15911_v53, %v12454_v29 }
0x1706   :  { %v18247_v4 = vpack.c.bf16 %v12460_v23, %v12455_v9  ;;  %v17474_v37 = vpop.f32.mrb[166].mxu0 }
0x1707   :  { %v12470_v61 = vadd.f32 %v17474_v37, %v15911_v53  ;;  %v12464_v34 = vpop.f32.mrb[167].mxu0 }
0x1708   :  { %v12465_v12 = vadd.f32 %v15911_v53, %v12464_v34 }
0x1709   :  { %18240 = vmatpush3.bf16.xpose.msk.msra.mxu0 %vm22238_vm7, %v18235_v32  ;;  %v12196_v32 = vld [vmem:[%s23218_s29 + $0x38] sm:$0xff] }
0x170a   :  { %v18253_v1 = vpack.c.bf16 %v12470_v61, %v12465_v12  ;;  %v17477_v39 = vpop.f32.mrb[168].mxu0  ;;  %18243 = vmatprep.subr.msk.bf16.mxu0 %vm22238_vm7, %v18241_v48  ;;  %v18187_v14 = vpack.c.bf16 %v12196_v32, %v12195_v15  ;;  %v15906_v61 = vld [vmem:[#allocation7] ss:$0 sm:$0xff]  ;;  %v16010_v32 = vld [vmem:[%s23219_s12 + $0x70] sm:$0xff] }
0x170b   :  { %v12480_v35 = vadd.f32 %v17477_v39, %v15911_v53  ;;  %v12474_v17 = vpop.f32.mrb[169].mxu0 }
0x170c   :  { %v12475_v25 = vadd.f32 %v15911_v53, %v12474_v17  ;;  %v12495_v17 = vld [vmem:[%s23219_s12 + $0x10] sm:$0xff] }
0x170e   :  { %v18259_v56 = vpack.c.bf16 %v12480_v35, %v12475_v25  ;;  %v17480_v16 = vpop.f32.mrb[170].mxu0  ;;  %v12496_v25 = vld [vmem:[%s23219_s12 + $0x18] sm:$0xff] }
0x170f   :  { %v12490_v10 = vadd.f32 %v17480_v16, %v15911_v53  ;;  %v12484_v36 = vpop.f32.mrb[171].mxu0 }
0x1710   :  { %v12485_v41 = vadd.f32 %v15911_v53, %v12484_v36  ;;  %v18211_v36 = vpack.c.bf16 %v12496_v25, %v12495_v17 }
0x1711   :  { %18246 = vmatpush3.bf16.xpose.msk.msra.mxu0 %vm22238_vm7, %v18241_v48 }
0x1712   :  { %v18265_v60 = vpack.c.bf16 %v12490_v10, %v12485_v41  ;;  %18249 = vmatprep.subr.msk.bf16.mxu0 %vm22238_vm7, %v18247_v4  ;;  %v12497_v41 = vld [vmem:[%s23219_s12 + $0x20] sm:$0xff] }
0x1719   :  { %18252 = vmatpush3.bf16.xpose.msk.msra.mxu0 %vm22238_vm7, %v18247_v4 }
0x171a   :  { %18255 = vmatprep.subr.msk.bf16.mxu0 %vm22238_vm7, %v18253_v1 }
0x1721   :  { %18258 = vmatpush3.bf16.xpose.msk.msra.mxu0 %vm22238_vm7, %v18253_v1  ;;  %v15907_v1 = vld [vmem:[#allocation5] ss:$0 sm:$0xff] }
0x1722   :  { %18261 = vmatprep.subr.msk.bf16.mxu0 %vm22238_vm7, %v18259_v56 }
0x1729   :  { %18264 = vmatpush3.bf16.xpose.msk.msra.mxu0 %vm22238_vm7, %v18259_v56 }
0x172a   :  { %18267 = vmatprep.subr.msk.bf16.mxu0 %vm22238_vm7, %v18265_v60 }
0x1731   :  { %18270 = vmatpush3.bf16.xpose.msk.msra.mxu0 %vm22238_vm7, %v18265_v60  ;;  %v12498_v60 = vld [vmem:[%s23219_s12 + $0x28] sm:$0xff] }
0x1779   :  { %v12144_v26 = vpop.xlane.xlu0 %12143 }
0x177a   :  { %v12148_v47 = vmul.f32 0.015625, %v12144_v26  ;;  %v18215_v26 = vpack.c.bf16 %v12498_v60, %v12497_v41 }
0x177b   :  { %v12147_v55 = vpop.xlane.xlu1 %12146 }
0x177c   :  { %v12150_v53 = vsub.f32 %v22668_v43, %v12148_v47  ;;  %v12149_v31 = vmul.f32 0.015625, %v12147_v55  ;;  %v12191_v43 = vld [vmem:[%s23218_s29 + $0x10] sm:$0xff]  ;;  %v12500_v55 = vld [vmem:[%s23219_s12 + $0x38] sm:$0xff] }
0x177d   :  { %v12499_v47 = vld [vmem:[%s23219_s12 + $0x30] sm:$0xff] }
0x177e   :  { %v12151_v8 = vsub.f32 %v22673_v40, %v12149_v31  ;;  %v12152_v50 = vmul.f32 %v12150_v53, %v12150_v53  ;;  %v12192_v40 = vld [vmem:[%s23218_s29 + $0x18] sm:$0xff]  ;;  %v16004_v31 = vld [vmem:[%s23219_s12 + $0x40] sm:$0xff] }
0x177f   :  { %v18179_v46 = vpack.c.bf16 %v12192_v40, %v12191_v43  ;;  %v16007_v43 = vld [vmem:[%s23219_s12 + $0x58] sm:$0xff] }
0x1780   :  { %v12154_v54 = vsel %vm8547_vm5, %v12152_v50, 0.0  ;;  %v12153_v57 = vmul.f32 %v12151_v8, %v12151_v8  ;;  %v18347_v33 = vpack.c.bf16 %v16007_v43, %v16006_v63 }
0x1781   :  { %12155 = vadd.xlane.f32.xlu0 %v12154_v54  ;;  %18180 = vmatprep.subr.bf16.mxu1 %v18179_v46  ;;  %v15908_v54 = vld [vmem:[%s23220_s5] ss:$0 sm:$0xff] }
0x1782   :  { %v12157_v19 = vsel %vm9874_vm12, %v12153_v57, 0.0  ;;  %18182 = vmatpush3.bf16.msra.mxu1 %v18179_v46 }
0x1783   :  { %12158 = vadd.xlane.f32.xlu1 %v12157_v19  ;;  %18184 = vmatprep.subr.bf16.mxu1 %v18183_v24 }
0x1786   :  { %18186 = vmatpush3.bf16.msra.mxu1 %v18183_v24  ;;  %v16009_v24 = vld [vmem:[%s23219_s12 + $0x68] sm:$0xff] }
0x1787   :  { %18188 = vmatprep.subr.bf16.mxu1 %v18187_v14  ;;  %v18351_v15 = vpack.c.bf16 %v16009_v24, %v16008_v51 }
0x178a   :  { %18190 = vmatpush3.bf16.msra.mxu1 %v18187_v14  ;;  %v16011_v14 = vld [vmem:[%s23219_s12 + $0x78] sm:$0xff] }
0x178b   :  { %18208 = vmatprep.subr.bf16.mxu1 %v18207_v11  ;;  %v18355_v58 = vpack.c.bf16 %v16011_v14, %v16010_v32  ;;  %v22833_v32 = vld [vmem:[%s23222_s21 + $0x8] sm:$0x3]  ;;  %v22836_v14 = vld [vmem:[%s23222_s21] sm:$0xff] }
0x180e   :  { %v12156_v48 = vpop.xlane.xlu0 %12155 }
0x180f   :  { %v12160_v22 = vmul.f32 0.015625, %v12156_v48 }
0x1810   :  { %v12159_v23 = vpop.xlane.xlu1 %12158 }
0x1811   :  { %v12162_v29 = vadd.f32 1e-05, %v12160_v22  ;;  %v12161_v9 = vmul.f32 0.015625, %v12159_v23 }
0x1813   :  { %20126 = vrsqrt.f32 %v12162_v29  ;;  %v12163_v4 = vadd.f32 1e-05, %v12161_v9 }
0x1815   :  { %20128 = vrsqrt.f32 %v12163_v4 }
0x181d   :  { %v20127_v37 = vpop.eup %20126 }
0x181e   :  { %v12166_v34 = vmul.f32 %v20127_v37, %v12150_v53  ;;  %v18219_v53 = vpack.c.bf16 %v12500_v55, %v12499_v47 }
0x181f   :  { %v20129_v12 = vpop.eup %20128 }
0x1820   :  { %v12167_v39 = vmul.f32 %v20129_v12, %v12151_v8  ;;  %v12175_v35 = vmul.f32 %v15906_v61, %v12166_v34  ;;  %v16005_v8 = vld [vmem:[%s23219_s12 + $0x48] sm:$0xff] }
0x1821   :  { %v18343_v50 = vpack.c.bf16 %v16005_v8, %v16004_v31 }
0x1822   :  { %v12176_v56 = vmul.f32 %v15906_v61, %v12167_v39  ;;  %v22726_v16 = vadd.f32 %v15907_v1, %v12175_v35 }
0x1823   :  { %18344 = vmatprep.subr.bf16.mxu0 %v18343_v50 }
0x1824   :  { %v22728_v10 = vadd.f32 %v15907_v1, %v12176_v56  ;;  %17438 = vmatprep.mubr.msk.f32.mxu1 %vm8547_vm5, %v22726_v16 }
0x1826   :  { %17439 = vmatmul.mubr.msk.f32.vlgmr.msra.gmra.mrb[166].mxu1 %vm8547_vm5, %v22728_v10 }
0x1827   :  { %18210 = vmatpush3.bf16.msra.mxu1 %v18207_v11  ;;  %17497 = vmatprep.mubr.msk.f32.mxu1 %vm8547_vm5, %v21457_v21 }
0x1828   :  { %18212 = vmatprep.subr.bf16.mxu1 %v18211_v36 }
0x182b   :  { %18214 = vmatpush3.bf16.msra.mxu1 %v18211_v36 }
0x182c   :  { %18216 = vmatprep.subr.bf16.mxu1 %v18215_v26 }
0x182f   :  { %18218 = vmatpush3.bf16.msra.mxu1 %v18215_v26 }
0x1830   :  { %18220 = vmatprep.subr.bf16.mxu1 %v18219_v53 }
0x1833   :  { %18222 = vmatpush3.bf16.msra.mxu1 %v18219_v53 }
0x1836   :  { %17498 = vmatmul.mubr.msk.f32.vlgmr.msra.gmra.mrb[200].mxu1 %vm8547_vm5, %v21462_v28 }
0x1837   :  { %17500 = vmatprep.mubr.msk.f32.mxu1 %vm8547_vm5, %v21470_v49 }
0x183a   :  { %17501 = vmatmul.mubr.msk.f32.gmra.mrb[202].mxu1 %vm8547_vm5, %v21476_v0 }
0x183b   :  { %17503 = vmatprep.mubr.msk.f32.mxu1 %vm8547_vm5, %v21485_v13 }
0x183e   :  { %17504 = vmatmul.mubr.msk.f32.gmra.mrb[204].mxu1 %vm8547_vm5, %v21492_v20 }
0x183f   :  { %17506 = vmatprep.mubr.msk.f32.mxu1 %vm8547_vm5, %v21502_v38 }
0x1842   :  { %17507 = vmatmul.mubr.msk.f32.gmra.mrb[206].mxu1 %vm8547_vm5, %v21508_v62 }
0x1843   :  { %17509 = vmatprep.mubr.msk.f32.mxu1 %vm8547_vm5, %v21516_v6 }
0x1846   :  { %17510 = vmatmul.mubr.msk.f32.gmra.mrb[208].mxu1 %vm8547_vm5, %v21522_v52 }
0x1847   :  { %17512 = vmatprep.mubr.msk.f32.mxu1 %vm8547_vm5, %v21535_v2 }
0x184a   :  { %17513 = vmatmul.mubr.msk.f32.gmra.mrb[210].mxu1 %vm8547_vm5, %v21540_v42 }
0x184b   :  { %17515 = vmatprep.mubr.msk.f32.mxu1 %vm8547_vm5, %v21550_v5 }
0x184e   :  { %17516 = vmatmul.mubr.msk.f32.gmra.mrb[212].mxu1 %vm8547_vm5, %v21554_v27 }
0x184f   :  { %17518 = vmatprep.mubr.msk.f32.mxu1 %vm8547_vm5, %v21563_v45 }
0x1852   :  { %17519 = vmatmul.mubr.msk.f32.gmra.mrb[214].mxu1 %vm8547_vm5, %v21568_v30 }
0x18f9   :  { %v17440_v57 = vpop.f32.mrb[166].mxu1 }
0x18fa   :  { %v12282_v19 = vadd.f32 %v17440_v57, %v15908_v54  ;;  %v12276_v44 = vpop.f32.mrb[167].mxu1 }
0x18fb   :  { %v12277_v59 = vadd.f32 %v15908_v54, %v12276_v44 }
0x18fc   :  { %v12654_v46 = vmul.f32 0.17677669, %v12282_v19 }
0x18fd   :  { %v12653_v40 = vmul.f32 0.17677669, %v12277_v59 }
0x18ff   :  { %17553 = vmatprep.mubr.msk.f32.mxu0 %vm1681_vm0, %v12653_v40 }
0x1900   :  { %17554 = vmatmul.mubr.msk.f32.vlgmr.msra.gmra.mrb[172].mxu0 %vm1681_vm0, %v12654_v46 }
0x1901   :  { %18346 = vmatpush3.bf16.msra.mxu0 %v18343_v50  ;;  %17677 = vmatprep.mubr.msk.f32.mxu0 %vm8547_vm5, %v21457_v21 }
0x1902   :  { %18348 = vmatprep.subr.bf16.mxu0 %v18347_v33 }
0x1905   :  { %18350 = vmatpush3.bf16.msra.mxu0 %v18347_v33 }
0x1906   :  { %18352 = vmatprep.subr.bf16.mxu0 %v18351_v15 }
0x1909   :  { %v17499_v11 = vpop.f32.mrb[200].mxu1  ;;  %18354 = vmatpush3.bf16.msra.mxu0 %v18351_v15 }
0x190a   :  { %v12580_v48 = vadd.f32 %v17499_v11, %v22784_v3  ;;  %v12574_v22 = vpop.f32.mrb[201].mxu1  ;;  %18356 = vmatprep.subr.bf16.mxu0 %v18355_v58 }
0x190b   :  { %v12575_v23 = vadd.f32 %v22784_v3, %v12574_v22 }
0x190d   :  { %v18271_v29 = vpack.c.bf16 %v12580_v48, %v12575_v23  ;;  %v17502_v9 = vpop.f32.mrb[202].mxu1  ;;  %18358 = vmatpush3.bf16.msra.mxu0 %v18355_v58  ;;  %v16013_v23 = vld [vmem:[%s23221_s20 + $0x1] ss:$0 sm:$0xff] }
0x190e   :  { %v12590_v4 = vadd.f32 %v17502_v9, %v22784_v3  ;;  %v12584_v37 = vpop.f32.mrb[203].mxu1 }
0x190f   :  { %v12585_v61 = vadd.f32 %v22784_v3, %v12584_v37  ;;  %18272 = vmatprep.subr.bf16.mxu1 %v18271_v29 }
0x1910   :  { %18274 = vmatpush3.bf16.msra.mxu1 %v18271_v29  ;;  %17678 = vmatmul.mubr.msk.f32.vlgmr.msra.gmra.mrb[174].mxu0 %vm8547_vm5, %v21462_v28 }
0x1911   :  { %v18275_v34 = vpack.c.bf16 %v12590_v4, %v12585_v61  ;;  %v17505_v12 = vpop.f32.mrb[204].mxu1  ;;  %17680 = vmatprep.mubr.msk.f32.mxu0 %vm8547_vm5, %v21470_v49 }
0x1912   :  { %v12600_v1 = vadd.f32 %v17505_v12, %v22784_v3  ;;  %v12594_v39 = vpop.f32.mrb[205].mxu1 }
0x1913   :  { %v12595_v35 = vadd.f32 %v22784_v3, %v12594_v39  ;;  %18276 = vmatprep.subr.bf16.mxu1 %v18275_v34 }
0x1914   :  { %18278 = vmatpush3.bf16.msra.mxu1 %v18275_v34  ;;  %17681 = vmatmul.mubr.msk.f32.gmra.mrb[176].mxu0 %vm8547_vm5, %v21476_v0 }
0x1915   :  { %v18279_v17 = vpack.c.bf16 %v12600_v1, %v12595_v35  ;;  %v17508_v25 = vpop.f32.mrb[206].mxu1  ;;  %17683 = vmatprep.mubr.msk.f32.mxu0 %vm8547_vm5, %v21485_v13 }
0x1916   :  { %v12610_v56 = vadd.f32 %v17508_v25, %v22784_v3  ;;  %v12604_v36 = vpop.f32.mrb[207].mxu1 }
0x1917   :  { %v12605_v41 = vadd.f32 %v22784_v3, %v12604_v36  ;;  %18280 = vmatprep.subr.bf16.mxu1 %v18279_v17 }
0x1918   :  { %18282 = vmatpush3.bf16.msra.mxu1 %v18279_v17  ;;  %17684 = vmatmul.mubr.msk.f32.gmra.mrb[178].mxu0 %vm8547_vm5, %v21492_v20 }
0x1919   :  { %v18283_v60 = vpack.c.bf16 %v12610_v56, %v12605_v41  ;;  %v17511_v26 = vpop.f32.mrb[208].mxu1  ;;  %17686 = vmatprep.mubr.msk.f32.mxu0 %vm8547_vm5, %v21502_v38 }
0x191a   :  { %v12620_v47 = vadd.f32 %v17511_v26, %v22784_v3  ;;  %v12614_v55 = vpop.f32.mrb[209].mxu1 }
0x191b   :  { %v12615_v53 = vadd.f32 %v22784_v3, %v12614_v55  ;;  %18284 = vmatprep.subr.bf16.mxu1 %v18283_v60 }
0x191c   :  { %18286 = vmatpush3.bf16.msra.mxu1 %v18283_v60  ;;  %17687 = vmatmul.mubr.msk.f32.gmra.mrb[180].mxu0 %vm8547_vm5, %v21508_v62 }
0x191d   :  { %v18287_v31 = vpack.c.bf16 %v12620_v47, %v12615_v53  ;;  %v17514_v8 = vpop.f32.mrb[210].mxu1  ;;  %17689 = vmatprep.mubr.msk.f32.mxu0 %vm8547_vm5, %v21516_v6 }
0x191e   :  { %v12630_v50 = vadd.f32 %v17514_v8, %v22784_v3  ;;  %v12624_v54 = vpop.f32.mrb[211].mxu1 }
0x191f   :  { %v12625_v57 = vadd.f32 %v22784_v3, %v12624_v54  ;;  %18288 = vmatprep.subr.bf16.mxu1 %v18287_v31 }
0x1920   :  { %18290 = vmatpush3.bf16.msra.mxu1 %v18287_v31  ;;  %17690 = vmatmul.mubr.msk.f32.gmra.mrb[182].mxu0 %vm8547_vm5, %v21522_v52 }
0x1921   :  { %v18291_v19 = vpack.c.bf16 %v12630_v50, %v12625_v57  ;;  %v17517_v44 = vpop.f32.mrb[212].mxu1  ;;  %17692 = vmatprep.mubr.msk.f32.mxu0 %vm8547_vm5, %v21535_v2 }
0x1922   :  { %v12640_v59 = vadd.f32 %v17517_v44, %v22784_v3  ;;  %v12634_v63 = vpop.f32.mrb[213].mxu1 }
0x1923   :  { %v12635_v43 = vadd.f32 %v22784_v3, %v12634_v63  ;;  %18292 = vmatprep.subr.bf16.mxu1 %v18291_v19 }
0x1924   :  { %18294 = vmatpush3.bf16.msra.mxu1 %v18291_v19  ;;  %17693 = vmatmul.mubr.msk.f32.gmra.mrb[184].mxu0 %vm8547_vm5, %v21540_v42 }
0x1925   :  { %v18295_v40 = vpack.c.bf16 %v12640_v59, %v12635_v43  ;;  %v17520_v46 = vpop.f32.mrb[214].mxu1  ;;  %17695 = vmatprep.mubr.msk.f32.mxu0 %vm8547_vm5, %v21550_v5 }
0x1926   :  { %v12650_v33 = vadd.f32 %v17520_v46, %v22784_v3  ;;  %v12644_v51 = vpop.f32.mrb[215].mxu1 }
0x1927   :  { %v12645_v24 = vadd.f32 %v22784_v3, %v12644_v51  ;;  %18296 = vmatprep.subr.bf16.mxu1 %v18295_v40 }
0x1928   :  { %18298 = vmatpush3.bf16.msra.mxu1 %v18295_v40  ;;  %17696 = vmatmul.mubr.msk.f32.gmra.mrb[186].mxu0 %vm8547_vm5, %v21554_v27 }
0x1929   :  { %v18299_v15 = vpack.c.bf16 %v12650_v33, %v12645_v24  ;;  %17698 = vmatprep.mubr.msk.f32.mxu0 %vm8547_vm5, %v21563_v45 }
0x192b   :  { %18300 = vmatprep.subr.bf16.mxu1 %v18299_v15 }
0x192c   :  { %18302 = vmatpush3.bf16.msra.mxu1 %v18299_v15  ;;  %17699 = vmatmul.mubr.msk.f32.gmra.mrb[188].mxu0 %vm8547_vm5, %v21568_v30 }
0x19d3   :  { %v17555_v58 = vpop.f32.mrb[172].mxu0 }
0x19d4   :  { %v22839_v3 = vadd.f32 %v17555_v58, %v22833_v32  ;;  %v12775_v11 = vpop.f32.mrb[173].mxu0 }
0x19d5   :  { %v22842_v48 = vadd.f32 %v12775_v11, %v22836_v14 }
0x19d6   :  { %v12786_v22 = vsel %vm9138_vm6, %v22839_v3, -inf }
0x19d7   :  { %12787 = vmax.xlane.f32.xlu1 %v12786_v22  ;;  %12784 = vmax.xlane.f32.xlu0 %v22842_v48 }
0x19e3   :  { %v17679_v29 = vpop.f32.mrb[174].mxu0 }
0x19e4   :  { %v13315_v9 = vadd.f32 %v17679_v29, %v16013_v23  ;;  %v13309_v4 = vpop.f32.mrb[175].mxu0 }
0x19e5   :  { %v13310_v37 = vadd.f32 %v16013_v23, %v13309_v4 }
0x19e7   :  { %v18407_v61 = vpack.c.bf16 %v13315_v9, %v13310_v37  ;;  %v17682_v34 = vpop.f32.mrb[176].mxu0 }
0x19e8   :  { %v13325_v12 = vadd.f32 %v17682_v34, %v16013_v23  ;;  %v13319_v1 = vpop.f32.mrb[177].mxu0 }
0x19e9   :  { %v13320_v39 = vadd.f32 %v16013_v23, %v13319_v1  ;;  %18408 = vmatprep.subr.bf16.mxu0 %v18407_v61 }
0x19ea   :  { %18410 = vmatpush3.bf16.msra.mxu0 %v18407_v61 }
0x19eb   :  { %v18411_v35 = vpack.c.bf16 %v13325_v12, %v13320_v39  ;;  %v17685_v17 = vpop.f32.mrb[178].mxu0 }
0x19ec   :  { %v13335_v25 = vadd.f32 %v17685_v17, %v16013_v23  ;;  %v13329_v56 = vpop.f32.mrb[179].mxu0  ;;  %v12880_v17 = vld [vmem:[%s23223_s18 + $0x8] sm:$0xff] }
0x19ed   :  { %v13330_v36 = vadd.f32 %v16013_v23, %v13329_v56  ;;  %18412 = vmatprep.subr.bf16.mxu0 %v18411_v35 }
0x19ee   :  { %18414 = vmatpush3.bf16.msra.mxu0 %v18411_v35  ;;  %v12879_v35 = vld [vmem:[%s23223_s18] sm:$0xff] }
0x19ef   :  { %v18415_v41 = vpack.c.bf16 %v13335_v25, %v13330_v36  ;;  %v17688_v60 = vpop.f32.mrb[180].mxu0  ;;  %v18303_v25 = vpack.c.bf16 %v12880_v17, %v12879_v35  ;;  %v12882_v36 = vld [vmem:[%s23223_s18 + $0x18] sm:$0xff] }
0x19f0   :  { %v13345_v26 = vadd.f32 %v17688_v60, %v16013_v23  ;;  %v13339_v47 = vpop.f32.mrb[181].mxu0 }
0x19f1   :  { %v13340_v55 = vadd.f32 %v16013_v23, %v13339_v47  ;;  %18416 = vmatprep.subr.bf16.mxu0 %v18415_v41  ;;  %18304 = vmatprep.subr.bf16.mxu1 %v18303_v25 }
0x19f2   :  { %18418 = vmatpush3.bf16.msra.mxu0 %v18415_v41 }
0x19f3   :  { %v18419_v53 = vpack.c.bf16 %v13345_v26, %v13340_v55  ;;  %v17691_v31 = vpop.f32.mrb[182].mxu0 }
0x19f4   :  { %v13355_v8 = vadd.f32 %v17691_v31, %v16013_v23  ;;  %v13349_v50 = vpop.f32.mrb[183].mxu0  ;;  %v15967_v31 = vld [vmem:[%s23218_s29 + $0x48] sm:$0xff] }
0x19f5   :  { %v13350_v54 = vadd.f32 %v16013_v23, %v13349_v50  ;;  %18420 = vmatprep.subr.bf16.mxu0 %v18419_v53  ;;  %v15968_v50 = vld [vmem:[%s23218_s29 + $0x50] sm:$0xff] }
0x19f6   :  { %18422 = vmatpush3.bf16.msra.mxu0 %v18419_v53  ;;  %v15966_v53 = vld [vmem:[%s23218_s29 + $0x40] sm:$0xff] }
0x19f7   :  { %v18423_v57 = vpack.c.bf16 %v13355_v8, %v13350_v54  ;;  %v17694_v19 = vpop.f32.mrb[184].mxu0  ;;  %v18311_v8 = vpack.c.bf16 %v15967_v31, %v15966_v53  ;;  %v15969_v54 = vld [vmem:[%s23218_s29 + $0x58] sm:$0xff] }
0x19f8   :  { %v13365_v44 = vadd.f32 %v17694_v19, %v16013_v23  ;;  %v13359_v59 = vpop.f32.mrb[185].mxu0 }
0x19f9   :  { %v13360_v63 = vadd.f32 %v16013_v23, %v13359_v59  ;;  %18424 = vmatprep.subr.bf16.mxu0 %v18423_v57  ;;  %v15970_v59 = vld [vmem:[%s23218_s29 + $0x60] sm:$0xff] }
0x19fa   :  { %18426 = vmatpush3.bf16.msra.mxu0 %v18423_v57 }
0x19fb   :  { %v18427_v43 = vpack.c.bf16 %v13365_v44, %v13360_v63  ;;  %v17697_v40 = vpop.f32.mrb[186].mxu0  ;;  %v18315_v44 = vpack.c.bf16 %v15969_v54, %v15968_v50  ;;  %v15971_v63 = vld [vmem:[%s23218_s29 + $0x68] sm:$0xff] }
0x19fc   :  { %v13375_v46 = vadd.f32 %v17697_v40, %v16013_v23  ;;  %v13369_v33 = vpop.f32.mrb[187].mxu0  ;;  %v15972_v40 = vld [vmem:[%s23218_s29 + $0x70] sm:$0xff] }
0x19fd   :  { %v13370_v51 = vadd.f32 %v16013_v23, %v13369_v33  ;;  %18428 = vmatprep.subr.bf16.mxu0 %v18427_v43 }
0x19fe   :  { %18430 = vmatpush3.bf16.msra.mxu0 %v18427_v43  ;;  %v18319_v43 = vpack.c.bf16 %v15971_v63, %v15970_v59 }
0x19ff   :  { %v18431_v24 = vpack.c.bf16 %v13375_v46, %v13370_v51  ;;  %v17700_v15 = vpop.f32.mrb[188].mxu0  ;;  %v15973_v46 = vld [vmem:[%s23218_s29 + $0x78] sm:$0xff]  ;;  %v15978_v51 = vld [vmem:[%s23216_s0 + $0x40] sm:$0xff] }
0x1a00   :  { %v13385_v58 = vadd.f32 %v17700_v15, %v16013_v23  ;;  %v13379_v11 = vpop.f32.mrb[189].mxu0  ;;  %v18323_v33 = vpack.c.bf16 %v15973_v46, %v15972_v40 }
0x1a01   :  { %v13380_v22 = vadd.f32 %v16013_v23, %v13379_v11  ;;  %18432 = vmatprep.subr.bf16.mxu0 %v18431_v24  ;;  %v15981_v11 = vld [vmem:[%s23216_s0 + $0x58] sm:$0xff] }
0x1a02   :  { %18434 = vmatpush3.bf16.msra.mxu0 %v18431_v24  ;;  %v15979_v24 = vld [vmem:[%s23216_s0 + $0x48] sm:$0xff] }
0x1a03   :  { %v18435_v29 = vpack.c.bf16 %v13385_v58, %v13380_v22  ;;  %v18327_v15 = vpack.c.bf16 %v15979_v24, %v15978_v51  ;;  %v15980_v58 = vld [vmem:[%s23216_s0 + $0x50] sm:$0xff] }
0x1a04   :  { %v18331_v22 = vpack.c.bf16 %v15981_v11, %v15980_v58 }
0x1a05   :  { %18436 = vmatprep.subr.bf16.mxu0 %v18435_v29 }
0x1a06   :  { %18438 = vmatpush3.bf16.msra.mxu0 %v18435_v29  ;;  %v15982_v29 = vld [vmem:[%s23216_s0 + $0x60] sm:$0xff] }
0x1a64   :  { %v12788_v9 = vpop.xlane.xlu1 %12787  ;;  %v12785_v4 = vpop.xlane.xlu0 %12784 }
0x1a65   :  { %v12790_v37 = vsub.f32 %v22839_v3, %v12788_v9  ;;  %v12789_v61 = vsub.f32 %v22842_v48, %v12785_v4  ;;  %v12881_v48 = vld [vmem:[%s23223_s18 + $0x10] sm:$0xff]  ;;  %v15983_v9 = vld [vmem:[%s23216_s0 + $0x68] sm:$0xff] }
0x1a66   :  { %v18307_v55 = vpack.c.bf16 %v12882_v36, %v12881_v48  ;;  %v18335_v4 = vpack.c.bf16 %v15983_v9, %v15982_v29 }
0x1a67   :  { %v12793_v34 = vmul.f32 1.442695, %v12790_v37  ;;  %v12791_v12 = vmul.f32 1.442695, %v12789_v61  ;;  %v15984_v37 = vld [vmem:[%s23216_s0 + $0x70] sm:$0xff]  ;;  %v15985_v61 = vld [vmem:[%s23216_s0 + $0x78] sm:$0xff] }
0x1a69   :  { %20130 = vpow2.f32 %v12793_v34  ;;  %v18339_v34 = vpack.c.bf16 %v15985_v61, %v15984_v37 }
0x1a6a   :  { %20132 = vpow2.f32 %v12791_v12 }
0x1a73   :  { %v20131_v23 = vpop.eup %20130 }
0x1a74   :  { %v20133_v1 = vpop.eup %20132  ;;  %v12797_v39 = vsel %vm9138_vm6, %v20131_v23, 0.0 }
0x1a75   :  { %12795 = vadd.xlane.f32.xlu0 %v20133_v1  ;;  %12798 = vadd.xlane.f32.xlu1 %v12797_v39 }
0x1b02   :  { %v12796_v56 = vpop.xlane.xlu0 %12795  ;;  %v12799_v3 = vpop.xlane.xlu1 %12798 }
0x1b03   :  { %20134 = vrcp.f32 %v12796_v56 }
0x1b04   :  { %20136 = vrcp.f32 %v12799_v3 }
0x1b0d   :  { %v20135_v41 = vpop.eup %20134 }
0x1b0e   :  { %v20137_v60 = vpop.eup %20136  ;;  %v12801_v26 = vmul.f32 %v20135_v41, %v20133_v1 }
0x1b0f   :  { %v12803_v47 = vmul.f32 %v20137_v60, %v20131_v23 }
0x1b10   :  { %17588 = vmatprep.mubr.f32.mxu1 %v12801_v26 }
0x1b11   :  { %17589 = vmatmul.mubr.f32.vlgmr.msra.gmra.mrb[216].mxu1 %v12803_v47 }
0x1b12   :  { %18306 = vmatpush3.bf16.msra.mxu1 %v18303_v25 }
0x1b13   :  { %18308 = vmatprep.subr.bf16.mxu1 %v18307_v55 }
0x1b16   :  { %18310 = vmatpush3.bf16.msra.mxu1 %v18307_v55 }
0x1b17   :  { %18312 = vmatprep.subr.bf16.mxu1 %v18311_v8 }
0x1be4   :  { %v17590_v57 = vpop.f32.mrb[216].mxu1 }
0x1be5   :  { %v12870_v19 = vpop.f32.mrb[217].mxu1 }
0x1be6   :  { %17599 = vmatprep.mubr.msk.f32.mxu1 %vm1681_vm0, %v12870_v19 }
0x1be7   :  { %17600 = vmatmul.mubr.msk.f32.vlgmr.msra.gmra.mrb[218].mxu1 %vm1681_vm0, %v17590_v57 }
0x1be8   :  { %18314 = vmatpush3.bf16.msra.mxu1 %v18311_v8  ;;  %17618 = vmatprep.mubr.msk.f32.mxu1 %vm8547_vm5, %v22726_v16 }
0x1be9   :  { %18316 = vmatprep.subr.bf16.mxu1 %v18315_v44 }
0x1bec   :  { %18318 = vmatpush3.bf16.msra.mxu1 %v18315_v44 }
0x1bed   :  { %18320 = vmatprep.subr.bf16.mxu1 %v18319_v43 }
0x1bf0   :  { %18322 = vmatpush3.bf16.msra.mxu1 %v18319_v43 }
0x1bf1   :  { %18324 = vmatprep.subr.bf16.mxu1 %v18323_v33 }
0x1bf4   :  { %18326 = vmatpush3.bf16.msra.mxu1 %v18323_v33 }
0x1bf5   :  { %18328 = vmatprep.subr.bf16.mxu1 %v18327_v15 }
0x1bf7   :  { %17619 = vmatmul.mubr.msk.f32.vlgmr.msra.gmra.mrb[220].mxu1 %vm8547_vm5, %v22728_v10 }
0x1bf8   :  { %18330 = vmatpush3.bf16.msra.mxu1 %v18327_v15  ;;  %17637 = vmatprep.mubr.msk.f32.mxu1 %vm8547_vm5, %v21457_v21  ;;  %v15975_v21 = vld [vmem:[%s23220_s5 + $0x1] ss:$0 sm:$0xff] }
0x1bf9   :  { %18332 = vmatprep.subr.bf16.mxu1 %v18331_v22 }
0x1bfc   :  { %18334 = vmatpush3.bf16.msra.mxu1 %v18331_v22 }
0x1bfd   :  { %18336 = vmatprep.subr.bf16.mxu1 %v18335_v4 }
0x1c00   :  { %18338 = vmatpush3.bf16.msra.mxu1 %v18335_v4 }
0x1c01   :  { %18340 = vmatprep.subr.bf16.mxu1 %v18339_v34 }
0x1c04   :  { %18342 = vmatpush3.bf16.msra.mxu1 %v18339_v34 }
0x1c07   :  { %17638 = vmatmul.mubr.msk.f32.vlgmr.msra.gmra.mrb[222].mxu1 %vm8547_vm5, %v21462_v28 }
0x1c08   :  { %17640 = vmatprep.mubr.msk.f32.mxu1 %vm8547_vm5, %v21470_v49 }
0x1c0b   :  { %17641 = vmatmul.mubr.msk.f32.gmra.mrb[224].mxu1 %vm8547_vm5, %v21476_v0 }
0x1c0c   :  { %17643 = vmatprep.mubr.msk.f32.mxu1 %vm8547_vm5, %v21485_v13 }
0x1c0f   :  { %17644 = vmatmul.mubr.msk.f32.gmra.mrb[226].mxu1 %vm8547_vm5, %v21492_v20 }
0x1c10   :  { %17646 = vmatprep.mubr.msk.f32.mxu1 %vm8547_vm5, %v21502_v38  ;;  %v15987_v38 = vld [vmem:[%s23217_s27 + $0x1] ss:$0 sm:$0xff] }
0x1c13   :  { %17647 = vmatmul.mubr.msk.f32.gmra.mrb[228].mxu1 %vm8547_vm5, %v21508_v62 }
0x1c14   :  { %17649 = vmatprep.mubr.msk.f32.mxu1 %vm8547_vm5, %v21516_v6 }
0x1c17   :  { %17650 = vmatmul.mubr.msk.f32.gmra.mrb[230].mxu1 %vm8547_vm5, %v21522_v52 }
0x1c18   :  { %17652 = vmatprep.mubr.msk.f32.mxu1 %vm8547_vm5, %v21535_v2 }
0x1c1b   :  { %17653 = vmatmul.mubr.msk.f32.gmra.mrb[232].mxu1 %vm8547_vm5, %v21540_v42 }
0x1c1c   :  { %17655 = vmatprep.mubr.msk.f32.mxu1 %vm8547_vm5, %v21550_v5 }
0x1c1f   :  { %17656 = vmatmul.mubr.msk.f32.gmra.mrb[234].mxu1 %vm8547_vm5, %v21554_v27 }
0x1c20   :  { %17658 = vmatprep.mubr.msk.f32.mxu1 %vm8547_vm5, %v21563_v45 }
0x1c23   :  { %17659 = vmatmul.mubr.msk.f32.gmra.mrb[236].mxu1 %vm8547_vm5, %v21568_v30 }
0x1cca   :  { %v17620_v28 = vpop.f32.mrb[220].mxu1 }
0x1ccb   :  { %v13061_v49 = vadd.f32 %v17620_v28, %v15975_v21  ;;  %v13055_v0 = vpop.f32.mrb[221].mxu1  ;;  %v16048_v28 = vld [vmem:[%s23223_s18 + $0x20] sm:$0xff] }
0x1ccc   :  { %v13056_v13 = vadd.f32 %v15975_v21, %v13055_v0  ;;  %v16050_v0 = vld [vmem:[%s23223_s18 + $0x30] sm:$0xff] }
0x1ccd   :  { %v13389_v24 = vmul.f32 0.17677669, %v13061_v49  ;;  %v16049_v49 = vld [vmem:[%s23223_s18 + $0x28] sm:$0xff] }
0x1cce   :  { %v13388_v20 = vmul.f32 0.17677669, %v13056_v13  ;;  %v18439_v13 = vpack.c.bf16 %v16049_v49, %v16048_v28  ;;  %v13832_v49 = vld [vmem:[%s23225_s23 + $0x30] sm:$0xff] }
0x1cd0   :  { %17733 = vmatprep.mubr.msk.f32.mxu1 %vm1681_vm0, %v13388_v20  ;;  %v16051_v20 = vld [vmem:[%s23223_s18 + $0x38] sm:$0xff] }
0x1cda   :  { %v17639_v62 = vpop.f32.mrb[222].mxu1 }
0x1cdb   :  { %v13153_v6 = vadd.f32 %v17639_v62, %v15987_v38  ;;  %v13147_v52 = vpop.f32.mrb[223].mxu1 }
0x1cdc   :  { %v13148_v2 = vadd.f32 %v15987_v38, %v13147_v52 }
0x1cde   :  { %v18359_v42 = vpack.c.bf16 %v13153_v6, %v13148_v2  ;;  %v17642_v5 = vpop.f32.mrb[224].mxu1 }
0x1cdf   :  { %v13163_v27 = vadd.f32 %v17642_v5, %v15987_v38  ;;  %v13157_v45 = vpop.f32.mrb[225].mxu1 }
0x1ce0   :  { %v13158_v12 = vadd.f32 %v15987_v38, %v13157_v45  ;;  %18361 = vmatprep.subr.msk.bf16.mxu1 %vm22238_vm7, %v18359_v42 }
0x1ce1   :  { %18364 = vmatpush3.bf16.xpose.msk.msra.mxu1 %vm22238_vm7, %v18359_v42 }
0x1ce2   :  { %v18365_v30 = vpack.c.bf16 %v13163_v27, %v13158_v12  ;;  %v17645_v23 = vpop.f32.mrb[226].mxu1  ;;  %v15965_v12 = vld [vmem:[%s23224_s22] ss:$0 sm:$0xff] }
0x1ce3   :  { %v13173_v1 = vadd.f32 %v17645_v23, %v15987_v38  ;;  %v13167_v39 = vpop.f32.mrb[227].mxu1 }
0x1ce4   :  { %v13168_v35 = vadd.f32 %v15987_v38, %v13167_v39  ;;  %18367 = vmatprep.subr.msk.bf16.mxu1 %vm22238_vm7, %v18365_v30 }
0x1ce6   :  { %v18371_v17 = vpack.c.bf16 %v13173_v1, %v13168_v35  ;;  %v17648_v25 = vpop.f32.mrb[228].mxu1 }
0x1ce7   :  { %v13183_v56 = vadd.f32 %v17648_v25, %v15987_v38  ;;  %v13177_v3 = vpop.f32.mrb[229].mxu1 }
0x1ce8   :  { %v13178_v48 = vadd.f32 %v15987_v38, %v13177_v3 }
0x1ce9   :  { %18370 = vmatpush3.bf16.xpose.msk.msra.mxu1 %vm22238_vm7, %v18365_v30 }
0x1cea   :  { %v18377_v36 = vpack.c.bf16 %v13183_v56, %v13178_v48  ;;  %v17651_v41 = vpop.f32.mrb[230].mxu1  ;;  %18373 = vmatprep.subr.msk.bf16.mxu1 %vm22238_vm7, %v18371_v17 }
0x1ceb   :  { %v13193_v60 = vadd.f32 %v17651_v41, %v15987_v38  ;;  %v13187_v26 = vpop.f32.mrb[231].mxu1 }
0x1cec   :  { %v13188_v47 = vadd.f32 %v15987_v38, %v13187_v26 }
0x1cee   :  { %v18383_v55 = vpack.c.bf16 %v13193_v60, %v13188_v47  ;;  %v17654_v53 = vpop.f32.mrb[232].mxu1 }
0x1cef   :  { %v13203_v31 = vadd.f32 %v17654_v53, %v15987_v38  ;;  %v13197_v8 = vpop.f32.mrb[233].mxu1 }
0x1cf0   :  { %v13198_v50 = vadd.f32 %v15987_v38, %v13197_v8 }
0x1cf1   :  { %18376 = vmatpush3.bf16.xpose.msk.msra.mxu1 %vm22238_vm7, %v18371_v17 }
0x1cf2   :  { %v18389_v54 = vpack.c.bf16 %v13203_v31, %v13198_v50  ;;  %v17657_v57 = vpop.f32.mrb[234].mxu1  ;;  %18379 = vmatprep.subr.msk.bf16.mxu1 %vm22238_vm7, %v18377_v36  ;;  %v20548_v31 = vmov 0.0  }
0x1cf3   :  { %v13213_v19 = vadd.f32 %v17657_v57, %v15987_v38  ;;  %v13207_v44 = vpop.f32.mrb[235].mxu1 }
0x1cf4   :  { %v13208_v59 = vadd.f32 %v15987_v38, %v13207_v44 }
0x1cf6   :  { %v18395_v63 = vpack.c.bf16 %v13213_v19, %v13208_v59  ;;  %v17660_v43 = vpop.f32.mrb[236].mxu1 }
0x1cf7   :  { %v13223_v40 = vadd.f32 %v17660_v43, %v15987_v38  ;;  %v13217_v46 = vpop.f32.mrb[237].mxu1 }
0x1cf8   :  { %v13218_v33 = vadd.f32 %v15987_v38, %v13217_v46  ;;  %v18443_v38 = vpack.c.bf16 %v16051_v20, %v16050_v0  ;;  %v13833_v0 = vld [vmem:[%s23225_s23 + $0x38] sm:$0xff]  ;;  %v16096_v20 = vld [vmem:[%s23226_s6 + $0x8] sm:$0x3] }
0x1cf9   :  { %18382 = vmatpush3.bf16.xpose.msk.msra.mxu1 %vm22238_vm7, %v18377_v36 }
0x1cfa   :  { %v18401_v51 = vpack.c.bf16 %v13223_v40, %v13218_v33  ;;  %18385 = vmatprep.subr.msk.bf16.mxu1 %vm22238_vm7, %v18383_v55  ;;  %v16055_v33 = vld [vmem:[#allocation19] ss:$0 sm:$0xff] }
0x1d01   :  { %18388 = vmatpush3.bf16.xpose.msk.msra.mxu1 %vm22238_vm7, %v18383_v55 }
0x1d02   :  { %18391 = vmatprep.subr.msk.bf16.mxu1 %vm22238_vm7, %v18389_v54 }
0x1d09   :  { %18394 = vmatpush3.bf16.xpose.msk.msra.mxu1 %vm22238_vm7, %v18389_v54 }
0x1d0a   :  { %18397 = vmatprep.subr.msk.bf16.mxu1 %vm22238_vm7, %v18395_v63 }
0x1d11   :  { %18400 = vmatpush3.bf16.xpose.msk.msra.mxu1 %vm22238_vm7, %v18395_v63  ;;  %v16054_v63 = vld [vmem:[#allocation20] ss:$0 sm:$0xff] }
0x1d12   :  { %18403 = vmatprep.subr.msk.bf16.mxu1 %vm22238_vm7, %v18401_v51 }
0x1d19   :  { %18406 = vmatpush3.bf16.xpose.msk.msra.mxu1 %vm22238_vm7, %v18401_v51 }
0x1d1a   :  { %18440 = vmatprep.subr.bf16.mxu1 %v18439_v13 }
0x1d20   :  { %17734 = vmatmul.mubr.msk.f32.vlgmr.msra.gmra.mrb[238].mxu1 %vm1681_vm0, %v13389_v24 }
0x1d21   :  { %18442 = vmatpush3.bf16.msra.mxu1 %v18439_v13  ;;  %v18461_v13 = vpack.c.bf16 %v13833_v0, %v13832_v49  ;;  %v16089_v0 = vld [vmem:[%s23225_s23 + $0xd0] sm:$0xff] }
0x1d22   :  { %18444 = vmatprep.subr.bf16.mxu1 %v18443_v38 }
0x1d25   :  { %18446 = vmatpush3.bf16.msra.mxu1 %v18443_v38  ;;  %v16063_v38 = vld [vmem:[%s23225_s23 + $0x40] sm:$0xff] }
0x1df3   :  { %v17735_v15 = vpop.f32.mrb[238].mxu1 }
0x1df4   :  { %v13516_v58 = vadd.f32 %v17735_v15, %v22833_v32  ;;  %v13510_v11 = vpop.f32.mrb[239].mxu1 }
0x1df5   :  { %v13511_v22 = vadd.f32 %v13510_v11, %v22836_v14 }
0x1df6   :  { %v13521_v29 = vsel %vm9138_vm6, %v13516_v58, -inf }
0x1df7   :  { %13522 = vmax.xlane.f32.xlu1 %v13521_v29  ;;  %13519 = vmax.xlane.f32.xlu0 %v13511_v22  ;;  %v13827_v29 = vld [vmem:[%s23225_s23 + $0x8] sm:$0xff] }
0x1e84   :  { %v13523_v9 = vpop.xlane.xlu1 %13522  ;;  %v13520_v4 = vpop.xlane.xlu0 %13519 }
0x1e85   :  { %v13525_v7 = vsub.f32 %v13516_v58, %v13523_v9  ;;  %v13524_v37 = vsub.f32 %v13511_v22, %v13520_v4  ;;  %v13826_v22 = vld [vmem:[%s23225_s23] sm:$0xff] }
0x1e86   :  { %v13749_v9 = vld [vmem:[%s23226_s6] sm:$0x3]  ;;  %v16072_v4 = vld [vmem:[%s23226_s6 + $0x4] sm:$0x3] }
0x1e87   :  { %v13528_v61 = vmul.f32 1.442695, %v13525_v7  ;;  %v13526_v34 = vmul.f32 1.442695, %v13524_v37  ;;  %v18452_v7 = vpack.c.bf16 %v13827_v29, %v13826_v22  ;;  %v13828_v37 = vld [vmem:[%s23225_s23 + $0x10] sm:$0xff]  ;;  %v16078_v22 = vld [vmem:[%s23225_s23 + $0x98] sm:$0xff] }
0x1e89   :  { %20138 = vpow2.f32 %v13528_v61  ;;  %v13829_v61 = vld [vmem:[%s23225_s23 + $0x18] sm:$0xff] }
0x1e8a   :  { %20140 = vpow2.f32 %v13526_v34  ;;  %v16084_v34 = vld [vmem:[%s23226_s6 + $0x6] sm:$0x3] }
0x1e93   :  { %v20139_v32 = vpop.eup %20138 }
0x1e94   :  { %v20141_v21 = vpop.eup %20140  ;;  %v13532_v14 = vsel %vm9138_vm6, %v20139_v32, 0.0 }
0x1e95   :  { %13530 = vadd.xlane.f32.xlu0 %v20141_v21  ;;  %13533 = vadd.xlane.f32.xlu1 %v13532_v14  ;;  %v13831_v14 = vld [vmem:[%s23225_s23 + $0x28] sm:$0xff] }
0x1f22   :  { %v13531_v62 = vpop.xlane.xlu0 %13530  ;;  %v13534_v6 = vpop.xlane.xlu1 %13533 }
0x1f23   :  { %20142 = vrcp.f32 %v13531_v62  ;;  %v16064_v62 = vld [vmem:[%s23225_s23 + $0x48] sm:$0xff] }
0x1f24   :  { %20144 = vrcp.f32 %v13534_v6 }
0x1f2d   :  { %v20143_v52 = vpop.eup %20142 }
0x1f2e   :  { %v20145_v2 = vpop.eup %20144  ;;  %v13536_v42 = vmul.f32 %v20143_v52, %v20141_v21  ;;  %v13830_v21 = vld [vmem:[%s23225_s23 + $0x20] sm:$0xff] }
0x1f2f   :  { %v13538_v5 = vmul.f32 %v20145_v2, %v20139_v32  ;;  %v18455_v32 = vpack.c.bf16 %v13829_v61, %v13828_v37  ;;  %v18458_v28 = vpack.c.bf16 %v13831_v14, %v13830_v21  ;;  %v16060_v2 = vld [vmem:[%s23226_s6 + $0x2] sm:$0x3]  ;;  %v16080_v37 = vld [vmem:[%s23225_s23 + $0xa8] sm:$0xff] }
0x1f30   :  { %17768 = vmatprep.mubr.f32.mxu0 %v13536_v42  ;;  %v18468_v42 = vpack.c.bf16 %v16064_v62, %v16063_v38  ;;  %v16087_v14 = vld [vmem:[%s23225_s23 + $0xc0] sm:$0xff]  ;;  %v16092_v62 = vld [vmem:[%s23225_s23 + $0xe8] sm:$0xff] }
0x1f31   :  { %17769 = vmatmul.mubr.f32.vlgmr.msra.gmra.mrb[190].mxu0 %v13538_v5  ;;  %v16065_v5 = vld [vmem:[%s23225_s23 + $0x50] sm:$0xff]  ;;  %v16091_v38 = vld [vmem:[%s23225_s23 + $0xe0] sm:$0xff] }
0x1f32   :  { %17786 = vmatprep.mubr.msk.f32.mxu0 %vm20547_vm13, %v20548_v31 }
0x2004   :  { %v17770_v27 = vpop.f32.mrb[190].mxu0 }
0x2005   :  { %v13605_v45 = vpop.f32.mrb[191].mxu0 }
0x2006   :  { %17779 = vmatprep.mubr.msk.f32.mxu1 %vm1681_vm0, %v13605_v45 }
0x2007   :  { %17780 = vmatmul.mubr.msk.f32.vlgmr.msra.gmra.mrb[218].mxu1 %vm1681_vm0, %v17770_v27  ;;  %v16066_v27 = vld [vmem:[%s23225_s23 + $0x58] sm:$0xff] }
0x2008   :  { %17838 = vmatprep.mubr.msk.f32.mxu1 %vm20547_vm13, %v20548_v31  ;;  %v18471_v45 = vpack.c.bf16 %v16066_v27, %v16065_v5  ;;  %v16099_v5 = vld [vmem:[%s23225_s23 + $0x100] sm:$0xff]  ;;  %v16100_v27 = vld [vmem:[%s23225_s23 + $0x108] sm:$0xff] }
0x20da   :  { %v17781_v30 = vpop.f32.mrb[218].mxu1 }
0x20db   :  { %v18593_v23 = vadd.f32 %v17781_v30, %v15965_v12  ;;  %v13691_v1 = vpop.f32.mrb[219].mxu1 }
0x20dc   :  { %v18594_v39 = vadd.f32 %v15965_v12, %v13691_v1  ;;  %v16068_v12 = vld [vmem:[%s23225_s23 + $0x68] sm:$0xff]  ;;  %v16070_v1 = vld [vmem:[%s23225_s23 + $0x78] sm:$0xff] }
0x20dd   :  { %v13703_v35 = vadd.f32 %v18593_v23, %v22728_v10  ;;  %v18474_v30 = vpack.c.bf16 %v16068_v12, %v16067_v18  ;;  %v16069_v23 = vld [vmem:[%s23225_s23 + $0x70] sm:$0xff]  ;;  %v16102_v12 = vld [vmem:[%s23225_s23 + $0x118] sm:$0xff] }
0x20de   :  { %v13702_v17 = vadd.f32 %v18594_v39, %v22726_v16  ;;  %v20546_v16 = vmov 0.0|0.0   ;;  %v18477_v39 = vpack.c.bf16 %v16070_v1, %v16069_v23  ;;  %v16101_v18 = vld [vmem:[%s23225_s23 + $0x110] sm:$0xff]  ;;  %v16103_v23 = vld [vmem:[%s23225_s23 + $0x120] sm:$0xff]  ;;  %v16104_v1 = vld [vmem:[%s23225_s23 + $0x128] sm:$0xff] }
0x20df   :  { %v13707_v25 = vsel %vm9874_vm12, %v13703_v35, 0.0  ;;  %18447 = vmatprep.subr.bf16.mxu0 %v20546_v16  ;;  %18479 = vmatprep.subr.bf16.mxu1 %v20546_v16 }
0x20e0   :  { %13708 = vadd.xlane.f32.xlu1 %v13707_v25  ;;  %v13704_v56 = vsel %vm8547_vm5, %v13702_v17, 0.0 }
0x20e1   :  { %13705 = vadd.xlane.f32.xlu0 %v13704_v56 }
0x216d   :  { %v13709_v3 = vpop.xlane.xlu1 %13708 }
0x216e   :  { %v13711_v48 = vmul.f32 0.015625, %v13709_v3  ;;  %v13706_v36 = vpop.xlane.xlu0 %13705 }
0x216f   :  { %v13710_v41 = vmul.f32 0.015625, %v13706_v36  ;;  %v14547_v36 = vld [vmem:[%s23227_s26] sm:$0xff] }
0x2170   :  { %v13713_v60 = vsub.f32 %v13703_v35, %v13711_v48 }
0x2171   :  { %v13712_v26 = vsub.f32 %v13702_v17, %v13710_v41  ;;  %v14548_v41 = vld [vmem:[%s23227_s26 + $0x8] sm:$0xff] }
0x2172   :  { %v13715_v47 = vmul.f32 %v13713_v60, %v13713_v60 }
0x2173   :  { %v13714_v55 = vmul.f32 %v13712_v26, %v13712_v26 }
0x2174   :  { %v13719_v53 = vsel %vm9874_vm12, %v13715_v47, 0.0  ;;  %v14550_v47 = vld [vmem:[%s23227_s26 + $0x18] sm:$0xff] }
0x2175   :  { %13720 = vadd.xlane.f32.xlu1 %v13719_v53  ;;  %v13716_v10 = vsel %vm8547_vm5, %v13714_v55, 0.0  ;;  %v14551_v53 = vld [vmem:[%s23227_s26 + $0x20] sm:$0xff] }
0x2176   :  { %13717 = vadd.xlane.f32.xlu0 %v13716_v10  ;;  %v14552_v10 = vld [vmem:[%s23227_s26 + $0x28] sm:$0xff] }
0x2202   :  { %v13721_v8 = vpop.xlane.xlu1 %13720 }
0x2203   :  { %v13723_v50 = vmul.f32 0.015625, %v13721_v8  ;;  %v13718_v54 = vpop.xlane.xlu0 %13717  ;;  %v18534_v8 = vpack.c.bf16 %v14552_v10, %v14551_v53 }
0x2204   :  { %v13722_v57 = vmul.f32 0.015625, %v13718_v54  ;;  %v14554_v54 = vld [vmem:[%s23227_s26 + $0x38] sm:$0xff] }
0x2205   :  { %v13725_v19 = vadd.f32 1e-05, %v13723_v50  ;;  %v14553_v50 = vld [vmem:[%s23227_s26 + $0x30] sm:$0xff] }
0x2206   :  { %v13724_v44 = vadd.f32 1e-05, %v13722_v57  ;;  %v18537_v57 = vpack.c.bf16 %v14554_v54, %v14553_v50 }
0x2207   :  { %20146 = vrsqrt.f32 %v13725_v19  ;;  %v14555_v19 = vld [vmem:[%s23227_s26 + $0x40] sm:$0xff] }
0x2208   :  { %20148 = vrsqrt.f32 %v13724_v44  ;;  %v14556_v44 = vld [vmem:[%s23227_s26 + $0x48] sm:$0xff] }
0x2211   :  { %v20147_v59 = vpop.eup %20146 }
0x2212   :  { %v20149_v43 = vpop.eup %20148  ;;  %v13729_v40 = vmul.f32 %v20147_v59, %v13713_v60  ;;  %v14549_v60 = vld [vmem:[%s23227_s26 + $0x10] sm:$0xff]  ;;  %v18540_v59 = vpack.c.bf16 %v14556_v44, %v14555_v19 }
0x2213   :  { %v13728_v46 = vmul.f32 %v20149_v43, %v13712_v26  ;;  %v18528_v26 = vpack.c.bf16 %v14548_v41, %v14547_v36  ;;  %v18531_v55 = vpack.c.bf16 %v14550_v47, %v14549_v60  ;;  %v14558_v43 = vld [vmem:[%s23227_s26 + $0x58] sm:$0xff]  ;;  %v16059_v36 = vld [vmem:[#allocation16] ss:$0 sm:$0xff] }
0x2214   :  { %v13738_v51 = vmul.f32 %v16054_v63, %v13729_v40 }
0x2215   :  { %v13737_v24 = vmul.f32 %v16054_v63, %v13728_v46  ;;  %v14557_v63 = vld [vmem:[%s23227_s26 + $0x50] sm:$0xff]  ;;  %v14559_v46 = vld [vmem:[%s23227_s26 + $0x60] sm:$0xff] }
0x2216   :  { %v13747_v15 = vadd.f32 %v16055_v33, %v13738_v51  ;;  %v18543_v40 = vpack.c.bf16 %v14558_v43, %v14557_v63 }
0x2217   :  { %v13746_v58 = vadd.f32 %v16055_v33, %v13737_v24  ;;  %v14560_v33 = vld [vmem:[%s23227_s26 + $0x68] sm:$0xff]  ;;  %v16075_v24 = vld [vmem:[%s23225_s23 + $0x80] sm:$0xff] }
0x2218   :  { %v18546_v51 = vpack.c.bf16 %v14560_v33, %v14559_v46 }
0x2219   :  { %v18448_v11 = vpack.c.bf16 %v13747_v15, %v13746_v58  ;;  %v16076_v15 = vld [vmem:[%s23225_s23 + $0x88] sm:$0xff] }
0x221a   :  { %v18484_v58 = vpack.c.bf16 %v16076_v15, %v16075_v24 }
0x221b   :  { %18450 = vmatpush3.bf16.msk.msra.mxu0 %vm22243_vm9, %v18448_v11  ;;  %18482 = vmatpush3.bf16.msk.msra.mxu1 %vm22243_vm9, %v18448_v11 }
0x221c   :  { %18495 = vmatprep.subr.bf16.mxu1 %v20546_v16  ;;  %18451 = vmatprep.subr.bf16.mxu0 %v20546_v16 }
0x221e   :  { %17787 = vmatmul.mubr.msk.f32.vlgmr.msra.gmra.mrb[192].mxu0 %vm9108_vm10, %v13749_v9  ;;  %17839 = vmatmul.mubr.msk.f32.vlgmr.msra.gmra.mrb[240].mxu1 %vm9108_vm10, %v16072_v4 }
0x221f   :  { %18498 = vmatpush3.bf16.msk.msra.mxu1 %vm22243_vm9, %v18448_v11  ;;  %17864 = vmatprep.mubr.msk.f32.mxu1 %vm20547_vm13, %v20548_v31 }
0x2220   :  { %18511 = vmatprep.subr.bf16.mxu1 %v20546_v16  ;;  %18453 = vmatpush3.bf16.msra.mxu0 %v18452_v7  ;;  %v16079_v7 = vld [vmem:[%s23225_s23 + $0xa0] sm:$0xff] }
0x2221   :  { %18454 = vmatprep.subr.bf16.mxu0 %v20546_v16  ;;  %17805 = vmatprep.mubr.msk.f32.mxu0 %vm20547_vm13, %v20548_v31  ;;  %v18490_v61 = vpack.c.bf16 %v16080_v37, %v16079_v7 }
0x2222   :  { %17865 = vmatmul.mubr.msk.f32.vlgmr.msra.gmra.mrb[242].mxu1 %vm9108_vm10, %v16084_v34  ;;  %v16081_v34 = vld [vmem:[%s23225_s23 + $0xb0] sm:$0xff] }
0x2223   :  { %18514 = vmatpush3.bf16.msk.msra.mxu1 %vm22243_vm9, %v18448_v11  ;;  %17890 = vmatprep.mubr.msk.f32.mxu1 %vm20547_vm13, %v20548_v31 }
0x2224   :  { %18456 = vmatpush3.bf16.msra.mxu0 %v18455_v32  ;;  %18527 = vmatprep.subr.bf16.mxu1 %v20546_v16  ;;  %v16082_v32 = vld [vmem:[%s23225_s23 + $0xb8] sm:$0xff] }
0x2225   :  { %18457 = vmatprep.subr.bf16.mxu0 %v20546_v16  ;;  %v18493_v21 = vpack.c.bf16 %v16082_v32, %v16081_v34 }
0x2226   :  { %17891 = vmatmul.mubr.msk.f32.vlgmr.msra.gmra.mrb[244].mxu1 %vm9108_vm10, %v16096_v20 }
0x2227   :  { %17944 = vmatprep.mubr.msk.f32.mxu1 %vm20547_vm13, %v20548_v31  ;;  %18529 = vmatpush3.bf16.msra.mxu1 %v18528_v26 }
0x2228   :  { %18459 = vmatpush3.bf16.msra.mxu0 %v18458_v28  ;;  %18530 = vmatprep.subr.bf16.mxu1 %v20546_v16  ;;  %v16088_v28 = vld [vmem:[%s23225_s23 + $0xc8] sm:$0xff] }
0x2229   :  { %18460 = vmatprep.subr.bf16.mxu0 %v20546_v16  ;;  %v18500_v49 = vpack.c.bf16 %v16088_v28, %v16087_v14 }
0x222b   :  { %18532 = vmatpush3.bf16.msra.mxu1 %v18531_v55  ;;  %v16108_v55 = vld [vmem:[#allocation17] ss:$0 sm:$0xff] }
0x222c   :  { %18462 = vmatpush3.bf16.msra.mxu0 %v18461_v13  ;;  %18533 = vmatprep.subr.bf16.mxu1 %v20546_v16  ;;  %v16090_v13 = vld [vmem:[%s23225_s23 + $0xd8] sm:$0xff] }
0x222d   :  { %18463 = vmatprep.subr.bf16.mxu0 %v20546_v16  ;;  %v18503_v20 = vpack.c.bf16 %v16090_v13, %v16089_v0 }
0x222f   :  { %18535 = vmatpush3.bf16.msra.mxu1 %v18534_v8 }
0x2230   :  { %18536 = vmatprep.subr.bf16.mxu1 %v20546_v16 }
0x2233   :  { %18538 = vmatpush3.bf16.msra.mxu1 %v18537_v57 }
0x2234   :  { %18539 = vmatprep.subr.bf16.mxu1 %v20546_v16 }
0x2237   :  { %18541 = vmatpush3.bf16.msra.mxu1 %v18540_v59 }
0x2238   :  { %18542 = vmatprep.subr.bf16.mxu1 %v20546_v16 }
0x223b   :  { %18544 = vmatpush3.bf16.msra.mxu1 %v18543_v40 }
0x223c   :  { %18545 = vmatprep.subr.bf16.mxu1 %v20546_v16 }
0x223f   :  { %18547 = vmatpush3.bf16.msra.mxu1 %v18546_v51 }
0x2240   :  { %18548 = vmatprep.subr.bf16.mxu1 %v20546_v16 }
0x22f1   :  { %v13822_v6 = vpop.f32.mrb[192].mxu0  ;;  %v23030_v35 = vpop.f32.mrb[240].mxu1 }
0x22f2   :  { %v17788_v52 = vpop.f32.mrb[193].mxu0  ;;  %17806 = vmatmul.mubr.msk.f32.vlgmr.msra.gmra.mrb[194].mxu0 %vm8547_vm5, %v13822_v6  ;;  %v17840_v17 = vpop.f32.mrb[241].mxu1  ;;  %v18506_v6 = vpack.c.bf16 %v16092_v62, %v16091_v38 }
0x22f3   :  { %18466 = vmatpush3.bf16.msk.msra.mxu0 %vm22243_vm9, %v18448_v11  ;;  %17812 = vmatprep.mubr.msk.f32.mxu0 %vm20547_vm13, %v20548_v31  ;;  %v16077_v11 = vld [vmem:[%s23225_s23 + $0x90] sm:$0xff]  ;;  %v16106_v17 = vld [vmem:[%s23225_s23 + $0x138] sm:$0xff] }
0x22f4   :  { %18467 = vmatprep.subr.bf16.mxu0 %v20546_v16  ;;  %v18487_v4 = vpack.c.bf16 %v16078_v22, %v16077_v11  ;;  %v16093_v52 = vld [vmem:[%s23225_s23 + $0xf0] sm:$0xff] }
0x22f5   :  { %v23032_v25 = vpop.f32.mrb[242].mxu1 }
0x22f6   :  { %17813 = vmatmul.mubr.msk.f32.vlgmr.msra.gmra.mrb[196].mxu0 %vm9108_vm10, %v16060_v2  ;;  %v17866_v56 = vpop.f32.mrb[243].mxu1  ;;  %v16094_v2 = vld [vmem:[%s23225_s23 + $0xf8] sm:$0xff] }
0x22f7   :  { %18469 = vmatpush3.bf16.msra.mxu0 %v18468_v42  ;;  %17831 = vmatprep.mubr.msk.f32.mxu0 %vm20547_vm13, %v20548_v31  ;;  %v18509_v42 = vpack.c.bf16 %v16094_v2, %v16093_v52 }
0x22f8   :  { %18470 = vmatprep.subr.bf16.mxu0 %v20546_v16 }
0x22f9   :  { %v23034_v3 = vpop.f32.mrb[244].mxu1 }
0x22fa   :  { %v17892_v48 = vpop.f32.mrb[245].mxu1 }
0x22fb   :  { %18472 = vmatpush3.bf16.msra.mxu0 %v18471_v45  ;;  %v18516_v45 = vpack.c.bf16 %v16100_v27, %v16099_v5 }
0x22fc   :  { %18473 = vmatprep.subr.bf16.mxu0 %v20546_v16 }
0x22ff   :  { %18475 = vmatpush3.bf16.msra.mxu0 %v18474_v30  ;;  %v18519_v30 = vpack.c.bf16 %v16102_v12, %v16101_v18 }
0x2300   :  { %18476 = vmatprep.subr.bf16.mxu0 %v20546_v16 }
0x2303   :  { %18478 = vmatpush3.bf16.msra.mxu0 %v18477_v39  ;;  %v18522_v39 = vpack.c.bf16 %v16104_v1, %v16103_v23 }
0x2304   :  { %18483 = vmatprep.subr.bf16.mxu0 %v20546_v16 }
0x23c9   :  { %v13985_v29 = vpop.f32.mrb[196].mxu0 }
0x23ca   :  { %v17814_v9 = vpop.f32.mrb[197].mxu0  ;;  %17832 = vmatmul.mubr.msk.f32.vlgmr.msra.gmra.mrb[194].mxu0 %vm8547_vm5, %v13985_v29 }
0x23cb   :  { %18485 = vmatpush3.bf16.msra.mxu0 %v18484_v58  ;;  %17857 = vmatprep.mubr.msk.f32.mxu0 %vm20547_vm13, %v20548_v31 }
0x23cc   :  { %18486 = vmatprep.subr.bf16.mxu0 %v20546_v16 }
0x23cf   :  { %18488 = vmatpush3.bf16.msra.mxu0 %v18487_v4 }
0x23d0   :  { %18489 = vmatprep.subr.bf16.mxu0 %v20546_v16 }
0x23d3   :  { %18491 = vmatpush3.bf16.msra.mxu0 %v18490_v61 }
0x23d4   :  { %18492 = vmatprep.subr.bf16.mxu0 %v20546_v16 }
0x23d7   :  { %18494 = vmatpush3.bf16.msra.mxu0 %v18493_v21 }
0x23d8   :  { %18499 = vmatprep.subr.bf16.mxu0 %v20546_v16 }
0x23da   :  { %17858 = vmatmul.mubr.msk.f32.vlgmr.msra.gmra.mrb[194].mxu0 %vm8547_vm5, %v23030_v35  ;;  %v16105_v35 = vld [vmem:[%s23225_s23 + $0x130] sm:$0xff] }
0x23db   :  { %18501 = vmatpush3.bf16.msra.mxu0 %v18500_v49  ;;  %17883 = vmatprep.mubr.msk.f32.mxu0 %vm20547_vm13, %v20548_v31  ;;  %v18525_v56 = vpack.c.bf16 %v16106_v17, %v16105_v35 }
0x23dc   :  { %18502 = vmatprep.subr.bf16.mxu0 %v20546_v16 }
0x23df   :  { %18504 = vmatpush3.bf16.msra.mxu0 %v18503_v20 }
0x23e0   :  { %18505 = vmatprep.subr.bf16.mxu0 %v20546_v16 }
0x23e3   :  { %18507 = vmatpush3.bf16.msra.mxu0 %v18506_v6 }
0x23e4   :  { %18508 = vmatprep.subr.bf16.mxu0 %v20546_v16 }
0x23e7   :  { %18510 = vmatpush3.bf16.msra.mxu0 %v18509_v42 }
0x23e8   :  { %18515 = vmatprep.subr.bf16.mxu0 %v20546_v16 }
0x23ea   :  { %17884 = vmatmul.mubr.msk.f32.vlgmr.msra.gmra.mrb[194].mxu0 %vm8547_vm5, %v23032_v25  ;;  %v14561_v25 = vld [vmem:[%s23227_s26 + $0x70] sm:$0xff] }
0x23eb   :  { %18517 = vmatpush3.bf16.msra.mxu0 %v18516_v45  ;;  %17909 = vmatprep.mubr.msk.f32.mxu0 %vm20547_vm13, %v20548_v31  ;;  %v14562_v31 = vld [vmem:[%s23227_s26 + $0x78] sm:$0xff] }
0x23ec   :  { %18518 = vmatprep.subr.bf16.mxu0 %v20546_v16  ;;  %v18549_v48 = vpack.c.bf16 %v14562_v31, %v14561_v25 }
0x23ee   :  { %18550 = vmatpush3.bf16.msra.mxu1 %v18549_v48 }
0x23ef   :  { %18520 = vmatpush3.bf16.msra.mxu0 %v18519_v30 }
0x23f0   :  { %18521 = vmatprep.subr.bf16.mxu0 %v20546_v16 }
0x23f3   :  { %18523 = vmatpush3.bf16.msra.mxu0 %v18522_v39 }
0x23f4   :  { %18524 = vmatprep.subr.bf16.mxu0 %v20546_v16 }
0x23f7   :  { %18526 = vmatpush3.bf16.msra.mxu0 %v18525_v56 }
0x23fa   :  { %17910 = vmatmul.mubr.msk.f32.vlgmr.msra.gmra.mrb[194].mxu0 %vm8547_vm5, %v23034_v3 }
0x24cd   :  { %v14541_v41 = vpop.f32.mrb[194].mxu0 }
0x24ce   :  { %v18595_v60 = vadd.f32 %v16059_v36, %v14541_v41  ;;  %v17911_v26 = vpop.f32.mrb[195].mxu0 }
0x24d0   :  { %v14546_v47 = vmax.f32 %v18595_v60, 0.0 }
0x24d2   :  { %17945 = vmatmul.mubr.f32.vlgmr.msra.gmra.mrb[246].mxu1 %v14546_v47 }
0x25a5   :  { %v14636_v53 = vpop.f32.mrb[246].mxu1 }
0x25a6   :  { %v14637_v16 = vadd.f32 %v16108_v55, %v14636_v53  ;;  %v17946_v10 = vpop.f32.mrb[247].mxu1 }
0x25a8   :  { %14641 = vst.msk [vmem:[#allocation23] sm:$0x3] %vm14640_vm14, %v14637_v16 }
0x25a9   :  { %20447 = shalt.err (!%p20444_p10)
}
0x25aa   :  { %s20448_s19 = scalar_lea.hbm %s20843_s9, 32 }
0x25ab   :  { %p20449_p11 = scmp.ne.s32.totalorder %s20843_s9, %s20448_s19  ;;  %p20452_p12 = scmp.lt.u32.totalorder %s20448_s19, %s20843_s9 }
0x25ad   :  { %p20454_p13 = pnand %p20452_p12, %p20449_p11 }
0x25af   :  { %20457 = shalt.err (!%p20454_p13)
}
0x25b0   :  { %14651 = dma.vmem_to_hbm [thread:$0]  %s14649_s3, 32, %s20843_s9, [#allocation4]  }
0x25b1   :  { %20472 = dma.done.wait [#allocation4], 32  }
0x25b2   :  { %20473 = vsyncadd [#allocation4], 4294967264 }
0x25b3   :  { %14655 = vsyncpa [#allocation3], 1 }
0x25b4   :  { %14656 = vsyncpa [#allocation6], 1 }
0x25b5   :  { %14657 = vsyncpa [#allocation9], 1 }
0x25b6   :  { %14658 = vsyncpa [#allocation12], 1 }
0x25b7   :  { %14659 = vsyncpa [#allocation15], 1 }
0x25b8   :  { %14660 = vsyncpa [#allocation18], 1 }
0x25b9   :  { %14661 = vsyncpa [#allocation21], 1 }
0x25ba   :  { %14662 = vsyncpa [#allocation4], 1 }

</bundles_post_ra>
